<compile_context>
chip_gen: v6e
topology: v6e:2x2x1
jax: 0.10.0
libtpu: 0.0.40
codegen_flags: <defaults>
</compile_context>

<pallas_src>
import functools

import numpy as np

import jax
import jax.numpy as jnp
from jax.experimental import pallas as pl
from jax.experimental.pallas import tpu as pltpu

BN_EPS = 1e-5


# ---------------------------------------------------------------------------
# Static configuration helpers
# ---------------------------------------------------------------------------
def split_branch(total_channels, num_groups):
    split = [total_channels // num_groups for _ in range(num_groups)]
    split[0] += total_channels - sum(split)
    return split


def _pool_windows(L, out_size):
    # PyTorch adaptive pooling windows: [floor(i*L/out), ceil((i+1)*L/out))
    return tuple(((i * L) // out_size, -((-(i + 1) * L) // out_size))
                 for i in range(out_size))


# ---------------------------------------------------------------------------
# Parameter construction (deterministic)
#   `raw`    mirrors the PyTorch module tree (conv taps, fc weights)
#   `params` is the Pallas-side derived form (transposed / banded / folded BN)
# ---------------------------------------------------------------------------
def init_raw_params(key, in_nc, class_num, segment_size, n_fs=64, n_b=3):
    ks = jax.random.split(key, 8)
    if in_nc == 113:
        dims = [(n_fs, n_fs * 2), (n_fs * 2, n_fs)]
    else:
        dims = [(n_fs, n_fs), (n_fs, n_fs)]
    dims += [(n_fs, n_fs), (n_fs, n_fs * 2), (n_fs * 2, n_fs * 4)]

    raw = {"stem_w": 0.1 * jax.random.normal(ks[0], (n_fs, in_nc), jnp.float32)}
    mods, mcfgs = [], []
    for mi, (ci, co) in enumerate(dims):
        o_ncs = split_branch(co, n_b + 1)
        shift_sizes = tuple(2 * i + 3 for i in range(n_b))
        mk = jax.random.split(ks[mi + 1], n_b + 1)
        l1_w = 0.1 * jax.random.normal(mk[0], (o_ncs[0], ci), jnp.float32)
        taps = [0.1 * jax.random.normal(mk[i + 1],
                                        (o_ncs[i + 1], shift_sizes[i]),
                                        jnp.float32)
                for i in range(n_b)]
        mods.append({"l1_w": l1_w, "branch_taps": taps})
        mcfgs.append({"o_ncs": tuple(o_ncs), "shift_sizes": shift_sizes})
    raw["mods"] = mods
    raw["fc_w"] = 0.1 * jax.random.normal(ks[6], (class_num, n_fs * 4), jnp.float32)
    raw["fc_b"] = 0.1 * jax.random.normal(ks[7], (class_num,), jnp.float32)

    cfg = {"in_nc": in_nc, "class_num": class_num, "T": segment_size,
           "modules": mcfgs}
    return raw, cfg


def _fold_bn(c):
    # TODO(synk): BatchNorm1d folded in eval mode with default running stats
    # (PyTorch's default .train() mode would normalize with batch statistics).
    gamma = jnp.ones((c,), jnp.float32)
    beta = jnp.zeros((c,), jnp.float32)
    mean = jnp.zeros((c,), jnp.float32)
    var = jnp.ones((c,), jnp.float32)
    scale = gamma / jnp.sqrt(var + BN_EPS)
    bias = beta - mean * scale
    return jnp.stack([scale, bias], axis=0)          # (2, C), lane-dense rows


def _banded_taps(taps, S):
    """Grouped 1x1-conv taps -> S banded (C, C) channel-mixing matrices.

    B_r[m, k] = taps[k, m - k + S//2]  if |m - k| <= S//2 and m % S == r, else 0
    so that the full S2Conv (per-channel time shift + channel zero pad +
    grouped conv) becomes   out = sum_r time_shift(x, r - S//2) @ B_r
    with channels on the lane axis.
    """
    taps = np.asarray(taps, dtype=np.float32)        # (C, S)
    C = taps.shape[0]
    pad = S // 2
    mats = np.zeros((S, C, C), np.float32)
    for m in range(C):                               # source channel (row)
        r = m % S                                    # its shift group
        for k in range(max(0, m - pad), min(C, m + pad + 1)):   # output chan
            mats[r, m, k] = taps[k, m - k + pad]
    return jnp.asarray(mats)


def derive_pallas_params(raw, cfg):
    params = {
        "stem": {"w": jnp.transpose(raw["stem_w"]),            # (Cin, 64)
                 "sb": _fold_bn(raw["stem_w"].shape[0])},
        "mods": [],
        "fc": {"w": jnp.transpose(raw["fc_w"]),                # (256, K)
               "b": raw["fc_b"].reshape(1, -1)},               # (1, K)
    }
    for rawm, mcfg in zip(raw["mods"], cfg["modules"]):
        mod = {"l1": {"w": jnp.transpose(rawm["l1_w"]),
                      "sb": _fold_bn(rawm["l1_w"].shape[0])},
               "ls": []}
        for taps, S in zip(rawm["branch_taps"], mcfg["shift_sizes"]):
            mod["ls"].append({"wband": _banded_taps(taps, S),
                              "sb": _fold_bn(taps.shape[0])})
        params["mods"].append(mod)
    return params


# ---------------------------------------------------------------------------
# In-kernel building blocks (all operate on (L, C) values, C on lanes)
# ---------------------------------------------------------------------------
def _bn_relu(y, sb_ref):
    sb = sb_ref[...]                                 # (2, C)
    return jnp.maximum(y * sb[0:1, :] + sb[1:2, :], 0.0)


def _dense_bn_relu(x, p):
    """1x1 Conv1d as (L, Cin) @ (Cin, Cout) on the MXU + folded BN + ReLU."""
    y = jnp.dot(x, p["w"][...], preferred_element_type=jnp.float32)
    return _bn_relu(y, p["sb"])


def _s2conv_bn_relu(txp, p, S, maxpad, L):
    """S2Conv as  sum_r time_shift(tx, r - S//2) @ B_r  + folded BN + ReLU.

    txp is the branch input zero-padded with `maxpad` rows on both ends of the
    time (sublane) axis, so every time shift is a static sublane slice.
    """
    pad = S // 2
    acc = None
    for r in range(S):
        start = maxpad - (r - pad)                   # y[t] = tx[t - (r - pad)]
        ts = txp[start:start + L, :]
        term = jnp.dot(ts, p["wband"][r], preferred_element_type=jnp.float32)
        acc = term if acc is None else acc + term
    return _bn_relu(acc, p["sb"])


def _mts_module(h, mp, mcfg):
    """One MTS_module: 1x1 conv + 3 S2Conv branches, concat on the lane axis."""
    x1 = _dense_bn_relu(h, mp["l1"])                 # (L, g0)
    g1 = mcfg["o_ncs"][1]
    tx = x1[:, :g1]
    L = tx.shape[0]
    maxpad = max(mcfg["shift_sizes"]) // 2
    zpad = jnp.zeros((maxpad, g1), jnp.float32)
    txp = jnp.concatenate([zpad, tx, zpad], axis=0)  # (L + 2*maxpad, g1)
    outs = [x1]
    for bi, S in enumerate(mcfg["shift_sizes"]):
        outs.append(_s2conv_bn_relu(txp, mp["ls"][bi], S, maxpad, L))
    return jnp.concatenate(outs, axis=1)             # (L, sum(o_ncs))


def _adaptive_max_pool_rows(h, windows):
    """adaptive_max_pool1d in (L, C) layout: per-window max over time rows."""
    rows = []
    for (s, e) in windows:
        m = h[s:s + 1, :]
        for t in range(s + 1, e):
            m = jnp.maximum(m, h[t:t + 1, :])
        rows.append(m)
    return jnp.concatenate(rows, axis=0)


# ---------------------------------------------------------------------------
# Fused forward pass: one pallas_call for the whole network
# ---------------------------------------------------------------------------
def mts_convnet_fwd(x, params, cfg):
    """x: (N, Cin, L) in the PyTorch NCL layout.  Returns (N, class_num)."""
    N, Cin, L0 = x.shape
    T = cfg["T"]
    K = cfg["class_num"]
    L_stem = L0 + 2                                  # stem: Conv1d(k=1, pad=1)
    pool1 = _pool_windows(L_stem, T // 2)
    pool2 = _pool_windows(T // 2, T // 4)
    mcfgs = cfg["modules"]

    leaves, treedef = jax.tree_util.tree_flatten(params)
    n_leaves = len(leaves)

    def kernel(*refs):
        x_ref = refs[0]
        w = jax.tree_util.tree_unflatten(treedef, refs[1:1 + n_leaves])
        o_ref = refs[1 + n_leaves]

        # stem: time zero-pad by 1 on each side, 1x1 conv + BN + ReLU
        xin = x_ref[0].astype(jnp.float32)                     # (L0, Cin)
        zrow = jnp.zeros((1, xin.shape[1]), jnp.float32)
        xin = jnp.concatenate([zrow, xin, zrow], axis=0)       # (L0 + 2, Cin)
        h = _dense_bn_relu(xin, w["stem"])

        # conv1 .. conv5 with the two adaptive max pools
        for mi, mcfg in enumerate(mcfgs):
            h = _mts_module(h, w["mods"][mi], mcfg)
            if mi == 2:
                h = _adaptive_max_pool_rows(h, pool1)
            elif mi == 3:
                h = _adaptive_max_pool_rows(h, pool2)

        # adaptive_avg_pool1d(1) + Linear head (mean and linear commute)
        hw = jnp.dot(h, w["fc"]["w"][...],
                     preferred_element_type=jnp.float32)       # (Lf, K)
        Lf = hw.shape[0]
        m = hw[0:1, :]
        for t in range(1, Lf):
            m = m + hw[t:t + 1, :]
        y = m * (1.0 / Lf) + w["fc"]["b"][...]                 # (1, K)
        o_ref[0] = y.astype(o_ref.dtype)

    x_lc = jnp.transpose(x, (0, 2, 1))                         # channels -> lanes

    def _full_spec(a):
        nd = a.ndim
        return pl.BlockSpec(a.shape, lambda n, _nd=nd: (0,) * _nd)

    out = pl.pallas_call(
        kernel,
        out_shape=jax.ShapeDtypeStruct((N, 1, K), jnp.float32),
        grid=(N,),
        in_specs=[pl.BlockSpec((1, L0, Cin), lambda n: (n, 0, 0))]
                 + [_full_spec(a) for a in leaves],
        out_specs=pl.BlockSpec((1, 1, K), lambda n: (n, 0, 0)),
        compiler_params=pltpu.CompilerParams(
            dimension_semantics=("parallel",)),
    )(x_lc, *leaves)
    return out.reshape(N, K)


# ---------------------------------------------------------------------------
# Pure-jnp (XLA) reference mirroring the PyTorch forward, for a sanity check
# ---------------------------------------------------------------------------
def _ref_bn_relu(y):
    return jnp.maximum(y * (1.0 / jnp.sqrt(1.0 + BN_EPS)), 0.0)


def _ref_conv1x1(x, w):                              # x: (N, C, L), w: (O, C)
    return jnp.einsum("oc,ncl->nol", w, x)


def _ref_s2conv(x, taps, S):
    N, C, L = x.shape
    pad = S // 2
    k = jnp.arange(C)
    sh = (k % S) - pad
    t = jnp.arange(L)
    src = t[None, :] - sh[:, None]
    valid = (src >= 0) & (src < L)
    src_c = jnp.clip(src, 0, L - 1)
    gathered = jnp.take_along_axis(
        x, jnp.broadcast_to(src_c[None], (N, C, L)), axis=2)
    shifted = jnp.where(valid[None], gathered, 0.0)
    xp = jnp.pad(shifted, ((0, 0), (pad, pad), (0, 0)))
    acc = jnp.zeros((N, C, L), x.dtype)
    for j in range(S):
        acc = acc + taps[None, :, j, None] * xp[:, j:j + C, :]
    return _ref_bn_relu(acc)


def _ref_mts_module(x, rawm, mcfg):
    x1 = _ref_bn_relu(_ref_conv1x1(x, rawm["l1_w"]))
    tx = x1[:, :mcfg["o_ncs"][1], :]
    outs = [x1]
    for taps, S in zip(rawm["branch_taps"], mcfg["shift_sizes"]):
        outs.append(_ref_s2conv(tx, taps, S))
    return jnp.concatenate(outs, axis=1)


def _ref_adaptive_max_pool(x, out_size):
    L = x.shape[2]
    cols = [jnp.max(x[:, :, s:e], axis=2, keepdims=True)
            for (s, e) in _pool_windows(L, out_size)]
    return jnp.concatenate(cols, axis=2)


def reference_forward(x, raw, cfg):
    T = cfg["T"]
    h = jnp.pad(x, ((0, 0), (0, 0), (1, 1)))
    h = _ref_bn_relu(_ref_conv1x1(h, raw["stem_w"]))
    for mi, mcfg in enumerate(cfg["modules"]):
        h = _ref_mts_module(h, raw["mods"][mi], mcfg)
        if mi == 2:
            h = _ref_adaptive_max_pool(h, T // 2)
        elif mi == 3:
            h = _ref_adaptive_max_pool(h, T // 4)
    m = jnp.mean(h, axis=2)
    return m @ raw["fc_w"].T + raw["fc_b"][None, :]


# ---------------------------------------------------------------------------
if __name__ == "__main__":
    key = jax.random.PRNGKey(0)
    k_param, k_x = jax.random.split(key)

    batch, in_nc, class_num, segment_size = 2, 4, 5, 16
    raw, cfg = init_raw_params(k_param, in_nc, class_num, segment_size)
    params = derive_pallas_params(raw, cfg)
    x = jax.random.normal(k_x, (batch, in_nc, segment_size), jnp.float32)

    fwd = jax.jit(functools.partial(mts_convnet_fwd, cfg=cfg))
    out = jax.block_until_ready(fwd(x, params))
    assert out.shape == (batch, class_num), out.shape
    assert bool(jnp.all(jnp.isfinite(out)))

    # Sanity-check the fused Pallas kernel against a plain XLA implementation
    # of the same (eval-mode-BN) forward pass.
    ref = jax.block_until_ready(reference_forward(x, raw, cfg))
    assert jnp.allclose(out, ref, rtol=2e-2, atol=2e-2)

    print("KERNEL_OK")
</pallas_src>

<mosaic_0001>
module attributes {stable_mosaic.version = 11 : i64} {
  func.func @kernel(%arg0: i32, %arg1: memref<1x16x4xf32, #tpu.memory_space<vmem>>, %arg2: memref<1x5xf32, #tpu.memory_space<vmem>>, %arg3: memref<256x5xf32, #tpu.memory_space<vmem>>, %arg4: memref<2x16xf32, #tpu.memory_space<vmem>>, %arg5: memref<64x16xf32, #tpu.memory_space<vmem>>, %arg6: memref<2x16xf32, #tpu.memory_space<vmem>>, %arg7: memref<3x16x16xf32, #tpu.memory_space<vmem>>, %arg8: memref<2x16xf32, #tpu.memory_space<vmem>>, %arg9: memref<5x16x16xf32, #tpu.memory_space<vmem>>, %arg10: memref<2x16xf32, #tpu.memory_space<vmem>>, %arg11: memref<7x16x16xf32, #tpu.memory_space<vmem>>, %arg12: memref<2x16xf32, #tpu.memory_space<vmem>>, %arg13: memref<64x16xf32, #tpu.memory_space<vmem>>, %arg14: memref<2x16xf32, #tpu.memory_space<vmem>>, %arg15: memref<3x16x16xf32, #tpu.memory_space<vmem>>, %arg16: memref<2x16xf32, #tpu.memory_space<vmem>>, %arg17: memref<5x16x16xf32, #tpu.memory_space<vmem>>, %arg18: memref<2x16xf32, #tpu.memory_space<vmem>>, %arg19: memref<7x16x16xf32, #tpu.memory_space<vmem>>, %arg20: memref<2x16xf32, #tpu.memory_space<vmem>>, %arg21: memref<64x16xf32, #tpu.memory_space<vmem>>, %arg22: memref<2x16xf32, #tpu.memory_space<vmem>>, %arg23: memref<3x16x16xf32, #tpu.memory_space<vmem>>, %arg24: memref<2x16xf32, #tpu.memory_space<vmem>>, %arg25: memref<5x16x16xf32, #tpu.memory_space<vmem>>, %arg26: memref<2x16xf32, #tpu.memory_space<vmem>>, %arg27: memref<7x16x16xf32, #tpu.memory_space<vmem>>, %arg28: memref<2x32xf32, #tpu.memory_space<vmem>>, %arg29: memref<64x32xf32, #tpu.memory_space<vmem>>, %arg30: memref<2x32xf32, #tpu.memory_space<vmem>>, %arg31: memref<3x32x32xf32, #tpu.memory_space<vmem>>, %arg32: memref<2x32xf32, #tpu.memory_space<vmem>>, %arg33: memref<5x32x32xf32, #tpu.memory_space<vmem>>, %arg34: memref<2x32xf32, #tpu.memory_space<vmem>>, %arg35: memref<7x32x32xf32, #tpu.memory_space<vmem>>, %arg36: memref<2x64xf32, #tpu.memory_space<vmem>>, %arg37: memref<128x64xf32, #tpu.memory_space<vmem>>, %arg38: memref<2x64xf32, #tpu.memory_space<vmem>>, %arg39: memref<3x64x64xf32, #tpu.memory_space<vmem>>, %arg40: memref<2x64xf32, #tpu.memory_space<vmem>>, %arg41: memref<5x64x64xf32, #tpu.memory_space<vmem>>, %arg42: memref<2x64xf32, #tpu.memory_space<vmem>>, %arg43: memref<7x64x64xf32, #tpu.memory_space<vmem>>, %arg44: memref<2x64xf32, #tpu.memory_space<vmem>>, %arg45: memref<4x64xf32, #tpu.memory_space<vmem>>, %arg46: memref<1x1x5xf32, #tpu.memory_space<vmem>>) attributes {dimension_semantics = [#tpu.dimension_semantics<parallel>], iteration_bounds = array<i64: 2>, scalar_prefetch = 0 : i64, scratch_operands = 0 : i64, tpu.core_type = #tpu.core_type<tc>, window_params = [{transform_indices = @transform_0, window_bounds = array<i64: 1, 16, 4>}, {pipeline_mode = #tpu.pipeline_mode<synchronous>, transform_indices = @transform_1, window_bounds = array<i64: 1, 5>}, {pipeline_mode = #tpu.pipeline_mode<synchronous>, transform_indices = @transform_2, window_bounds = array<i64: 256, 5>}, {pipeline_mode = #tpu.pipeline_mode<synchronous>, transform_indices = @transform_3, window_bounds = array<i64: 2, 16>}, {pipeline_mode = #tpu.pipeline_mode<synchronous>, transform_indices = @transform_4, window_bounds = array<i64: 64, 16>}, {pipeline_mode = #tpu.pipeline_mode<synchronous>, transform_indices = @transform_5, window_bounds = array<i64: 2, 16>}, {pipeline_mode = #tpu.pipeline_mode<synchronous>, transform_indices = @transform_6, window_bounds = array<i64: 3, 16, 16>}, {pipeline_mode = #tpu.pipeline_mode<synchronous>, transform_indices = @transform_7, window_bounds = array<i64: 2, 16>}, {pipeline_mode = #tpu.pipeline_mode<synchronous>, transform_indices = @transform_8, window_bounds = array<i64: 5, 16, 16>}, {pipeline_mode = #tpu.pipeline_mode<synchronous>, transform_indices = @transform_9, window_bounds = array<i64: 2, 16>}, {pipeline_mode = #tpu.pipeline_mode<synchronous>, transform_indices = @transform_10, window_bounds = array<i64: 7, 16, 16>}, {pipeline_mode = #tpu.pipeline_mode<synchronous>, transform_indices = @transform_11, window_bounds = array<i64: 2, 16>}, {pipeline_mode = #tpu.pipeline_mode<synchronous>, transform_indices = @transform_12, window_bounds = array<i64: 64, 16>}, {pipeline_mode = #tpu.pipeline_mode<synchronous>, transform_indices = @transform_13, window_bounds = array<i64: 2, 16>}, {pipeline_mode = #tpu.pipeline_mode<synchronous>, transform_indices = @transform_14, window_bounds = array<i64: 3, 16, 16>}, {pipeline_mode = #tpu.pipeline_mode<synchronous>, transform_indices = @transform_15, window_bounds = array<i64: 2, 16>}, {pipeline_mode = #tpu.pipeline_mode<synchronous>, transform_indices = @transform_16, window_bounds = array<i64: 5, 16, 16>}, {pipeline_mode = #tpu.pipeline_mode<synchronous>, transform_indices = @transform_17, window_bounds = array<i64: 2, 16>}, {pipeline_mode = #tpu.pipeline_mode<synchronous>, transform_indices = @transform_18, window_bounds = array<i64: 7, 16, 16>}, {pipeline_mode = #tpu.pipeline_mode<synchronous>, transform_indices = @transform_19, window_bounds = array<i64: 2, 16>}, {pipeline_mode = #tpu.pipeline_mode<synchronous>, transform_indices = @transform_20, window_bounds = array<i64: 64, 16>}, {pipeline_mode = #tpu.pipeline_mode<synchronous>, transform_indices = @transform_21, window_bounds = array<i64: 2, 16>}, {pipeline_mode = #tpu.pipeline_mode<synchronous>, transform_indices = @transform_22, window_bounds = array<i64: 3, 16, 16>}, {pipeline_mode = #tpu.pipeline_mode<synchronous>, transform_indices = @transform_23, window_bounds = array<i64: 2, 16>}, {pipeline_mode = #tpu.pipeline_mode<synchronous>, transform_indices = @transform_24, window_bounds = array<i64: 5, 16, 16>}, {pipeline_mode = #tpu.pipeline_mode<synchronous>, transform_indices = @transform_25, window_bounds = array<i64: 2, 16>}, {pipeline_mode = #tpu.pipeline_mode<synchronous>, transform_indices = @transform_26, window_bounds = array<i64: 7, 16, 16>}, {pipeline_mode = #tpu.pipeline_mode<synchronous>, transform_indices = @transform_27, window_bounds = array<i64: 2, 32>}, {pipeline_mode = #tpu.pipeline_mode<synchronous>, transform_indices = @transform_28, window_bounds = array<i64: 64, 32>}, {pipeline_mode = #tpu.pipeline_mode<synchronous>, transform_indices = @transform_29, window_bounds = array<i64: 2, 32>}, {pipeline_mode = #tpu.pipeline_mode<synchronous>, transform_indices = @transform_30, window_bounds = array<i64: 3, 32, 32>}, {pipeline_mode = #tpu.pipeline_mode<synchronous>, transform_indices = @transform_31, window_bounds = array<i64: 2, 32>}, {pipeline_mode = #tpu.pipeline_mode<synchronous>, transform_indices = @transform_32, window_bounds = array<i64: 5, 32, 32>}, {pipeline_mode = #tpu.pipeline_mode<synchronous>, transform_indices = @transform_33, window_bounds = array<i64: 2, 32>}, {pipeline_mode = #tpu.pipeline_mode<synchronous>, transform_indices = @transform_34, window_bounds = array<i64: 7, 32, 32>}, {pipeline_mode = #tpu.pipeline_mode<synchronous>, transform_indices = @transform_35, window_bounds = array<i64: 2, 64>}, {pipeline_mode = #tpu.pipeline_mode<synchronous>, transform_indices = @transform_36, window_bounds = array<i64: 128, 64>}, {pipeline_mode = #tpu.pipeline_mode<synchronous>, transform_indices = @transform_37, window_bounds = array<i64: 2, 64>}, {pipeline_mode = #tpu.pipeline_mode<synchronous>, transform_indices = @transform_38, window_bounds = array<i64: 3, 64, 64>}, {pipeline_mode = #tpu.pipeline_mode<synchronous>, transform_indices = @transform_39, window_bounds = array<i64: 2, 64>}, {pipeline_mode = #tpu.pipeline_mode<synchronous>, transform_indices = @transform_40, window_bounds = array<i64: 5, 64, 64>}, {pipeline_mode = #tpu.pipeline_mode<synchronous>, transform_indices = @transform_41, window_bounds = array<i64: 2, 64>}, {pipeline_mode = #tpu.pipeline_mode<synchronous>, transform_indices = @transform_42, window_bounds = array<i64: 7, 64, 64>}, {pipeline_mode = #tpu.pipeline_mode<synchronous>, transform_indices = @transform_43, window_bounds = array<i64: 2, 64>}, {pipeline_mode = #tpu.pipeline_mode<synchronous>, transform_indices = @transform_44, window_bounds = array<i64: 4, 64>}, {transform_indices = @transform_45, window_bounds = array<i64: 1, 1, 5>}]} {
    %c0 = arith.constant 0 : index
    %c0_0 = arith.constant 0 : index
    %c0_1 = arith.constant 0 : index
    %0 = vector.load %arg1[%c0, %c0_0, %c0_1] : memref<1x16x4xf32, #tpu.memory_space<vmem>>, vector<1x16x4xf32>
    %1 = vector.shape_cast %0 : vector<1x16x4xf32> to vector<16x4xf32>
    %cst = arith.constant 0.000000e+00 : f32
    %2 = vector.broadcast %cst : f32 to vector<1x4xf32>
    %3 = tpu.concatenate %2, %1, %2 in 0 : vector<1x4xf32>, vector<16x4xf32>, vector<1x4xf32> -> vector<18x4xf32>
    %c0_2 = arith.constant 0 : index
    %c0_3 = arith.constant 0 : index
    %4 = vector.load %arg45[%c0_2, %c0_3] : memref<4x64xf32, #tpu.memory_space<vmem>>, vector<4x64xf32>
    %cst_4 = arith.constant dense<0.000000e+00> : vector<18x64xf32>
    %5 = tpu.matmul %3, %4, %cst_4 {dimension_numbers = #tpu.dot_dimension_numbers<[1], [0], [0], [1], [0, 0, 1, 1], [], []>} : vector<18x4xf32>, vector<4x64xf32>, vector<18x64xf32> -> vector<18x64xf32>
    %c0_5 = arith.constant 0 : index
    %c0_6 = arith.constant 0 : index
    %6 = vector.load %arg44[%c0_5, %c0_6] : memref<2x64xf32, #tpu.memory_space<vmem>>, vector<2x64xf32>
    %7 = vector.extract_strided_slice %6 {offsets = [0, 0], sizes = [1, 64], strides = [1, 1]} : vector<2x64xf32> to vector<1x64xf32>
    %8 = vector.broadcast %7 : vector<1x64xf32> to vector<18x64xf32>
    %9 = arith.mulf %5, %8 : vector<18x64xf32>
    %10 = vector.extract_strided_slice %6 {offsets = [1, 0], sizes = [1, 64], strides = [1, 1]} : vector<2x64xf32> to vector<1x64xf32>
    %11 = vector.broadcast %10 : vector<1x64xf32> to vector<18x64xf32>
    %12 = arith.addf %9, %11 : vector<18x64xf32>
    %cst_7 = arith.constant 0.000000e+00 : f32
    %13 = vector.broadcast %cst_7 : f32 to vector<18x64xf32>
    %14 = arith.maximumf %12, %13 : vector<18x64xf32>
    %c0_8 = arith.constant 0 : index
    %c0_9 = arith.constant 0 : index
    %15 = vector.load %arg5[%c0_8, %c0_9] : memref<64x16xf32, #tpu.memory_space<vmem>>, vector<64x16xf32>
    %cst_10 = arith.constant dense<0.000000e+00> : vector<18x16xf32>
    %16 = tpu.matmul %14, %15, %cst_10 {dimension_numbers = #tpu.dot_dimension_numbers<[1], [0], [0], [1], [0, 0, 1, 1], [], []>} : vector<18x64xf32>, vector<64x16xf32>, vector<18x16xf32> -> vector<18x16xf32>
    %c0_11 = arith.constant 0 : index
    %c0_12 = arith.constant 0 : index
    %17 = vector.load %arg4[%c0_11, %c0_12] : memref<2x16xf32, #tpu.memory_space<vmem>>, vector<2x16xf32>
    %18 = vector.extract_strided_slice %17 {offsets = [0, 0], sizes = [1, 16], strides = [1, 1]} : vector<2x16xf32> to vector<1x16xf32>
    %19 = vector.broadcast %18 : vector<1x16xf32> to vector<18x16xf32>
    %20 = arith.mulf %16, %19 : vector<18x16xf32>
    %21 = vector.extract_strided_slice %17 {offsets = [1, 0], sizes = [1, 16], strides = [1, 1]} : vector<2x16xf32> to vector<1x16xf32>
    %22 = vector.broadcast %21 : vector<1x16xf32> to vector<18x16xf32>
    %23 = arith.addf %20, %22 : vector<18x16xf32>
    %cst_13 = arith.constant 0.000000e+00 : f32
    %24 = vector.broadcast %cst_13 : f32 to vector<18x16xf32>
    %25 = arith.maximumf %23, %24 : vector<18x16xf32>
    %cst_14 = arith.constant 0.000000e+00 : f32
    %26 = vector.broadcast %cst_14 : f32 to vector<3x16xf32>
    %27 = tpu.concatenate %26, %25, %26 in 0 : vector<3x16xf32>, vector<18x16xf32>, vector<3x16xf32> -> vector<24x16xf32>
    %28 = vector.extract_strided_slice %27 {offsets = [4, 0], sizes = [18, 16], strides = [1, 1]} : vector<24x16xf32> to vector<18x16xf32>
    %c0_15 = arith.constant 0 : index
    %c0_16 = arith.constant 0 : index
    %c0_17 = arith.constant 0 : index
    %29 = vector.load %arg7[%c0_15, %c0_16, %c0_17] : memref<3x16x16xf32, #tpu.memory_space<vmem>>, vector<1x16x16xf32>
    %30 = vector.shape_cast %29 : vector<1x16x16xf32> to vector<16x16xf32>
    %cst_18 = arith.constant dense<0.000000e+00> : vector<18x16xf32>
    %31 = tpu.matmul %28, %30, %cst_18 {dimension_numbers = #tpu.dot_dimension_numbers<[1], [0], [0], [1], [0, 0, 1, 1], [], []>} : vector<18x16xf32>, vector<16x16xf32>, vector<18x16xf32> -> vector<18x16xf32>
    %32 = vector.extract_strided_slice %27 {offsets = [3, 0], sizes = [18, 16], strides = [1, 1]} : vector<24x16xf32> to vector<18x16xf32>
    %c1 = arith.constant 1 : index
    %c0_19 = arith.constant 0 : index
    %c0_20 = arith.constant 0 : index
    %33 = vector.load %arg7[%c1, %c0_19, %c0_20] : memref<3x16x16xf32, #tpu.memory_space<vmem>>, vector<1x16x16xf32>
    %34 = vector.shape_cast %33 : vector<1x16x16xf32> to vector<16x16xf32>
    %cst_21 = arith.constant dense<0.000000e+00> : vector<18x16xf32>
    %35 = tpu.matmul %32, %34, %cst_21 {dimension_numbers = #tpu.dot_dimension_numbers<[1], [0], [0], [1], [0, 0, 1, 1], [], []>} : vector<18x16xf32>, vector<16x16xf32>, vector<18x16xf32> -> vector<18x16xf32>
    %36 = arith.addf %31, %35 : vector<18x16xf32>
    %37 = vector.extract_strided_slice %27 {offsets = [2, 0], sizes = [18, 16], strides = [1, 1]} : vector<24x16xf32> to vector<18x16xf32>
    %c2 = arith.constant 2 : index
    %c0_22 = arith.constant 0 : index
    %c0_23 = arith.constant 0 : index
    %38 = vector.load %arg7[%c2, %c0_22, %c0_23] : memref<3x16x16xf32, #tpu.memory_space<vmem>>, vector<1x16x16xf32>
    %39 = vector.shape_cast %38 : vector<1x16x16xf32> to vector<16x16xf32>
    %cst_24 = arith.constant dense<0.000000e+00> : vector<18x16xf32>
    %40 = tpu.matmul %37, %39, %cst_24 {dimension_numbers = #tpu.dot_dimension_numbers<[1], [0], [0], [1], [0, 0, 1, 1], [], []>} : vector<18x16xf32>, vector<16x16xf32>, vector<18x16xf32> -> vector<18x16xf32>
    %41 = arith.addf %36, %40 : vector<18x16xf32>
    %c0_25 = arith.constant 0 : index
    %c0_26 = arith.constant 0 : index
    %42 = vector.load %arg6[%c0_25, %c0_26] : memref<2x16xf32, #tpu.memory_space<vmem>>, vector<2x16xf32>
    %43 = vector.extract_strided_slice %42 {offsets = [0, 0], sizes = [1, 16], strides = [1, 1]} : vector<2x16xf32> to vector<1x16xf32>
    %44 = vector.broadcast %43 : vector<1x16xf32> to vector<18x16xf32>
    %45 = arith.mulf %41, %44 : vector<18x16xf32>
    %46 = vector.extract_strided_slice %42 {offsets = [1, 0], sizes = [1, 16], strides = [1, 1]} : vector<2x16xf32> to vector<1x16xf32>
    %47 = vector.broadcast %46 : vector<1x16xf32> to vector<18x16xf32>
    %48 = arith.addf %45, %47 : vector<18x16xf32>
    %cst_27 = arith.constant 0.000000e+00 : f32
    %49 = vector.broadcast %cst_27 : f32 to vector<18x16xf32>
    %50 = arith.maximumf %48, %49 : vector<18x16xf32>
    %51 = vector.extract_strided_slice %27 {offsets = [5, 0], sizes = [18, 16], strides = [1, 1]} : vector<24x16xf32> to vector<18x16xf32>
    %c0_28 = arith.constant 0 : index
    %c0_29 = arith.constant 0 : index
    %c0_30 = arith.constant 0 : index
    %52 = vector.load %arg9[%c0_28, %c0_29, %c0_30] : memref<5x16x16xf32, #tpu.memory_space<vmem>>, vector<1x16x16xf32>
    %53 = vector.shape_cast %52 : vector<1x16x16xf32> to vector<16x16xf32>
    %cst_31 = arith.constant dense<0.000000e+00> : vector<18x16xf32>
    %54 = tpu.matmul %51, %53, %cst_31 {dimension_numbers = #tpu.dot_dimension_numbers<[1], [0], [0], [1], [0, 0, 1, 1], [], []>} : vector<18x16xf32>, vector<16x16xf32>, vector<18x16xf32> -> vector<18x16xf32>
    %55 = vector.extract_strided_slice %27 {offsets = [4, 0], sizes = [18, 16], strides = [1, 1]} : vector<24x16xf32> to vector<18x16xf32>
    %c1_32 = arith.constant 1 : index
    %c0_33 = arith.constant 0 : index
    %c0_34 = arith.constant 0 : index
    %56 = vector.load %arg9[%c1_32, %c0_33, %c0_34] : memref<5x16x16xf32, #tpu.memory_space<vmem>>, vector<1x16x16xf32>
    %57 = vector.shape_cast %56 : vector<1x16x16xf32> to vector<16x16xf32>
    %cst_35 = arith.constant dense<0.000000e+00> : vector<18x16xf32>
    %58 = tpu.matmul %55, %57, %cst_35 {dimension_numbers = #tpu.dot_dimension_numbers<[1], [0], [0], [1], [0, 0, 1, 1], [], []>} : vector<18x16xf32>, vector<16x16xf32>, vector<18x16xf32> -> vector<18x16xf32>
    %59 = arith.addf %54, %58 : vector<18x16xf32>
    %60 = vector.extract_strided_slice %27 {offsets = [3, 0], sizes = [18, 16], strides = [1, 1]} : vector<24x16xf32> to vector<18x16xf32>
    %c2_36 = arith.constant 2 : index
    %c0_37 = arith.constant 0 : index
    %c0_38 = arith.constant 0 : index
    %61 = vector.load %arg9[%c2_36, %c0_37, %c0_38] : memref<5x16x16xf32, #tpu.memory_space<vmem>>, vector<1x16x16xf32>
    %62 = vector.shape_cast %61 : vector<1x16x16xf32> to vector<16x16xf32>
    %cst_39 = arith.constant dense<0.000000e+00> : vector<18x16xf32>
    %63 = tpu.matmul %60, %62, %cst_39 {dimension_numbers = #tpu.dot_dimension_numbers<[1], [0], [0], [1], [0, 0, 1, 1], [], []>} : vector<18x16xf32>, vector<16x16xf32>, vector<18x16xf32> -> vector<18x16xf32>
    %64 = arith.addf %59, %63 : vector<18x16xf32>
    %65 = vector.extract_strided_slice %27 {offsets = [2, 0], sizes = [18, 16], strides = [1, 1]} : vector<24x16xf32> to vector<18x16xf32>
    %c3 = arith.constant 3 : index
    %c0_40 = arith.constant 0 : index
    %c0_41 = arith.constant 0 : index
    %66 = vector.load %arg9[%c3, %c0_40, %c0_41] : memref<5x16x16xf32, #tpu.memory_space<vmem>>, vector<1x16x16xf32>
    %67 = vector.shape_cast %66 : vector<1x16x16xf32> to vector<16x16xf32>
    %cst_42 = arith.constant dense<0.000000e+00> : vector<18x16xf32>
    %68 = tpu.matmul %65, %67, %cst_42 {dimension_numbers = #tpu.dot_dimension_numbers<[1], [0], [0], [1], [0, 0, 1, 1], [], []>} : vector<18x16xf32>, vector<16x16xf32>, vector<18x16xf32> -> vector<18x16xf32>
    %69 = arith.addf %64, %68 : vector<18x16xf32>
    %70 = vector.extract_strided_slice %27 {offsets = [1, 0], sizes = [18, 16], strides = [1, 1]} : vector<24x16xf32> to vector<18x16xf32>
    %c4 = arith.constant 4 : index
    %c0_43 = arith.constant 0 : index
    %c0_44 = arith.constant 0 : index
    %71 = vector.load %arg9[%c4, %c0_43, %c0_44] : memref<5x16x16xf32, #tpu.memory_space<vmem>>, vector<1x16x16xf32>
    %72 = vector.shape_cast %71 : vector<1x16x16xf32> to vector<16x16xf32>
    %cst_45 = arith.constant dense<0.000000e+00> : vector<18x16xf32>
    %73 = tpu.matmul %70, %72, %cst_45 {dimension_numbers = #tpu.dot_dimension_numbers<[1], [0], [0], [1], [0, 0, 1, 1], [], []>} : vector<18x16xf32>, vector<16x16xf32>, vector<18x16xf32> -> vector<18x16xf32>
    %74 = arith.addf %69, %73 : vector<18x16xf32>
    %c0_46 = arith.constant 0 : index
    %c0_47 = arith.constant 0 : index
    %75 = vector.load %arg8[%c0_46, %c0_47] : memref<2x16xf32, #tpu.memory_space<vmem>>, vector<2x16xf32>
    %76 = vector.extract_strided_slice %75 {offsets = [0, 0], sizes = [1, 16], strides = [1, 1]} : vector<2x16xf32> to vector<1x16xf32>
    %77 = vector.broadcast %76 : vector<1x16xf32> to vector<18x16xf32>
    %78 = arith.mulf %74, %77 : vector<18x16xf32>
    %79 = vector.extract_strided_slice %75 {offsets = [1, 0], sizes = [1, 16], strides = [1, 1]} : vector<2x16xf32> to vector<1x16xf32>
    %80 = vector.broadcast %79 : vector<1x16xf32> to vector<18x16xf32>
    %81 = arith.addf %78, %80 : vector<18x16xf32>
    %cst_48 = arith.constant 0.000000e+00 : f32
    %82 = vector.broadcast %cst_48 : f32 to vector<18x16xf32>
    %83 = arith.maximumf %81, %82 : vector<18x16xf32>
    %84 = vector.extract_strided_slice %27 {offsets = [6, 0], sizes = [18, 16], strides = [1, 1]} : vector<24x16xf32> to vector<18x16xf32>
    %c0_49 = arith.constant 0 : index
    %c0_50 = arith.constant 0 : index
    %c0_51 = arith.constant 0 : index
    %85 = vector.load %arg11[%c0_49, %c0_50, %c0_51] : memref<7x16x16xf32, #tpu.memory_space<vmem>>, vector<1x16x16xf32>
    %86 = vector.shape_cast %85 : vector<1x16x16xf32> to vector<16x16xf32>
    %cst_52 = arith.constant dense<0.000000e+00> : vector<18x16xf32>
    %87 = tpu.matmul %84, %86, %cst_52 {dimension_numbers = #tpu.dot_dimension_numbers<[1], [0], [0], [1], [0, 0, 1, 1], [], []>} : vector<18x16xf32>, vector<16x16xf32>, vector<18x16xf32> -> vector<18x16xf32>
    %88 = vector.extract_strided_slice %27 {offsets = [5, 0], sizes = [18, 16], strides = [1, 1]} : vector<24x16xf32> to vector<18x16xf32>
    %c1_53 = arith.constant 1 : index
    %c0_54 = arith.constant 0 : index
    %c0_55 = arith.constant 0 : index
    %89 = vector.load %arg11[%c1_53, %c0_54, %c0_55] : memref<7x16x16xf32, #tpu.memory_space<vmem>>, vector<1x16x16xf32>
    %90 = vector.shape_cast %89 : vector<1x16x16xf32> to vector<16x16xf32>
    %cst_56 = arith.constant dense<0.000000e+00> : vector<18x16xf32>
    %91 = tpu.matmul %88, %90, %cst_56 {dimension_numbers = #tpu.dot_dimension_numbers<[1], [0], [0], [1], [0, 0, 1, 1], [], []>} : vector<18x16xf32>, vector<16x16xf32>, vector<18x16xf32> -> vector<18x16xf32>
    %92 = arith.addf %87, %91 : vector<18x16xf32>
    %93 = vector.extract_strided_slice %27 {offsets = [4, 0], sizes = [18, 16], strides = [1, 1]} : vector<24x16xf32> to vector<18x16xf32>
    %c2_57 = arith.constant 2 : index
    %c0_58 = arith.constant 0 : index
    %c0_59 = arith.constant 0 : index
    %94 = vector.load %arg11[%c2_57, %c0_58, %c0_59] : memref<7x16x16xf32, #tpu.memory_space<vmem>>, vector<1x16x16xf32>
    %95 = vector.shape_cast %94 : vector<1x16x16xf32> to vector<16x16xf32>
    %cst_60 = arith.constant dense<0.000000e+00> : vector<18x16xf32>
    %96 = tpu.matmul %93, %95, %cst_60 {dimension_numbers = #tpu.dot_dimension_numbers<[1], [0], [0], [1], [0, 0, 1, 1], [], []>} : vector<18x16xf32>, vector<16x16xf32>, vector<18x16xf32> -> vector<18x16xf32>
    %97 = arith.addf %92, %96 : vector<18x16xf32>
    %98 = vector.extract_strided_slice %27 {offsets = [3, 0], sizes = [18, 16], strides = [1, 1]} : vector<24x16xf32> to vector<18x16xf32>
    %c3_61 = arith.constant 3 : index
    %c0_62 = arith.constant 0 : index
    %c0_63 = arith.constant 0 : index
    %99 = vector.load %arg11[%c3_61, %c0_62, %c0_63] : memref<7x16x16xf32, #tpu.memory_space<vmem>>, vector<1x16x16xf32>
    %100 = vector.shape_cast %99 : vector<1x16x16xf32> to vector<16x16xf32>
    %cst_64 = arith.constant dense<0.000000e+00> : vector<18x16xf32>
    %101 = tpu.matmul %98, %100, %cst_64 {dimension_numbers = #tpu.dot_dimension_numbers<[1], [0], [0], [1], [0, 0, 1, 1], [], []>} : vector<18x16xf32>, vector<16x16xf32>, vector<18x16xf32> -> vector<18x16xf32>
    %102 = arith.addf %97, %101 : vector<18x16xf32>
    %103 = vector.extract_strided_slice %27 {offsets = [2, 0], sizes = [18, 16], strides = [1, 1]} : vector<24x16xf32> to vector<18x16xf32>
    %c4_65 = arith.constant 4 : index
    %c0_66 = arith.constant 0 : index
    %c0_67 = arith.constant 0 : index
    %104 = vector.load %arg11[%c4_65, %c0_66, %c0_67] : memref<7x16x16xf32, #tpu.memory_space<vmem>>, vector<1x16x16xf32>
    %105 = vector.shape_cast %104 : vector<1x16x16xf32> to vector<16x16xf32>
    %cst_68 = arith.constant dense<0.000000e+00> : vector<18x16xf32>
    %106 = tpu.matmul %103, %105, %cst_68 {dimension_numbers = #tpu.dot_dimension_numbers<[1], [0], [0], [1], [0, 0, 1, 1], [], []>} : vector<18x16xf32>, vector<16x16xf32>, vector<18x16xf32> -> vector<18x16xf32>
    %107 = arith.addf %102, %106 : vector<18x16xf32>
    %108 = vector.extract_strided_slice %27 {offsets = [1, 0], sizes = [18, 16], strides = [1, 1]} : vector<24x16xf32> to vector<18x16xf32>
    %c5 = arith.constant 5 : index
    %c0_69 = arith.constant 0 : index
    %c0_70 = arith.constant 0 : index
    %109 = vector.load %arg11[%c5, %c0_69, %c0_70] : memref<7x16x16xf32, #tpu.memory_space<vmem>>, vector<1x16x16xf32>
    %110 = vector.shape_cast %109 : vector<1x16x16xf32> to vector<16x16xf32>
    %cst_71 = arith.constant dense<0.000000e+00> : vector<18x16xf32>
    %111 = tpu.matmul %108, %110, %cst_71 {dimension_numbers = #tpu.dot_dimension_numbers<[1], [0], [0], [1], [0, 0, 1, 1], [], []>} : vector<18x16xf32>, vector<16x16xf32>, vector<18x16xf32> -> vector<18x16xf32>
    %112 = arith.addf %107, %111 : vector<18x16xf32>
    %113 = vector.extract_strided_slice %27 {offsets = [0, 0], sizes = [18, 16], strides = [1, 1]} : vector<24x16xf32> to vector<18x16xf32>
    %c6 = arith.constant 6 : index
    %c0_72 = arith.constant 0 : index
    %c0_73 = arith.constant 0 : index
    %114 = vector.load %arg11[%c6, %c0_72, %c0_73] : memref<7x16x16xf32, #tpu.memory_space<vmem>>, vector<1x16x16xf32>
    %115 = vector.shape_cast %114 : vector<1x16x16xf32> to vector<16x16xf32>
    %cst_74 = arith.constant dense<0.000000e+00> : vector<18x16xf32>
    %116 = tpu.matmul %113, %115, %cst_74 {dimension_numbers = #tpu.dot_dimension_numbers<[1], [0], [0], [1], [0, 0, 1, 1], [], []>} : vector<18x16xf32>, vector<16x16xf32>, vector<18x16xf32> -> vector<18x16xf32>
    %117 = arith.addf %112, %116 : vector<18x16xf32>
    %c0_75 = arith.constant 0 : index
    %c0_76 = arith.constant 0 : index
    %118 = vector.load %arg10[%c0_75, %c0_76] : memref<2x16xf32, #tpu.memory_space<vmem>>, vector<2x16xf32>
    %119 = vector.extract_strided_slice %118 {offsets = [0, 0], sizes = [1, 16], strides = [1, 1]} : vector<2x16xf32> to vector<1x16xf32>
    %120 = vector.broadcast %119 : vector<1x16xf32> to vector<18x16xf32>
    %121 = arith.mulf %117, %120 : vector<18x16xf32>
    %122 = vector.extract_strided_slice %118 {offsets = [1, 0], sizes = [1, 16], strides = [1, 1]} : vector<2x16xf32> to vector<1x16xf32>
    %123 = vector.broadcast %122 : vector<1x16xf32> to vector<18x16xf32>
    %124 = arith.addf %121, %123 : vector<18x16xf32>
    %cst_77 = arith.constant 0.000000e+00 : f32
    %125 = vector.broadcast %cst_77 : f32 to vector<18x16xf32>
    %126 = arith.maximumf %124, %125 : vector<18x16xf32>
    %127 = tpu.concatenate %25, %50, %83, %126 in 1 : vector<18x16xf32>, vector<18x16xf32>, vector<18x16xf32>, vector<18x16xf32> -> vector<18x64xf32>
    %c0_78 = arith.constant 0 : index
    %c0_79 = arith.constant 0 : index
    %128 = vector.load %arg13[%c0_78, %c0_79] : memref<64x16xf32, #tpu.memory_space<vmem>>, vector<64x16xf32>
    %cst_80 = arith.constant dense<0.000000e+00> : vector<18x16xf32>
    %129 = tpu.matmul %127, %128, %cst_80 {dimension_numbers = #tpu.dot_dimension_numbers<[1], [0], [0], [1], [0, 0, 1, 1], [], []>} : vector<18x64xf32>, vector<64x16xf32>, vector<18x16xf32> -> vector<18x16xf32>
    %c0_81 = arith.constant 0 : index
    %c0_82 = arith.constant 0 : index
    %130 = vector.load %arg12[%c0_81, %c0_82] : memref<2x16xf32, #tpu.memory_space<vmem>>, vector<2x16xf32>
    %131 = vector.extract_strided_slice %130 {offsets = [0, 0], sizes = [1, 16], strides = [1, 1]} : vector<2x16xf32> to vector<1x16xf32>
    %132 = vector.broadcast %131 : vector<1x16xf32> to vector<18x16xf32>
    %133 = arith.mulf %129, %132 : vector<18x16xf32>
    %134 = vector.extract_strided_slice %130 {offsets = [1, 0], sizes = [1, 16], strides = [1, 1]} : vector<2x16xf32> to vector<1x16xf32>
    %135 = vector.broadcast %134 : vector<1x16xf32> to vector<18x16xf32>
    %136 = arith.addf %133, %135 : vector<18x16xf32>
    %cst_83 = arith.constant 0.000000e+00 : f32
    %137 = vector.broadcast %cst_83 : f32 to vector<18x16xf32>
    %138 = arith.maximumf %136, %137 : vector<18x16xf32>
    %cst_84 = arith.constant 0.000000e+00 : f32
    %139 = vector.broadcast %cst_84 : f32 to vector<3x16xf32>
    %140 = tpu.concatenate %139, %138, %139 in 0 : vector<3x16xf32>, vector<18x16xf32>, vector<3x16xf32> -> vector<24x16xf32>
    %141 = vector.extract_strided_slice %140 {offsets = [4, 0], sizes = [18, 16], strides = [1, 1]} : vector<24x16xf32> to vector<18x16xf32>
    %c0_85 = arith.constant 0 : index
    %c0_86 = arith.constant 0 : index
    %c0_87 = arith.constant 0 : index
    %142 = vector.load %arg15[%c0_85, %c0_86, %c0_87] : memref<3x16x16xf32, #tpu.memory_space<vmem>>, vector<1x16x16xf32>
    %143 = vector.shape_cast %142 : vector<1x16x16xf32> to vector<16x16xf32>
    %cst_88 = arith.constant dense<0.000000e+00> : vector<18x16xf32>
    %144 = tpu.matmul %141, %143, %cst_88 {dimension_numbers = #tpu.dot_dimension_numbers<[1], [0], [0], [1], [0, 0, 1, 1], [], []>} : vector<18x16xf32>, vector<16x16xf32>, vector<18x16xf32> -> vector<18x16xf32>
    %145 = vector.extract_strided_slice %140 {offsets = [3, 0], sizes = [18, 16], strides = [1, 1]} : vector<24x16xf32> to vector<18x16xf32>
    %c1_89 = arith.constant 1 : index
    %c0_90 = arith.constant 0 : index
    %c0_91 = arith.constant 0 : index
    %146 = vector.load %arg15[%c1_89, %c0_90, %c0_91] : memref<3x16x16xf32, #tpu.memory_space<vmem>>, vector<1x16x16xf32>
    %147 = vector.shape_cast %146 : vector<1x16x16xf32> to vector<16x16xf32>
    %cst_92 = arith.constant dense<0.000000e+00> : vector<18x16xf32>
    %148 = tpu.matmul %145, %147, %cst_92 {dimension_numbers = #tpu.dot_dimension_numbers<[1], [0], [0], [1], [0, 0, 1, 1], [], []>} : vector<18x16xf32>, vector<16x16xf32>, vector<18x16xf32> -> vector<18x16xf32>
    %149 = arith.addf %144, %148 : vector<18x16xf32>
    %150 = vector.extract_strided_slice %140 {offsets = [2, 0], sizes = [18, 16], strides = [1, 1]} : vector<24x16xf32> to vector<18x16xf32>
    %c2_93 = arith.constant 2 : index
    %c0_94 = arith.constant 0 : index
    %c0_95 = arith.constant 0 : index
    %151 = vector.load %arg15[%c2_93, %c0_94, %c0_95] : memref<3x16x16xf32, #tpu.memory_space<vmem>>, vector<1x16x16xf32>
    %152 = vector.shape_cast %151 : vector<1x16x16xf32> to vector<16x16xf32>
    %cst_96 = arith.constant dense<0.000000e+00> : vector<18x16xf32>
    %153 = tpu.matmul %150, %152, %cst_96 {dimension_numbers = #tpu.dot_dimension_numbers<[1], [0], [0], [1], [0, 0, 1, 1], [], []>} : vector<18x16xf32>, vector<16x16xf32>, vector<18x16xf32> -> vector<18x16xf32>
    %154 = arith.addf %149, %153 : vector<18x16xf32>
    %c0_97 = arith.constant 0 : index
    %c0_98 = arith.constant 0 : index
    %155 = vector.load %arg14[%c0_97, %c0_98] : memref<2x16xf32, #tpu.memory_space<vmem>>, vector<2x16xf32>
    %156 = vector.extract_strided_slice %155 {offsets = [0, 0], sizes = [1, 16], strides = [1, 1]} : vector<2x16xf32> to vector<1x16xf32>
    %157 = vector.broadcast %156 : vector<1x16xf32> to vector<18x16xf32>
    %158 = arith.mulf %154, %157 : vector<18x16xf32>
    %159 = vector.extract_strided_slice %155 {offsets = [1, 0], sizes = [1, 16], strides = [1, 1]} : vector<2x16xf32> to vector<1x16xf32>
    %160 = vector.broadcast %159 : vector<1x16xf32> to vector<18x16xf32>
    %161 = arith.addf %158, %160 : vector<18x16xf32>
    %cst_99 = arith.constant 0.000000e+00 : f32
    %162 = vector.broadcast %cst_99 : f32 to vector<18x16xf32>
    %163 = arith.maximumf %161, %162 : vector<18x16xf32>
    %164 = vector.extract_strided_slice %140 {offsets = [5, 0], sizes = [18, 16], strides = [1, 1]} : vector<24x16xf32> to vector<18x16xf32>
    %c0_100 = arith.constant 0 : index
    %c0_101 = arith.constant 0 : index
    %c0_102 = arith.constant 0 : index
    %165 = vector.load %arg17[%c0_100, %c0_101, %c0_102] : memref<5x16x16xf32, #tpu.memory_space<vmem>>, vector<1x16x16xf32>
    %166 = vector.shape_cast %165 : vector<1x16x16xf32> to vector<16x16xf32>
    %cst_103 = arith.constant dense<0.000000e+00> : vector<18x16xf32>
    %167 = tpu.matmul %164, %166, %cst_103 {dimension_numbers = #tpu.dot_dimension_numbers<[1], [0], [0], [1], [0, 0, 1, 1], [], []>} : vector<18x16xf32>, vector<16x16xf32>, vector<18x16xf32> -> vector<18x16xf32>
    %168 = vector.extract_strided_slice %140 {offsets = [4, 0], sizes = [18, 16], strides = [1, 1]} : vector<24x16xf32> to vector<18x16xf32>
    %c1_104 = arith.constant 1 : index
    %c0_105 = arith.constant 0 : index
    %c0_106 = arith.constant 0 : index
    %169 = vector.load %arg17[%c1_104, %c0_105, %c0_106] : memref<5x16x16xf32, #tpu.memory_space<vmem>>, vector<1x16x16xf32>
    %170 = vector.shape_cast %169 : vector<1x16x16xf32> to vector<16x16xf32>
    %cst_107 = arith.constant dense<0.000000e+00> : vector<18x16xf32>
    %171 = tpu.matmul %168, %170, %cst_107 {dimension_numbers = #tpu.dot_dimension_numbers<[1], [0], [0], [1], [0, 0, 1, 1], [], []>} : vector<18x16xf32>, vector<16x16xf32>, vector<18x16xf32> -> vector<18x16xf32>
    %172 = arith.addf %167, %171 : vector<18x16xf32>
    %173 = vector.extract_strided_slice %140 {offsets = [3, 0], sizes = [18, 16], strides = [1, 1]} : vector<24x16xf32> to vector<18x16xf32>
    %c2_108 = arith.constant 2 : index
    %c0_109 = arith.constant 0 : index
    %c0_110 = arith.constant 0 : index
    %174 = vector.load %arg17[%c2_108, %c0_109, %c0_110] : memref<5x16x16xf32, #tpu.memory_space<vmem>>, vector<1x16x16xf32>
    %175 = vector.shape_cast %174 : vector<1x16x16xf32> to vector<16x16xf32>
    %cst_111 = arith.constant dense<0.000000e+00> : vector<18x16xf32>
    %176 = tpu.matmul %173, %175, %cst_111 {dimension_numbers = #tpu.dot_dimension_numbers<[1], [0], [0], [1], [0, 0, 1, 1], [], []>} : vector<18x16xf32>, vector<16x16xf32>, vector<18x16xf32> -> vector<18x16xf32>
    %177 = arith.addf %172, %176 : vector<18x16xf32>
    %178 = vector.extract_strided_slice %140 {offsets = [2, 0], sizes = [18, 16], strides = [1, 1]} : vector<24x16xf32> to vector<18x16xf32>
    %c3_112 = arith.constant 3 : index
    %c0_113 = arith.constant 0 : index
    %c0_114 = arith.constant 0 : index
    %179 = vector.load %arg17[%c3_112, %c0_113, %c0_114] : memref<5x16x16xf32, #tpu.memory_space<vmem>>, vector<1x16x16xf32>
    %180 = vector.shape_cast %179 : vector<1x16x16xf32> to vector<16x16xf32>
    %cst_115 = arith.constant dense<0.000000e+00> : vector<18x16xf32>
    %181 = tpu.matmul %178, %180, %cst_115 {dimension_numbers = #tpu.dot_dimension_numbers<[1], [0], [0], [1], [0, 0, 1, 1], [], []>} : vector<18x16xf32>, vector<16x16xf32>, vector<18x16xf32> -> vector<18x16xf32>
    %182 = arith.addf %177, %181 : vector<18x16xf32>
    %183 = vector.extract_strided_slice %140 {offsets = [1, 0], sizes = [18, 16], strides = [1, 1]} : vector<24x16xf32> to vector<18x16xf32>
    %c4_116 = arith.constant 4 : index
    %c0_117 = arith.constant 0 : index
    %c0_118 = arith.constant 0 : index
    %184 = vector.load %arg17[%c4_116, %c0_117, %c0_118] : memref<5x16x16xf32, #tpu.memory_space<vmem>>, vector<1x16x16xf32>
    %185 = vector.shape_cast %184 : vector<1x16x16xf32> to vector<16x16xf32>
    %cst_119 = arith.constant dense<0.000000e+00> : vector<18x16xf32>
    %186 = tpu.matmul %183, %185, %cst_119 {dimension_numbers = #tpu.dot_dimension_numbers<[1], [0], [0], [1], [0, 0, 1, 1], [], []>} : vector<18x16xf32>, vector<16x16xf32>, vector<18x16xf32> -> vector<18x16xf32>
    %187 = arith.addf %182, %186 : vector<18x16xf32>
    %c0_120 = arith.constant 0 : index
    %c0_121 = arith.constant 0 : index
    %188 = vector.load %arg16[%c0_120, %c0_121] : memref<2x16xf32, #tpu.memory_space<vmem>>, vector<2x16xf32>
    %189 = vector.extract_strided_slice %188 {offsets = [0, 0], sizes = [1, 16], strides = [1, 1]} : vector<2x16xf32> to vector<1x16xf32>
    %190 = vector.broadcast %189 : vector<1x16xf32> to vector<18x16xf32>
    %191 = arith.mulf %187, %190 : vector<18x16xf32>
    %192 = vector.extract_strided_slice %188 {offsets = [1, 0], sizes = [1, 16], strides = [1, 1]} : vector<2x16xf32> to vector<1x16xf32>
    %193 = vector.broadcast %192 : vector<1x16xf32> to vector<18x16xf32>
    %194 = arith.addf %191, %193 : vector<18x16xf32>
    %cst_122 = arith.constant 0.000000e+00 : f32
    %195 = vector.broadcast %cst_122 : f32 to vector<18x16xf32>
    %196 = arith.maximumf %194, %195 : vector<18x16xf32>
    %197 = vector.extract_strided_slice %140 {offsets = [6, 0], sizes = [18, 16], strides = [1, 1]} : vector<24x16xf32> to vector<18x16xf32>
    %c0_123 = arith.constant 0 : index
    %c0_124 = arith.constant 0 : index
    %c0_125 = arith.constant 0 : index
    %198 = vector.load %arg19[%c0_123, %c0_124, %c0_125] : memref<7x16x16xf32, #tpu.memory_space<vmem>>, vector<1x16x16xf32>
    %199 = vector.shape_cast %198 : vector<1x16x16xf32> to vector<16x16xf32>
    %cst_126 = arith.constant dense<0.000000e+00> : vector<18x16xf32>
    %200 = tpu.matmul %197, %199, %cst_126 {dimension_numbers = #tpu.dot_dimension_numbers<[1], [0], [0], [1], [0, 0, 1, 1], [], []>} : vector<18x16xf32>, vector<16x16xf32>, vector<18x16xf32> -> vector<18x16xf32>
    %201 = vector.extract_strided_slice %140 {offsets = [5, 0], sizes = [18, 16], strides = [1, 1]} : vector<24x16xf32> to vector<18x16xf32>
    %c1_127 = arith.constant 1 : index
    %c0_128 = arith.constant 0 : index
    %c0_129 = arith.constant 0 : index
    %202 = vector.load %arg19[%c1_127, %c0_128, %c0_129] : memref<7x16x16xf32, #tpu.memory_space<vmem>>, vector<1x16x16xf32>
    %203 = vector.shape_cast %202 : vector<1x16x16xf32> to vector<16x16xf32>
    %cst_130 = arith.constant dense<0.000000e+00> : vector<18x16xf32>
    %204 = tpu.matmul %201, %203, %cst_130 {dimension_numbers = #tpu.dot_dimension_numbers<[1], [0], [0], [1], [0, 0, 1, 1], [], []>} : vector<18x16xf32>, vector<16x16xf32>, vector<18x16xf32> -> vector<18x16xf32>
    %205 = arith.addf %200, %204 : vector<18x16xf32>
    %206 = vector.extract_strided_slice %140 {offsets = [4, 0], sizes = [18, 16], strides = [1, 1]} : vector<24x16xf32> to vector<18x16xf32>
    %c2_131 = arith.constant 2 : index
    %c0_132 = arith.constant 0 : index
    %c0_133 = arith.constant 0 : index
    %207 = vector.load %arg19[%c2_131, %c0_132, %c0_133] : memref<7x16x16xf32, #tpu.memory_space<vmem>>, vector<1x16x16xf32>
    %208 = vector.shape_cast %207 : vector<1x16x16xf32> to vector<16x16xf32>
    %cst_134 = arith.constant dense<0.000000e+00> : vector<18x16xf32>
    %209 = tpu.matmul %206, %208, %cst_134 {dimension_numbers = #tpu.dot_dimension_numbers<[1], [0], [0], [1], [0, 0, 1, 1], [], []>} : vector<18x16xf32>, vector<16x16xf32>, vector<18x16xf32> -> vector<18x16xf32>
    %210 = arith.addf %205, %209 : vector<18x16xf32>
    %211 = vector.extract_strided_slice %140 {offsets = [3, 0], sizes = [18, 16], strides = [1, 1]} : vector<24x16xf32> to vector<18x16xf32>
    %c3_135 = arith.constant 3 : index
    %c0_136 = arith.constant 0 : index
    %c0_137 = arith.constant 0 : index
    %212 = vector.load %arg19[%c3_135, %c0_136, %c0_137] : memref<7x16x16xf32, #tpu.memory_space<vmem>>, vector<1x16x16xf32>
    %213 = vector.shape_cast %212 : vector<1x16x16xf32> to vector<16x16xf32>
    %cst_138 = arith.constant dense<0.000000e+00> : vector<18x16xf32>
    %214 = tpu.matmul %211, %213, %cst_138 {dimension_numbers = #tpu.dot_dimension_numbers<[1], [0], [0], [1], [0, 0, 1, 1], [], []>} : vector<18x16xf32>, vector<16x16xf32>, vector<18x16xf32> -> vector<18x16xf32>
    %215 = arith.addf %210, %214 : vector<18x16xf32>
    %216 = vector.extract_strided_slice %140 {offsets = [2, 0], sizes = [18, 16], strides = [1, 1]} : vector<24x16xf32> to vector<18x16xf32>
    %c4_139 = arith.constant 4 : index
    %c0_140 = arith.constant 0 : index
    %c0_141 = arith.constant 0 : index
    %217 = vector.load %arg19[%c4_139, %c0_140, %c0_141] : memref<7x16x16xf32, #tpu.memory_space<vmem>>, vector<1x16x16xf32>
    %218 = vector.shape_cast %217 : vector<1x16x16xf32> to vector<16x16xf32>
    %cst_142 = arith.constant dense<0.000000e+00> : vector<18x16xf32>
    %219 = tpu.matmul %216, %218, %cst_142 {dimension_numbers = #tpu.dot_dimension_numbers<[1], [0], [0], [1], [0, 0, 1, 1], [], []>} : vector<18x16xf32>, vector<16x16xf32>, vector<18x16xf32> -> vector<18x16xf32>
    %220 = arith.addf %215, %219 : vector<18x16xf32>
    %221 = vector.extract_strided_slice %140 {offsets = [1, 0], sizes = [18, 16], strides = [1, 1]} : vector<24x16xf32> to vector<18x16xf32>
    %c5_143 = arith.constant 5 : index
    %c0_144 = arith.constant 0 : index
    %c0_145 = arith.constant 0 : index
    %222 = vector.load %arg19[%c5_143, %c0_144, %c0_145] : memref<7x16x16xf32, #tpu.memory_space<vmem>>, vector<1x16x16xf32>
    %223 = vector.shape_cast %222 : vector<1x16x16xf32> to vector<16x16xf32>
    %cst_146 = arith.constant dense<0.000000e+00> : vector<18x16xf32>
    %224 = tpu.matmul %221, %223, %cst_146 {dimension_numbers = #tpu.dot_dimension_numbers<[1], [0], [0], [1], [0, 0, 1, 1], [], []>} : vector<18x16xf32>, vector<16x16xf32>, vector<18x16xf32> -> vector<18x16xf32>
    %225 = arith.addf %220, %224 : vector<18x16xf32>
    %226 = vector.extract_strided_slice %140 {offsets = [0, 0], sizes = [18, 16], strides = [1, 1]} : vector<24x16xf32> to vector<18x16xf32>
    %c6_147 = arith.constant 6 : index
    %c0_148 = arith.constant 0 : index
    %c0_149 = arith.constant 0 : index
    %227 = vector.load %arg19[%c6_147, %c0_148, %c0_149] : memref<7x16x16xf32, #tpu.memory_space<vmem>>, vector<1x16x16xf32>
    %228 = vector.shape_cast %227 : vector<1x16x16xf32> to vector<16x16xf32>
    %cst_150 = arith.constant dense<0.000000e+00> : vector<18x16xf32>
    %229 = tpu.matmul %226, %228, %cst_150 {dimension_numbers = #tpu.dot_dimension_numbers<[1], [0], [0], [1], [0, 0, 1, 1], [], []>} : vector<18x16xf32>, vector<16x16xf32>, vector<18x16xf32> -> vector<18x16xf32>
    %230 = arith.addf %225, %229 : vector<18x16xf32>
    %c0_151 = arith.constant 0 : index
    %c0_152 = arith.constant 0 : index
    %231 = vector.load %arg18[%c0_151, %c0_152] : memref<2x16xf32, #tpu.memory_space<vmem>>, vector<2x16xf32>
    %232 = vector.extract_strided_slice %231 {offsets = [0, 0], sizes = [1, 16], strides = [1, 1]} : vector<2x16xf32> to vector<1x16xf32>
    %233 = vector.broadcast %232 : vector<1x16xf32> to vector<18x16xf32>
    %234 = arith.mulf %230, %233 : vector<18x16xf32>
    %235 = vector.extract_strided_slice %231 {offsets = [1, 0], sizes = [1, 16], strides = [1, 1]} : vector<2x16xf32> to vector<1x16xf32>
    %236 = vector.broadcast %235 : vector<1x16xf32> to vector<18x16xf32>
    %237 = arith.addf %234, %236 : vector<18x16xf32>
    %cst_153 = arith.constant 0.000000e+00 : f32
    %238 = vector.broadcast %cst_153 : f32 to vector<18x16xf32>
    %239 = arith.maximumf %237, %238 : vector<18x16xf32>
    %240 = tpu.concatenate %138, %163, %196, %239 in 1 : vector<18x16xf32>, vector<18x16xf32>, vector<18x16xf32>, vector<18x16xf32> -> vector<18x64xf32>
    %c0_154 = arith.constant 0 : index
    %c0_155 = arith.constant 0 : index
    %241 = vector.load %arg21[%c0_154, %c0_155] : memref<64x16xf32, #tpu.memory_space<vmem>>, vector<64x16xf32>
    %cst_156 = arith.constant dense<0.000000e+00> : vector<18x16xf32>
    %242 = tpu.matmul %240, %241, %cst_156 {dimension_numbers = #tpu.dot_dimension_numbers<[1], [0], [0], [1], [0, 0, 1, 1], [], []>} : vector<18x64xf32>, vector<64x16xf32>, vector<18x16xf32> -> vector<18x16xf32>
    %c0_157 = arith.constant 0 : index
    %c0_158 = arith.constant 0 : index
    %243 = vector.load %arg20[%c0_157, %c0_158] : memref<2x16xf32, #tpu.memory_space<vmem>>, vector<2x16xf32>
    %244 = vector.extract_strided_slice %243 {offsets = [0, 0], sizes = [1, 16], strides = [1, 1]} : vector<2x16xf32> to vector<1x16xf32>
    %245 = vector.broadcast %244 : vector<1x16xf32> to vector<18x16xf32>
    %246 = arith.mulf %242, %245 : vector<18x16xf32>
    %247 = vector.extract_strided_slice %243 {offsets = [1, 0], sizes = [1, 16], strides = [1, 1]} : vector<2x16xf32> to vector<1x16xf32>
    %248 = vector.broadcast %247 : vector<1x16xf32> to vector<18x16xf32>
    %249 = arith.addf %246, %248 : vector<18x16xf32>
    %cst_159 = arith.constant 0.000000e+00 : f32
    %250 = vector.broadcast %cst_159 : f32 to vector<18x16xf32>
    %251 = arith.maximumf %249, %250 : vector<18x16xf32>
    %cst_160 = arith.constant 0.000000e+00 : f32
    %252 = vector.broadcast %cst_160 : f32 to vector<3x16xf32>
    %253 = tpu.concatenate %252, %251, %252 in 0 : vector<3x16xf32>, vector<18x16xf32>, vector<3x16xf32> -> vector<24x16xf32>
    %254 = vector.extract_strided_slice %253 {offsets = [4, 0], sizes = [18, 16], strides = [1, 1]} : vector<24x16xf32> to vector<18x16xf32>
    %c0_161 = arith.constant 0 : index
    %c0_162 = arith.constant 0 : index
    %c0_163 = arith.constant 0 : index
    %255 = vector.load %arg23[%c0_161, %c0_162, %c0_163] : memref<3x16x16xf32, #tpu.memory_space<vmem>>, vector<1x16x16xf32>
    %256 = vector.shape_cast %255 : vector<1x16x16xf32> to vector<16x16xf32>
    %cst_164 = arith.constant dense<0.000000e+00> : vector<18x16xf32>
    %257 = tpu.matmul %254, %256, %cst_164 {dimension_numbers = #tpu.dot_dimension_numbers<[1], [0], [0], [1], [0, 0, 1, 1], [], []>} : vector<18x16xf32>, vector<16x16xf32>, vector<18x16xf32> -> vector<18x16xf32>
    %258 = vector.extract_strided_slice %253 {offsets = [3, 0], sizes = [18, 16], strides = [1, 1]} : vector<24x16xf32> to vector<18x16xf32>
    %c1_165 = arith.constant 1 : index
    %c0_166 = arith.constant 0 : index
    %c0_167 = arith.constant 0 : index
    %259 = vector.load %arg23[%c1_165, %c0_166, %c0_167] : memref<3x16x16xf32, #tpu.memory_space<vmem>>, vector<1x16x16xf32>
    %260 = vector.shape_cast %259 : vector<1x16x16xf32> to vector<16x16xf32>
    %cst_168 = arith.constant dense<0.000000e+00> : vector<18x16xf32>
    %261 = tpu.matmul %258, %260, %cst_168 {dimension_numbers = #tpu.dot_dimension_numbers<[1], [0], [0], [1], [0, 0, 1, 1], [], []>} : vector<18x16xf32>, vector<16x16xf32>, vector<18x16xf32> -> vector<18x16xf32>
    %262 = arith.addf %257, %261 : vector<18x16xf32>
    %263 = vector.extract_strided_slice %253 {offsets = [2, 0], sizes = [18, 16], strides = [1, 1]} : vector<24x16xf32> to vector<18x16xf32>
    %c2_169 = arith.constant 2 : index
    %c0_170 = arith.constant 0 : index
    %c0_171 = arith.constant 0 : index
    %264 = vector.load %arg23[%c2_169, %c0_170, %c0_171] : memref<3x16x16xf32, #tpu.memory_space<vmem>>, vector<1x16x16xf32>
    %265 = vector.shape_cast %264 : vector<1x16x16xf32> to vector<16x16xf32>
    %cst_172 = arith.constant dense<0.000000e+00> : vector<18x16xf32>
    %266 = tpu.matmul %263, %265, %cst_172 {dimension_numbers = #tpu.dot_dimension_numbers<[1], [0], [0], [1], [0, 0, 1, 1], [], []>} : vector<18x16xf32>, vector<16x16xf32>, vector<18x16xf32> -> vector<18x16xf32>
    %267 = arith.addf %262, %266 : vector<18x16xf32>
    %c0_173 = arith.constant 0 : index
    %c0_174 = arith.constant 0 : index
    %268 = vector.load %arg22[%c0_173, %c0_174] : memref<2x16xf32, #tpu.memory_space<vmem>>, vector<2x16xf32>
    %269 = vector.extract_strided_slice %268 {offsets = [0, 0], sizes = [1, 16], strides = [1, 1]} : vector<2x16xf32> to vector<1x16xf32>
    %270 = vector.broadcast %269 : vector<1x16xf32> to vector<18x16xf32>
    %271 = arith.mulf %267, %270 : vector<18x16xf32>
    %272 = vector.extract_strided_slice %268 {offsets = [1, 0], sizes = [1, 16], strides = [1, 1]} : vector<2x16xf32> to vector<1x16xf32>
    %273 = vector.broadcast %272 : vector<1x16xf32> to vector<18x16xf32>
    %274 = arith.addf %271, %273 : vector<18x16xf32>
    %cst_175 = arith.constant 0.000000e+00 : f32
    %275 = vector.broadcast %cst_175 : f32 to vector<18x16xf32>
    %276 = arith.maximumf %274, %275 : vector<18x16xf32>
    %277 = vector.extract_strided_slice %253 {offsets = [5, 0], sizes = [18, 16], strides = [1, 1]} : vector<24x16xf32> to vector<18x16xf32>
    %c0_176 = arith.constant 0 : index
    %c0_177 = arith.constant 0 : index
    %c0_178 = arith.constant 0 : index
    %278 = vector.load %arg25[%c0_176, %c0_177, %c0_178] : memref<5x16x16xf32, #tpu.memory_space<vmem>>, vector<1x16x16xf32>
    %279 = vector.shape_cast %278 : vector<1x16x16xf32> to vector<16x16xf32>
    %cst_179 = arith.constant dense<0.000000e+00> : vector<18x16xf32>
    %280 = tpu.matmul %277, %279, %cst_179 {dimension_numbers = #tpu.dot_dimension_numbers<[1], [0], [0], [1], [0, 0, 1, 1], [], []>} : vector<18x16xf32>, vector<16x16xf32>, vector<18x16xf32> -> vector<18x16xf32>
    %281 = vector.extract_strided_slice %253 {offsets = [4, 0], sizes = [18, 16], strides = [1, 1]} : vector<24x16xf32> to vector<18x16xf32>
    %c1_180 = arith.constant 1 : index
    %c0_181 = arith.constant 0 : index
    %c0_182 = arith.constant 0 : index
    %282 = vector.load %arg25[%c1_180, %c0_181, %c0_182] : memref<5x16x16xf32, #tpu.memory_space<vmem>>, vector<1x16x16xf32>
    %283 = vector.shape_cast %282 : vector<1x16x16xf32> to vector<16x16xf32>
    %cst_183 = arith.constant dense<0.000000e+00> : vector<18x16xf32>
    %284 = tpu.matmul %281, %283, %cst_183 {dimension_numbers = #tpu.dot_dimension_numbers<[1], [0], [0], [1], [0, 0, 1, 1], [], []>} : vector<18x16xf32>, vector<16x16xf32>, vector<18x16xf32> -> vector<18x16xf32>
    %285 = arith.addf %280, %284 : vector<18x16xf32>
    %286 = vector.extract_strided_slice %253 {offsets = [3, 0], sizes = [18, 16], strides = [1, 1]} : vector<24x16xf32> to vector<18x16xf32>
    %c2_184 = arith.constant 2 : index
    %c0_185 = arith.constant 0 : index
    %c0_186 = arith.constant 0 : index
    %287 = vector.load %arg25[%c2_184, %c0_185, %c0_186] : memref<5x16x16xf32, #tpu.memory_space<vmem>>, vector<1x16x16xf32>
    %288 = vector.shape_cast %287 : vector<1x16x16xf32> to vector<16x16xf32>
    %cst_187 = arith.constant dense<0.000000e+00> : vector<18x16xf32>
    %289 = tpu.matmul %286, %288, %cst_187 {dimension_numbers = #tpu.dot_dimension_numbers<[1], [0], [0], [1], [0, 0, 1, 1], [], []>} : vector<18x16xf32>, vector<16x16xf32>, vector<18x16xf32> -> vector<18x16xf32>
    %290 = arith.addf %285, %289 : vector<18x16xf32>
    %291 = vector.extract_strided_slice %253 {offsets = [2, 0], sizes = [18, 16], strides = [1, 1]} : vector<24x16xf32> to vector<18x16xf32>
    %c3_188 = arith.constant 3 : index
    %c0_189 = arith.constant 0 : index
    %c0_190 = arith.constant 0 : index
    %292 = vector.load %arg25[%c3_188, %c0_189, %c0_190] : memref<5x16x16xf32, #tpu.memory_space<vmem>>, vector<1x16x16xf32>
    %293 = vector.shape_cast %292 : vector<1x16x16xf32> to vector<16x16xf32>
    %cst_191 = arith.constant dense<0.000000e+00> : vector<18x16xf32>
    %294 = tpu.matmul %291, %293, %cst_191 {dimension_numbers = #tpu.dot_dimension_numbers<[1], [0], [0], [1], [0, 0, 1, 1], [], []>} : vector<18x16xf32>, vector<16x16xf32>, vector<18x16xf32> -> vector<18x16xf32>
    %295 = arith.addf %290, %294 : vector<18x16xf32>
    %296 = vector.extract_strided_slice %253 {offsets = [1, 0], sizes = [18, 16], strides = [1, 1]} : vector<24x16xf32> to vector<18x16xf32>
    %c4_192 = arith.constant 4 : index
    %c0_193 = arith.constant 0 : index
    %c0_194 = arith.constant 0 : index
    %297 = vector.load %arg25[%c4_192, %c0_193, %c0_194] : memref<5x16x16xf32, #tpu.memory_space<vmem>>, vector<1x16x16xf32>
    %298 = vector.shape_cast %297 : vector<1x16x16xf32> to vector<16x16xf32>
    %cst_195 = arith.constant dense<0.000000e+00> : vector<18x16xf32>
    %299 = tpu.matmul %296, %298, %cst_195 {dimension_numbers = #tpu.dot_dimension_numbers<[1], [0], [0], [1], [0, 0, 1, 1], [], []>} : vector<18x16xf32>, vector<16x16xf32>, vector<18x16xf32> -> vector<18x16xf32>
    %300 = arith.addf %295, %299 : vector<18x16xf32>
    %c0_196 = arith.constant 0 : index
    %c0_197 = arith.constant 0 : index
    %301 = vector.load %arg24[%c0_196, %c0_197] : memref<2x16xf32, #tpu.memory_space<vmem>>, vector<2x16xf32>
    %302 = vector.extract_strided_slice %301 {offsets = [0, 0], sizes = [1, 16], strides = [1, 1]} : vector<2x16xf32> to vector<1x16xf32>
    %303 = vector.broadcast %302 : vector<1x16xf32> to vector<18x16xf32>
    %304 = arith.mulf %300, %303 : vector<18x16xf32>
    %305 = vector.extract_strided_slice %301 {offsets = [1, 0], sizes = [1, 16], strides = [1, 1]} : vector<2x16xf32> to vector<1x16xf32>
    %306 = vector.broadcast %305 : vector<1x16xf32> to vector<18x16xf32>
    %307 = arith.addf %304, %306 : vector<18x16xf32>
    %cst_198 = arith.constant 0.000000e+00 : f32
    %308 = vector.broadcast %cst_198 : f32 to vector<18x16xf32>
    %309 = arith.maximumf %307, %308 : vector<18x16xf32>
    %310 = vector.extract_strided_slice %253 {offsets = [6, 0], sizes = [18, 16], strides = [1, 1]} : vector<24x16xf32> to vector<18x16xf32>
    %c0_199 = arith.constant 0 : index
    %c0_200 = arith.constant 0 : index
    %c0_201 = arith.constant 0 : index
    %311 = vector.load %arg27[%c0_199, %c0_200, %c0_201] : memref<7x16x16xf32, #tpu.memory_space<vmem>>, vector<1x16x16xf32>
    %312 = vector.shape_cast %311 : vector<1x16x16xf32> to vector<16x16xf32>
    %cst_202 = arith.constant dense<0.000000e+00> : vector<18x16xf32>
    %313 = tpu.matmul %310, %312, %cst_202 {dimension_numbers = #tpu.dot_dimension_numbers<[1], [0], [0], [1], [0, 0, 1, 1], [], []>} : vector<18x16xf32>, vector<16x16xf32>, vector<18x16xf32> -> vector<18x16xf32>
    %314 = vector.extract_strided_slice %253 {offsets = [5, 0], sizes = [18, 16], strides = [1, 1]} : vector<24x16xf32> to vector<18x16xf32>
    %c1_203 = arith.constant 1 : index
    %c0_204 = arith.constant 0 : index
    %c0_205 = arith.constant 0 : index
    %315 = vector.load %arg27[%c1_203, %c0_204, %c0_205] : memref<7x16x16xf32, #tpu.memory_space<vmem>>, vector<1x16x16xf32>
    %316 = vector.shape_cast %315 : vector<1x16x16xf32> to vector<16x16xf32>
    %cst_206 = arith.constant dense<0.000000e+00> : vector<18x16xf32>
    %317 = tpu.matmul %314, %316, %cst_206 {dimension_numbers = #tpu.dot_dimension_numbers<[1], [0], [0], [1], [0, 0, 1, 1], [], []>} : vector<18x16xf32>, vector<16x16xf32>, vector<18x16xf32> -> vector<18x16xf32>
    %318 = arith.addf %313, %317 : vector<18x16xf32>
    %319 = vector.extract_strided_slice %253 {offsets = [4, 0], sizes = [18, 16], strides = [1, 1]} : vector<24x16xf32> to vector<18x16xf32>
    %c2_207 = arith.constant 2 : index
    %c0_208 = arith.constant 0 : index
    %c0_209 = arith.constant 0 : index
    %320 = vector.load %arg27[%c2_207, %c0_208, %c0_209] : memref<7x16x16xf32, #tpu.memory_space<vmem>>, vector<1x16x16xf32>
    %321 = vector.shape_cast %320 : vector<1x16x16xf32> to vector<16x16xf32>
    %cst_210 = arith.constant dense<0.000000e+00> : vector<18x16xf32>
    %322 = tpu.matmul %319, %321, %cst_210 {dimension_numbers = #tpu.dot_dimension_numbers<[1], [0], [0], [1], [0, 0, 1, 1], [], []>} : vector<18x16xf32>, vector<16x16xf32>, vector<18x16xf32> -> vector<18x16xf32>
    %323 = arith.addf %318, %322 : vector<18x16xf32>
    %324 = vector.extract_strided_slice %253 {offsets = [3, 0], sizes = [18, 16], strides = [1, 1]} : vector<24x16xf32> to vector<18x16xf32>
    %c3_211 = arith.constant 3 : index
    %c0_212 = arith.constant 0 : index
    %c0_213 = arith.constant 0 : index
    %325 = vector.load %arg27[%c3_211, %c0_212, %c0_213] : memref<7x16x16xf32, #tpu.memory_space<vmem>>, vector<1x16x16xf32>
    %326 = vector.shape_cast %325 : vector<1x16x16xf32> to vector<16x16xf32>
    %cst_214 = arith.constant dense<0.000000e+00> : vector<18x16xf32>
    %327 = tpu.matmul %324, %326, %cst_214 {dimension_numbers = #tpu.dot_dimension_numbers<[1], [0], [0], [1], [0, 0, 1, 1], [], []>} : vector<18x16xf32>, vector<16x16xf32>, vector<18x16xf32> -> vector<18x16xf32>
    %328 = arith.addf %323, %327 : vector<18x16xf32>
    %329 = vector.extract_strided_slice %253 {offsets = [2, 0], sizes = [18, 16], strides = [1, 1]} : vector<24x16xf32> to vector<18x16xf32>
    %c4_215 = arith.constant 4 : index
    %c0_216 = arith.constant 0 : index
    %c0_217 = arith.constant 0 : index
    %330 = vector.load %arg27[%c4_215, %c0_216, %c0_217] : memref<7x16x16xf32, #tpu.memory_space<vmem>>, vector<1x16x16xf32>
    %331 = vector.shape_cast %330 : vector<1x16x16xf32> to vector<16x16xf32>
    %cst_218 = arith.constant dense<0.000000e+00> : vector<18x16xf32>
    %332 = tpu.matmul %329, %331, %cst_218 {dimension_numbers = #tpu.dot_dimension_numbers<[1], [0], [0], [1], [0, 0, 1, 1], [], []>} : vector<18x16xf32>, vector<16x16xf32>, vector<18x16xf32> -> vector<18x16xf32>
    %333 = arith.addf %328, %332 : vector<18x16xf32>
    %334 = vector.extract_strided_slice %253 {offsets = [1, 0], sizes = [18, 16], strides = [1, 1]} : vector<24x16xf32> to vector<18x16xf32>
    %c5_219 = arith.constant 5 : index
    %c0_220 = arith.constant 0 : index
    %c0_221 = arith.constant 0 : index
    %335 = vector.load %arg27[%c5_219, %c0_220, %c0_221] : memref<7x16x16xf32, #tpu.memory_space<vmem>>, vector<1x16x16xf32>
    %336 = vector.shape_cast %335 : vector<1x16x16xf32> to vector<16x16xf32>
    %cst_222 = arith.constant dense<0.000000e+00> : vector<18x16xf32>
    %337 = tpu.matmul %334, %336, %cst_222 {dimension_numbers = #tpu.dot_dimension_numbers<[1], [0], [0], [1], [0, 0, 1, 1], [], []>} : vector<18x16xf32>, vector<16x16xf32>, vector<18x16xf32> -> vector<18x16xf32>
    %338 = arith.addf %333, %337 : vector<18x16xf32>
    %339 = vector.extract_strided_slice %253 {offsets = [0, 0], sizes = [18, 16], strides = [1, 1]} : vector<24x16xf32> to vector<18x16xf32>
    %c6_223 = arith.constant 6 : index
    %c0_224 = arith.constant 0 : index
    %c0_225 = arith.constant 0 : index
    %340 = vector.load %arg27[%c6_223, %c0_224, %c0_225] : memref<7x16x16xf32, #tpu.memory_space<vmem>>, vector<1x16x16xf32>
    %341 = vector.shape_cast %340 : vector<1x16x16xf32> to vector<16x16xf32>
    %cst_226 = arith.constant dense<0.000000e+00> : vector<18x16xf32>
    %342 = tpu.matmul %339, %341, %cst_226 {dimension_numbers = #tpu.dot_dimension_numbers<[1], [0], [0], [1], [0, 0, 1, 1], [], []>} : vector<18x16xf32>, vector<16x16xf32>, vector<18x16xf32> -> vector<18x16xf32>
    %343 = arith.addf %338, %342 : vector<18x16xf32>
    %c0_227 = arith.constant 0 : index
    %c0_228 = arith.constant 0 : index
    %344 = vector.load %arg26[%c0_227, %c0_228] : memref<2x16xf32, #tpu.memory_space<vmem>>, vector<2x16xf32>
    %345 = vector.extract_strided_slice %344 {offsets = [0, 0], sizes = [1, 16], strides = [1, 1]} : vector<2x16xf32> to vector<1x16xf32>
    %346 = vector.broadcast %345 : vector<1x16xf32> to vector<18x16xf32>
    %347 = arith.mulf %343, %346 : vector<18x16xf32>
    %348 = vector.extract_strided_slice %344 {offsets = [1, 0], sizes = [1, 16], strides = [1, 1]} : vector<2x16xf32> to vector<1x16xf32>
    %349 = vector.broadcast %348 : vector<1x16xf32> to vector<18x16xf32>
    %350 = arith.addf %347, %349 : vector<18x16xf32>
    %cst_229 = arith.constant 0.000000e+00 : f32
    %351 = vector.broadcast %cst_229 : f32 to vector<18x16xf32>
    %352 = arith.maximumf %350, %351 : vector<18x16xf32>
    %353 = tpu.concatenate %251, %276, %309, %352 in 1 : vector<18x16xf32>, vector<18x16xf32>, vector<18x16xf32>, vector<18x16xf32> -> vector<18x64xf32>
    %354 = vector.extract_strided_slice %353 {offsets = [0, 0], sizes = [1, 64], strides = [1, 1]} : vector<18x64xf32> to vector<1x64xf32>
    %355 = vector.extract_strided_slice %353 {offsets = [1, 0], sizes = [1, 64], strides = [1, 1]} : vector<18x64xf32> to vector<1x64xf32>
    %356 = arith.maximumf %354, %355 : vector<1x64xf32>
    %357 = vector.extract_strided_slice %353 {offsets = [2, 0], sizes = [1, 64], strides = [1, 1]} : vector<18x64xf32> to vector<1x64xf32>
    %358 = arith.maximumf %356, %357 : vector<1x64xf32>
    %359 = vector.extract_strided_slice %353 {offsets = [2, 0], sizes = [1, 64], strides = [1, 1]} : vector<18x64xf32> to vector<1x64xf32>
    %360 = vector.extract_strided_slice %353 {offsets = [3, 0], sizes = [1, 64], strides = [1, 1]} : vector<18x64xf32> to vector<1x64xf32>
    %361 = arith.maximumf %359, %360 : vector<1x64xf32>
    %362 = vector.extract_strided_slice %353 {offsets = [4, 0], sizes = [1, 64], strides = [1, 1]} : vector<18x64xf32> to vector<1x64xf32>
    %363 = arith.maximumf %361, %362 : vector<1x64xf32>
    %364 = vector.extract_strided_slice %353 {offsets = [4, 0], sizes = [1, 64], strides = [1, 1]} : vector<18x64xf32> to vector<1x64xf32>
    %365 = vector.extract_strided_slice %353 {offsets = [5, 0], sizes = [1, 64], strides = [1, 1]} : vector<18x64xf32> to vector<1x64xf32>
    %366 = arith.maximumf %364, %365 : vector<1x64xf32>
    %367 = vector.extract_strided_slice %353 {offsets = [6, 0], sizes = [1, 64], strides = [1, 1]} : vector<18x64xf32> to vector<1x64xf32>
    %368 = arith.maximumf %366, %367 : vector<1x64xf32>
    %369 = vector.extract_strided_slice %353 {offsets = [6, 0], sizes = [1, 64], strides = [1, 1]} : vector<18x64xf32> to vector<1x64xf32>
    %370 = vector.extract_strided_slice %353 {offsets = [7, 0], sizes = [1, 64], strides = [1, 1]} : vector<18x64xf32> to vector<1x64xf32>
    %371 = arith.maximumf %369, %370 : vector<1x64xf32>
    %372 = vector.extract_strided_slice %353 {offsets = [8, 0], sizes = [1, 64], strides = [1, 1]} : vector<18x64xf32> to vector<1x64xf32>
    %373 = arith.maximumf %371, %372 : vector<1x64xf32>
    %374 = vector.extract_strided_slice %353 {offsets = [9, 0], sizes = [1, 64], strides = [1, 1]} : vector<18x64xf32> to vector<1x64xf32>
    %375 = vector.extract_strided_slice %353 {offsets = [10, 0], sizes = [1, 64], strides = [1, 1]} : vector<18x64xf32> to vector<1x64xf32>
    %376 = arith.maximumf %374, %375 : vector<1x64xf32>
    %377 = vector.extract_strided_slice %353 {offsets = [11, 0], sizes = [1, 64], strides = [1, 1]} : vector<18x64xf32> to vector<1x64xf32>
    %378 = arith.maximumf %376, %377 : vector<1x64xf32>
    %379 = vector.extract_strided_slice %353 {offsets = [11, 0], sizes = [1, 64], strides = [1, 1]} : vector<18x64xf32> to vector<1x64xf32>
    %380 = vector.extract_strided_slice %353 {offsets = [12, 0], sizes = [1, 64], strides = [1, 1]} : vector<18x64xf32> to vector<1x64xf32>
    %381 = arith.maximumf %379, %380 : vector<1x64xf32>
    %382 = vector.extract_strided_slice %353 {offsets = [13, 0], sizes = [1, 64], strides = [1, 1]} : vector<18x64xf32> to vector<1x64xf32>
    %383 = arith.maximumf %381, %382 : vector<1x64xf32>
    %384 = vector.extract_strided_slice %353 {offsets = [13, 0], sizes = [1, 64], strides = [1, 1]} : vector<18x64xf32> to vector<1x64xf32>
    %385 = vector.extract_strided_slice %353 {offsets = [14, 0], sizes = [1, 64], strides = [1, 1]} : vector<18x64xf32> to vector<1x64xf32>
    %386 = arith.maximumf %384, %385 : vector<1x64xf32>
    %387 = vector.extract_strided_slice %353 {offsets = [15, 0], sizes = [1, 64], strides = [1, 1]} : vector<18x64xf32> to vector<1x64xf32>
    %388 = arith.maximumf %386, %387 : vector<1x64xf32>
    %389 = vector.extract_strided_slice %353 {offsets = [15, 0], sizes = [1, 64], strides = [1, 1]} : vector<18x64xf32> to vector<1x64xf32>
    %390 = vector.extract_strided_slice %353 {offsets = [16, 0], sizes = [1, 64], strides = [1, 1]} : vector<18x64xf32> to vector<1x64xf32>
    %391 = arith.maximumf %389, %390 : vector<1x64xf32>
    %392 = vector.extract_strided_slice %353 {offsets = [17, 0], sizes = [1, 64], strides = [1, 1]} : vector<18x64xf32> to vector<1x64xf32>
    %393 = arith.maximumf %391, %392 : vector<1x64xf32>
    %394 = tpu.concatenate %358, %363, %368, %373, %378, %383, %388, %393 in 0 : vector<1x64xf32>, vector<1x64xf32>, vector<1x64xf32>, vector<1x64xf32>, vector<1x64xf32>, vector<1x64xf32>, vector<1x64xf32>, vector<1x64xf32> -> vector<8x64xf32>
    %c0_230 = arith.constant 0 : index
    %c0_231 = arith.constant 0 : index
    %395 = vector.load %arg29[%c0_230, %c0_231] : memref<64x32xf32, #tpu.memory_space<vmem>>, vector<64x32xf32>
    %cst_232 = arith.constant dense<0.000000e+00> : vector<8x32xf32>
    %396 = tpu.matmul %394, %395, %cst_232 {dimension_numbers = #tpu.dot_dimension_numbers<[1], [0], [0], [1], [0, 0, 1, 1], [], []>} : vector<8x64xf32>, vector<64x32xf32>, vector<8x32xf32> -> vector<8x32xf32>
    %c0_233 = arith.constant 0 : index
    %c0_234 = arith.constant 0 : index
    %397 = vector.load %arg28[%c0_233, %c0_234] : memref<2x32xf32, #tpu.memory_space<vmem>>, vector<2x32xf32>
    %398 = vector.extract_strided_slice %397 {offsets = [0, 0], sizes = [1, 32], strides = [1, 1]} : vector<2x32xf32> to vector<1x32xf32>
    %399 = vector.broadcast %398 : vector<1x32xf32> to vector<8x32xf32>
    %400 = arith.mulf %396, %399 : vector<8x32xf32>
    %401 = vector.extract_strided_slice %397 {offsets = [1, 0], sizes = [1, 32], strides = [1, 1]} : vector<2x32xf32> to vector<1x32xf32>
    %402 = vector.broadcast %401 : vector<1x32xf32> to vector<8x32xf32>
    %403 = arith.addf %400, %402 : vector<8x32xf32>
    %cst_235 = arith.constant 0.000000e+00 : f32
    %404 = vector.broadcast %cst_235 : f32 to vector<8x32xf32>
    %405 = arith.maximumf %403, %404 : vector<8x32xf32>
    %cst_236 = arith.constant 0.000000e+00 : f32
    %406 = vector.broadcast %cst_236 : f32 to vector<3x32xf32>
    %407 = tpu.concatenate %406, %405, %406 in 0 : vector<3x32xf32>, vector<8x32xf32>, vector<3x32xf32> -> vector<14x32xf32>
    %408 = vector.extract_strided_slice %407 {offsets = [4, 0], sizes = [8, 32], strides = [1, 1]} : vector<14x32xf32> to vector<8x32xf32>
    %c0_237 = arith.constant 0 : index
    %c0_238 = arith.constant 0 : index
    %c0_239 = arith.constant 0 : index
    %409 = vector.load %arg31[%c0_237, %c0_238, %c0_239] : memref<3x32x32xf32, #tpu.memory_space<vmem>>, vector<1x32x32xf32>
    %410 = vector.shape_cast %409 : vector<1x32x32xf32> to vector<32x32xf32>
    %cst_240 = arith.constant dense<0.000000e+00> : vector<8x32xf32>
    %411 = tpu.matmul %408, %410, %cst_240 {dimension_numbers = #tpu.dot_dimension_numbers<[1], [0], [0], [1], [0, 0, 1, 1], [], []>} : vector<8x32xf32>, vector<32x32xf32>, vector<8x32xf32> -> vector<8x32xf32>
    %412 = vector.extract_strided_slice %407 {offsets = [3, 0], sizes = [8, 32], strides = [1, 1]} : vector<14x32xf32> to vector<8x32xf32>
    %c1_241 = arith.constant 1 : index
    %c0_242 = arith.constant 0 : index
    %c0_243 = arith.constant 0 : index
    %413 = vector.load %arg31[%c1_241, %c0_242, %c0_243] : memref<3x32x32xf32, #tpu.memory_space<vmem>>, vector<1x32x32xf32>
    %414 = vector.shape_cast %413 : vector<1x32x32xf32> to vector<32x32xf32>
    %cst_244 = arith.constant dense<0.000000e+00> : vector<8x32xf32>
    %415 = tpu.matmul %412, %414, %cst_244 {dimension_numbers = #tpu.dot_dimension_numbers<[1], [0], [0], [1], [0, 0, 1, 1], [], []>} : vector<8x32xf32>, vector<32x32xf32>, vector<8x32xf32> -> vector<8x32xf32>
    %416 = arith.addf %411, %415 : vector<8x32xf32>
    %417 = vector.extract_strided_slice %407 {offsets = [2, 0], sizes = [8, 32], strides = [1, 1]} : vector<14x32xf32> to vector<8x32xf32>
    %c2_245 = arith.constant 2 : index
    %c0_246 = arith.constant 0 : index
    %c0_247 = arith.constant 0 : index
    %418 = vector.load %arg31[%c2_245, %c0_246, %c0_247] : memref<3x32x32xf32, #tpu.memory_space<vmem>>, vector<1x32x32xf32>
    %419 = vector.shape_cast %418 : vector<1x32x32xf32> to vector<32x32xf32>
    %cst_248 = arith.constant dense<0.000000e+00> : vector<8x32xf32>
    %420 = tpu.matmul %417, %419, %cst_248 {dimension_numbers = #tpu.dot_dimension_numbers<[1], [0], [0], [1], [0, 0, 1, 1], [], []>} : vector<8x32xf32>, vector<32x32xf32>, vector<8x32xf32> -> vector<8x32xf32>
    %421 = arith.addf %416, %420 : vector<8x32xf32>
    %c0_249 = arith.constant 0 : index
    %c0_250 = arith.constant 0 : index
    %422 = vector.load %arg30[%c0_249, %c0_250] : memref<2x32xf32, #tpu.memory_space<vmem>>, vector<2x32xf32>
    %423 = vector.extract_strided_slice %422 {offsets = [0, 0], sizes = [1, 32], strides = [1, 1]} : vector<2x32xf32> to vector<1x32xf32>
    %424 = vector.broadcast %423 : vector<1x32xf32> to vector<8x32xf32>
    %425 = arith.mulf %421, %424 : vector<8x32xf32>
    %426 = vector.extract_strided_slice %422 {offsets = [1, 0], sizes = [1, 32], strides = [1, 1]} : vector<2x32xf32> to vector<1x32xf32>
    %427 = vector.broadcast %426 : vector<1x32xf32> to vector<8x32xf32>
    %428 = arith.addf %425, %427 : vector<8x32xf32>
    %cst_251 = arith.constant 0.000000e+00 : f32
    %429 = vector.broadcast %cst_251 : f32 to vector<8x32xf32>
    %430 = arith.maximumf %428, %429 : vector<8x32xf32>
    %431 = vector.extract_strided_slice %407 {offsets = [5, 0], sizes = [8, 32], strides = [1, 1]} : vector<14x32xf32> to vector<8x32xf32>
    %c0_252 = arith.constant 0 : index
    %c0_253 = arith.constant 0 : index
    %c0_254 = arith.constant 0 : index
    %432 = vector.load %arg33[%c0_252, %c0_253, %c0_254] : memref<5x32x32xf32, #tpu.memory_space<vmem>>, vector<1x32x32xf32>
    %433 = vector.shape_cast %432 : vector<1x32x32xf32> to vector<32x32xf32>
    %cst_255 = arith.constant dense<0.000000e+00> : vector<8x32xf32>
    %434 = tpu.matmul %431, %433, %cst_255 {dimension_numbers = #tpu.dot_dimension_numbers<[1], [0], [0], [1], [0, 0, 1, 1], [], []>} : vector<8x32xf32>, vector<32x32xf32>, vector<8x32xf32> -> vector<8x32xf32>
    %435 = vector.extract_strided_slice %407 {offsets = [4, 0], sizes = [8, 32], strides = [1, 1]} : vector<14x32xf32> to vector<8x32xf32>
    %c1_256 = arith.constant 1 : index
    %c0_257 = arith.constant 0 : index
    %c0_258 = arith.constant 0 : index
    %436 = vector.load %arg33[%c1_256, %c0_257, %c0_258] : memref<5x32x32xf32, #tpu.memory_space<vmem>>, vector<1x32x32xf32>
    %437 = vector.shape_cast %436 : vector<1x32x32xf32> to vector<32x32xf32>
    %cst_259 = arith.constant dense<0.000000e+00> : vector<8x32xf32>
    %438 = tpu.matmul %435, %437, %cst_259 {dimension_numbers = #tpu.dot_dimension_numbers<[1], [0], [0], [1], [0, 0, 1, 1], [], []>} : vector<8x32xf32>, vector<32x32xf32>, vector<8x32xf32> -> vector<8x32xf32>
    %439 = arith.addf %434, %438 : vector<8x32xf32>
    %440 = vector.extract_strided_slice %407 {offsets = [3, 0], sizes = [8, 32], strides = [1, 1]} : vector<14x32xf32> to vector<8x32xf32>
    %c2_260 = arith.constant 2 : index
    %c0_261 = arith.constant 0 : index
    %c0_262 = arith.constant 0 : index
    %441 = vector.load %arg33[%c2_260, %c0_261, %c0_262] : memref<5x32x32xf32, #tpu.memory_space<vmem>>, vector<1x32x32xf32>
    %442 = vector.shape_cast %441 : vector<1x32x32xf32> to vector<32x32xf32>
    %cst_263 = arith.constant dense<0.000000e+00> : vector<8x32xf32>
    %443 = tpu.matmul %440, %442, %cst_263 {dimension_numbers = #tpu.dot_dimension_numbers<[1], [0], [0], [1], [0, 0, 1, 1], [], []>} : vector<8x32xf32>, vector<32x32xf32>, vector<8x32xf32> -> vector<8x32xf32>
    %444 = arith.addf %439, %443 : vector<8x32xf32>
    %445 = vector.extract_strided_slice %407 {offsets = [2, 0], sizes = [8, 32], strides = [1, 1]} : vector<14x32xf32> to vector<8x32xf32>
    %c3_264 = arith.constant 3 : index
    %c0_265 = arith.constant 0 : index
    %c0_266 = arith.constant 0 : index
    %446 = vector.load %arg33[%c3_264, %c0_265, %c0_266] : memref<5x32x32xf32, #tpu.memory_space<vmem>>, vector<1x32x32xf32>
    %447 = vector.shape_cast %446 : vector<1x32x32xf32> to vector<32x32xf32>
    %cst_267 = arith.constant dense<0.000000e+00> : vector<8x32xf32>
    %448 = tpu.matmul %445, %447, %cst_267 {dimension_numbers = #tpu.dot_dimension_numbers<[1], [0], [0], [1], [0, 0, 1, 1], [], []>} : vector<8x32xf32>, vector<32x32xf32>, vector<8x32xf32> -> vector<8x32xf32>
    %449 = arith.addf %444, %448 : vector<8x32xf32>
    %450 = vector.extract_strided_slice %407 {offsets = [1, 0], sizes = [8, 32], strides = [1, 1]} : vector<14x32xf32> to vector<8x32xf32>
    %c4_268 = arith.constant 4 : index
    %c0_269 = arith.constant 0 : index
    %c0_270 = arith.constant 0 : index
    %451 = vector.load %arg33[%c4_268, %c0_269, %c0_270] : memref<5x32x32xf32, #tpu.memory_space<vmem>>, vector<1x32x32xf32>
    %452 = vector.shape_cast %451 : vector<1x32x32xf32> to vector<32x32xf32>
    %cst_271 = arith.constant dense<0.000000e+00> : vector<8x32xf32>
    %453 = tpu.matmul %450, %452, %cst_271 {dimension_numbers = #tpu.dot_dimension_numbers<[1], [0], [0], [1], [0, 0, 1, 1], [], []>} : vector<8x32xf32>, vector<32x32xf32>, vector<8x32xf32> -> vector<8x32xf32>
    %454 = arith.addf %449, %453 : vector<8x32xf32>
    %c0_272 = arith.constant 0 : index
    %c0_273 = arith.constant 0 : index
    %455 = vector.load %arg32[%c0_272, %c0_273] : memref<2x32xf32, #tpu.memory_space<vmem>>, vector<2x32xf32>
    %456 = vector.extract_strided_slice %455 {offsets = [0, 0], sizes = [1, 32], strides = [1, 1]} : vector<2x32xf32> to vector<1x32xf32>
    %457 = vector.broadcast %456 : vector<1x32xf32> to vector<8x32xf32>
    %458 = arith.mulf %454, %457 : vector<8x32xf32>
    %459 = vector.extract_strided_slice %455 {offsets = [1, 0], sizes = [1, 32], strides = [1, 1]} : vector<2x32xf32> to vector<1x32xf32>
    %460 = vector.broadcast %459 : vector<1x32xf32> to vector<8x32xf32>
    %461 = arith.addf %458, %460 : vector<8x32xf32>
    %cst_274 = arith.constant 0.000000e+00 : f32
    %462 = vector.broadcast %cst_274 : f32 to vector<8x32xf32>
    %463 = arith.maximumf %461, %462 : vector<8x32xf32>
    %464 = vector.extract_strided_slice %407 {offsets = [6, 0], sizes = [8, 32], strides = [1, 1]} : vector<14x32xf32> to vector<8x32xf32>
    %c0_275 = arith.constant 0 : index
    %c0_276 = arith.constant 0 : index
    %c0_277 = arith.constant 0 : index
    %465 = vector.load %arg35[%c0_275, %c0_276, %c0_277] : memref<7x32x32xf32, #tpu.memory_space<vmem>>, vector<1x32x32xf32>
    %466 = vector.shape_cast %465 : vector<1x32x32xf32> to vector<32x32xf32>
    %cst_278 = arith.constant dense<0.000000e+00> : vector<8x32xf32>
    %467 = tpu.matmul %464, %466, %cst_278 {dimension_numbers = #tpu.dot_dimension_numbers<[1], [0], [0], [1], [0, 0, 1, 1], [], []>} : vector<8x32xf32>, vector<32x32xf32>, vector<8x32xf32> -> vector<8x32xf32>
    %468 = vector.extract_strided_slice %407 {offsets = [5, 0], sizes = [8, 32], strides = [1, 1]} : vector<14x32xf32> to vector<8x32xf32>
    %c1_279 = arith.constant 1 : index
    %c0_280 = arith.constant 0 : index
    %c0_281 = arith.constant 0 : index
    %469 = vector.load %arg35[%c1_279, %c0_280, %c0_281] : memref<7x32x32xf32, #tpu.memory_space<vmem>>, vector<1x32x32xf32>
    %470 = vector.shape_cast %469 : vector<1x32x32xf32> to vector<32x32xf32>
    %cst_282 = arith.constant dense<0.000000e+00> : vector<8x32xf32>
    %471 = tpu.matmul %468, %470, %cst_282 {dimension_numbers = #tpu.dot_dimension_numbers<[1], [0], [0], [1], [0, 0, 1, 1], [], []>} : vector<8x32xf32>, vector<32x32xf32>, vector<8x32xf32> -> vector<8x32xf32>
    %472 = arith.addf %467, %471 : vector<8x32xf32>
    %473 = vector.extract_strided_slice %407 {offsets = [4, 0], sizes = [8, 32], strides = [1, 1]} : vector<14x32xf32> to vector<8x32xf32>
    %c2_283 = arith.constant 2 : index
    %c0_284 = arith.constant 0 : index
    %c0_285 = arith.constant 0 : index
    %474 = vector.load %arg35[%c2_283, %c0_284, %c0_285] : memref<7x32x32xf32, #tpu.memory_space<vmem>>, vector<1x32x32xf32>
    %475 = vector.shape_cast %474 : vector<1x32x32xf32> to vector<32x32xf32>
    %cst_286 = arith.constant dense<0.000000e+00> : vector<8x32xf32>
    %476 = tpu.matmul %473, %475, %cst_286 {dimension_numbers = #tpu.dot_dimension_numbers<[1], [0], [0], [1], [0, 0, 1, 1], [], []>} : vector<8x32xf32>, vector<32x32xf32>, vector<8x32xf32> -> vector<8x32xf32>
    %477 = arith.addf %472, %476 : vector<8x32xf32>
    %478 = vector.extract_strided_slice %407 {offsets = [3, 0], sizes = [8, 32], strides = [1, 1]} : vector<14x32xf32> to vector<8x32xf32>
    %c3_287 = arith.constant 3 : index
    %c0_288 = arith.constant 0 : index
    %c0_289 = arith.constant 0 : index
    %479 = vector.load %arg35[%c3_287, %c0_288, %c0_289] : memref<7x32x32xf32, #tpu.memory_space<vmem>>, vector<1x32x32xf32>
    %480 = vector.shape_cast %479 : vector<1x32x32xf32> to vector<32x32xf32>
    %cst_290 = arith.constant dense<0.000000e+00> : vector<8x32xf32>
    %481 = tpu.matmul %478, %480, %cst_290 {dimension_numbers = #tpu.dot_dimension_numbers<[1], [0], [0], [1], [0, 0, 1, 1], [], []>} : vector<8x32xf32>, vector<32x32xf32>, vector<8x32xf32> -> vector<8x32xf32>
    %482 = arith.addf %477, %481 : vector<8x32xf32>
    %483 = vector.extract_strided_slice %407 {offsets = [2, 0], sizes = [8, 32], strides = [1, 1]} : vector<14x32xf32> to vector<8x32xf32>
    %c4_291 = arith.constant 4 : index
    %c0_292 = arith.constant 0 : index
    %c0_293 = arith.constant 0 : index
    %484 = vector.load %arg35[%c4_291, %c0_292, %c0_293] : memref<7x32x32xf32, #tpu.memory_space<vmem>>, vector<1x32x32xf32>
    %485 = vector.shape_cast %484 : vector<1x32x32xf32> to vector<32x32xf32>
    %cst_294 = arith.constant dense<0.000000e+00> : vector<8x32xf32>
    %486 = tpu.matmul %483, %485, %cst_294 {dimension_numbers = #tpu.dot_dimension_numbers<[1], [0], [0], [1], [0, 0, 1, 1], [], []>} : vector<8x32xf32>, vector<32x32xf32>, vector<8x32xf32> -> vector<8x32xf32>
    %487 = arith.addf %482, %486 : vector<8x32xf32>
    %488 = vector.extract_strided_slice %407 {offsets = [1, 0], sizes = [8, 32], strides = [1, 1]} : vector<14x32xf32> to vector<8x32xf32>
    %c5_295 = arith.constant 5 : index
    %c0_296 = arith.constant 0 : index
    %c0_297 = arith.constant 0 : index
    %489 = vector.load %arg35[%c5_295, %c0_296, %c0_297] : memref<7x32x32xf32, #tpu.memory_space<vmem>>, vector<1x32x32xf32>
    %490 = vector.shape_cast %489 : vector<1x32x32xf32> to vector<32x32xf32>
    %cst_298 = arith.constant dense<0.000000e+00> : vector<8x32xf32>
    %491 = tpu.matmul %488, %490, %cst_298 {dimension_numbers = #tpu.dot_dimension_numbers<[1], [0], [0], [1], [0, 0, 1, 1], [], []>} : vector<8x32xf32>, vector<32x32xf32>, vector<8x32xf32> -> vector<8x32xf32>
    %492 = arith.addf %487, %491 : vector<8x32xf32>
    %493 = vector.extract_strided_slice %407 {offsets = [0, 0], sizes = [8, 32], strides = [1, 1]} : vector<14x32xf32> to vector<8x32xf32>
    %c6_299 = arith.constant 6 : index
    %c0_300 = arith.constant 0 : index
    %c0_301 = arith.constant 0 : index
    %494 = vector.load %arg35[%c6_299, %c0_300, %c0_301] : memref<7x32x32xf32, #tpu.memory_space<vmem>>, vector<1x32x32xf32>
    %495 = vector.shape_cast %494 : vector<1x32x32xf32> to vector<32x32xf32>
    %cst_302 = arith.constant dense<0.000000e+00> : vector<8x32xf32>
    %496 = tpu.matmul %493, %495, %cst_302 {dimension_numbers = #tpu.dot_dimension_numbers<[1], [0], [0], [1], [0, 0, 1, 1], [], []>} : vector<8x32xf32>, vector<32x32xf32>, vector<8x32xf32> -> vector<8x32xf32>
    %497 = arith.addf %492, %496 : vector<8x32xf32>
    %c0_303 = arith.constant 0 : index
    %c0_304 = arith.constant 0 : index
    %498 = vector.load %arg34[%c0_303, %c0_304] : memref<2x32xf32, #tpu.memory_space<vmem>>, vector<2x32xf32>
    %499 = vector.extract_strided_slice %498 {offsets = [0, 0], sizes = [1, 32], strides = [1, 1]} : vector<2x32xf32> to vector<1x32xf32>
    %500 = vector.broadcast %499 : vector<1x32xf32> to vector<8x32xf32>
    %501 = arith.mulf %497, %500 : vector<8x32xf32>
    %502 = vector.extract_strided_slice %498 {offsets = [1, 0], sizes = [1, 32], strides = [1, 1]} : vector<2x32xf32> to vector<1x32xf32>
    %503 = vector.broadcast %502 : vector<1x32xf32> to vector<8x32xf32>
    %504 = arith.addf %501, %503 : vector<8x32xf32>
    %cst_305 = arith.constant 0.000000e+00 : f32
    %505 = vector.broadcast %cst_305 : f32 to vector<8x32xf32>
    %506 = arith.maximumf %504, %505 : vector<8x32xf32>
    %507 = tpu.concatenate %405, %430, %463, %506 in 1 : vector<8x32xf32>, vector<8x32xf32>, vector<8x32xf32>, vector<8x32xf32> -> vector<8x128xf32>
    %508 = vector.extract_strided_slice %507 {offsets = [0, 0], sizes = [1, 128], strides = [1, 1]} : vector<8x128xf32> to vector<1x128xf32>
    %509 = vector.extract_strided_slice %507 {offsets = [1, 0], sizes = [1, 128], strides = [1, 1]} : vector<8x128xf32> to vector<1x128xf32>
    %510 = arith.maximumf %508, %509 : vector<1x128xf32>
    %511 = vector.extract_strided_slice %507 {offsets = [2, 0], sizes = [1, 128], strides = [1, 1]} : vector<8x128xf32> to vector<1x128xf32>
    %512 = vector.extract_strided_slice %507 {offsets = [3, 0], sizes = [1, 128], strides = [1, 1]} : vector<8x128xf32> to vector<1x128xf32>
    %513 = arith.maximumf %511, %512 : vector<1x128xf32>
    %514 = vector.extract_strided_slice %507 {offsets = [4, 0], sizes = [1, 128], strides = [1, 1]} : vector<8x128xf32> to vector<1x128xf32>
    %515 = vector.extract_strided_slice %507 {offsets = [5, 0], sizes = [1, 128], strides = [1, 1]} : vector<8x128xf32> to vector<1x128xf32>
    %516 = arith.maximumf %514, %515 : vector<1x128xf32>
    %517 = vector.extract_strided_slice %507 {offsets = [6, 0], sizes = [1, 128], strides = [1, 1]} : vector<8x128xf32> to vector<1x128xf32>
    %518 = vector.extract_strided_slice %507 {offsets = [7, 0], sizes = [1, 128], strides = [1, 1]} : vector<8x128xf32> to vector<1x128xf32>
    %519 = arith.maximumf %517, %518 : vector<1x128xf32>
    %520 = tpu.concatenate %510, %513, %516, %519 in 0 : vector<1x128xf32>, vector<1x128xf32>, vector<1x128xf32>, vector<1x128xf32> -> vector<4x128xf32>
    %c0_306 = arith.constant 0 : index
    %c0_307 = arith.constant 0 : index
    %521 = vector.load %arg37[%c0_306, %c0_307] : memref<128x64xf32, #tpu.memory_space<vmem>>, vector<128x64xf32>
    %cst_308 = arith.constant dense<0.000000e+00> : vector<4x64xf32>
    %522 = tpu.matmul %520, %521, %cst_308 {dimension_numbers = #tpu.dot_dimension_numbers<[1], [0], [0], [1], [0, 0, 1, 1], [], []>} : vector<4x128xf32>, vector<128x64xf32>, vector<4x64xf32> -> vector<4x64xf32>
    %c0_309 = arith.constant 0 : index
    %c0_310 = arith.constant 0 : index
    %523 = vector.load %arg36[%c0_309, %c0_310] : memref<2x64xf32, #tpu.memory_space<vmem>>, vector<2x64xf32>
    %524 = vector.extract_strided_slice %523 {offsets = [0, 0], sizes = [1, 64], strides = [1, 1]} : vector<2x64xf32> to vector<1x64xf32>
    %525 = vector.broadcast %524 : vector<1x64xf32> to vector<4x64xf32>
    %526 = arith.mulf %522, %525 : vector<4x64xf32>
    %527 = vector.extract_strided_slice %523 {offsets = [1, 0], sizes = [1, 64], strides = [1, 1]} : vector<2x64xf32> to vector<1x64xf32>
    %528 = vector.broadcast %527 : vector<1x64xf32> to vector<4x64xf32>
    %529 = arith.addf %526, %528 : vector<4x64xf32>
    %cst_311 = arith.constant 0.000000e+00 : f32
    %530 = vector.broadcast %cst_311 : f32 to vector<4x64xf32>
    %531 = arith.maximumf %529, %530 : vector<4x64xf32>
    %cst_312 = arith.constant 0.000000e+00 : f32
    %532 = vector.broadcast %cst_312 : f32 to vector<3x64xf32>
    %533 = tpu.concatenate %532, %531, %532 in 0 : vector<3x64xf32>, vector<4x64xf32>, vector<3x64xf32> -> vector<10x64xf32>
    %534 = vector.extract_strided_slice %533 {offsets = [4, 0], sizes = [4, 64], strides = [1, 1]} : vector<10x64xf32> to vector<4x64xf32>
    %c0_313 = arith.constant 0 : index
    %c0_314 = arith.constant 0 : index
    %c0_315 = arith.constant 0 : index
    %535 = vector.load %arg39[%c0_313, %c0_314, %c0_315] : memref<3x64x64xf32, #tpu.memory_space<vmem>>, vector<1x64x64xf32>
    %536 = vector.shape_cast %535 : vector<1x64x64xf32> to vector<64x64xf32>
    %cst_316 = arith.constant dense<0.000000e+00> : vector<4x64xf32>
    %537 = tpu.matmul %534, %536, %cst_316 {dimension_numbers = #tpu.dot_dimension_numbers<[1], [0], [0], [1], [0, 0, 1, 1], [], []>} : vector<4x64xf32>, vector<64x64xf32>, vector<4x64xf32> -> vector<4x64xf32>
    %538 = vector.extract_strided_slice %533 {offsets = [3, 0], sizes = [4, 64], strides = [1, 1]} : vector<10x64xf32> to vector<4x64xf32>
    %c1_317 = arith.constant 1 : index
    %c0_318 = arith.constant 0 : index
    %c0_319 = arith.constant 0 : index
    %539 = vector.load %arg39[%c1_317, %c0_318, %c0_319] : memref<3x64x64xf32, #tpu.memory_space<vmem>>, vector<1x64x64xf32>
    %540 = vector.shape_cast %539 : vector<1x64x64xf32> to vector<64x64xf32>
    %cst_320 = arith.constant dense<0.000000e+00> : vector<4x64xf32>
    %541 = tpu.matmul %538, %540, %cst_320 {dimension_numbers = #tpu.dot_dimension_numbers<[1], [0], [0], [1], [0, 0, 1, 1], [], []>} : vector<4x64xf32>, vector<64x64xf32>, vector<4x64xf32> -> vector<4x64xf32>
    %542 = arith.addf %537, %541 : vector<4x64xf32>
    %543 = vector.extract_strided_slice %533 {offsets = [2, 0], sizes = [4, 64], strides = [1, 1]} : vector<10x64xf32> to vector<4x64xf32>
    %c2_321 = arith.constant 2 : index
    %c0_322 = arith.constant 0 : index
    %c0_323 = arith.constant 0 : index
    %544 = vector.load %arg39[%c2_321, %c0_322, %c0_323] : memref<3x64x64xf32, #tpu.memory_space<vmem>>, vector<1x64x64xf32>
    %545 = vector.shape_cast %544 : vector<1x64x64xf32> to vector<64x64xf32>
    %cst_324 = arith.constant dense<0.000000e+00> : vector<4x64xf32>
    %546 = tpu.matmul %543, %545, %cst_324 {dimension_numbers = #tpu.dot_dimension_numbers<[1], [0], [0], [1], [0, 0, 1, 1], [], []>} : vector<4x64xf32>, vector<64x64xf32>, vector<4x64xf32> -> vector<4x64xf32>
    %547 = arith.addf %542, %546 : vector<4x64xf32>
    %c0_325 = arith.constant 0 : index
    %c0_326 = arith.constant 0 : index
    %548 = vector.load %arg38[%c0_325, %c0_326] : memref<2x64xf32, #tpu.memory_space<vmem>>, vector<2x64xf32>
    %549 = vector.extract_strided_slice %548 {offsets = [0, 0], sizes = [1, 64], strides = [1, 1]} : vector<2x64xf32> to vector<1x64xf32>
    %550 = vector.broadcast %549 : vector<1x64xf32> to vector<4x64xf32>
    %551 = arith.mulf %547, %550 : vector<4x64xf32>
    %552 = vector.extract_strided_slice %548 {offsets = [1, 0], sizes = [1, 64], strides = [1, 1]} : vector<2x64xf32> to vector<1x64xf32>
    %553 = vector.broadcast %552 : vector<1x64xf32> to vector<4x64xf32>
    %554 = arith.addf %551, %553 : vector<4x64xf32>
    %cst_327 = arith.constant 0.000000e+00 : f32
    %555 = vector.broadcast %cst_327 : f32 to vector<4x64xf32>
    %556 = arith.maximumf %554, %555 : vector<4x64xf32>
    %557 = vector.extract_strided_slice %533 {offsets = [5, 0], sizes = [4, 64], strides = [1, 1]} : vector<10x64xf32> to vector<4x64xf32>
    %c0_328 = arith.constant 0 : index
    %c0_329 = arith.constant 0 : index
    %c0_330 = arith.constant 0 : index
    %558 = vector.load %arg41[%c0_328, %c0_329, %c0_330] : memref<5x64x64xf32, #tpu.memory_space<vmem>>, vector<1x64x64xf32>
    %559 = vector.shape_cast %558 : vector<1x64x64xf32> to vector<64x64xf32>
    %cst_331 = arith.constant dense<0.000000e+00> : vector<4x64xf32>
    %560 = tpu.matmul %557, %559, %cst_331 {dimension_numbers = #tpu.dot_dimension_numbers<[1], [0], [0], [1], [0, 0, 1, 1], [], []>} : vector<4x64xf32>, vector<64x64xf32>, vector<4x64xf32> -> vector<4x64xf32>
    %561 = vector.extract_strided_slice %533 {offsets = [4, 0], sizes = [4, 64], strides = [1, 1]} : vector<10x64xf32> to vector<4x64xf32>
    %c1_332 = arith.constant 1 : index
    %c0_333 = arith.constant 0 : index
    %c0_334 = arith.constant 0 : index
    %562 = vector.load %arg41[%c1_332, %c0_333, %c0_334] : memref<5x64x64xf32, #tpu.memory_space<vmem>>, vector<1x64x64xf32>
    %563 = vector.shape_cast %562 : vector<1x64x64xf32> to vector<64x64xf32>
    %cst_335 = arith.constant dense<0.000000e+00> : vector<4x64xf32>
    %564 = tpu.matmul %561, %563, %cst_335 {dimension_numbers = #tpu.dot_dimension_numbers<[1], [0], [0], [1], [0, 0, 1, 1], [], []>} : vector<4x64xf32>, vector<64x64xf32>, vector<4x64xf32> -> vector<4x64xf32>
    %565 = arith.addf %560, %564 : vector<4x64xf32>
    %566 = vector.extract_strided_slice %533 {offsets = [3, 0], sizes = [4, 64], strides = [1, 1]} : vector<10x64xf32> to vector<4x64xf32>
    %c2_336 = arith.constant 2 : index
    %c0_337 = arith.constant 0 : index
    %c0_338 = arith.constant 0 : index
    %567 = vector.load %arg41[%c2_336, %c0_337, %c0_338] : memref<5x64x64xf32, #tpu.memory_space<vmem>>, vector<1x64x64xf32>
    %568 = vector.shape_cast %567 : vector<1x64x64xf32> to vector<64x64xf32>
    %cst_339 = arith.constant dense<0.000000e+00> : vector<4x64xf32>
    %569 = tpu.matmul %566, %568, %cst_339 {dimension_numbers = #tpu.dot_dimension_numbers<[1], [0], [0], [1], [0, 0, 1, 1], [], []>} : vector<4x64xf32>, vector<64x64xf32>, vector<4x64xf32> -> vector<4x64xf32>
    %570 = arith.addf %565, %569 : vector<4x64xf32>
    %571 = vector.extract_strided_slice %533 {offsets = [2, 0], sizes = [4, 64], strides = [1, 1]} : vector<10x64xf32> to vector<4x64xf32>
    %c3_340 = arith.constant 3 : index
    %c0_341 = arith.constant 0 : index
    %c0_342 = arith.constant 0 : index
    %572 = vector.load %arg41[%c3_340, %c0_341, %c0_342] : memref<5x64x64xf32, #tpu.memory_space<vmem>>, vector<1x64x64xf32>
    %573 = vector.shape_cast %572 : vector<1x64x64xf32> to vector<64x64xf32>
    %cst_343 = arith.constant dense<0.000000e+00> : vector<4x64xf32>
    %574 = tpu.matmul %571, %573, %cst_343 {dimension_numbers = #tpu.dot_dimension_numbers<[1], [0], [0], [1], [0, 0, 1, 1], [], []>} : vector<4x64xf32>, vector<64x64xf32>, vector<4x64xf32> -> vector<4x64xf32>
    %575 = arith.addf %570, %574 : vector<4x64xf32>
    %576 = vector.extract_strided_slice %533 {offsets = [1, 0], sizes = [4, 64], strides = [1, 1]} : vector<10x64xf32> to vector<4x64xf32>
    %c4_344 = arith.constant 4 : index
    %c0_345 = arith.constant 0 : index
    %c0_346 = arith.constant 0 : index
    %577 = vector.load %arg41[%c4_344, %c0_345, %c0_346] : memref<5x64x64xf32, #tpu.memory_space<vmem>>, vector<1x64x64xf32>
    %578 = vector.shape_cast %577 : vector<1x64x64xf32> to vector<64x64xf32>
    %cst_347 = arith.constant dense<0.000000e+00> : vector<4x64xf32>
    %579 = tpu.matmul %576, %578, %cst_347 {dimension_numbers = #tpu.dot_dimension_numbers<[1], [0], [0], [1], [0, 0, 1, 1], [], []>} : vector<4x64xf32>, vector<64x64xf32>, vector<4x64xf32> -> vector<4x64xf32>
    %580 = arith.addf %575, %579 : vector<4x64xf32>
    %c0_348 = arith.constant 0 : index
    %c0_349 = arith.constant 0 : index
    %581 = vector.load %arg40[%c0_348, %c0_349] : memref<2x64xf32, #tpu.memory_space<vmem>>, vector<2x64xf32>
    %582 = vector.extract_strided_slice %581 {offsets = [0, 0], sizes = [1, 64], strides = [1, 1]} : vector<2x64xf32> to vector<1x64xf32>
    %583 = vector.broadcast %582 : vector<1x64xf32> to vector<4x64xf32>
    %584 = arith.mulf %580, %583 : vector<4x64xf32>
    %585 = vector.extract_strided_slice %581 {offsets = [1, 0], sizes = [1, 64], strides = [1, 1]} : vector<2x64xf32> to vector<1x64xf32>
    %586 = vector.broadcast %585 : vector<1x64xf32> to vector<4x64xf32>
    %587 = arith.addf %584, %586 : vector<4x64xf32>
    %cst_350 = arith.constant 0.000000e+00 : f32
    %588 = vector.broadcast %cst_350 : f32 to vector<4x64xf32>
    %589 = arith.maximumf %587, %588 : vector<4x64xf32>
    %590 = vector.extract_strided_slice %533 {offsets = [6, 0], sizes = [4, 64], strides = [1, 1]} : vector<10x64xf32> to vector<4x64xf32>
    %c0_351 = arith.constant 0 : index
    %c0_352 = arith.constant 0 : index
    %c0_353 = arith.constant 0 : index
    %591 = vector.load %arg43[%c0_351, %c0_352, %c0_353] : memref<7x64x64xf32, #tpu.memory_space<vmem>>, vector<1x64x64xf32>
    %592 = vector.shape_cast %591 : vector<1x64x64xf32> to vector<64x64xf32>
    %cst_354 = arith.constant dense<0.000000e+00> : vector<4x64xf32>
    %593 = tpu.matmul %590, %592, %cst_354 {dimension_numbers = #tpu.dot_dimension_numbers<[1], [0], [0], [1], [0, 0, 1, 1], [], []>} : vector<4x64xf32>, vector<64x64xf32>, vector<4x64xf32> -> vector<4x64xf32>
    %594 = vector.extract_strided_slice %533 {offsets = [5, 0], sizes = [4, 64], strides = [1, 1]} : vector<10x64xf32> to vector<4x64xf32>
    %c1_355 = arith.constant 1 : index
    %c0_356 = arith.constant 0 : index
    %c0_357 = arith.constant 0 : index
    %595 = vector.load %arg43[%c1_355, %c0_356, %c0_357] : memref<7x64x64xf32, #tpu.memory_space<vmem>>, vector<1x64x64xf32>
    %596 = vector.shape_cast %595 : vector<1x64x64xf32> to vector<64x64xf32>
    %cst_358 = arith.constant dense<0.000000e+00> : vector<4x64xf32>
    %597 = tpu.matmul %594, %596, %cst_358 {dimension_numbers = #tpu.dot_dimension_numbers<[1], [0], [0], [1], [0, 0, 1, 1], [], []>} : vector<4x64xf32>, vector<64x64xf32>, vector<4x64xf32> -> vector<4x64xf32>
    %598 = arith.addf %593, %597 : vector<4x64xf32>
    %599 = vector.extract_strided_slice %533 {offsets = [4, 0], sizes = [4, 64], strides = [1, 1]} : vector<10x64xf32> to vector<4x64xf32>
    %c2_359 = arith.constant 2 : index
    %c0_360 = arith.constant 0 : index
    %c0_361 = arith.constant 0 : index
    %600 = vector.load %arg43[%c2_359, %c0_360, %c0_361] : memref<7x64x64xf32, #tpu.memory_space<vmem>>, vector<1x64x64xf32>
    %601 = vector.shape_cast %600 : vector<1x64x64xf32> to vector<64x64xf32>
    %cst_362 = arith.constant dense<0.000000e+00> : vector<4x64xf32>
    %602 = tpu.matmul %599, %601, %cst_362 {dimension_numbers = #tpu.dot_dimension_numbers<[1], [0], [0], [1], [0, 0, 1, 1], [], []>} : vector<4x64xf32>, vector<64x64xf32>, vector<4x64xf32> -> vector<4x64xf32>
    %603 = arith.addf %598, %602 : vector<4x64xf32>
    %604 = vector.extract_strided_slice %533 {offsets = [3, 0], sizes = [4, 64], strides = [1, 1]} : vector<10x64xf32> to vector<4x64xf32>
    %c3_363 = arith.constant 3 : index
    %c0_364 = arith.constant 0 : index
    %c0_365 = arith.constant 0 : index
    %605 = vector.load %arg43[%c3_363, %c0_364, %c0_365] : memref<7x64x64xf32, #tpu.memory_space<vmem>>, vector<1x64x64xf32>
    %606 = vector.shape_cast %605 : vector<1x64x64xf32> to vector<64x64xf32>
    %cst_366 = arith.constant dense<0.000000e+00> : vector<4x64xf32>
    %607 = tpu.matmul %604, %606, %cst_366 {dimension_numbers = #tpu.dot_dimension_numbers<[1], [0], [0], [1], [0, 0, 1, 1], [], []>} : vector<4x64xf32>, vector<64x64xf32>, vector<4x64xf32> -> vector<4x64xf32>
    %608 = arith.addf %603, %607 : vector<4x64xf32>
    %609 = vector.extract_strided_slice %533 {offsets = [2, 0], sizes = [4, 64], strides = [1, 1]} : vector<10x64xf32> to vector<4x64xf32>
    %c4_367 = arith.constant 4 : index
    %c0_368 = arith.constant 0 : index
    %c0_369 = arith.constant 0 : index
    %610 = vector.load %arg43[%c4_367, %c0_368, %c0_369] : memref<7x64x64xf32, #tpu.memory_space<vmem>>, vector<1x64x64xf32>
    %611 = vector.shape_cast %610 : vector<1x64x64xf32> to vector<64x64xf32>
    %cst_370 = arith.constant dense<0.000000e+00> : vector<4x64xf32>
    %612 = tpu.matmul %609, %611, %cst_370 {dimension_numbers = #tpu.dot_dimension_numbers<[1], [0], [0], [1], [0, 0, 1, 1], [], []>} : vector<4x64xf32>, vector<64x64xf32>, vector<4x64xf32> -> vector<4x64xf32>
    %613 = arith.addf %608, %612 : vector<4x64xf32>
    %614 = vector.extract_strided_slice %533 {offsets = [1, 0], sizes = [4, 64], strides = [1, 1]} : vector<10x64xf32> to vector<4x64xf32>
    %c5_371 = arith.constant 5 : index
    %c0_372 = arith.constant 0 : index
    %c0_373 = arith.constant 0 : index
    %615 = vector.load %arg43[%c5_371, %c0_372, %c0_373] : memref<7x64x64xf32, #tpu.memory_space<vmem>>, vector<1x64x64xf32>
    %616 = vector.shape_cast %615 : vector<1x64x64xf32> to vector<64x64xf32>
    %cst_374 = arith.constant dense<0.000000e+00> : vector<4x64xf32>
    %617 = tpu.matmul %614, %616, %cst_374 {dimension_numbers = #tpu.dot_dimension_numbers<[1], [0], [0], [1], [0, 0, 1, 1], [], []>} : vector<4x64xf32>, vector<64x64xf32>, vector<4x64xf32> -> vector<4x64xf32>
    %618 = arith.addf %613, %617 : vector<4x64xf32>
    %619 = vector.extract_strided_slice %533 {offsets = [0, 0], sizes = [4, 64], strides = [1, 1]} : vector<10x64xf32> to vector<4x64xf32>
    %c6_375 = arith.constant 6 : index
    %c0_376 = arith.constant 0 : index
    %c0_377 = arith.constant 0 : index
    %620 = vector.load %arg43[%c6_375, %c0_376, %c0_377] : memref<7x64x64xf32, #tpu.memory_space<vmem>>, vector<1x64x64xf32>
    %621 = vector.shape_cast %620 : vector<1x64x64xf32> to vector<64x64xf32>
    %cst_378 = arith.constant dense<0.000000e+00> : vector<4x64xf32>
    %622 = tpu.matmul %619, %621, %cst_378 {dimension_numbers = #tpu.dot_dimension_numbers<[1], [0], [0], [1], [0, 0, 1, 1], [], []>} : vector<4x64xf32>, vector<64x64xf32>, vector<4x64xf32> -> vector<4x64xf32>
    %623 = arith.addf %618, %622 : vector<4x64xf32>
    %c0_379 = arith.constant 0 : index
    %c0_380 = arith.constant 0 : index
    %624 = vector.load %arg42[%c0_379, %c0_380] : memref<2x64xf32, #tpu.memory_space<vmem>>, vector<2x64xf32>
    %625 = vector.extract_strided_slice %624 {offsets = [0, 0], sizes = [1, 64], strides = [1, 1]} : vector<2x64xf32> to vector<1x64xf32>
    %626 = vector.broadcast %625 : vector<1x64xf32> to vector<4x64xf32>
    %627 = arith.mulf %623, %626 : vector<4x64xf32>
    %628 = vector.extract_strided_slice %624 {offsets = [1, 0], sizes = [1, 64], strides = [1, 1]} : vector<2x64xf32> to vector<1x64xf32>
    %629 = vector.broadcast %628 : vector<1x64xf32> to vector<4x64xf32>
    %630 = arith.addf %627, %629 : vector<4x64xf32>
    %cst_381 = arith.constant 0.000000e+00 : f32
    %631 = vector.broadcast %cst_381 : f32 to vector<4x64xf32>
    %632 = arith.maximumf %630, %631 : vector<4x64xf32>
    %633 = tpu.concatenate %531, %556, %589, %632 in 1 : vector<4x64xf32>, vector<4x64xf32>, vector<4x64xf32>, vector<4x64xf32> -> vector<4x256xf32>
    %c0_382 = arith.constant 0 : index
    %c0_383 = arith.constant 0 : index
    %634 = vector.load %arg3[%c0_382, %c0_383] : memref<256x5xf32, #tpu.memory_space<vmem>>, vector<256x5xf32>
    %cst_384 = arith.constant dense<0.000000e+00> : vector<4x5xf32>
    %635 = tpu.matmul %633, %634, %cst_384 {dimension_numbers = #tpu.dot_dimension_numbers<[1], [0], [0], [1], [0, 0, 1, 1], [], []>} : vector<4x256xf32>, vector<256x5xf32>, vector<4x5xf32> -> vector<4x5xf32>
    %636 = vector.extract_strided_slice %635 {offsets = [0, 0], sizes = [1, 5], strides = [1, 1]} : vector<4x5xf32> to vector<1x5xf32>
    %637 = vector.extract_strided_slice %635 {offsets = [1, 0], sizes = [1, 5], strides = [1, 1]} : vector<4x5xf32> to vector<1x5xf32>
    %638 = arith.addf %636, %637 : vector<1x5xf32>
    %639 = vector.extract_strided_slice %635 {offsets = [2, 0], sizes = [1, 5], strides = [1, 1]} : vector<4x5xf32> to vector<1x5xf32>
    %640 = arith.addf %638, %639 : vector<1x5xf32>
    %641 = vector.extract_strided_slice %635 {offsets = [3, 0], sizes = [1, 5], strides = [1, 1]} : vector<4x5xf32> to vector<1x5xf32>
    %642 = arith.addf %640, %641 : vector<1x5xf32>
    %cst_385 = arith.constant 2.500000e-01 : f32
    %643 = vector.broadcast %cst_385 : f32 to vector<1x5xf32>
    %644 = arith.mulf %642, %643 : vector<1x5xf32>
    %c0_386 = arith.constant 0 : index
    %c0_387 = arith.constant 0 : index
    %645 = vector.load %arg2[%c0_386, %c0_387] : memref<1x5xf32, #tpu.memory_space<vmem>>, vector<1x5xf32>
    %646 = arith.addf %644, %645 : vector<1x5xf32>
    %c0_388 = arith.constant 0 : index
    %c0_389 = arith.constant 0 : index
    %c0_390 = arith.constant 0 : index
    %647 = vector.load %arg46[%c0_388, %c0_389, %c0_390] : memref<1x1x5xf32, #tpu.memory_space<vmem>>, vector<1x1x5xf32>
    %648 = vector.shape_cast %647 : vector<1x1x5xf32> to vector<1x5xf32>
    %649 = vector.shape_cast %646 : vector<1x5xf32> to vector<1x1x5xf32>
    tpu.vector_store %arg46[%c0_388, %c0_389, %c0_390], %649 {strides = array<i32>} : memref<1x1x5xf32, #tpu.memory_space<vmem>>, vector<1x1x5xf32>,
    return
  }
  func.func @transform_0(%arg0: i32) -> (i32, i32, i32) {
    %c0_i32 = arith.constant 0 : i32
    %c0_i32_0 = arith.constant 0 : i32
    %c0_i32_1 = arith.constant 0 : i32
    return %arg0, %c0_i32, %c0_i32_0 : i32, i32, i32
  }
  func.func @transform_1(%arg0: i32) -> (i32, i32) {
    %c0_i32 = arith.constant 0 : i32
    %c0_i32_0 = arith.constant 0 : i32
    %c0_i32_1 = arith.constant 0 : i32
    return %c0_i32, %c0_i32_0 : i32, i32
  }
  func.func @transform_2(%arg0: i32) -> (i32, i32) {
    %c0_i32 = arith.constant 0 : i32
    %c0_i32_0 = arith.constant 0 : i32
    %c0_i32_1 = arith.constant 0 : i32
    return %c0_i32, %c0_i32_0 : i32, i32
  }
  func.func @transform_3(%arg0: i32) -> (i32, i32) {
    %c0_i32 = arith.constant 0 : i32
    %c0_i32_0 = arith.constant 0 : i32
    %c0_i32_1 = arith.constant 0 : i32
    return %c0_i32, %c0_i32_0 : i32, i32
  }
  func.func @transform_4(%arg0: i32) -> (i32, i32) {
    %c0_i32 = arith.constant 0 : i32
    %c0_i32_0 = arith.constant 0 : i32
    %c0_i32_1 = arith.constant 0 : i32
    return %c0_i32, %c0_i32_0 : i32, i32
  }
  func.func @transform_5(%arg0: i32) -> (i32, i32) {
    %c0_i32 = arith.constant 0 : i32
    %c0_i32_0 = arith.constant 0 : i32
    %c0_i32_1 = arith.constant 0 : i32
    return %c0_i32, %c0_i32_0 : i32, i32
  }
  func.func @transform_6(%arg0: i32) -> (i32, i32, i32) {
    %c0_i32 = arith.constant 0 : i32
    %c0_i32_0 = arith.constant 0 : i32
    %c0_i32_1 = arith.constant 0 : i32
    %c0_i32_2 = arith.constant 0 : i32
    return %c0_i32, %c0_i32_0, %c0_i32_1 : i32, i32, i32
  }
  func.func @transform_7(%arg0: i32) -> (i32, i32) {
    %c0_i32 = arith.constant 0 : i32
    %c0_i32_0 = arith.constant 0 : i32
    %c0_i32_1 = arith.constant 0 : i32
    return %c0_i32, %c0_i32_0 : i32, i32
  }
  func.func @transform_8(%arg0: i32) -> (i32, i32, i32) {
    %c0_i32 = arith.constant 0 : i32
    %c0_i32_0 = arith.constant 0 : i32
    %c0_i32_1 = arith.constant 0 : i32
    %c0_i32_2 = arith.constant 0 : i32
    return %c0_i32, %c0_i32_0, %c0_i32_1 : i32, i32, i32
  }
  func.func @transform_9(%arg0: i32) -> (i32, i32) {
    %c0_i32 = arith.constant 0 : i32
    %c0_i32_0 = arith.constant 0 : i32
    %c0_i32_1 = arith.constant 0 : i32
    return %c0_i32, %c0_i32_0 : i32, i32
  }
  func.func @transform_10(%arg0: i32) -> (i32, i32, i32) {
    %c0_i32 = arith.constant 0 : i32
    %c0_i32_0 = arith.constant 0 : i32
    %c0_i32_1 = arith.constant 0 : i32
    %c0_i32_2 = arith.constant 0 : i32
    return %c0_i32, %c0_i32_0, %c0_i32_1 : i32, i32, i32
  }
  func.func @transform_11(%arg0: i32) -> (i32, i32) {
    %c0_i32 = arith.constant 0 : i32
    %c0_i32_0 = arith.constant 0 : i32
    %c0_i32_1 = arith.constant 0 : i32
    return %c0_i32, %c0_i32_0 : i32, i32
  }
  func.func @transform_12(%arg0: i32) -> (i32, i32) {
    %c0_i32 = arith.constant 0 : i32
    %c0_i32_0 = arith.constant 0 : i32
    %c0_i32_1 = arith.constant 0 : i32
    return %c0_i32, %c0_i32_0 : i32, i32
  }
  func.func @transform_13(%arg0: i32) -> (i32, i32) {
    %c0_i32 = arith.constant 0 : i32
    %c0_i32_0 = arith.constant 0 : i32
    %c0_i32_1 = arith.constant 0 : i32
    return %c0_i32, %c0_i32_0 : i32, i32
  }
  func.func @transform_14(%arg0: i32) -> (i32, i32, i32) {
    %c0_i32 = arith.constant 0 : i32
    %c0_i32_0 = arith.constant 0 : i32
    %c0_i32_1 = arith.constant 0 : i32
    %c0_i32_2 = arith.constant 0 : i32
    return %c0_i32, %c0_i32_0, %c0_i32_1 : i32, i32, i32
  }
  func.func @transform_15(%arg0: i32) -> (i32, i32) {
    %c0_i32 = arith.constant 0 : i32
    %c0_i32_0 = arith.constant 0 : i32
    %c0_i32_1 = arith.constant 0 : i32
    return %c0_i32, %c0_i32_0 : i32, i32
  }
  func.func @transform_16(%arg0: i32) -> (i32, i32, i32) {
    %c0_i32 = arith.constant 0 : i32
    %c0_i32_0 = arith.constant 0 : i32
    %c0_i32_1 = arith.constant 0 : i32
    %c0_i32_2 = arith.constant 0 : i32
    return %c0_i32, %c0_i32_0, %c0_i32_1 : i32, i32, i32
  }
  func.func @transform_17(%arg0: i32) -> (i32, i32) {
    %c0_i32 = arith.constant 0 : i32
    %c0_i32_0 = arith.constant 0 : i32
    %c0_i32_1 = arith.constant 0 : i32
    return %c0_i32, %c0_i32_0 : i32, i32
  }
  func.func @transform_18(%arg0: i32) -> (i32, i32, i32) {
    %c0_i32 = arith.constant 0 : i32
    %c0_i32_0 = arith.constant 0 : i32
    %c0_i32_1 = arith.constant 0 : i32
    %c0_i32_2 = arith.constant 0 : i32
    return %c0_i32, %c0_i32_0, %c0_i32_1 : i32, i32, i32
  }
  func.func @transform_19(%arg0: i32) -> (i32, i32) {
    %c0_i32 = arith.constant 0 : i32
    %c0_i32_0 = arith.constant 0 : i32
    %c0_i32_1 = arith.constant 0 : i32
    return %c0_i32, %c0_i32_0 : i32, i32
  }
  func.func @transform_20(%arg0: i32) -> (i32, i32) {
    %c0_i32 = arith.constant 0 : i32
    %c0_i32_0 = arith.constant 0 : i32
    %c0_i32_1 = arith.constant 0 : i32
    return %c0_i32, %c0_i32_0 : i32, i32
  }
  func.func @transform_21(%arg0: i32) -> (i32, i32) {
    %c0_i32 = arith.constant 0 : i32
    %c0_i32_0 = arith.constant 0 : i32
    %c0_i32_1 = arith.constant 0 : i32
    return %c0_i32, %c0_i32_0 : i32, i32
  }
  func.func @transform_22(%arg0: i32) -> (i32, i32, i32) {
    %c0_i32 = arith.constant 0 : i32
    %c0_i32_0 = arith.constant 0 : i32
    %c0_i32_1 = arith.constant 0 : i32
    %c0_i32_2 = arith.constant 0 : i32
    return %c0_i32, %c0_i32_0, %c0_i32_1 : i32, i32, i32
  }
  func.func @transform_23(%arg0: i32) -> (i32, i32) {
    %c0_i32 = arith.constant 0 : i32
    %c0_i32_0 = arith.constant 0 : i32
    %c0_i32_1 = arith.constant 0 : i32
    return %c0_i32, %c0_i32_0 : i32, i32
  }
  func.func @transform_24(%arg0: i32) -> (i32, i32, i32) {
    %c0_i32 = arith.constant 0 : i32
    %c0_i32_0 = arith.constant 0 : i32
    %c0_i32_1 = arith.constant 0 : i32
    %c0_i32_2 = arith.constant 0 : i32
    return %c0_i32, %c0_i32_0, %c0_i32_1 : i32, i32, i32
  }
  func.func @transform_25(%arg0: i32) -> (i32, i32) {
    %c0_i32 = arith.constant 0 : i32
    %c0_i32_0 = arith.constant 0 : i32
    %c0_i32_1 = arith.constant 0 : i32
    return %c0_i32, %c0_i32_0 : i32, i32
  }
  func.func @transform_26(%arg0: i32) -> (i32, i32, i32) {
    %c0_i32 = arith.constant 0 : i32
    %c0_i32_0 = arith.constant 0 : i32
    %c0_i32_1 = arith.constant 0 : i32
    %c0_i32_2 = arith.constant 0 : i32
    return %c0_i32, %c0_i32_0, %c0_i32_1 : i32, i32, i32
  }
  func.func @transform_27(%arg0: i32) -> (i32, i32) {
    %c0_i32 = arith.constant 0 : i32
    %c0_i32_0 = arith.constant 0 : i32
    %c0_i32_1 = arith.constant 0 : i32
    return %c0_i32, %c0_i32_0 : i32, i32
  }
  func.func @transform_28(%arg0: i32) -> (i32, i32) {
    %c0_i32 = arith.constant 0 : i32
    %c0_i32_0 = arith.constant 0 : i32
    %c0_i32_1 = arith.constant 0 : i32
    return %c0_i32, %c0_i32_0 : i32, i32
  }
  func.func @transform_29(%arg0: i32) -> (i32, i32) {
    %c0_i32 = arith.constant 0 : i32
    %c0_i32_0 = arith.constant 0 : i32
    %c0_i32_1 = arith.constant 0 : i32
    return %c0_i32, %c0_i32_0 : i32, i32
  }
  func.func @transform_30(%arg0: i32) -> (i32, i32, i32) {
    %c0_i32 = arith.constant 0 : i32
    %c0_i32_0 = arith.constant 0 : i32
    %c0_i32_1 = arith.constant 0 : i32
    %c0_i32_2 = arith.constant 0 : i32
    return %c0_i32, %c0_i32_0, %c0_i32_1 : i32, i32, i32
  }
  func.func @transform_31(%arg0: i32) -> (i32, i32) {
    %c0_i32 = arith.constant 0 : i32
    %c0_i32_0 = arith.constant 0 : i32
    %c0_i32_1 = arith.constant 0 : i32
    return %c0_i32, %c0_i32_0 : i32, i32
  }
  func.func @transform_32(%arg0: i32) -> (i32, i32, i32) {
    %c0_i32 = arith.constant 0 : i32
    %c0_i32_0 = arith.constant 0 : i32
    %c0_i32_1 = arith.constant 0 : i32
    %c0_i32_2 = arith.constant 0 : i32
    return %c0_i32, %c0_i32_0, %c0_i32_1 : i32, i32, i32
  }
  func.func @transform_33(%arg0: i32) -> (i32, i32) {
    %c0_i32 = arith.constant 0 : i32
    %c0_i32_0 = arith.constant 0 : i32
    %c0_i32_1 = arith.constant 0 : i32
    return %c0_i32, %c0_i32_0 : i32, i32
  }
  func.func @transform_34(%arg0: i32) -> (i32, i32, i32) {
    %c0_i32 = arith.constant 0 : i32
    %c0_i32_0 = arith.constant 0 : i32
    %c0_i32_1 = arith.constant 0 : i32
    %c0_i32_2 = arith.constant 0 : i32
    return %c0_i32, %c0_i32_0, %c0_i32_1 : i32, i32, i32
  }
  func.func @transform_35(%arg0: i32) -> (i32, i32) {
    %c0_i32 = arith.constant 0 : i32
    %c0_i32_0 = arith.constant 0 : i32
    %c0_i32_1 = arith.constant 0 : i32
    return %c0_i32, %c0_i32_0 : i32, i32
  }
  func.func @transform_36(%arg0: i32) -> (i32, i32) {
    %c0_i32 = arith.constant 0 : i32
    %c0_i32_0 = arith.constant 0 : i32
    %c0_i32_1 = arith.constant 0 : i32
    return %c0_i32, %c0_i32_0 : i32, i32
  }
  func.func @transform_37(%arg0: i32) -> (i32, i32) {
    %c0_i32 = arith.constant 0 : i32
    %c0_i32_0 = arith.constant 0 : i32
    %c0_i32_1 = arith.constant 0 : i32
    return %c0_i32, %c0_i32_0 : i32, i32
  }
  func.func @transform_38(%arg0: i32) -> (i32, i32, i32) {
    %c0_i32 = arith.constant 0 : i32
    %c0_i32_0 = arith.constant 0 : i32
    %c0_i32_1 = arith.constant 0 : i32
    %c0_i32_2 = arith.constant 0 : i32
    return %c0_i32, %c0_i32_0, %c0_i32_1 : i32, i32, i32
  }
  func.func @transform_39(%arg0: i32) -> (i32, i32) {
    %c0_i32 = arith.constant 0 : i32
    %c0_i32_0 = arith.constant 0 : i32
    %c0_i32_1 = arith.constant 0 : i32
    return %c0_i32, %c0_i32_0 : i32, i32
  }
  func.func @transform_40(%arg0: i32) -> (i32, i32, i32) {
    %c0_i32 = arith.constant 0 : i32
    %c0_i32_0 = arith.constant 0 : i32
    %c0_i32_1 = arith.constant 0 : i32
    %c0_i32_2 = arith.constant 0 : i32
    return %c0_i32, %c0_i32_0, %c0_i32_1 : i32, i32, i32
  }
  func.func @transform_41(%arg0: i32) -> (i32, i32) {
    %c0_i32 = arith.constant 0 : i32
    %c0_i32_0 = arith.constant 0 : i32
    %c0_i32_1 = arith.constant 0 : i32
    return %c0_i32, %c0_i32_0 : i32, i32
  }
  func.func @transform_42(%arg0: i32) -> (i32, i32, i32) {
    %c0_i32 = arith.constant 0 : i32
    %c0_i32_0 = arith.constant 0 : i32
    %c0_i32_1 = arith.constant 0 : i32
    %c0_i32_2 = arith.constant 0 : i32
    return %c0_i32, %c0_i32_0, %c0_i32_1 : i32, i32, i32
  }
  func.func @transform_43(%arg0: i32) -> (i32, i32) {
    %c0_i32 = arith.constant 0 : i32
    %c0_i32_0 = arith.constant 0 : i32
    %c0_i32_1 = arith.constant 0 : i32
    return %c0_i32, %c0_i32_0 : i32, i32
  }
  func.func @transform_44(%arg0: i32) -> (i32, i32) {
    %c0_i32 = arith.constant 0 : i32
    %c0_i32_0 = arith.constant 0 : i32
    %c0_i32_1 = arith.constant 0 : i32
    return %c0_i32, %c0_i32_0 : i32, i32
  }
  func.func @transform_45(%arg0: i32) -> (i32, i32, i32) {
    %c0_i32 = arith.constant 0 : i32
    %c0_i32_0 = arith.constant 0 : i32
    %c0_i32_1 = arith.constant 0 : i32
    return %arg0, %c0_i32, %c0_i32_0 : i32, i32, i32
  }
}

</mosaic_0001>

<bundles_post_ra>
// kernel: mts_convnet_fwd.1
= control target key start
LH: loop header
LB: loop body
LE: loop exit
PB: predicated region body
PF: predicated region fallthrough
CT: control target
= control target key end

     0   :  { %s13199_s6 = smov 1   ;;  %s13200_s10 = smov 2   ;;  %s15650_s0 = inlined_call_operand.smem [shape: u32[46], index: -1, kind: input, shape index: {}] }
   0x1   :  { %s13292_s5 = sld [smem:[%s15650_s0]]   ;;  %s13201_s14 = smov 3  }
   0x2   :  { %s13297_s9 = sld [smem:[%s15650_s0 + %s13199_s6]]   ;;  %s13202_s18 = smov 4  }
   0x3   :  { %s13302_s13 = sld [smem:[%s15650_s0 + %s13200_s10]]   ;;  %s13203_s22 = smov 5  }
   0x4   :  { %s13307_s17 = sld [smem:[%s15650_s0 + %s13201_s14]]   ;;  %s13204_s26 = smov 6  }
   0x5   :  { %s13312_s21 = sld [smem:[%s15650_s0 + %s13202_s18]]   ;;  %s13205_s30 = smov 7  }
   0x6   :  { %s13317_s25 = sld [smem:[%s15650_s0 + %s13203_s22]]   ;;  %s13206_s4 = smov 8  }
   0x7   :  { %15675 = sst [smem:[#allocation67_spill]] %s13292_s5  ;;  %s13207_s10 = smov 9  }
   0x8   :  { %15676 = sst [smem:[#allocation68_spill]] %s13297_s9  ;;  %s13208_s15 = smov 10  }
   0x9   :  { %15677 = sst [smem:[#allocation69_spill]] %s13302_s13  ;;  %s13209_s20 = smov 11  }
   0xa   :  { %15678 = sst [smem:[#allocation70_spill]] %s13307_s17  ;;  %s13211_s1 = smov 13  }
   0xb   :  { %15679 = sst [smem:[#allocation71_spill]] %s13312_s21  ;;  %s13212_s7 = smov 14  }
   0xc   :  { %15680 = sst [smem:[#allocation72_spill]] %s13317_s25  ;;  %s13214_s22 = smov 16  }
   0xd   :  { %s13322_s29 = sld [smem:[%s15650_s0 + %s13204_s26]]   ;;  %s13210_s26 = smov 12  }
   0xe   :  { %s13327_s3 = sld [smem:[%s15650_s0 + %s13205_s30]]   ;;  %s13215_s28 = smov 17  }
   0xf   :  { %s13332_s8 = sld [smem:[%s15650_s0 + %s13206_s4]]  }
  0x10   :  { %s13337_s14 = sld [smem:[%s15650_s0 + %s13207_s10]]  }
  0x11   :  { %s13342_s19 = sld [smem:[%s15650_s0 + %s13208_s15]]   ;;  %s13213_s15 = smov 15  }
  0x12   :  { %s13347_s24 = sld [smem:[%s15650_s0 + %s13209_s20]]  }
  0x13   :  { %15681 = sst [smem:[#allocation73_spill]] %s13322_s29 }
  0x14   :  { %15682 = sst [smem:[#allocation74_spill]] %s13327_s3 }
  0x15   :  { %s13352_s30 = sld [smem:[%s15650_s0 + %s13210_s26]]  }
  0x16   :  { %15683 = sst [smem:[#allocation75_spill]] %s13337_s14 }
  0x17   :  { %15684 = sst [smem:[#allocation76_spill]] %s13342_s19 }
  0x18   :  { %s13357_s6 = sld [smem:[%s15650_s0 + %s13211_s1]]  }
  0x19   :  { %s13362_s12 = sld [smem:[%s15650_s0 + %s13212_s7]]   ;;  %s13216_s7 = smov 18  }
  0x1a   :  { %s13367_s20 = sld [smem:[%s15650_s0 + %s13213_s15]]   ;;  %s13217_s15 = smov 19  }
  0x1b   :  { %15685 = sst [smem:[#allocation77_spill]] %s13352_s30 }
  0x1c   :  { %s13372_s27 = sld [smem:[%s15650_s0 + %s13214_s22]]   ;;  %s13218_s22 = smov 20  }
  0x1d   :  { %s13377_s4 = sld [smem:[%s15650_s0 + %s13215_s28]]   ;;  %s13219_s28 = smov 21  }
  0x1e   :  { %15686 = sst [smem:[#allocation78_spill]] %s13357_s6 }
  0x1f   :  { %s13382_s13 = sld [smem:[%s15650_s0 + %s13216_s7]]   ;;  %s13220_s7 = smov 22  }
  0x20   :  { %15687 = sst [smem:[#allocation79_spill]] %s13367_s20 }
  0x21   :  { %s13387_s30 = sld [smem:[%s15650_s0 + %s13217_s15]]   ;;  %s13221_s15 = smov 23  }
  0x22   :  { %s13392_s19 = sld [smem:[%s15650_s0 + %s13218_s22]]   ;;  %s13222_s22 = smov 24  }
  0x23   :  { %15688 = sst [smem:[#allocation80_spill]] %s13377_s4 }
  0x24   :  { %s13397_s21 = sld [smem:[%s15650_s0 + %s13219_s28]]   ;;  %s13223_s28 = smov 25  }
  0x25   :  { %s13402_s5 = sld [smem:[%s15650_s0 + %s13220_s7]]   ;;  %s13224_s7 = smov 26  }
  0x26   :  { %s13417_s4 = sld [smem:[%s15650_s0 + %s13223_s28]]   ;;  %s13227_s28 = smov 29  }
  0x27   :  { %15689 = sst [smem:[#allocation81_spill]] %s13387_s30 }
  0x28   :  { %15690 = sst [smem:[#allocation82_spill]] %s13392_s19 }
  0x29   :  { %s13407_s30 = sld [smem:[%s15650_s0 + %s13221_s15]]   ;;  %s13225_s15 = smov 27  }
  0x2a   :  { %s13412_s19 = sld [smem:[%s15650_s0 + %s13222_s22]]   ;;  %s13226_s22 = smov 28  }
  0x2b   :  { %15691 = sst [smem:[#allocation83_spill]] %s13402_s5 }
  0x2c   :  { %15693 = sst [smem:[#allocation85_spill]] %s13417_s4 }
  0x2d   :  { %s13422_s5 = sld [smem:[%s15650_s0 + %s13224_s7]]   ;;  %s13228_s7 = smov 30  }
  0x2e   :  { %s13427_s20 = sld [smem:[%s15650_s0 + %s13225_s15]]   ;;  %s13229_s15 = smov 31  }
  0x2f   :  { %s13437_s6 = sld [smem:[%s15650_s0 + %s13227_s28]]   ;;  %s13231_s28 = smov 33  }
  0x30   :  { %15692 = sst [smem:[#allocation84_spill]] %s13412_s19 }
  0x31   :  { %s13432_s19 = sld [smem:[%s15650_s0 + %s13226_s22]]   ;;  %s13230_s22 = smov 32  }
  0x32   :  { %s13447_s14 = sld [smem:[%s15650_s0 + %s13229_s15]]   ;;  %s13233_s15 = smov 35  }
  0x33   :  { %15694 = sst [smem:[#allocation86_spill]] %s13422_s5 }
  0x34   :  { %s13442_s5 = sld [smem:[%s15650_s0 + %s13228_s7]]   ;;  %s13232_s7 = smov 34  }
  0x35   :  { %15696 = sst [smem:[#allocation88_spill]] %s13437_s6 }
  0x36   :  { %s13457_s6 = sld [smem:[%s15650_s0 + %s13231_s28]]   ;;  %s13235_s28 = smov 37  }
  0x37   :  { %15695 = sst [smem:[#allocation87_spill]] %s13432_s19 }
  0x38   :  { %15698 = sst [smem:[#allocation90_spill]] %s13447_s14 }
  0x39   :  { %s13452_s19 = sld [smem:[%s15650_s0 + %s13230_s22]]   ;;  %s13234_s22 = smov 36  }
  0x3a   :  { %15697 = sst [smem:[#allocation89_spill]] %s13442_s5 }
  0x3b   :  { %s13462_s3 = sld [smem:[%s15650_s0 + %s13232_s7]]   ;;  %s13236_s7 = smov 38  }
  0x3c   :  { %15699 = sst [smem:[#allocation91_spill]] %s13457_s6 }
  0x3d   :  { %s13467_s14 = sld [smem:[%s15650_s0 + %s13233_s15]]   ;;  %s13237_s15 = smov 39  }
  0x3e   :  { %s13472_s25 = sld [smem:[%s15650_s0 + %s13234_s22]]   ;;  %s13238_s22 = smov 40  }
  0x3f   :  { %s13477_s6 = sld [smem:[%s15650_s0 + %s13235_s28]]   ;;  %s13239_s28 = smov 41  }
  0x40   :  { %s13482_s9 = sld [smem:[%s15650_s0 + %s13236_s7]]   ;;  %s13240_s7 = smov 42  }
  0x41   :  { %15700 = sst [smem:[#allocation92_spill]] %s13462_s3 }
  0x43   :  { %15701 = sst [smem:[#allocation93_spill]] %s13467_s14 }
  0x44   :  { %15702 = sst [smem:[#allocation94_spill]] %s13472_s25 }
  0x45   :  { %15703 = sst [smem:[#allocation95_spill]] %s13477_s6 }
  0x46   :  { %15704 = sst [smem:[#allocation96_spill]] %s13482_s9 }
  0x47   :  { %s13487_s14 = sld [smem:[%s15650_s0 + %s13237_s15]]   ;;  %s13241_s15 = smov 43  }
  0x48   :  { %s13492_s25 = sld [smem:[%s15650_s0 + %s13238_s22]]   ;;  %s13242_s22 = smov 44  }
  0x49   :  { %s13497_s6 = sld [smem:[%s15650_s0 + %s13239_s28]]   ;;  %s13243_s28 = smov 45  }
  0x4a   :  { %s13502_s9 = sld [smem:[%s15650_s0 + %s13240_s7]]  }
  0x4d   :  { %15705 = sst [smem:[#allocation97_spill]] %s13487_s14 }
  0x4e   :  { %15706 = sst [smem:[#allocation98_spill]] %s13492_s25 }
  0x4f   :  { %15707 = sst [smem:[#allocation99_spill]] %s13497_s6 }
  0x50   :  { %s13507_s14 = sld [smem:[%s15650_s0 + %s13241_s15]]  }
  0x51   :  { %s13512_s25 = sld [smem:[%s15650_s0 + %s13242_s22]]  }
  0x52   :  { %s13517_s6 = sld [smem:[%s15650_s0 + %s13243_s28]]  }
  0x53   :  { %96 = vsyncpa [#allocation3], 0 }
  0x54   :  { %97 = vsyncpa [#allocation6], 0 }
  0x55   :  { %98 = vsyncpa [#allocation9], 0 }
  0x56   :  { %99 = vsyncpa [#allocation12], 0 }
  0x57   :  { %100 = vsyncpa [#allocation15], 0 }
  0x58   :  { %101 = vsyncpa [#allocation18], 0 }
  0x59   :  { %102 = vsyncpa [#allocation21], 0 }
  0x5a   :  { %103 = vsyncpa [#allocation24], 0 }
  0x5b   :  { %104 = vsyncpa [#allocation27], 0 }
  0x5c   :  { %105 = vsyncpa [#allocation30], 0 }
  0x5d   :  { %106 = vsyncpa [#allocation33], 0 }
  0x5e   :  { %107 = vsyncpa [#allocation36], 0 }
  0x5f   :  { %108 = vsyncpa [#allocation39], 0 }
  0x60   :  { %109 = vsyncpa [#allocation42], 0 }
  0x61   :  { %110 = vsyncpa [#allocation45], 0 }
  0x62   :  { %111 = vsyncpa [#allocation48], 0 }
  0x63   :  { %112 = vsyncpa [#allocation4], 0 }
  0x64   :  { %114 = vsyncpa [#allocation4 + $0x1], 0  ;;  %s13519_s0 = smov 0   ;;  %s13521_s7 = smov 0  }
  0x65   :  { %s13523_s10 = smov 0   ;;  %s13525_s11 = smov 0  }
  0x66 LB: > { %15708 = sst [smem:[#allocation100_spill]] %s13185_s0  ;;  %s13540_s15 = sadd.s32 4294967295, %s13197_s11   ;;  %s13197_s11 = sphi %s13525_s11, %s15793_s11   ;;  %s13193_s10 = sphi %s13523_s10, %s15795_s10   ;;  %s13189_s7 = sphi %s13521_s7, %s15797_s7   ;;  %s13185_s0 = sphi %s13519_s0, %s15796_s0  }
  0x67   : > { %15709 = sst [smem:[#allocation101_spill]] %s13193_s10  ;;  %s9845_s16 = sadd.s32 4294967294, %s13197_s11  }
  0x68   : > { %15710 = sst [smem:[#allocation102_spill]] %s13197_s11  ;;  %s13544_s18 = sadd.s32 1, %s13197_s11  }
  0x69   : > { %15711 = sst [smem:[#allocation103_spill]] %s13544_s18  ;;  %s1077_s22 = sadd.s32 1, %s13193_s10 }
  0x6a   : > { %s1074_s23 = ssub.s32 %s13197_s11, %s13544_s18  ;;  %p1087_p0 = scmp.ne.s32.totalorder %s13193_s10, %s13189_s7 }
  0x6b   : > { %p1075_p1 = scmp.eq.s32.totalorder %s1074_s23, 0  ;;  %p1088_p2 = scmp.eq.s32.totalorder %s13540_s15, 1 }
  0x6c   : > { %p1093_p3 = scmp.ne.s32.totalorder %s13189_s7, %s13185_s0  ;;  %p1094_p4 = scmp.eq.s32.totalorder %s9845_s16, 1 }
  0x6d   : > { %s13555_s26 = scalar_select %p1075_p1, %s13193_s10, %s1077_s22  }
  0x6e   : > { %p13557_p5 = por %p1088_p2, %p1087_p0  ;;  %p13561_p6 = por %p1094_p4, %p1093_p3 }
  0x6f   : > { %15712 = sst [smem:[#allocation104_spill]] %s13555_s26  ;;  %p9846_p7 = scmp.ge.s32.totalorder %s13197_s11, 1 }
  0x70   : > { %s15713_s28 = scalar_select %p13557_p5, 1, 0 }
  0x71   : > { %s15714_s1 = scalar_select %p13561_p6, 1, 0 }
  0x72   : > { %p1101_p8 = scmp.lt.s32.totalorder %s13197_s11, 3  ;;  %p15664_p9 = scmp.eq.s32.totalorder %s13540_s15, 0 }
  0x73   : > { %15715 = sst [smem:[#allocation105_spill]] %s15714_s1  ;;  %s13244_s23 = smov [#allocation5]  }
  0x74   : > { %p13568_p10 = pnand %p9846_p7, %p1101_p8  ;;  %s1128_s16 = sshll.u32 %s13244_s23, 4  ;;  %s1129_s16 = int_to_ptr.vmem [resolvable:$true] %s1128_s16 }
  0x75   : > { %s13245_s22 = smov [#allocation8]   ;;  %s13246_s18 = smov [#allocation11]  }
  0x76   : > { %s15716_s2 = scalar_select %p13568_p10, 1, 0 }
  0x77   : > { %p12016_p11 = pneg %p13568_p10  ;;  %s1152_s26 = sshll.u32 %s13245_s22, 4  ;;  %s1153_s26 = int_to_ptr.vmem [resolvable:$true] %s1152_s26 }
  0x78   : > { %s1176_s1 = sshll.u32 %s13246_s18, 4  ;;  %s12304_s23 = scalar_lea.vmem %s1129_s16, 32  ;;  %s1177_s1 = int_to_ptr.vmem [resolvable:$true] %s1176_s1 }
  0x79   : > { %p13576_p12 = pnand %p15664_p9, %p12016_p11  ;;  %p12305_p0 = scmp.ne.s32.totalorder %s1129_s16, %s12304_s23 }
  0x7a   : > { %p12312_p3 = scmp.lt.s32.totalorder %s1129_s16, %s1129_s16  ;;  %p12313_p4 = scmp.lt.s32.totalorder %s12304_s23, %s12304_s23 }
  0x7b   : > { %p13582_p13 = pneg %p13576_p12 }
  0x7c   : > { %p12314_p7 = por %p12313_p4, %p12312_p3 }
  0x7d   : > { %p12307_p1 = pnand %p12305_p0, %p13582_p13 }
  0x7f   : > { %p12308_p2 = pneg %p12307_p1 }
  0x81   : > { %p12315_p8 = pnand %p12314_p7, %p12308_p2 }
  0x83   : > { %12318 = shalt.err (!%p12315_p8)
}
  0x84   : > { %s15719_s17 = sld [smem:[#allocation70_spill]]  ;;  %s12330_s18 = scalar_lea.vmem %s1153_s26, 768 }
  0x85   : > { %p12331_p11 = scmp.ne.s32.totalorder %s1153_s26, %s12330_s18  ;;  %p12338_p5 = scmp.lt.s32.totalorder %s1153_s26, %s1153_s26 }
  0x86   : > { %p12339_p10 = scmp.lt.s32.totalorder %s12330_s18, %s12330_s18 }
  0x87   : > { %p12333_p9 = pnand %p12331_p11, %p13582_p13 }
  0x88   : > { %p12340_p0 = por %p12339_p10, %p12338_p5 }
  0x89   : > { %p12334_p6 = pneg %p12333_p9 }
  0x8a   : > { %12022 = dma.hbm_to_vmem [thread:$0]  (!%p13576_p12), %s15719_s17, 32, %s1129_s16, [#allocation6]  }
  0x8b   : > { %p12341_p1 = pnand %p12340_p0, %p12334_p6 }
  0x8d   : > { %12344 = shalt.err (!%p12341_p1)
}
  0x8e   : > { %s15668_s22 = smov 128   ;;  %s15720_s29 = sld [smem:[#allocation73_spill]] }
  0x8f   : > { %s15670_s23 = smov 8   ;;  %s12356_s16 = scalar_lea.vmem %s1177_s1, 1280 }
  0x90   : > { %p12357_p2 = scmp.ne.s32.totalorder %s1177_s1, %s12356_s16  ;;  %p12364_p4 = scmp.lt.s32.totalorder %s1177_s1, %s1177_s1 }
  0x91   : > { %p12365_p5 = scmp.lt.s32.totalorder %s12356_s16, %s12356_s16 }
  0x92   : > { %p12359_p9 = pnand %p12357_p2, %p13582_p13 }
  0x93   : > { %p12366_p6 = por %p12365_p5, %p12364_p4 }
  0x94   : > { %12028 = dma.hbm_to_vmem [thread:$0]  (!%p13576_p12), %s15720_s29, 768, %s1153_s26, [#allocation9], %s15668_s22, %s15668_s22, %s15670_s23  }
  0x95   : > { %p12360_p3 = pneg %p12359_p9 }
  0x97   : > { %p12367_p10 = pnand %p12366_p6, %p12360_p3 }
  0x99   : > { %12370 = shalt.err (!%p12367_p10)
}
  0x9a   : > { %12034 = dma.hbm_to_vmem [thread:$0]  (!%p13576_p12), %s13332_s8, 1280, %s1177_s1, [#allocation12], %s15668_s22, %s15668_s22, %s15670_s23  }
  0x9b   : > { %s13249_s26 = smov [#allocation14]   ;;  %s13250_s17 = smov [#allocation17]  }
  0x9c   : > { %s1204_s18 = sshll.u32 %s13249_s26, 4  ;;  %s1228_s29 = sshll.u32 %s13250_s17, 4  ;;  %s1205_s18 = int_to_ptr.vmem [resolvable:$true] %s1204_s18  ;;  %s1229_s29 = int_to_ptr.vmem [resolvable:$true] %s1228_s29 }
  0x9d   : > { %s12382_s11 = scalar_lea.vmem %s1205_s18, 32  ;;  %p12390_p0 = scmp.lt.s32.totalorder %s1205_s18, %s1205_s18 }
  0x9e   : > { %p12383_p7 = scmp.ne.s32.totalorder %s1205_s18, %s12382_s11  ;;  %p12391_p1 = scmp.lt.s32.totalorder %s12382_s11, %s12382_s11 }
  0xa0   : > { %p12385_p8 = pnand %p12383_p7, %p13582_p13  ;;  %p12392_p2 = por %p12391_p1, %p12390_p0 }
  0xa2   : > { %p12386_p11 = pneg %p12385_p8 }
  0xa4   : > { %p12393_p9 = pnand %p12392_p2, %p12386_p11 }
  0xa6   : > { %12396 = shalt.err (!%p12393_p9)
}
  0xa7   : > { %12040 = dma.hbm_to_vmem [thread:$0]  (!%p13576_p12), %s13347_s24, 32, %s1205_s18, [#allocation15]  }
  0xa8   : > { %s12408_s1 = scalar_lea.vmem %s1229_s29, 768  ;;  %p12416_p6 = scmp.lt.s32.totalorder %s1229_s29, %s1229_s29 }
  0xa9   : > { %p12409_p3 = scmp.ne.s32.totalorder %s1229_s29, %s12408_s1  ;;  %p12417_p10 = scmp.lt.s32.totalorder %s12408_s1, %s12408_s1 }
  0xab   : > { %p12411_p4 = pnand %p12409_p3, %p13582_p13  ;;  %p12418_p7 = por %p12417_p10, %p12416_p6 }
  0xad   : > { %p12412_p5 = pneg %p12411_p4 }
  0xaf   : > { %p12419_p8 = pnand %p12418_p7, %p12412_p5 }
  0xb1   : > { %12422 = shalt.err (!%p12419_p8)
}
  0xb2   : > { %12046 = dma.hbm_to_vmem [thread:$0]  (!%p13576_p12), %s13362_s12, 768, %s1229_s29, [#allocation18], %s15668_s22, %s15668_s22, %s15670_s23  }
  0xb3   : > { %s13251_s17 = smov [#allocation20]   ;;  %s13252_s16 = smov [#allocation23]  }
  0xb4   : > { %s1252_s11 = sshll.u32 %s13251_s17, 4  ;;  %s1276_s26 = sshll.u32 %s13252_s16, 4  ;;  %s1253_s11 = int_to_ptr.vmem [resolvable:$true] %s1252_s11  ;;  %s1277_s26 = int_to_ptr.vmem [resolvable:$true] %s1276_s26 }
  0xb5   : > { %s12434_s18 = scalar_lea.vmem %s1253_s11, 1280  ;;  %p12442_p2 = scmp.lt.s32.totalorder %s1253_s11, %s1253_s11 }
  0xb6   : > { %p12435_p11 = scmp.ne.s32.totalorder %s1253_s11, %s12434_s18  ;;  %p12443_p9 = scmp.lt.s32.totalorder %s12434_s18, %s12434_s18 }
  0xb8   : > { %p12437_p0 = pnand %p12435_p11, %p13582_p13  ;;  %p12444_p3 = por %p12443_p9, %p12442_p2 }
  0xba   : > { %p12438_p1 = pneg %p12437_p0 }
  0xbc   : > { %p12445_p4 = pnand %p12444_p3, %p12438_p1 }
  0xbe   : > { %12448 = shalt.err (!%p12445_p4)
}
  0xbf   : > { %12052 = dma.hbm_to_vmem [thread:$0]  (!%p13576_p12), %s13372_s27, 1280, %s1253_s11, [#allocation21], %s15668_s22, %s15668_s22, %s15670_s23  }
  0xc0   : > { %s12460_s29 = scalar_lea.vmem %s1277_s26, 1792  ;;  %p12468_p7 = scmp.lt.s32.totalorder %s1277_s26, %s1277_s26 }
  0xc1   : > { %p12461_p5 = scmp.ne.s32.totalorder %s1277_s26, %s12460_s29  ;;  %p12469_p8 = scmp.lt.s32.totalorder %s12460_s29, %s12460_s29 }
  0xc3   : > { %p12463_p6 = pnand %p12461_p5, %p13582_p13  ;;  %p12470_p11 = por %p12469_p8, %p12468_p7 }
  0xc5   : > { %p12464_p10 = pneg %p12463_p6 }
  0xc7   : > { %p12471_p0 = pnand %p12470_p11, %p12464_p10 }
  0xc9   : > { %12474 = shalt.err (!%p12471_p0)
}
  0xca   : > { %12058 = dma.hbm_to_vmem [thread:$0]  (!%p13576_p12), %s13382_s13, 1792, %s1277_s26, [#allocation24], %s15668_s22, %s15668_s22, %s15670_s23  }
  0xcb   : > { %s13253_s1 = smov [#allocation26]   ;;  %s13254_s11 = smov [#allocation29]  }
  0xcc   : > { %s1304_s17 = sshll.u32 %s13253_s1, 4  ;;  %s1328_s16 = sshll.u32 %s13254_s11, 4  ;;  %s1305_s17 = int_to_ptr.vmem [resolvable:$true] %s1304_s17  ;;  %s1329_s16 = int_to_ptr.vmem [resolvable:$true] %s1328_s16 }
  0xcd   : > { %s12486_s18 = scalar_lea.vmem %s1305_s17, 32  ;;  %p12494_p3 = scmp.lt.s32.totalorder %s1305_s17, %s1305_s17 }
  0xce   : > { %p12487_p1 = scmp.ne.s32.totalorder %s1305_s17, %s12486_s18  ;;  %p12495_p4 = scmp.lt.s32.totalorder %s12486_s18, %s12486_s18 }
  0xd0   : > { %p12489_p2 = pnand %p12487_p1, %p13582_p13  ;;  %p12496_p5 = por %p12495_p4, %p12494_p3 }
  0xd2   : > { %p12490_p9 = pneg %p12489_p2 }
  0xd4   : > { %p12497_p6 = pnand %p12496_p5, %p12490_p9 }
  0xd6   : > { %12500 = shalt.err (!%p12497_p6)
}
  0xd7   : > { %12064 = dma.hbm_to_vmem [thread:$0]  (!%p13576_p12), %s13397_s21, 32, %s1305_s17, [#allocation27]  }
  0xd8   : > { %s12512_s26 = scalar_lea.vmem %s1329_s16, 32  ;;  %p12520_p11 = scmp.lt.s32.totalorder %s1329_s16, %s1329_s16 }
  0xd9   : > { %p12513_p10 = scmp.ne.s32.totalorder %s1329_s16, %s12512_s26  ;;  %p12521_p0 = scmp.lt.s32.totalorder %s12512_s26, %s12512_s26 }
  0xdb   : > { %p12515_p7 = pnand %p12513_p10, %p13582_p13  ;;  %p12522_p1 = por %p12521_p0, %p12520_p11 }
  0xdd   : > { %p12516_p8 = pneg %p12515_p7 }
  0xdf   : > { %p12523_p2 = pnand %p12522_p1, %p12516_p8 }
  0xe1   : > { %12526 = shalt.err (!%p12523_p2)
}
  0xe2   : > { %12070 = dma.hbm_to_vmem [thread:$0]  (!%p13576_p12), %s13407_s30, 32, %s1329_s16, [#allocation30]  }
  0xe3   : > { %s13255_s29 = smov [#allocation32]   ;;  %s13256_s17 = smov [#allocation35]  }
  0xe4   : > { %s1352_s1 = sshll.u32 %s13255_s29, 4  ;;  %s1376_s11 = sshll.u32 %s13256_s17, 4  ;;  %s1353_s1 = int_to_ptr.vmem [resolvable:$true] %s1352_s1  ;;  %s1377_s11 = int_to_ptr.vmem [resolvable:$true] %s1376_s11 }
  0xe5   : > { %s12538_s18 = scalar_lea.vmem %s1353_s1, 32  ;;  %p12546_p5 = scmp.lt.s32.totalorder %s1353_s1, %s1353_s1 }
  0xe6   : > { %p12539_p9 = scmp.ne.s32.totalorder %s1353_s1, %s12538_s18  ;;  %p12547_p6 = scmp.lt.s32.totalorder %s12538_s18, %s12538_s18 }
  0xe8   : > { %p12541_p3 = pnand %p12539_p9, %p13582_p13  ;;  %p12548_p10 = por %p12547_p6, %p12546_p5 }
  0xea   : > { %p12542_p4 = pneg %p12541_p3 }
  0xec   : > { %p12549_p7 = pnand %p12548_p10, %p12542_p4 }
  0xee   : > { %12552 = shalt.err (!%p12549_p7)
}
  0xef   : > { %s15721_s4 = sld [smem:[#allocation85_spill]]  ;;  %s12564_s16 = scalar_lea.vmem %s1377_s11, 32 }
  0xf0   : > { %p12565_p8 = scmp.ne.s32.totalorder %s1377_s11, %s12564_s16  ;;  %p12572_p1 = scmp.lt.s32.totalorder %s1377_s11, %s1377_s11 }
  0xf1   : > { %p12573_p2 = scmp.lt.s32.totalorder %s12564_s16, %s12564_s16 }
  0xf2   : > { %p12567_p11 = pnand %p12565_p8, %p13582_p13 }
  0xf3   : > { %p12574_p9 = por %p12573_p2, %p12572_p1 }
  0xf4   : > { %p12568_p0 = pneg %p12567_p11 }
  0xf5   : > { %12076 = dma.hbm_to_vmem [thread:$0]  (!%p13576_p12), %s15721_s4, 32, %s1353_s1, [#allocation33]  }
  0xf6   : > { %p12575_p3 = pnand %p12574_p9, %p12568_p0 }
  0xf8   : > { %12578 = shalt.err (!%p12575_p3)
}
  0xf9   : > { %12082 = dma.hbm_to_vmem [thread:$0]  (!%p13576_p12), %s13427_s20, 32, %s1377_s11, [#allocation36]  }
  0xfa   : > { %s13257_s26 = smov [#allocation38]   ;;  %s13258_s1 = smov [#allocation41]  }
  0xfb   : > { %s1400_s29 = sshll.u32 %s13257_s26, 4  ;;  %s1424_s17 = sshll.u32 %s13258_s1, 4  ;;  %s1401_s29 = int_to_ptr.vmem [resolvable:$true] %s1400_s29  ;;  %s1425_s17 = int_to_ptr.vmem [resolvable:$true] %s1424_s17 }
  0xfc   : > { %s12590_s18 = scalar_lea.vmem %s1401_s29, 1536  ;;  %p12598_p10 = scmp.lt.s32.totalorder %s1401_s29, %s1401_s29 }
  0xfd   : > { %p12591_p4 = scmp.ne.s32.totalorder %s1401_s29, %s12590_s18  ;;  %p12599_p7 = scmp.lt.s32.totalorder %s12590_s18, %s12590_s18 }
  0xff   : > { %p12593_p5 = pnand %p12591_p4, %p13582_p13  ;;  %p12600_p8 = por %p12599_p7, %p12598_p10 }
 0x101   : > { %p12594_p6 = pneg %p12593_p5 }
 0x103   : > { %p12601_p11 = pnand %p12600_p8, %p12594_p6 }
 0x105   : > { %12604 = shalt.err (!%p12601_p11)
}
 0x106   : > { %s15722_s5 = sld [smem:[#allocation89_spill]]  ;;  %s12616_s11 = scalar_lea.vmem %s1425_s17, 2560 }
 0x107   : > { %p12617_p0 = scmp.ne.s32.totalorder %s1425_s17, %s12616_s11  ;;  %p12624_p9 = scmp.lt.s32.totalorder %s1425_s17, %s1425_s17 }
 0x108   : > { %p12625_p3 = scmp.lt.s32.totalorder %s12616_s11, %s12616_s11 }
 0x109   : > { %p12619_p1 = pnand %p12617_p0, %p13582_p13 }
 0x10a   : > { %p12626_p4 = por %p12625_p3, %p12624_p9 }
 0x10b   : > { %p12620_p2 = pneg %p12619_p1 }
 0x10c   : > { %12088 = dma.hbm_to_vmem [thread:$0]  (!%p13576_p12), %s15722_s5, 1536, %s1401_s29, [#allocation39], %s15668_s22, %s15668_s22, %s15670_s23  }
 0x10d   : > { %p12627_p5 = pnand %p12626_p4, %p12620_p2 }
 0x10f   : > { %12630 = shalt.err (!%p12627_p5)
}
 0x110   : > { %12094 = dma.hbm_to_vmem [thread:$0]  (!%p13576_p12), %s13452_s19, 2560, %s1425_s17, [#allocation42], %s15668_s22, %s15668_s22, %s15670_s23  }
 0x111   : > { %s13259_s16 = smov [#allocation44]   ;;  %s13260_s29 = smov [#allocation2]  }
 0x112   : > { %s1448_s26 = sshll.u32 %s13259_s16, 4  ;;  %s1114_s1 = sshll.u32 %s13260_s29, 4  ;;  %s1449_s26 = int_to_ptr.vmem [resolvable:$true] %s1448_s26  ;;  %s1115_s1 = int_to_ptr.vmem [resolvable:$true] %s1114_s1 }
 0x113   : > { %s12642_s18 = scalar_lea.vmem %s1449_s26, 3584  ;;  %p12650_p8 = scmp.lt.s32.totalorder %s1449_s26, %s1449_s26 }
 0x114   : > { %p12643_p6 = scmp.ne.s32.totalorder %s1449_s26, %s12642_s18  ;;  %p12651_p11 = scmp.lt.s32.totalorder %s12642_s18, %s12642_s18 }
 0x116   : > { %p12645_p10 = pnand %p12643_p6, %p13582_p13  ;;  %p12652_p0 = por %p12651_p11, %p12650_p8 }
 0x118   : > { %p12646_p7 = pneg %p12645_p10 }
 0x11a   : > { %p12653_p1 = pnand %p12652_p0, %p12646_p7 }
 0x11c   : > { %12656 = shalt.err (!%p12653_p1)
}
 0x11d   : > { %s15723_s3 = sld [smem:[#allocation92_spill]]  ;;  %s12668_s17 = scalar_lea.vmem %s1115_s1, 16 }
 0x11e   : > { %p12669_p2 = scmp.ne.s32.totalorder %s1115_s1, %s12668_s17  ;;  %s12675_s11 = scalar_lea.vmem %s1115_s1, 32 }
 0x11f   : > { %p12676_p4 = scmp.lt.s32.totalorder %s1115_s1, %s1115_s1  ;;  %p12677_p5 = scmp.lt.s32.totalorder %s12675_s11, %s12668_s17 }
 0x120   : > { %p12671_p9 = pnand %p12669_p2, %p13582_p13 }
 0x121   : > { %p12678_p6 = por %p12677_p5, %p12676_p4 }
 0x122   : > { %p12672_p3 = pneg %p12671_p9 }
 0x123   : > { %12100 = dma.hbm_to_vmem [thread:$0]  (!%p13576_p12), %s15723_s3, 3584, %s1449_s26, [#allocation45], %s15668_s22, %s15668_s22, %s15670_s23  }
 0x124   : > { %p12679_p10 = pnand %p12678_p6, %p12672_p3 }
 0x126   : > { %12682 = shalt.err (!%p12679_p10)
}
 0x127   : > { %s15724_s16 = sld [smem:[#allocation68_spill]]  ;;  %s13261_s29 = smov [#allocation7]  }
 0x128   : > { %s1142_s18 = sshll.u32 %s13261_s29, 4  ;;  %s13262_s26 = smov [#allocation10]   ;;  %s1143_s18 = int_to_ptr.vmem [resolvable:$true] %s1142_s18 }
 0x129   : > { %s1166_s22 = sshll.u32 %s13262_s26, 4  ;;  %s12694_s23 = scalar_lea.vmem %s1143_s18, 32  ;;  %s1167_s22 = int_to_ptr.vmem [resolvable:$true] %s1166_s22 }
 0x12a   : > { %p12695_p7 = scmp.ne.s32.totalorder %s1143_s18, %s12694_s23  ;;  %p12702_p0 = scmp.lt.s32.totalorder %s1143_s18, %s1143_s18 }
 0x12b   : > { %p12703_p1 = scmp.lt.s32.totalorder %s12694_s23, %s12694_s23 }
 0x12c   : > { %p12697_p8 = pnand %p12695_p7, %p13582_p13 }
 0x12d   : > { %12019 = dma.hbm_to_vmem [thread:$0]  (!%p13576_p12), %s15724_s16, 16, %s1115_s1, [#allocation3]  }
 0x12e   : > { %p12698_p11 = pneg %p12697_p8  ;;  %p12704_p2 = por %p12703_p1, %p12702_p0 }
 0x130   : > { %p12705_p9 = pnand %p12704_p2, %p12698_p11 }
 0x132   : > { %12708 = shalt.err (!%p12705_p9)
}
 0x133   : > { %s15725_s17 = sld [smem:[#allocation72_spill]]  ;;  %s12720_s1 = scalar_lea.vmem %s1167_s22, 32 }
 0x134   : > { %p12721_p3 = scmp.ne.s32.totalorder %s1167_s22, %s12720_s1  ;;  %p12728_p6 = scmp.lt.s32.totalorder %s1167_s22, %s1167_s22 }
 0x135   : > { %p12729_p10 = scmp.lt.s32.totalorder %s12720_s1, %s12720_s1 }
 0x136   : > { %p12723_p4 = pnand %p12721_p3, %p13582_p13 }
 0x137   : > { %p12730_p7 = por %p12729_p10, %p12728_p6 }
 0x138   : > { %p12724_p5 = pneg %p12723_p4 }
 0x139   : > { %12025 = dma.hbm_to_vmem [thread:$0]  (!%p13576_p12), %s15725_s17, 32, %s1143_s18, [#allocation6]  }
 0x13a   : > { %p12731_p8 = pnand %p12730_p7, %p12724_p5 }
 0x13c   : > { %12734 = shalt.err (!%p12731_p8)
}
 0x13d   : > { %s15726_s23 = sld [smem:[#allocation74_spill]]  ;;  %s13263_s11 = smov [#allocation13]  }
 0x13e   : > { %s1190_s16 = sshll.u32 %s13263_s11, 4  ;;  %s13264_s29 = smov [#allocation16]   ;;  %s1191_s16 = int_to_ptr.vmem [resolvable:$true] %s1190_s16 }
 0x13f   : > { %s1218_s18 = sshll.u32 %s13264_s29, 4  ;;  %s12746_s26 = scalar_lea.vmem %s1191_s16, 32  ;;  %s1219_s18 = int_to_ptr.vmem [resolvable:$true] %s1218_s18 }
 0x140   : > { %p12747_p11 = scmp.ne.s32.totalorder %s1191_s16, %s12746_s26  ;;  %p12754_p2 = scmp.lt.s32.totalorder %s1191_s16, %s1191_s16 }
 0x141   : > { %p12755_p9 = scmp.lt.s32.totalorder %s12746_s26, %s12746_s26 }
 0x142   : > { %p12749_p0 = pnand %p12747_p11, %p13582_p13 }
 0x143   : > { %12031 = dma.hbm_to_vmem [thread:$0]  (!%p13576_p12), %s15726_s23, 32, %s1167_s22, [#allocation9]  }
 0x144   : > { %p12750_p1 = pneg %p12749_p0  ;;  %p12756_p3 = por %p12755_p9, %p12754_p2 }
 0x146   : > { %p12757_p4 = pnand %p12756_p3, %p12750_p1 }
 0x148   : > { %12760 = shalt.err (!%p12757_p4)
}
 0x149   : > { %s15727_s17 = sld [smem:[#allocation75_spill]]  ;;  %s12772_s22 = scalar_lea.vmem %s1219_s18, 32 }
 0x14a   : > { %p12773_p5 = scmp.ne.s32.totalorder %s1219_s18, %s12772_s22  ;;  %p12780_p7 = scmp.lt.s32.totalorder %s1219_s18, %s1219_s18 }
 0x14b   : > { %p12781_p8 = scmp.lt.s32.totalorder %s12772_s22, %s12772_s22 }
 0x14c   : > { %p12775_p6 = pnand %p12773_p5, %p13582_p13 }
 0x14d   : > { %p12782_p11 = por %p12781_p8, %p12780_p7 }
 0x14e   : > { %p12776_p10 = pneg %p12775_p6 }
 0x14f   : > { %12037 = dma.hbm_to_vmem [thread:$0]  (!%p13576_p12), %s15727_s17, 32, %s1191_s16, [#allocation12]  }
 0x150   : > { %p12783_p0 = pnand %p12782_p11, %p12776_p10 }
 0x152   : > { %12786 = shalt.err (!%p12783_p0)
}
 0x153   : > { %s15728_s1 = sld [smem:[#allocation78_spill]]  ;;  %s13265_s23 = smov [#allocation19]  }
 0x154   : > { %s1242_s11 = sshll.u32 %s13265_s23, 4  ;;  %s13266_s16 = smov [#allocation22]   ;;  %s1243_s11 = int_to_ptr.vmem [resolvable:$true] %s1242_s11 }
 0x155   : > { %s1266_s29 = sshll.u32 %s13266_s16, 4  ;;  %s12798_s26 = scalar_lea.vmem %s1243_s11, 32  ;;  %s1267_s29 = int_to_ptr.vmem [resolvable:$true] %s1266_s29 }
 0x156   : > { %p12799_p1 = scmp.ne.s32.totalorder %s1243_s11, %s12798_s26  ;;  %p12806_p3 = scmp.lt.s32.totalorder %s1243_s11, %s1243_s11 }
 0x157   : > { %p12807_p4 = scmp.lt.s32.totalorder %s12798_s26, %s12798_s26 }
 0x158   : > { %p12801_p2 = pnand %p12799_p1, %p13582_p13 }
 0x159   : > { %12043 = dma.hbm_to_vmem [thread:$0]  (!%p13576_p12), %s15728_s1, 32, %s1219_s18, [#allocation15]  }
 0x15a   : > { %p12802_p9 = pneg %p12801_p2  ;;  %p12808_p5 = por %p12807_p4, %p12806_p3 }
 0x15c   : > { %p12809_p6 = pnand %p12808_p5, %p12802_p9 }
 0x15e   : > { %12812 = shalt.err (!%p12809_p6)
}
 0x15f   : > { %s15729_s17 = sld [smem:[#allocation79_spill]]  ;;  %s12824_s18 = scalar_lea.vmem %s1267_s29, 32 }
 0x160   : > { %p12825_p10 = scmp.ne.s32.totalorder %s1267_s29, %s12824_s18  ;;  %p12832_p11 = scmp.lt.s32.totalorder %s1267_s29, %s1267_s29 }
 0x161   : > { %p12833_p0 = scmp.lt.s32.totalorder %s12824_s18, %s12824_s18 }
 0x162   : > { %p12827_p7 = pnand %p12825_p10, %p13582_p13 }
 0x163   : > { %p12834_p1 = por %p12833_p0, %p12832_p11 }
 0x164   : > { %p12828_p8 = pneg %p12827_p7 }
 0x165   : > { %12049 = dma.hbm_to_vmem [thread:$0]  (!%p13576_p12), %s15729_s17, 32, %s1243_s11, [#allocation18]  }
 0x166   : > { %p12835_p2 = pnand %p12834_p1, %p12828_p8 }
 0x168   : > { %12838 = shalt.err (!%p12835_p2)
}
 0x169   : > { %s15730_s22 = sld [smem:[#allocation80_spill]]  ;;  %s13267_s1 = smov [#allocation25]  }
 0x16a   : > { %s1290_s23 = sshll.u32 %s13267_s1, 4  ;;  %s13268_s11 = smov [#allocation28]   ;;  %s1291_s23 = int_to_ptr.vmem [resolvable:$true] %s1290_s23 }
 0x16b   : > { %s1314_s16 = sshll.u32 %s13268_s11, 4  ;;  %s12850_s26 = scalar_lea.vmem %s1291_s23, 32  ;;  %s1315_s16 = int_to_ptr.vmem [resolvable:$true] %s1314_s16 }
 0x16c   : > { %p12851_p9 = scmp.ne.s32.totalorder %s1291_s23, %s12850_s26  ;;  %p12858_p5 = scmp.lt.s32.totalorder %s1291_s23, %s1291_s23 }
 0x16d   : > { %p12859_p6 = scmp.lt.s32.totalorder %s12850_s26, %s12850_s26 }
 0x16e   : > { %p12853_p3 = pnand %p12851_p9, %p13582_p13 }
 0x16f   : > { %12055 = dma.hbm_to_vmem [thread:$0]  (!%p13576_p12), %s15730_s22, 32, %s1267_s29, [#allocation21]  }
 0x170   : > { %p12854_p4 = pneg %p12853_p3  ;;  %p12860_p10 = por %p12859_p6, %p12858_p5 }
 0x172   : > { %p12861_p7 = pnand %p12860_p10, %p12854_p4 }
 0x174   : > { %12864 = shalt.err (!%p12861_p7)
}
 0x175   : > { %s15731_s17 = sld [smem:[#allocation81_spill]]  ;;  %s12876_s29 = scalar_lea.vmem %s1315_s16, 768 }
 0x176   : > { %p12877_p8 = scmp.ne.s32.totalorder %s1315_s16, %s12876_s29  ;;  %p12884_p1 = scmp.lt.s32.totalorder %s1315_s16, %s1315_s16 }
 0x177   : > { %p12885_p2 = scmp.lt.s32.totalorder %s12876_s29, %s12876_s29 }
 0x178   : > { %p12879_p11 = pnand %p12877_p8, %p13582_p13 }
 0x179   : > { %p12886_p9 = por %p12885_p2, %p12884_p1 }
 0x17a   : > { %p12880_p0 = pneg %p12879_p11 }
 0x17b   : > { %12061 = dma.hbm_to_vmem [thread:$0]  (!%p13576_p12), %s15731_s17, 32, %s1291_s23, [#allocation24]  }
 0x17c   : > { %p12887_p3 = pnand %p12886_p9, %p12880_p0 }
 0x17e   : > { %12890 = shalt.err (!%p12887_p3)
}
 0x17f   : > { %s15732_s18 = smov 8   ;;  %s15733_s22 = smov 128  }
 0x180   : > { %s15734_s1 = sld [smem:[#allocation83_spill]]  ;;  %s13269_s23 = smov [#allocation31]  }
 0x181   : > { %s1338_s11 = sshll.u32 %s13269_s23, 4  ;;  %s13270_s26 = smov [#allocation34]   ;;  %s1339_s11 = int_to_ptr.vmem [resolvable:$true] %s1338_s11 }
 0x182   : > { %s1362_s17 = sshll.u32 %s13270_s26, 4  ;;  %s12902_s3 = scalar_lea.vmem %s1339_s11, 1280  ;;  %s1363_s17 = int_to_ptr.vmem [resolvable:$true] %s1362_s17 }
 0x183   : > { %p12903_p4 = scmp.ne.s32.totalorder %s1339_s11, %s12902_s3  ;;  %p12910_p10 = scmp.lt.s32.totalorder %s1339_s11, %s1339_s11 }
 0x184   : > { %p12911_p7 = scmp.lt.s32.totalorder %s12902_s3, %s12902_s3 }
 0x185   : > { %p12905_p5 = pnand %p12903_p4, %p13582_p13 }
 0x186   : > { %12067 = dma.hbm_to_vmem [thread:$0]  (!%p13576_p12), %s15734_s1, 768, %s1315_s16, [#allocation27], %s15733_s22, %s15733_s22, %s15732_s18  }
 0x187   : > { %p12906_p6 = pneg %p12905_p5  ;;  %p12912_p8 = por %p12911_p7, %p12910_p10 }
 0x189   : > { %p12913_p11 = pnand %p12912_p8, %p12906_p6 }
 0x18b   : > { %12916 = shalt.err (!%p12913_p11)
}
 0x18c   : > { %s15735_s16 = sld [smem:[#allocation84_spill]]  ;;  %s12928_s29 = scalar_lea.vmem %s1363_s17, 1792 }
 0x18d   : > { %p12929_p0 = scmp.ne.s32.totalorder %s1363_s17, %s12928_s29  ;;  %p12936_p9 = scmp.lt.s32.totalorder %s1363_s17, %s1363_s17 }
 0x18e   : > { %p12937_p3 = scmp.lt.s32.totalorder %s12928_s29, %s12928_s29 }
 0x18f   : > { %p12931_p1 = pnand %p12929_p0, %p13582_p13 }
 0x190   : > { %p12938_p4 = por %p12937_p3, %p12936_p9 }
 0x191   : > { %p12932_p2 = pneg %p12931_p1 }
 0x192   : > { %12073 = dma.hbm_to_vmem [thread:$0]  (!%p13576_p12), %s15735_s16, 1280, %s1339_s11, [#allocation30], %s15733_s22, %s15733_s22, %s15732_s18  }
 0x193   : > { %p12939_p5 = pnand %p12938_p4, %p12932_p2 }
 0x195   : > { %12942 = shalt.err (!%p12939_p5)
}
 0x196   : > { %s15736_s3 = sld [smem:[#allocation86_spill]]  ;;  %s13271_s1 = smov [#allocation37]  }
 0x197   : > { %s1390_s23 = sshll.u32 %s13271_s1, 4  ;;  %s13272_s11 = smov [#allocation40]   ;;  %s1391_s23 = int_to_ptr.vmem [resolvable:$true] %s1390_s23 }
 0x198   : > { %s1414_s26 = sshll.u32 %s13272_s11, 4  ;;  %s12954_s16 = scalar_lea.vmem %s1391_s23, 32  ;;  %s1415_s26 = int_to_ptr.vmem [resolvable:$true] %s1414_s26 }
 0x199   : > { %p12955_p6 = scmp.ne.s32.totalorder %s1391_s23, %s12954_s16  ;;  %p12962_p8 = scmp.lt.s32.totalorder %s1391_s23, %s1391_s23 }
 0x19a   : > { %p12963_p11 = scmp.lt.s32.totalorder %s12954_s16, %s12954_s16 }
 0x19b   : > { %p12957_p10 = pnand %p12955_p6, %p13582_p13 }
 0x19c   : > { %12079 = dma.hbm_to_vmem [thread:$0]  (!%p13576_p12), %s15736_s3, 1792, %s1363_s17, [#allocation33], %s15733_s22, %s15733_s22, %s15732_s18  }
 0x19d   : > { %p12958_p7 = pneg %p12957_p10  ;;  %p12964_p0 = por %p12963_p11, %p12962_p8 }
 0x19f   : > { %p12965_p1 = pnand %p12964_p0, %p12958_p7 }
 0x1a1   : > { %12968 = shalt.err (!%p12965_p1)
}
 0x1a2   : > { %s15737_s29 = sld [smem:[#allocation88_spill]]  ;;  %s12980_s17 = scalar_lea.vmem %s1415_s26, 32 }
 0x1a3   : > { %p12981_p2 = scmp.ne.s32.totalorder %s1415_s26, %s12980_s17  ;;  %p12988_p4 = scmp.lt.s32.totalorder %s1415_s26, %s1415_s26 }
 0x1a4   : > { %p12989_p5 = scmp.lt.s32.totalorder %s12980_s17, %s12980_s17 }
 0x1a5   : > { %p12983_p9 = pnand %p12981_p2, %p13582_p13 }
 0x1a6   : > { %p12990_p6 = por %p12989_p5, %p12988_p4 }
 0x1a7   : > { %p12984_p3 = pneg %p12983_p9 }
 0x1a8   : > { %12085 = dma.hbm_to_vmem [thread:$0]  (!%p13576_p12), %s15737_s29, 32, %s1391_s23, [#allocation36]  }
 0x1a9   : > { %p12991_p10 = pnand %p12990_p6, %p12984_p3 }
 0x1ab   : > { %12994 = shalt.err (!%p12991_p10)
}
 0x1ac   : > { %s15738_s3 = sld [smem:[#allocation90_spill]]  ;;  %s13273_s1 = smov [#allocation43]  }
 0x1ad   : > { %s1438_s11 = sshll.u32 %s13273_s1, 4  ;;  %s13274_s23 = smov [#allocation46]   ;;  %s1439_s11 = int_to_ptr.vmem [resolvable:$true] %s1438_s11 }
 0x1ae   : > { %s1470_s16 = sshll.u32 %s13274_s23, 4  ;;  %s13006_s29 = scalar_lea.vmem %s1439_s11, 32  ;;  %s1471_s16 = int_to_ptr.vmem [resolvable:$true] %s1470_s16 }
 0x1af   : > { %p13007_p7 = scmp.ne.s32.totalorder %s1439_s11, %s13006_s29  ;;  %p13014_p0 = scmp.lt.s32.totalorder %s1439_s11, %s1439_s11 }
 0x1b0   : > { %p13015_p1 = scmp.lt.s32.totalorder %s13006_s29, %s13006_s29 }
 0x1b1   : > { %p13009_p8 = pnand %p13007_p7, %p13582_p13 }
 0x1b2   : > { %12091 = dma.hbm_to_vmem [thread:$0]  (!%p13576_p12), %s15738_s3, 32, %s1415_s26, [#allocation39]  }
 0x1b3   : > { %p13010_p11 = pneg %p13009_p8  ;;  %p13016_p2 = por %p13015_p1, %p13014_p0 }
 0x1b5   : > { %p13017_p9 = pnand %p13016_p2, %p13010_p11 }
 0x1b7   : > { %13020 = shalt.err (!%p13017_p9)
}
 0x1b8   : > { %s15739_s17 = sld [smem:[#allocation91_spill]]  ;;  %s13032_s26 = scalar_lea.vmem %s1471_s16, 3072 }
 0x1b9   : > { %p13033_p3 = scmp.ne.s32.totalorder %s1471_s16, %s13032_s26  ;;  %p13040_p6 = scmp.lt.s32.totalorder %s1471_s16, %s1471_s16 }
 0x1ba   : > { %p13041_p10 = scmp.lt.s32.totalorder %s13032_s26, %s13032_s26 }
 0x1bb   : > { %p13035_p4 = pnand %p13033_p3, %p13582_p13 }
 0x1bc   : > { %p13042_p7 = por %p13041_p10, %p13040_p6 }
 0x1bd   : > { %p13036_p5 = pneg %p13035_p4 }
 0x1be   : > { %12097 = dma.hbm_to_vmem [thread:$0]  (!%p13576_p12), %s15739_s17, 32, %s1439_s11, [#allocation42]  }
 0x1bf   : > { %p13043_p8 = pnand %p13042_p7, %p13036_p5 }
 0x1c1   : > { %13046 = shalt.err (!%p13043_p8)
}
 0x1c2   : > { %s15740_s3 = sld [smem:[#allocation96_spill]]  ;;  %s13275_s1 = smov [#allocation47]  }
 0x1c3   : > { %s1490_s11 = sshll.u32 %s13275_s1, 4  ;;  %s1491_s11 = int_to_ptr.vmem [resolvable:$true] %s1490_s11 }
 0x1c4   : > { %s13058_s23 = scalar_lea.vmem %s1491_s11, 32  ;;  %p13066_p2 = scmp.lt.s32.totalorder %s1491_s11, %s1491_s11 }
 0x1c5   : > { %p13059_p11 = scmp.ne.s32.totalorder %s1491_s11, %s13058_s23  ;;  %p13067_p9 = scmp.lt.s32.totalorder %s13058_s23, %s13058_s23 }
 0x1c7   : > { %p13061_p0 = pnand %p13059_p11, %p13582_p13  ;;  %p13068_p3 = por %p13067_p9, %p13066_p2 }
 0x1c8   : > { %12103 = dma.hbm_to_vmem [thread:$0]  (!%p13576_p12), %s15740_s3, 3072, %s1471_s16, [#allocation45], %s15733_s22, %s15733_s22, %s15732_s18  }
 0x1c9   : > { %p13062_p1 = pneg %p13061_p0 }
 0x1cb   : > { %p13069_p4 = pnand %p13068_p3, %p13062_p1 }
 0x1cd   : > { %13072 = shalt.err (!%p13069_p4)
}
 0x1ce   : > { %s15741_s29 = sld [smem:[#allocation99_spill]]  ;;  %p15742_p5 = scmp.ne.s32.totalorder %s15716_s2, 0 }
 0x1cf   : > { %p15743_p6 = scmp.eq.s32.totalorder (!%p15742_p5), %s13540_s15, 0 }
 0x1d0   : > { %1520 = sbr.rel (%p15742_p5) target bundleno = 4057 (0xfd9), region = 200 }
 0x1d4   : > { %12106 = dma.hbm_to_vmem [thread:$0]  (!%p13576_p12), %s15741_s29, 32, %s1491_s11, [#allocation48]  }
 0x1d5   : > { %13116 = dma.done.wait (%p15743_p6), [#allocation3], 16   ;;  %p15744_p10 = pmov %p15743_p6 }
 0x1d6   : > { %p15745_p13 = pmov %p15743_p6 }
 0x1d7   : > { %13118 = vsyncadd (%p15744_p10), [#allocation3], 4294967280 }
 0x1d8   : > { %13120 = dma.done.wait (%p15745_p13), [#allocation6], 64   ;;  %p15746_p7 = pmov %p15743_p6 }
 0x1d9   : > { %p15747_p8 = pmov %p15743_p6 }
 0x1da   : > { %13122 = vsyncadd (%p15746_p7), [#allocation6], 4294967232 }
 0x1db   : > { %13124 = dma.done.wait (%p15747_p8), [#allocation9], 800   ;;  %p15748_p12 = pmov %p15743_p6 }
 0x1dc   : > { %p15749_p11 = pmov %p15743_p6 }
 0x1dd   : > { %13126 = vsyncadd (%p15748_p12), [#allocation9], 4294966496 }
 0x1de   : > { %13128 = dma.done.wait (%p15749_p11), [#allocation12], 1312   ;;  %p15750_p0 = pmov %p15743_p6 }
 0x1e0   : > { %13130 = vsyncadd (%p15750_p0), [#allocation12], 4294965984  ;;  %p15751_p1 = pmov %p15750_p0 }
 0x1e1   : > { %p15752_p2 = pmov %p15750_p0 }
 0x1e2   : > { %13132 = dma.done.wait (%p15751_p1), [#allocation15], 64  }
 0x1e3   : > { %13134 = vsyncadd (%p15752_p2), [#allocation15], 4294967232  ;;  %p15753_p9 = pmov %p15750_p0 }
 0x1e4   : > { %p15754_p3 = pmov %p15750_p0 }
 0x1e5   : > { %13136 = dma.done.wait (%p15753_p9), [#allocation18], 800  }
 0x1e6   : > { %13138 = vsyncadd (%p15754_p3), [#allocation18], 4294966496  ;;  %p15755_p4 = pmov %p15750_p0 }
 0x1e7   : > { %p15756_p5 = pmov %p15750_p0 }
 0x1e8   : > { %13140 = dma.done.wait (%p15755_p4), [#allocation21], 1312  }
 0x1e9   : > { %13142 = vsyncadd (%p15756_p5), [#allocation21], 4294965984  ;;  %p15757_p6 = pmov %p15750_p0 }
 0x1ea   : > { %p15758_p10 = pmov %p15750_p0 }
 0x1eb   : > { %13144 = dma.done.wait (%p15757_p6), [#allocation24], 1824  }
 0x1ec   : > { %13146 = vsyncadd (%p15758_p10), [#allocation24], 4294965472  ;;  %p15759_p13 = pmov %p15750_p0 }
 0x1ed   : > { %p15760_p7 = pmov %p15750_p0 }
 0x1ee   : > { %13148 = dma.done.wait (%p15759_p13), [#allocation27], 800  }
 0x1ef   : > { %13150 = vsyncadd (%p15760_p7), [#allocation27], 4294966496  ;;  %p15761_p8 = pmov %p15750_p0 }
 0x1f0   : > { %p15762_p12 = pmov %p15750_p0 }
 0x1f1   : > { %13152 = dma.done.wait (%p15761_p8), [#allocation30], 1312  }
 0x1f2   : > { %13154 = vsyncadd (%p15762_p12), [#allocation30], 4294965984  ;;  %p15763_p11 = pmov %p15750_p0 }
 0x1f4   : > { %13156 = dma.done.wait (%p15763_p11), [#allocation33], 1824  }
 0x1f5   : > { %13158 = vsyncadd (%p15750_p0), [#allocation33], 4294965472  ;;  %p15764_p1 = pmov %p15750_p0 }
 0x1f6   : > { %p15765_p2 = pmov %p15750_p0 }
 0x1f7   : > { %13160 = dma.done.wait (%p15764_p1), [#allocation36], 64  }
 0x1f8   : > { %13162 = vsyncadd (%p15765_p2), [#allocation36], 4294967232  ;;  %p15766_p9 = pmov %p15750_p0 }
 0x1f9   : > { %p15767_p3 = pmov %p15750_p0 }
 0x1fa   : > { %13164 = dma.done.wait (%p15766_p9), [#allocation39], 1568  }
 0x1fb   : > { %13166 = vsyncadd (%p15767_p3), [#allocation39], 4294965728  ;;  %p15768_p4 = pmov %p15750_p0 }
 0x1fc   : > { %p15769_p5 = pmov %p15750_p0 }
 0x1fd   : > { %13168 = dma.done.wait (%p15768_p4), [#allocation42], 2592  }
 0x1fe   : > { %13170 = vsyncadd (%p15769_p5), [#allocation42], 4294964704  ;;  %p15770_p6 = pmov %p15750_p0 }
 0x1ff   : > { %p15771_p10 = pmov %p15750_p0 }
 0x200   : > { %13172 = dma.done.wait (%p15770_p6), [#allocation45], 6656  }
 0x201   : > { %13174 = vsyncadd (%p15771_p10), [#allocation45], 4294960640  ;;  %p15772_p13 = pmov %p15750_p0 }
 0x202   : > { %p15773_p7 = pmov %p15750_p0 }
 0x203   : > { %13176 = dma.done.wait (%p15772_p13), [#allocation48], 32  }
 0x204   : > { %13178 = vsyncadd (%p15773_p7), [#allocation48], 4294967264  ;;  %s15774_s0 = sld [smem:[#allocation67_spill]]  ;;  %p1743_p8 = scmp.lt.s32.totalorder %s13540_s15, 1  ;;  %v13276_v0 = vmov 0.0   ;;  %vm13277_vm0 = vmmov 0   ;;  %v1855_v17 = vlaneseq }
 0x205   : > { %10719 = vmatprep.subr.mxu1 %v13276_v0  ;;  %10721 = vmatprep.mubr.msk.f32.mxu1 %vm13277_vm0, %v13276_v0  ;;  %s15775_s10 = sld [smem:[#allocation71_spill]]  ;;  %vm1770_vm1 = vcmask 1043456   ;;  %v1760_v1 = vld [vmem:[%s13512_s25] sm:$0xf]  ;;  %vm1752_vm2 = vcmask 1040384   ;;  %vm1761_vm3 = vcmask 31744  }
 0x206   : > { %s1744_s18 = scalar_select %p1743_p8, %s13540_s15, 1  ;;  %10755 = vmatprep.subr.mxu0 %v13276_v0  ;;  %10759 = vmatprep.mubr.msk.f32.mxu0 %vm13277_vm0, %v13276_v0  ;;  %v1856_v18 = vshrl.u32 %v1855_v17, 7  ;;  %v1854_v20 = vld [vmem:[%s13507_s14] sm:$0x3]  ;;  %vm1880_vm4 = vcmask 523264   ;;  %v2194_v40 = vld [vmem:[#allocation8 + $0x28] sm:$0xff] }
 0x207   : > { %10720 = vmatpush3.msk.msra.mxu1 %vm1770_vm1, %v1760_v1  ;;  %v2006_v39 = vld [vmem:[#allocation8 + $0x18] sm:$0xff]  ;;  %v2005_v41 = vld [vmem:[#allocation8 + $0x10] sm:$0xff]  ;;  %v2193_v42 = vld [vmem:[#allocation8 + $0x20] sm:$0xff]  ;;  %vm1991_vm5 = vcmask 1042432   ;;  %vm2000_vm6 = vcmask 1044480   ;;  %vm2014_vm7 = vcmask 130048  }
 0x208   : > { %s10185_s22 = sshll.u32 %s1744_s18, 4  ;;  %10730 = vmatprep.subr.mxu1 %v13276_v0  ;;  %v13878_v19 = vsub.s32 0, %v1856_v18  ;;  %v13881_v21 = vsub.s32 1, %v1856_v18  ;;  %10756 = vmatpush3.msra.mxu0 %v2006_v39  ;;  %v1970_v43 = vld [vmem:[#allocation5] sm:$0x3]  ;;  %vm2195_vm8 = vcmask 1045504  }
 0x209   : > { %10757 = vmatprep.subr.mxu0 %v13276_v0  ;;  %v2308_v18 = vld [vmem:[#allocation11] sm:$0xff]  ;;  %s15777_s17 = sld [smem:[#allocation76_spill]]  ;;  %v2658_v39 = vld [vmem:[#allocation11 + $0x48] sm:$0xff]  ;;  %vm2659_vm9 = vcmask 1046528   ;;  %vm2857_vm10 = vcmask 1041408   ;;  %s13278_s26 = smov 16  }
 0x20a   : > { %s1747_s16 = scalar_lea.vmem %s15774_s0, %s10185_s22  ;;  %v1858_v22 = vrot.slane %v1854_v20, %v13878_v19  ;;  %v1865_v23 = vrot.slane %v1854_v20, %v13881_v21  ;;  %10758 = vmatpush3.msra.mxu0 %v2005_v41  ;;  %v1974_v44 = vrot.slane %v1970_v43, %v13878_v19  ;;  %v1981_v45 = vrot.slane %v1970_v43, %v13881_v21  ;;  %s15778_s3 = sld [smem:[#allocation77_spill]] }
 0x20b   : > { %s15776_s2 = smov %s15775_s10  ;;  %v1748_v2 = vld [vmem:[%s1747_s16] sm:$0xff]  ;;  %v1749_v3 = vld [vmem:[%s1747_s16 + $0x8] sm:$0xff]  ;;  %v1879_v6 = vld [vmem:[%s15775_s10 + $0x38] sm:$0xff]  ;;  %10768 = vmatprep.subr.mxu0 %v13276_v0  ;;  %s13279_s1 = smov 32   ;;  %vm3442_vm11 = vcmask 261120   ;;  %vm3446_vm12 = vcmask 392192  }
 0x20c   : > { %v1753_v4 = vrot.slane %v1748_v2, 7  ;;  %v1754_v5 = vrot.slane %v1749_v3, 7  ;;  %v1878_v8 = vld [vmem:[%s15776_s2 + $0x30] sm:$0xff]  ;;  %v1877_v10 = vld [vmem:[%s15776_s2 + $0x28] sm:$0xff]  ;;  %v1876_v11 = vld [vmem:[%s15776_s2 + $0x20] sm:$0xff]  ;;  %s13280_s11 = smov 48  }
 0x20d   : > { %v1875_v13 = vld [vmem:[%s15776_s2 + $0x18] sm:$0xff]  ;;  %v1874_v14 = vld [vmem:[%s15776_s2 + $0x10] sm:$0xff]  ;;  %v1873_v15 = vld [vmem:[%s15776_s2 + $0x8] sm:$0xff]  ;;  %s15779_s23 = sld [smem:[#allocation82_spill]]  ;;  %s13281_s10 = smov 64   ;;  %vm7945_vm13 = vcmask 785408  }
 0x20e   : > { %v1758_v7 = vsel %vm1752_vm2, 0.0, %v1753_v4  ;;  %v1755_v9 = vsel %vm1752_vm2, %v1753_v4, %v1754_v5  ;;  %v1759_v12 = vsel %vm1752_vm2, %v1754_v5, 0.0  ;;  %v1872_v16 = vld [vmem:[%s15776_s2] sm:$0xff]  ;;  %s15780_s29 = sld [smem:[#allocation87_spill]]  ;;  %s13282_s22 = smov 96   ;;  %vm9442_vm14 = vcmask 32768  }
 0x20f   : > { %10722 = vmatmul.mubr.msk.f32.vlgmr.msra.gmra.mxu1 %vm1761_vm3, %v1758_v7  ;;  %v2003_v7 = vld [vmem:[#allocation8 + $0x8] sm:$0xff]  ;;  %s15781_s0 = sld [smem:[#allocation94_spill]]  ;;  %p15788_p11 = scmp.ne.s32.totalorder %s15713_s28, 0 }
 0x210   : > { %10724 = vmatprep.mubr.msk.f32.mxu1 %vm13277_vm0, %v13276_v0  ;;  %10731 = vmatpush3.msra.mxu1 %v1879_v6  ;;  %v9951_v41 = vld [vmem:[%s15777_s17 + $0x28] sm:$0xff]  ;;  %s15783_s16 = sld [smem:[#allocation93_spill]] }
 0x211   : > { %10732 = vmatprep.subr.mxu1 %v13276_v0 }
 0x212   : > { %10733 = vmatpush3.msra.mxu1 %v1878_v8 }
 0x213   : > { %10725 = vmatmul.mubr.msk.f32.gmra.mxu1 %vm1761_vm3, %v1755_v9  ;;  %10734 = vmatprep.subr.mxu1 %v13276_v0 }
 0x214   : > { %10727 = vmatprep.mubr.msk.f32.mxu1 %vm13277_vm0, %v13276_v0  ;;  %10735 = vmatpush3.msra.mxu1 %v1877_v10 }
 0x215   : > { %10736 = vmatprep.subr.mxu1 %v13276_v0  ;;  %s15782_s18 = smov %s15781_s0 }
 0x216   : > { %10737 = vmatpush3.msra.mxu1 %v1876_v11  ;;  %v2002_v11 = vld [vmem:[#allocation8] sm:$0xff] }
 0x217   : > { %10728 = vmatmul.mubr.msk.f32.gmra.mxu1 %vm1761_vm3, %v1759_v12  ;;  %10738 = vmatprep.subr.mxu1 %v13276_v0  ;;  %v2309_v12 = vld [vmem:[#allocation11 + $0x8] sm:$0xff] }
 0x218   : > { %10746 = vmatprep.mubr.msk.f32.mxu1 %vm13277_vm0, %v13276_v0  ;;  %10739 = vmatpush3.msra.mxu1 %v1875_v13 }
 0x219   : > { %10740 = vmatprep.subr.mxu1 %v13276_v0 }
 0x21a   : > { %10741 = vmatpush3.msra.mxu1 %v1874_v14 }
 0x21b   : > { %10742 = vmatprep.subr.mxu1 %v13276_v0 }
 0x21c   : > { %10743 = vmatpush3.msra.mxu1 %v1873_v15 }
 0x21d   : > { %10744 = vmatprep.subr.mxu1 %v13276_v0 }
 0x21e   : > { %10745 = vmatpush3.msra.mxu1 %v1872_v16 }
 0x21f   : > { %10781 = vmatprep.subr.mxu1 %v13276_v0 }
 0x2cf   : > { %v1840_v24 = vpop.f32.mrf.mxu1 }
 0x2d0   : > { %v1859_v25 = vmul.f32 %v1858_v22, %v1840_v24 }
 0x2d1   : > { %v10723_v26 = vpop.f32.mrf.mxu1 }
 0x2d2   : > { %v1866_v27 = vadd.f32 %v1865_v23, %v1859_v25  ;;  %v2312_v25 = vld [vmem:[#allocation11 + $0x18] sm:$0xff] }
 0x2d3   : > { %v1845_v28 = vpop.f32.mrf.mxu1 }
 0x2d4   : > { %v1869_v29 = vmax.f32 %v1866_v27, 0.0  ;;  %v1860_v30 = vmul.f32 %v1858_v22, %v1845_v28 }
 0x2d5   : > { %v10726_v31 = vpop.f32.mrf.mxu1 }
 0x2d6   : > { %v1867_v32 = vadd.f32 %v1865_v23, %v1860_v30  ;;  %10747 = vmatmul.mubr.msk.f32.vlgmr.msra.gmra.mxu1 %vm1880_vm4, %v1869_v29  ;;  %v2311_v30 = vld [vmem:[#allocation11 + $0x10] sm:$0xff]  ;;  %v2572_v31 = vld [vmem:[#allocation11 + $0x38] sm:$0xff] }
 0x2d7   : > { %v1850_v33 = vpop.f32.mrf.mxu1  ;;  %10749 = vmatprep.mubr.msk.f32.mxu1 %vm13277_vm0, %v13276_v0  ;;  %10782 = vmatpush3.msra.mxu1 %v2194_v40  ;;  %v2657_v40 = vld [vmem:[#allocation11 + $0x40] sm:$0xff] }
 0x2d8   : > { %v1870_v34 = vmax.f32 %v1867_v32, 0.0  ;;  %v1861_v35 = vmul.f32 %v1858_v22, %v1850_v33  ;;  %10783 = vmatprep.subr.mxu1 %v13276_v0 }
 0x2d9   : > { %v10729_v36 = vpop.f32.mrf.mxu1  ;;  %10784 = vmatpush3.msra.mxu1 %v2193_v42  ;;  %v9950_v42 = vld [vmem:[%s15777_s17 + $0x20] sm:$0xff] }
 0x2da   : > { %v1868_v37 = vadd.f32 %v1865_v23, %v1861_v35  ;;  %10750 = vmatmul.mubr.msk.f32.gmra.mxu1 %vm1880_vm4, %v1870_v34  ;;  %10807 = vmatprep.subr.mxu1 %v13276_v0  ;;  %v2571_v34 = vld [vmem:[#allocation11 + $0x30] sm:$0xff]  ;;  %v2486_v35 = vld [vmem:[#allocation11 + $0x28] sm:$0xff]  ;;  %v2485_v36 = vld [vmem:[#allocation11 + $0x20] sm:$0xff] }
 0x2db   : > { %10752 = vmatprep.mubr.msk.f32.mxu1 %vm13277_vm0, %v13276_v0 }
 0x2dc   : > { %v1871_v38 = vmax.f32 %v1868_v37, 0.0  ;;  %v9943_v37 = vld [vmem:[%s15777_s17 + $0x18] sm:$0xff] }
 0x2de   : > { %10753 = vmatmul.mubr.msk.f32.gmra.mxu1 %vm1880_vm4, %v1871_v38  ;;  %v9942_v38 = vld [vmem:[%s15777_s17 + $0x10] sm:$0xff] }
 0x2df   : > { %10785 = vmatprep.mubr.msk.f32.mxu1 %vm13277_vm0, %v13276_v0 }
 0x396   : > { %v1956_v46 = vpop.f32.mrf.mxu1 }
 0x397   : > { %v1975_v47 = vmul.f32 %v1974_v44, %v1956_v46 }
 0x398   : > { %v10748_v48 = vpop.f32.mrf.mxu1 }
 0x399   : > { %v13900_v49 = vadd.f32 %v1981_v45, %v1975_v47  ;;  %v2772_v48 = vld [vmem:[%s15777_s17] sm:$0xff] }
 0x39a   : > { %v1961_v50 = vpop.f32.mrf.mxu1 }
 0x39b   : > { %v1985_v51 = vmax.f32 %v13900_v49, 0.0  ;;  %v1976_v52 = vmul.f32 %v1974_v44, %v1961_v50  ;;  %v9961_v50 = vld [vmem:[%s15777_s17 + $0x48] sm:$0xff] }
 0x39c   : > { %v10751_v53 = vpop.f32.mrf.mxu1 }
 0x39d   : > { %v1992_v54 = vrot.slane %v1985_v51, 5  ;;  %v13905_v55 = vadd.f32 %v1981_v45, %v1976_v52  ;;  %v9960_v53 = vld [vmem:[%s15777_s17 + $0x40] sm:$0xff] }
 0x39e   : > { %v1966_v56 = vpop.f32.mrf.mxu1 }
 0x39f   : > { %v1986_v57 = vmax.f32 %v13905_v55, 0.0  ;;  %v1977_v58 = vmul.f32 %v1974_v44, %v1966_v56  ;;  %v13909_v60 = vsel %vm1991_vm5, 0.0, %v1992_v54 }
 0x3a0   : > { %v10754_v59 = vpop.f32.mrf.mxu1  ;;  %v2009_v2 = vrot.slane %v13909_v60, 3  ;;  %v2196_v4 = vrot.slane %v13909_v60, 2  ;;  %v2101_v23 = vrot.slane %v13909_v60, 4  ;;  %v2393_v24 = vrot.slane %v13909_v60, 5 }
 0x3a1   : > { %v1993_v61 = vrot.slane %v1986_v57, 5  ;;  %v13913_v62 = vadd.f32 %v1981_v45, %v1977_v58  ;;  %v2660_v44 = vrot.slane %v13909_v60, 1  ;;  %v2773_v45 = vld [vmem:[%s15777_s17 + $0x8] sm:$0xff]  ;;  %v2858_v56 = vrot.slane %v13909_v60, 6  ;;  %v9956_v58 = vld [vmem:[%s15777_s17 + $0x38] sm:$0xff] }
 0x3a3   : > { %v13916_v63 = vsel %vm1991_vm5, %v1992_v54, %v1993_v61  ;;  %v1987_v1 = vmax.f32 %v13913_v62, 0.0  ;;  %v3580_v62 = vld [vmem:[#allocation17 + $0x10] sm:$0xff] }
 0x3a4   : > { %v2010_v3 = vrot.slane %v13916_v63, 3  ;;  %v2197_v5 = vrot.slane %v13916_v63, 2  ;;  %v2102_v20 = vrot.slane %v13916_v63, 4  ;;  %v2394_v22 = vrot.slane %v13916_v63, 5 }
 0x3a5   : > { %v1995_v6 = vrot.slane %v1987_v1, 5  ;;  %v2661_v43 = vrot.slane %v13916_v63, 1  ;;  %v2859_v54 = vrot.slane %v13916_v63, 6 }
 0x3a6   : > { %v13926_v8 = vsel %vm2000_vm6, %v2009_v2, %v2010_v3  ;;  %v13929_v9 = vsel %vm2195_vm8, %v2196_v4, %v2197_v5  ;;  %v13982_v26 = vsel %vm1770_vm1, %v2101_v23, %v2102_v20  ;;  %v2395_v27 = vsel %vm1991_vm5, %v2393_v24, %v2394_v22  ;;  %v9955_v2 = vld [vmem:[%s15777_s17 + $0x30] sm:$0xff] }
 0x3a7   : > { %v1996_v10 = vsel %vm1991_vm5, %v1993_v61, %v1995_v6  ;;  %10760 = vmatmul.mubr.msk.f32.vlgmr.msra.gmra.mxu0 %vm2014_vm7, %v13926_v8  ;;  %10786 = vmatmul.mubr.msk.f32.vlgmr.msra.gmra.mxu1 %vm2014_vm7, %v13929_v9  ;;  %v14085_v46 = vsel %vm2659_vm9, %v2660_v44, %v2661_v43  ;;  %v2860_v59 = vsel %vm2857_vm10, %v2858_v56, %v2859_v54  ;;  %v9966_v6 = vld [vmem:[%s15777_s17 + $0x58] sm:$0xff] }
 0x3a8   : > { %v13937_v13 = vsel %vm2000_vm6, %v1996_v10, 0.0  ;;  %10769 = vmatpush3.msra.mxu0 %v2003_v7  ;;  %10762 = vmatprep.mubr.msk.f32.mxu0 %vm13277_vm0, %v13276_v0  ;;  %v9965_v7 = vld [vmem:[%s15777_s17 + $0x50] sm:$0xff] }
 0x3a9   : > { %10788 = vmatprep.mubr.msk.f32.mxu1 %vm13277_vm0, %v13276_v0  ;;  %v13944_v14 = vrot.slane %v13937_v13, 3  ;;  %v13947_v15 = vrot.slane %v13937_v13, 2  ;;  %10770 = vmatprep.subr.mxu0 %v13276_v0  ;;  %v13986_v28 = vrot.slane %v13937_v13, 4  ;;  %v13989_v29 = vrot.slane %v13937_v13, 5 }
 0x3aa   : > { %10771 = vmatpush3.msra.mxu0 %v2002_v11  ;;  %10808 = vmatpush3.msra.mxu1 %v2309_v12  ;;  %v14088_v47 = vrot.slane %v13937_v13, 1  ;;  %v2861_v61 = vrot.slane %v13937_v13, 6 }
 0x3ab   : > { %v13952_v16 = vsel %vm2000_vm6, %v2010_v3, %v13944_v14  ;;  %v13956_v17 = vsel %vm2195_vm8, %v2197_v5, %v13947_v15  ;;  %10809 = vmatprep.subr.mxu1 %v13276_v0  ;;  %10794 = vmatprep.subr.mxu0 %v13276_v0  ;;  %v14001_v32 = vsel %vm1770_vm1, %v2102_v20, %v13986_v28  ;;  %v9971_v3 = vld [vmem:[%s15777_s17 + $0x68] sm:$0xff]  ;;  %v9970_v5 = vld [vmem:[%s15777_s17 + $0x60] sm:$0xff] }
 0x3ac   : > { %10763 = vmatmul.mubr.msk.f32.gmra.mxu0 %vm2014_vm7, %v13952_v16  ;;  %10789 = vmatmul.mubr.msk.f32.gmra.mxu1 %vm2014_vm7, %v13956_v17  ;;  %v2397_v33 = vsel %vm1991_vm5, %v2394_v22, %v13989_v29  ;;  %v14103_v52 = vsel %vm2659_vm9, %v2661_v43, %v14088_v47  ;;  %v2862_v4 = vsel %vm2857_vm10, %v2859_v54, %v2861_v61 }
 0x3ad   : > { %10765 = vmatprep.mubr.msk.f32.mxu0 %vm13277_vm0, %v13276_v0  ;;  %10791 = vmatprep.mubr.msk.f32.mxu1 %vm13277_vm0, %v13276_v0 }
 0x3ae   : > { %10810 = vmatpush3.msra.mxu1 %v2308_v18  ;;  %v2290_v18 = vld [vmem:[#allocation7] sm:$0x3] }
 0x3af   : > { %10833 = vmatprep.subr.mxu1 %v13276_v0  ;;  %v14202_v24 = vrot.slane %v2290_v18, %v13878_v19 }
 0x3b0   : > { %10766 = vmatmul.mubr.msk.f32.gmra.mxu0 %vm2014_vm7, %v13944_v14  ;;  %10792 = vmatmul.mubr.msk.f32.gmra.mxu1 %vm2014_vm7, %v13947_v15 }
 0x3b1   : > { %10772 = vmatprep.mubr.msk.f32.mxu0 %vm13277_vm0, %v13276_v0  ;;  %10811 = vmatprep.mubr.msk.f32.mxu1 %vm13277_vm0, %v13276_v0 }
 0x3b4   : > { %10773 = vmatmul.mubr.msk.f32.vlgmr.msra.gmra.mxu0 %vm2014_vm7, %v13982_v26  ;;  %10812 = vmatmul.mubr.msk.f32.vlgmr.msra.gmra.mxu1 %vm2014_vm7, %v2395_v27 }
 0x3b5   : > { %10795 = vmatpush3.msra.mxu0 %v2312_v25  ;;  %10775 = vmatprep.mubr.msk.f32.mxu0 %vm13277_vm0, %v13276_v0 }
 0x3b6   : > { %10814 = vmatprep.mubr.msk.f32.mxu1 %vm13277_vm0, %v13276_v0  ;;  %10796 = vmatprep.subr.mxu0 %v13276_v0 }
 0x3b7   : > { %10797 = vmatpush3.msra.mxu0 %v2311_v30  ;;  %10834 = vmatpush3.msra.mxu1 %v2572_v31 }
 0x3b8   : > { %10776 = vmatmul.mubr.msk.f32.gmra.mxu0 %vm2014_vm7, %v14001_v32  ;;  %10815 = vmatmul.mubr.msk.f32.gmra.mxu1 %vm2014_vm7, %v2397_v33 }
 0x3b9   : > { %10778 = vmatprep.mubr.msk.f32.mxu0 %vm13277_vm0, %v13276_v0  ;;  %10817 = vmatprep.mubr.msk.f32.mxu1 %vm13277_vm0, %v13276_v0 }
 0x3ba   : > { %10835 = vmatprep.subr.mxu1 %v13276_v0  ;;  %10820 = vmatprep.subr.mxu0 %v13276_v0 }
 0x3bb   : > { %10836 = vmatpush3.msra.mxu1 %v2571_v34 }
 0x3bc   : > { %10779 = vmatmul.mubr.msk.f32.gmra.mxu0 %vm2014_vm7, %v13986_v28  ;;  %10818 = vmatmul.mubr.msk.f32.gmra.mxu1 %vm2014_vm7, %v13989_v29 }
 0x3bd   : > { %10798 = vmatprep.mubr.msk.f32.mxu0 %vm13277_vm0, %v13276_v0  ;;  %10837 = vmatprep.mubr.msk.f32.mxu1 %vm13277_vm0, %v13276_v0 }
 0x3be   : > { %10859 = vmatprep.subr.mxu1 %v13276_v0 }
 0x3c0   : > { %10799 = vmatmul.mubr.msk.f32.vlgmr.msra.gmra.mxu0 %vm2014_vm7, %v13982_v26  ;;  %10838 = vmatmul.mubr.msk.f32.vlgmr.msra.gmra.mxu1 %vm2014_vm7, %v13929_v9 }
 0x3c1   : > { %10821 = vmatpush3.msra.mxu0 %v2486_v35  ;;  %10801 = vmatprep.mubr.msk.f32.mxu0 %vm13277_vm0, %v13276_v0 }
 0x3c2   : > { %10840 = vmatprep.mubr.msk.f32.mxu1 %vm13277_vm0, %v13276_v0  ;;  %10822 = vmatprep.subr.mxu0 %v13276_v0 }
 0x3c3   : > { %10823 = vmatpush3.msra.mxu0 %v2485_v36  ;;  %10860 = vmatpush3.msra.mxu1 %v9943_v37 }
 0x3c4   : > { %10802 = vmatmul.mubr.msk.f32.gmra.mxu0 %vm2014_vm7, %v14001_v32  ;;  %10841 = vmatmul.mubr.msk.f32.gmra.mxu1 %vm2014_vm7, %v13956_v17 }
 0x3c5   : > { %10804 = vmatprep.mubr.msk.f32.mxu0 %vm13277_vm0, %v13276_v0  ;;  %10843 = vmatprep.mubr.msk.f32.mxu1 %vm13277_vm0, %v13276_v0 }
 0x3c6   : > { %10861 = vmatprep.subr.mxu1 %v13276_v0  ;;  %10846 = vmatprep.subr.mxu0 %v13276_v0 }
 0x3c7   : > { %10862 = vmatpush3.msra.mxu1 %v9942_v38 }
 0x3c8   : > { %10805 = vmatmul.mubr.msk.f32.gmra.mxu0 %vm2014_vm7, %v13986_v28  ;;  %10844 = vmatmul.mubr.msk.f32.gmra.mxu1 %vm2014_vm7, %v13947_v15 }
 0x3c9   : > { %10824 = vmatprep.mubr.msk.f32.mxu0 %vm13277_vm0, %v13276_v0  ;;  %10863 = vmatprep.mubr.msk.f32.mxu1 %vm13277_vm0, %v13276_v0 }
 0x3ca   : > { %10885 = vmatprep.subr.mxu1 %v13276_v0 }
 0x3cc   : > { %10825 = vmatmul.mubr.msk.f32.vlgmr.msra.gmra.mxu0 %vm2014_vm7, %v13926_v8  ;;  %10864 = vmatmul.mubr.msk.f32.vlgmr.msra.gmra.mxu1 %vm2014_vm7, %v2395_v27 }
 0x3cd   : > { %10847 = vmatpush3.msra.mxu0 %v2658_v39  ;;  %10827 = vmatprep.mubr.msk.f32.mxu0 %vm13277_vm0, %v13276_v0 }
 0x3ce   : > { %10866 = vmatprep.mubr.msk.f32.mxu1 %vm13277_vm0, %v13276_v0  ;;  %10848 = vmatprep.subr.mxu0 %v13276_v0 }
 0x3cf   : > { %10849 = vmatpush3.msra.mxu0 %v2657_v40  ;;  %10886 = vmatpush3.msra.mxu1 %v9951_v41 }
 0x3d0   : > { %10828 = vmatmul.mubr.msk.f32.gmra.mxu0 %vm2014_vm7, %v13952_v16  ;;  %10867 = vmatmul.mubr.msk.f32.gmra.mxu1 %vm2014_vm7, %v2397_v33 }
 0x3d1   : > { %10830 = vmatprep.mubr.msk.f32.mxu0 %vm13277_vm0, %v13276_v0  ;;  %10869 = vmatprep.mubr.msk.f32.mxu1 %vm13277_vm0, %v13276_v0 }
 0x3d2   : > { %10887 = vmatprep.subr.mxu1 %v13276_v0  ;;  %10872 = vmatprep.subr.mxu0 %v13276_v0 }
 0x3d3   : > { %10888 = vmatpush3.msra.mxu1 %v9950_v42 }
 0x3d4   : > { %10831 = vmatmul.mubr.msk.f32.gmra.mxu0 %vm2014_vm7, %v13944_v14  ;;  %10870 = vmatmul.mubr.msk.f32.gmra.mxu1 %vm2014_vm7, %v13989_v29 }
 0x3d5   : > { %10850 = vmatprep.mubr.msk.f32.mxu0 %vm13277_vm0, %v13276_v0  ;;  %10889 = vmatprep.mubr.msk.f32.mxu1 %vm13277_vm0, %v13276_v0 }
 0x3d6   : > { %10911 = vmatprep.subr.mxu1 %v13276_v0 }
 0x3d8   : > { %10851 = vmatmul.mubr.msk.f32.vlgmr.msra.gmra.mxu0 %vm2014_vm7, %v14085_v46  ;;  %10890 = vmatmul.mubr.msk.f32.vlgmr.msra.gmra.mxu1 %vm2014_vm7, %v13982_v26 }
 0x3d9   : > { %10873 = vmatpush3.msra.mxu0 %v2773_v45  ;;  %10853 = vmatprep.mubr.msk.f32.mxu0 %vm13277_vm0, %v13276_v0 }
 0x3da   : > { %10892 = vmatprep.mubr.msk.f32.mxu1 %vm13277_vm0, %v13276_v0  ;;  %10874 = vmatprep.subr.mxu0 %v13276_v0 }
 0x3db   : > { %10875 = vmatpush3.msra.mxu0 %v2772_v48  ;;  %10912 = vmatpush3.msra.mxu1 %v9961_v50 }
 0x3dc   : > { %10854 = vmatmul.mubr.msk.f32.gmra.mxu0 %vm2014_vm7, %v14103_v52  ;;  %10893 = vmatmul.mubr.msk.f32.gmra.mxu1 %vm2014_vm7, %v14001_v32 }
 0x3dd   : > { %10856 = vmatprep.mubr.msk.f32.mxu0 %vm13277_vm0, %v13276_v0  ;;  %10895 = vmatprep.mubr.msk.f32.mxu1 %vm13277_vm0, %v13276_v0 }
 0x3de   : > { %10913 = vmatprep.subr.mxu1 %v13276_v0  ;;  %10898 = vmatprep.subr.mxu0 %v13276_v0 }
 0x3df   : > { %10914 = vmatpush3.msra.mxu1 %v9960_v53 }
 0x3e0   : > { %10857 = vmatmul.mubr.msk.f32.gmra.mxu0 %vm2014_vm7, %v14088_v47  ;;  %10896 = vmatmul.mubr.msk.f32.gmra.mxu1 %vm2014_vm7, %v13986_v28  ;;  %v14205_v28 = vrot.slane %v2290_v18, %v13881_v21 }
 0x3e1   : > { %10876 = vmatprep.mubr.msk.f32.mxu0 %vm13277_vm0, %v13276_v0  ;;  %10915 = vmatprep.mubr.msk.f32.mxu1 %vm13277_vm0, %v13276_v0 }
 0x3e2   : > { %10937 = vmatprep.subr.mxu1 %v13276_v0 }
 0x3e4   : > { %10877 = vmatmul.mubr.msk.f32.vlgmr.msra.gmra.mxu0 %vm2014_vm7, %v2860_v59  ;;  %10916 = vmatmul.mubr.msk.f32.vlgmr.msra.gmra.mxu1 %vm2014_vm7, %v13929_v9 }
 0x3e5   : > { %10899 = vmatpush3.msra.mxu0 %v9956_v58  ;;  %10879 = vmatprep.mubr.msk.f32.mxu0 %vm13277_vm0, %v13276_v0 }
 0x3e6   : > { %10918 = vmatprep.mubr.msk.f32.mxu1 %vm13277_vm0, %v13276_v0  ;;  %10900 = vmatprep.subr.mxu0 %v13276_v0 }
 0x3e7   : > { %10901 = vmatpush3.msra.mxu0 %v9955_v2  ;;  %10938 = vmatpush3.msra.mxu1 %v9971_v3 }
 0x3e8   : > { %10880 = vmatmul.mubr.msk.f32.gmra.mxu0 %vm2014_vm7, %v2862_v4  ;;  %10919 = vmatmul.mubr.msk.f32.gmra.mxu1 %vm2014_vm7, %v13956_v17 }
 0x3e9   : > { %10882 = vmatprep.mubr.msk.f32.mxu0 %vm13277_vm0, %v13276_v0  ;;  %10921 = vmatprep.mubr.msk.f32.mxu1 %vm13277_vm0, %v13276_v0 }
 0x3ea   : > { %10939 = vmatprep.subr.mxu1 %v13276_v0  ;;  %10924 = vmatprep.subr.mxu0 %v13276_v0 }
 0x3eb   : > { %10940 = vmatpush3.msra.mxu1 %v9970_v5 }
 0x3ec   : > { %10883 = vmatmul.mubr.msk.f32.gmra.mxu0 %vm2014_vm7, %v2861_v61  ;;  %10922 = vmatmul.mubr.msk.f32.gmra.mxu1 %vm2014_vm7, %v13947_v15 }
 0x3ed   : > { %10902 = vmatprep.mubr.msk.f32.mxu0 %vm13277_vm0, %v13276_v0  ;;  %10941 = vmatprep.mubr.msk.f32.mxu1 %vm13277_vm0, %v13276_v0 }
 0x3ee   : > { %10975 = vmatprep.subr.mxu1 %v13276_v0 }
 0x3f0   : > { %10903 = vmatmul.mubr.msk.f32.vlgmr.msra.gmra.mxu0 %vm2014_vm7, %v13926_v8  ;;  %10942 = vmatmul.mubr.msk.f32.vlgmr.msra.gmra.mxu1 %vm2014_vm7, %v13909_v60 }
 0x3f1   : > { %10925 = vmatpush3.msra.mxu0 %v9966_v6  ;;  %10905 = vmatprep.mubr.msk.f32.mxu0 %vm13277_vm0, %v13276_v0 }
 0x3f2   : > { %10944 = vmatprep.mubr.msk.f32.mxu1 %vm13277_vm0, %v13276_v0  ;;  %10926 = vmatprep.subr.mxu0 %v13276_v0 }
 0x3f3   : > { %10927 = vmatpush3.msra.mxu0 %v9965_v7 }
 0x3f4   : > { %10906 = vmatmul.mubr.msk.f32.gmra.mxu0 %vm2014_vm7, %v13952_v16  ;;  %10945 = vmatmul.mubr.msk.f32.gmra.mxu1 %vm2014_vm7, %v13916_v63 }
 0x3f5   : > { %10908 = vmatprep.mubr.msk.f32.mxu0 %vm13277_vm0, %v13276_v0  ;;  %10947 = vmatprep.mubr.msk.f32.mxu1 %vm13277_vm0, %v13276_v0 }
 0x3f6   : > { %10950 = vmatprep.subr.mxu0 %v13276_v0 }
 0x3f8   : > { %10909 = vmatmul.mubr.msk.f32.gmra.mxu0 %vm2014_vm7, %v13944_v14  ;;  %10948 = vmatmul.mubr.msk.f32.gmra.mxu1 %vm2014_vm7, %v13937_v13 }
 0x3f9   : > { %10928 = vmatprep.mubr.msk.f32.mxu0 %vm13277_vm0, %v13276_v0  ;;  %10979 = vmatprep.mubr.msk.f32.mxu1 %vm13277_vm0, %v13276_v0 }
 0x3fc   : > { %10929 = vmatmul.mubr.msk.f32.vlgmr.msra.gmra.mxu0 %vm2014_vm7, %v14085_v46 }
 0x3fd   : > { %10931 = vmatprep.mubr.msk.f32.mxu0 %vm13277_vm0, %v13276_v0 }
 0x400   : > { %10932 = vmatmul.mubr.msk.f32.gmra.mxu0 %vm2014_vm7, %v14103_v52 }
 0x401   : > { %10934 = vmatprep.mubr.msk.f32.mxu0 %vm13277_vm0, %v13276_v0 }
 0x404   : > { %10935 = vmatmul.mubr.msk.f32.gmra.mxu0 %vm2014_vm7, %v14088_v47 }
 0x405   : > { %10966 = vmatprep.mubr.msk.f32.mxu0 %vm13277_vm0, %v13276_v0 }
 0x467   : > { %v2087_v60 = vpop.f32.mrf.mxu0  ;;  %v2273_v63 = vpop.f32.mrf.mxu1 }
 0x469   : > { %v10761_v8 = vpop.f32.mrf.mxu0  ;;  %v10787_v9 = vpop.f32.mrf.mxu1 }
 0x46c   : > { %v2092_v10 = vpop.f32.mrf.mxu0  ;;  %v2278_v11 = vpop.f32.mrf.mxu1 }
 0x46e   : > { %v10764_v12 = vpop.f32.mrf.mxu0  ;;  %v10790_v13 = vpop.f32.mrf.mxu1 }
 0x46f   : > { %v2754_v12 = vld [vmem:[#allocation10] sm:$0x3] }
 0x470   : > { %v2097_v14 = vpop.f32.mrf.mxu0  ;;  %v14199_v15 = vpop.f32.mrf.mxu1 }
 0x472   : > { %v10767_v16 = vpop.f32.mrf.mxu0  ;;  %v10793_v17 = vpop.f32.mrf.mxu1 }
 0x474   : > { %v2178_v20 = vpop.f32.mrf.mxu0  ;;  %v2470_v22 = vpop.f32.mrf.mxu1 }
 0x475   : > { %v2179_v23 = vadd.f32 %v2178_v20, %v2087_v60 }
 0x476   : > { %v10774_v25 = vpop.f32.mrf.mxu0  ;;  %v10813_v26 = vpop.f32.mrf.mxu1 }
 0x477   : > { %v2287_v27 = vadd.f32 %v2273_v63, %v2179_v23  ;;  %v14228_v25 = vrot.slane %v2754_v12, %v13878_v19 }
 0x478   : > { %v2183_v29 = vpop.f32.mrf.mxu0  ;;  %v2475_v30 = vpop.f32.mrf.mxu1 }
 0x479   : > { %v2184_v31 = vadd.f32 %v2183_v29, %v2092_v10  ;;  %v2295_v32 = vmul.f32 %v14202_v24, %v2287_v27  ;;  %v14233_v29 = vrot.slane %v2754_v12, %v13881_v21 }
 0x47a   : > { %v10777_v33 = vpop.f32.mrf.mxu0  ;;  %v10816_v34 = vpop.f32.mrf.mxu1 }
 0x47b   : > { %v2288_v35 = vadd.f32 %v2278_v11, %v2184_v31  ;;  %v2302_v36 = vadd.f32 %v14205_v28, %v2295_v32 }
 0x47c   : > { %v2188_v37 = vpop.f32.mrf.mxu0  ;;  %v14209_v38 = vpop.f32.mrf.mxu1 }
 0x47d   : > { %v2305_v39 = vmax.f32 %v2302_v36, 0.0  ;;  %v2296_v40 = vmul.f32 %v14202_v24, %v2288_v35  ;;  %v2189_v18 = vadd.f32 %v2188_v37, %v2097_v14  ;;  %v3457_v36 = vld [vmem:[%s15778_s3 + $0x38] sm:$0xff]  ;;  %v3456_v37 = vld [vmem:[%s15778_s3 + $0x30] sm:$0xff] }
 0x47e   : > { %v10780_v41 = vpop.f32.mrf.mxu0  ;;  %v10819_v42 = vpop.f32.mrf.mxu1  ;;  %10951 = vmatpush3.msra.mxu0 %v3457_v36 }
 0x47f   : > { %3406 = vrot.lane.b32.xlu0 %v2305_v39, %s13278_s26  ;;  %v2303_v43 = vadd.f32 %v14205_v28, %v2296_v40  ;;  %v2289_v32 = vadd.f32 %v14199_v15, %v2189_v18  ;;  %10952 = vmatprep.subr.mxu0 %v13276_v0 }
 0x480   : > { %v2379_v44 = vpop.f32.mrf.mxu0  ;;  %v2639_v45 = vpop.f32.mrf.mxu1  ;;  %10953 = vmatpush3.msra.mxu0 %v3456_v37 }
 0x481   : > { %v2306_v46 = vmax.f32 %v2303_v43, 0.0  ;;  %v2471_v60 = vadd.f32 %v2470_v22, %v2379_v44  ;;  %v3455_v43 = vld [vmem:[%s15778_s3 + $0x28] sm:$0xff]  ;;  %v2297_v15 = vmul.f32 %v14202_v24, %v2289_v32  ;;  %10954 = vmatprep.subr.mxu0 %v13276_v0 }
 0x482   : > { %v10800_v47 = vpop.f32.mrf.mxu0  ;;  %v10839_v48 = vpop.f32.mrf.mxu1  ;;  %10955 = vmatpush3.msra.mxu0 %v3455_v43 }
 0x483   : > { %3408 = vrot.lane.b32.xlu1 %v2306_v46, %s13278_s26  ;;  %v3454_v48 = vld [vmem:[%s15778_s3 + $0x20] sm:$0xff]  ;;  %10956 = vmatprep.subr.mxu0 %v13276_v0 }
 0x484   : > { %v2384_v50 = vpop.f32.mrf.mxu0  ;;  %v2644_v52 = vpop.f32.mrf.mxu1  ;;  %10957 = vmatpush3.msra.mxu0 %v3454_v48 }
 0x485   : > { %v2476_v13 = vadd.f32 %v2475_v30, %v2384_v50  ;;  %10958 = vmatprep.subr.mxu0 %v13276_v0 }
 0x486   : > { %v10803_v53 = vpop.f32.mrf.mxu0  ;;  %v10842_v54 = vpop.f32.mrf.mxu1 }
 0x487   : > { %v3453_v53 = vld [vmem:[%s15778_s3 + $0x18] sm:$0xff] }
 0x488   : > { %v14215_v56 = vpop.f32.mrf.mxu0  ;;  %v14217_v58 = vpop.f32.mrf.mxu1  ;;  %10959 = vmatpush3.msra.mxu0 %v3453_v53 }
 0x489   : > { %10960 = vmatprep.subr.mxu0 %v13276_v0 }
 0x48a   : > { %v10806_v59 = vpop.f32.mrf.mxu0  ;;  %v10845_v61 = vpop.f32.mrf.mxu1 }
 0x48b   : > { %v2304_v59 = vadd.f32 %v14205_v28, %v2297_v15 }
 0x48c   : > { %v2553_v2 = vpop.f32.mrf.mxu0  ;;  %v14219_v3 = vpop.f32.mrf.mxu1 }
 0x48d   : > { %v2567_v9 = vadd.f32 %v2553_v2, %v2471_v60  ;;  %v3451_v60 = vld [vmem:[%s15778_s3 + $0x8] sm:$0xff] }
 0x48e   : > { %v10826_v4 = vpop.f32.mrf.mxu0  ;;  %v10865_v5 = vpop.f32.mrf.mxu1 }
 0x48f   : > { %v2653_v23 = vadd.f32 %v2639_v45, %v2567_v9  ;;  %v3452_v4 = vld [vmem:[%s15778_s3 + $0x10] sm:$0xff] }
 0x490   : > { %v2558_v6 = vpop.f32.mrf.mxu0  ;;  %v14221_v7 = vpop.f32.mrf.mxu1  ;;  %10961 = vmatpush3.msra.mxu0 %v3452_v4 }
 0x491   : > { %v2568_v20 = vadd.f32 %v2558_v6, %v2476_v13  ;;  %10962 = vmatprep.subr.mxu0 %v13276_v0 }
 0x492   : > { %v10829_v63 = vpop.f32.mrf.mxu0  ;;  %v10868_v8 = vpop.f32.mrf.mxu1  ;;  %10963 = vmatpush3.msra.mxu0 %v3451_v60 }
 0x493   : > { %v2654_v33 = vadd.f32 %v2644_v52, %v2568_v20  ;;  %v2307_v63 = vmax.f32 %v2304_v59, 0.0  ;;  %10964 = vmatprep.subr.mxu0 %v13276_v0 }
 0x494   : > { %v14223_v10 = vpop.f32.mrf.mxu0  ;;  %v14225_v11 = vpop.f32.mrf.mxu1 }
 0x496   : > { %v10832_v16 = vpop.f32.mrf.mxu0  ;;  %v10871_v17 = vpop.f32.mrf.mxu1 }
 0x498   : > { %v2737_v22 = vpop.f32.mrf.mxu0  ;;  %v14230_v26 = vpop.f32.mrf.mxu1 }
 0x499   : > { %v2751_v27 = vadd.f32 %v2737_v22, %v2653_v23 }
 0x49a   : > { %v10852_v31 = vpop.f32.mrf.mxu0  ;;  %v10891_v30 = vpop.f32.mrf.mxu1 }
 0x49b   : > { %v2759_v14 = vmul.f32 %v14228_v25, %v2751_v27 }
 0x49c   : > { %v2742_v34 = vpop.f32.mrf.mxu0  ;;  %v14237_v35 = vpop.f32.mrf.mxu1 }
 0x49d   : > { %v2752_v39 = vadd.f32 %v2742_v34, %v2654_v33  ;;  %v2766_v40 = vadd.f32 %v14233_v29, %v2759_v14 }
 0x49e   : > { %v10855_v41 = vpop.f32.mrf.mxu0  ;;  %v10894_v42 = vpop.f32.mrf.mxu1 }
 0x49f   : > { %v2760_v44 = vmul.f32 %v14228_v25, %v2752_v39  ;;  %v2769_v45 = vmax.f32 %v2766_v40, 0.0  ;;  %v2481_v41 = vadd.f32 %v14209_v38, %v14215_v56 }
 0x4a0   : > { %v14246_v46 = vpop.f32.mrf.mxu0  ;;  %v14248_v47 = vpop.f32.mrf.mxu1 }
 0x4a1   : > { %3418 = vrot.lane.b32.xlu0 %v2769_v45, %s13279_s1  ;;  %v2767_v50 = vadd.f32 %v14233_v29, %v2760_v44  ;;  %v3385_v44 = vld [vmem:[#allocation13] sm:$0x3]  ;;  %v3450_v45 = vld [vmem:[%s15778_s3] sm:$0xff]  ;;  %s13283_s3 = smov [#allocation49]  }
 0x4a2   : > { %v10858_v52 = vpop.f32.mrf.mxu0  ;;  %v10897_v24 = vpop.f32.mrf.mxu1  ;;  %10965 = vmatpush3.msra.mxu0 %v3450_v45  ;;  %v3389_v38 = vrot.slane %v3385_v44, %v13878_v19  ;;  %s13077_s4 = sshll.u32 %s13283_s3, 4  ;;  %s13078_s4 = int_to_ptr.vmem [resolvable:$false] %s13077_s4 }
 0x4a3   : > { %v2770_v54 = vmax.f32 %v2767_v50, 0.0  ;;  %11001 = vmatprep.subr.mxu0 %v13276_v0  ;;  %s13079_s5 = scalar_lea.vmem %s13078_s4, 32 }
 0x4a4   : > { %v2935_v61 = vpop.f32.mrf.mxu0  ;;  %v3190_v2 = vpop.f32.mrf.mxu1 }
 0x4a5   : > { %3420 = vrot.lane.b32.xlu0 %v2770_v54, %s13279_s1  ;;  %v2936_v22 = vadd.f32 %v2935_v61, %v14219_v3 }
 0x4a6   : > { %v10878_v5 = vpop.f32.mrf.mxu0  ;;  %v10917_v6 = vpop.f32.mrf.mxu1 }
 0x4a7   : > { %v3032_v33 = vadd.f32 %v14230_v26, %v2936_v22 }
 0x4a8   : > { %v2940_v8 = vpop.f32.mrf.mxu0  ;;  %v3195_v9 = vpop.f32.mrf.mxu1 }
 0x4a9   : > { %3410 = vrot.lane.b32.xlu0 %v2307_v63, %s13278_s26  ;;  %v2941_v14 = vadd.f32 %v2940_v8, %v14221_v7  ;;  %v2569_v7 = vadd.f32 %v14223_v10, %v2481_v41 }
 0x4aa   : > { %v10881_v28 = vpop.f32.mrf.mxu0  ;;  %v10920_v12 = vpop.f32.mrf.mxu1 }
 0x4ab   : > { %v3033_v3 = vadd.f32 %v14237_v35, %v2941_v14  ;;  %v2655_v35 = vadd.f32 %v14217_v58, %v2569_v7 }
 0x4ac   : > { %v2945_v13 = vpop.f32.mrf.mxu0  ;;  %v3200_v16 = vpop.f32.mrf.mxu1 }
 0x4ad   : > { %v2946_v42 = vadd.f32 %v2945_v13, %v14225_v11  ;;  %v3396_v11 = vrot.slane %v3385_v44, %v13881_v21  ;;  %v2753_v61 = vadd.f32 %v14246_v46, %v2655_v35 }
 0x4ae   : > { %v10884_v17 = vpop.f32.mrf.mxu0  ;;  %v10923_v18 = vpop.f32.mrf.mxu1 }
 0x4af   : > { %v3034_v52 = vadd.f32 %v14248_v47, %v2946_v42  ;;  %v2761_v8 = vmul.f32 %v14228_v25, %v2753_v61  ;;  %v3581_v42 = vld [vmem:[#allocation17 + $0x18] sm:$0xff] }
 0x4b0   : > { %v3104_v20 = vpop.f32.mrf.mxu0  ;;  %v3368_v23 = vpop.f32.mrf.mxu1  ;;  %10976 = vmatpush3.msra.mxu1 %v3581_v42  ;;  %v4231_v42 = vld [vmem:[#allocation20 + $0x48] sm:$0xff] }
 0x4b1   : > { %v3118_v37 = vadd.f32 %v3104_v20, %v3032_v33  ;;  %v2768_v20 = vadd.f32 %v14233_v29, %v2761_v8  ;;  %10977 = vmatprep.subr.mxu1 %v13276_v0  ;;  %v3578_v8 = vld [vmem:[#allocation17 + $0x8] sm:$0xff] }
 0x4b2   : > { %v10904_v27 = vpop.f32.mrf.mxu0  ;;  %v10943_v31 = vpop.f32.mrf.mxu1  ;;  %10978 = vmatpush3.msra.mxu1 %v3580_v62  ;;  %v4522_v62 = vld [vmem:[#allocation23 + $0x28] sm:$0xff] }
 0x4b3   : > { %v3204_v26 = vadd.f32 %v3190_v2, %v3118_v37  ;;  %10988 = vmatprep.subr.mxu1 %v13276_v0 }
 0x4b4   : > { %v3109_v30 = vpop.f32.mrf.mxu0  ;;  %v3373_v32 = vpop.f32.mrf.mxu1 }
 0x4b5   : > { %v3119_v48 = vadd.f32 %v3109_v30, %v3033_v3  ;;  %v3768_v3 = vld [vmem:[#allocation17 + $0x28] sm:$0xff] }
 0x4b6   : > { %v10907_v34 = vpop.f32.mrf.mxu0  ;;  %v10946_v36 = vpop.f32.mrf.mxu1 }
 0x4b7   : > { %v3205_v59 = vadd.f32 %v3195_v9, %v3119_v48 }
 0x4b8   : > { %v3114_v39 = vpop.f32.mrf.mxu0  ;;  %v3378_v40 = vpop.f32.mrf.mxu1 }
 0x4b9   : > { %v3120_v53 = vadd.f32 %v3114_v39, %v3034_v52 }
 0x4ba   : > { %v10910_v43 = vpop.f32.mrf.mxu0  ;;  %v10949_v15 = vpop.f32.mrf.mxu1 }
 0x4bb   : > { %v3206_v60 = vadd.f32 %v3200_v16, %v3120_v53  ;;  %v3547_v43 = vld [vmem:[#allocation14] sm:$0x3] }
 0x4bc   : > { %v3276_v50 = vpop.f32.mrf.mxu0  ;;  %v3551_v15 = vrot.slane %v3547_v43, %v13878_v19  ;;  %v3558_v44 = vrot.slane %v3547_v43, %v13881_v21 }
 0x4bd   : > { %v3290_v24 = vadd.f32 %v3276_v50, %v3204_v26 }
 0x4be   : > { %v10930_v56 = vpop.f32.mrf.mxu0 }
 0x4bf   : > { %v3382_v54 = vadd.f32 %v3368_v23, %v3290_v24  ;;  %v2771_v23 = vmax.f32 %v2768_v20, 0.0 }
 0x4c0   : > { %v3281_v10 = vpop.f32.mrf.mxu0 }
 0x4c1   : > { %v3390_v2 = vmul.f32 %v3389_v38, %v3382_v54  ;;  %v3291_v4 = vadd.f32 %v3281_v10, %v3205_v59 }
 0x4c2   : > { %v10933_v5 = vpop.f32.mrf.mxu0 }
 0x4c3   : > { %v3383_v6 = vadd.f32 %v3373_v32, %v3291_v4  ;;  %v3397_v47 = vadd.f32 %v3396_v11, %v3390_v2 }
 0x4c4   : > { %v3286_v63 = vpop.f32.mrf.mxu0 }
 0x4c5   : > { %v3391_v28 = vmul.f32 %v3389_v38, %v3383_v6  ;;  %v3292_v12 = vadd.f32 %v3286_v63, %v3206_v60  ;;  %v3400_v13 = vmax.f32 %v3397_v47, 0.0 }
 0x4c6   : > { %v10936_v17 = vpop.f32.mrf.mxu0 }
 0x4c7   : > { %v3384_v58 = vadd.f32 %v3378_v40, %v3292_v12  ;;  %3430 = vrot.lane.b32.xlu1 %v3400_v13, %s13280_s11  ;;  %v3398_v9 = vadd.f32 %v3396_v11, %v3391_v28  ;;  %v3577_v17 = vld [vmem:[#allocation17] sm:$0xff] }
 0x4c9   : > { %v3392_v18 = vmul.f32 %v3389_v38, %v3384_v58  ;;  %v3401_v46 = vmax.f32 %v3398_v9, 0.0  ;;  %v3882_v58 = vld [vmem:[#allocation20 + $0x8] sm:$0xff] }
 0x4cb   : > { %3432 = vrot.lane.b32.xlu1 %v3401_v46, %s13280_s11  ;;  %v3399_v16 = vadd.f32 %v3396_v11, %v3392_v18  ;;  %v3881_v46 = vld [vmem:[#allocation20] sm:$0xff] }
 0x4cd   : > { %v3402_v22 = vmax.f32 %v3399_v16, 0.0 }
 0x4cf   : > { %3422 = vrot.lane.b32.xlu1 %v2771_v23, %s13279_s1  ;;  %3434 = vrot.lane.b32.xlu0 %v3402_v22, %s13280_s11 }
 0x4f1   : > { %v3407_v25 = vpop.permute.xlu0 %3406 }
 0x4f2   : > { %v3439_v32 = vsel %vm2014_vm7, %v1985_v51, %v3407_v25 }
 0x4f5   : > { %v3409_v31 = vpop.permute.xlu1 %3408 }
 0x4f6   : > { %v3440_v34 = vsel %vm2014_vm7, %v1986_v57, %v3409_v31 }
 0x513   : > { %v3419_v27 = vpop.permute.xlu0 %3418 }
 0x514   : > { %v3443_v29 = vsel %vm3442_vm11, %v3439_v32, %v3419_v27  ;;  %v3885_v32 = vld [vmem:[#allocation20 + $0x18] sm:$0xff] }
 0x517   : > { %v3421_v30 = vpop.permute.xlu0 %3420 }
 0x518   : > { %v3444_v36 = vsel %vm3442_vm11, %v3440_v34, %v3421_v30 }
 0x51b   : > { %v3411_v37 = vpop.permute.xlu0 %3410 }
 0x51c   : > { %v3441_v55 = vsel %vm2014_vm7, %v1987_v1, %v3411_v37  ;;  %v3767_v1 = vld [vmem:[#allocation17 + $0x20] sm:$0xff]  ;;  %v4145_v37 = vld [vmem:[#allocation20 + $0x38] sm:$0xff] }
 0x539   : > { %v3431_v14 = vpop.permute.xlu1 %3430 }
 0x53a   : > { %v3447_v33 = vsel %vm3446_vm12, %v3443_v29, %v3431_v14 }
 0x53b   : > { %10967 = vmatmul.mubr.msk.f32.vlgmr.msra.gmra.mxu0 %vm1880_vm4, %v3447_v33 }
 0x53c   : > { %10969 = vmatprep.mubr.msk.f32.mxu0 %vm13277_vm0, %v13276_v0  ;;  %11002 = vmatpush3.msra.mxu0 %v3768_v3  ;;  %v4230_v3 = vld [vmem:[#allocation20 + $0x40] sm:$0xff] }
 0x53d   : > { %v3433_v49 = vpop.permute.xlu1 %3432  ;;  %11003 = vmatprep.subr.mxu0 %v13276_v0 }
 0x53e   : > { %v3448_v51 = vsel %vm3446_vm12, %v3444_v36, %v3433_v49  ;;  %11004 = vmatpush3.msra.mxu0 %v3767_v1  ;;  %v3884_v36 = vld [vmem:[#allocation20 + $0x10] sm:$0xff] }
 0x53f   : > { %10970 = vmatmul.mubr.msk.f32.gmra.mxu0 %vm1880_vm4, %v3448_v51  ;;  %11027 = vmatprep.subr.mxu0 %v13276_v0  ;;  %v4521_v1 = vld [vmem:[#allocation23 + $0x20] sm:$0xff] }
 0x540   : > { %10972 = vmatprep.mubr.msk.f32.mxu0 %vm13277_vm0, %v13276_v0 }
 0x541   : > { %v3423_v39 = vpop.permute.xlu1 %3422  ;;  %v3435_v57 = vpop.permute.xlu0 %3434 }
 0x542   : > { %v3445_v40 = vsel %vm3442_vm11, %v3441_v55, %v3423_v39  ;;  %v4144_v55 = vld [vmem:[#allocation20 + $0x30] sm:$0xff]  ;;  %v4059_v39 = vld [vmem:[#allocation20 + $0x28] sm:$0xff] }
 0x543   : > { %v3449_v41 = vsel %vm3446_vm12, %v3445_v40, %v3435_v57  ;;  %v4058_v57 = vld [vmem:[#allocation20 + $0x20] sm:$0xff]  ;;  %v4348_v40 = vld [vmem:[#allocation23 + $0x18] sm:$0xff] }
 0x544   : > { %10973 = vmatmul.mubr.msk.f32.gmra.mxu0 %vm1880_vm4, %v3449_v41  ;;  %v4347_v41 = vld [vmem:[#allocation23 + $0x10] sm:$0xff] }
 0x545   : > { %11005 = vmatprep.mubr.msk.f32.mxu0 %vm13277_vm0, %v13276_v0 }
 0x5fb   : > { %v3533_v45 = vpop.f32.mrf.mxu0 }
 0x5fc   : > { %v3552_v7 = vmul.f32 %v3551_v15, %v3533_v45 }
 0x5fd   : > { %v10968_v48 = vpop.f32.mrf.mxu0 }
 0x5fe   : > { %v14316_v26 = vadd.f32 %v3558_v44, %v3552_v7  ;;  %v4344_v48 = vld [vmem:[#allocation23] sm:$0xff] }
 0x5ff   : > { %v3538_v50 = vpop.f32.mrf.mxu0 }
 0x600   : > { %v3562_v52 = vmax.f32 %v14316_v26, 0.0  ;;  %v3553_v24 = vmul.f32 %v3551_v15, %v3538_v50  ;;  %v4694_v50 = vld [vmem:[#allocation23 + $0x48] sm:$0xff] }
 0x601   : > { %v10971_v38 = vpop.f32.mrf.mxu0 }
 0x602   : > { %v3568_v56 = vrot.slane %v3562_v52, 5  ;;  %v14321_v11 = vadd.f32 %v3558_v44, %v3553_v24  ;;  %v4693_v38 = vld [vmem:[#allocation23 + $0x40] sm:$0xff] }
 0x604   : > { %v3563_v35 = vmax.f32 %v14321_v11, 0.0  ;;  %v3543_v53 = vpop.f32.mrf.mxu0  ;;  %v14325_v54 = vsel %vm1991_vm5, 0.0, %v3568_v56 }
 0x605   : > { %v3554_v59 = vmul.f32 %v3551_v15, %v3543_v53  ;;  %v3584_v5 = vrot.slane %v14325_v54, 3  ;;  %v3769_v47 = vrot.slane %v14325_v54, 2  ;;  %v3675_v31 = vrot.slane %v14325_v54, 4 }
 0x606   : > { %v3569_v10 = vrot.slane %v3563_v35, 5  ;;  %v10974_v61 = vpop.f32.mrf.mxu0  ;;  %v3966_v30 = vrot.slane %v14325_v54, 5  ;;  %v4232_v15 = vrot.slane %v14325_v54, 1  ;;  %v4429_v53 = vrot.slane %v14325_v54, 6 }
 0x607   : > { %v14329_v2 = vadd.f32 %v3558_v44, %v3554_v59  ;;  %v4345_v44 = vld [vmem:[#allocation23 + $0x8] sm:$0xff]  ;;  %v4608_v59 = vld [vmem:[#allocation23 + $0x38] sm:$0xff] }
 0x608   : > { %v14332_v4 = vsel %vm1991_vm5, %v3568_v56, %v3569_v10 }
 0x609   : > { %v3564_v6 = vmax.f32 %v14329_v2, 0.0  ;;  %v3585_v60 = vrot.slane %v14332_v4, 3  ;;  %v3770_v63 = vrot.slane %v14332_v4, 2  ;;  %v3676_v25 = vrot.slane %v14332_v4, 4  ;;  %v5149_v2 = vld [vmem:[#allocation28 + $0x10] sm:$0xff] }
 0x60a   : > { %v3967_v27 = vrot.slane %v14332_v4, 5  ;;  %v4233_v43 = vrot.slane %v14332_v4, 1  ;;  %v4430_v56 = vrot.slane %v14332_v4, 6 }
 0x60b   : > { %v3571_v28 = vrot.slane %v3564_v6, 5  ;;  %v14342_v12 = vsel %vm2000_vm6, %v3584_v5, %v3585_v60  ;;  %v14345_v13 = vsel %vm2195_vm8, %v3769_v47, %v3770_v63  ;;  %v14398_v29 = vsel %vm1770_vm1, %v3675_v31, %v3676_v25  ;;  %v4607_v5 = vld [vmem:[#allocation23 + $0x30] sm:$0xff] }
 0x60c   : > { %10980 = vmatmul.mubr.msk.f32.vlgmr.msra.gmra.mxu1 %vm2014_vm7, %v14342_v12  ;;  %11006 = vmatmul.mubr.msk.f32.vlgmr.msra.gmra.mxu0 %vm2014_vm7, %v14345_v13  ;;  %v3968_v14 = vsel %vm1991_vm5, %v3966_v30, %v3967_v27  ;;  %v14496_v45 = vsel %vm2659_vm9, %v4232_v15, %v4233_v43 }
 0x60d   : > { %v3572_v9 = vsel %vm1991_vm5, %v3569_v10, %v3571_v28  ;;  %10989 = vmatpush3.msra.mxu1 %v3578_v8  ;;  %10982 = vmatprep.mubr.msk.f32.mxu1 %vm13277_vm0, %v13276_v0  ;;  %v4431_v10 = vsel %vm2857_vm10, %v4429_v53, %v4430_v56  ;;  %v4780_v8 = vld [vmem:[#allocation23 + $0x58] sm:$0xff]  ;;  %v4779_v28 = vld [vmem:[#allocation23 + $0x50] sm:$0xff] }
 0x60e   : > { %v14355_v18 = vsel %vm2000_vm6, %v3572_v9, 0.0  ;;  %11008 = vmatprep.mubr.msk.f32.mxu0 %vm13277_vm0, %v13276_v0  ;;  %10990 = vmatprep.subr.mxu1 %v13276_v0 }
 0x60f   : > { %v14361_v20 = vrot.slane %v14355_v18, 3  ;;  %v14364_v16 = vrot.slane %v14355_v18, 2  ;;  %10991 = vmatpush3.msra.mxu1 %v3577_v17  ;;  %11028 = vmatpush3.msra.mxu0 %v3882_v58  ;;  %v14402_v33 = vrot.slane %v14355_v18, 4  ;;  %v14405_v34 = vrot.slane %v14355_v18, 5 }
 0x610   : > { %11029 = vmatprep.subr.mxu0 %v13276_v0  ;;  %11014 = vmatprep.subr.mxu1 %v13276_v0  ;;  %v14499_v7 = vrot.slane %v14355_v18, 1  ;;  %v4432_v61 = vrot.slane %v14355_v18, 6 }
 0x611   : > { %v14370_v23 = vsel %vm2000_vm6, %v3585_v60, %v14361_v20  ;;  %v14374_v22 = vsel %vm2195_vm8, %v3770_v63, %v14364_v16  ;;  %11030 = vmatpush3.msra.mxu0 %v3881_v46  ;;  %v14417_v49 = vsel %vm1770_vm1, %v3676_v25, %v14402_v33  ;;  %v3970_v51 = vsel %vm1991_vm5, %v3967_v27, %v14405_v34  ;;  %v4866_v60 = vld [vmem:[#allocation23 + $0x68] sm:$0xff]  ;;  %v4865_v63 = vld [vmem:[#allocation23 + $0x60] sm:$0xff] }
 0x612   : > { %10983 = vmatmul.mubr.msk.f32.gmra.mxu1 %vm2014_vm7, %v14370_v23  ;;  %11009 = vmatmul.mubr.msk.f32.gmra.mxu0 %vm2014_vm7, %v14374_v22  ;;  %v14512_v24 = vsel %vm2659_vm9, %v4233_v43, %v14499_v7  ;;  %v4433_v47 = vsel %vm2857_vm10, %v4430_v56, %v4432_v61 }
 0x613   : > { %10985 = vmatprep.mubr.msk.f32.mxu1 %vm13277_vm0, %v13276_v0  ;;  %11011 = vmatprep.mubr.msk.f32.mxu0 %vm13277_vm0, %v13276_v0 }
 0x614   : > { %11053 = vmatprep.subr.mxu0 %v13276_v0 }
 0x616   : > { %10986 = vmatmul.mubr.msk.f32.gmra.mxu1 %vm2014_vm7, %v14361_v20  ;;  %11012 = vmatmul.mubr.msk.f32.gmra.mxu0 %vm2014_vm7, %v14364_v16 }
 0x617   : > { %10992 = vmatprep.mubr.msk.f32.mxu1 %vm13277_vm0, %v13276_v0  ;;  %11031 = vmatprep.mubr.msk.f32.mxu0 %vm13277_vm0, %v13276_v0 }
 0x61a   : > { %10993 = vmatmul.mubr.msk.f32.vlgmr.msra.gmra.mxu1 %vm2014_vm7, %v14398_v29  ;;  %11032 = vmatmul.mubr.msk.f32.vlgmr.msra.gmra.mxu0 %vm2014_vm7, %v3968_v14 }
 0x61b   : > { %11015 = vmatpush3.msra.mxu1 %v3885_v32  ;;  %10995 = vmatprep.mubr.msk.f32.mxu1 %vm13277_vm0, %v13276_v0 }
 0x61c   : > { %11034 = vmatprep.mubr.msk.f32.mxu0 %vm13277_vm0, %v13276_v0  ;;  %11016 = vmatprep.subr.mxu1 %v13276_v0 }
 0x61d   : > { %11017 = vmatpush3.msra.mxu1 %v3884_v36  ;;  %11054 = vmatpush3.msra.mxu0 %v4145_v37 }
 0x61e   : > { %10996 = vmatmul.mubr.msk.f32.gmra.mxu1 %vm2014_vm7, %v14417_v49  ;;  %11035 = vmatmul.mubr.msk.f32.gmra.mxu0 %vm2014_vm7, %v3970_v51 }
 0x61f   : > { %10998 = vmatprep.mubr.msk.f32.mxu1 %vm13277_vm0, %v13276_v0  ;;  %11037 = vmatprep.mubr.msk.f32.mxu0 %vm13277_vm0, %v13276_v0 }
 0x620   : > { %11055 = vmatprep.subr.mxu0 %v13276_v0  ;;  %11040 = vmatprep.subr.mxu1 %v13276_v0 }
 0x621   : > { %11056 = vmatpush3.msra.mxu0 %v4144_v55 }
 0x622   : > { %10999 = vmatmul.mubr.msk.f32.gmra.mxu1 %vm2014_vm7, %v14402_v33  ;;  %11038 = vmatmul.mubr.msk.f32.gmra.mxu0 %vm2014_vm7, %v14405_v34 }
 0x623   : > { %11018 = vmatprep.mubr.msk.f32.mxu1 %vm13277_vm0, %v13276_v0  ;;  %11057 = vmatprep.mubr.msk.f32.mxu0 %vm13277_vm0, %v13276_v0 }
 0x624   : > { %11079 = vmatprep.subr.mxu0 %v13276_v0 }
 0x626   : > { %11019 = vmatmul.mubr.msk.f32.vlgmr.msra.gmra.mxu1 %vm2014_vm7, %v14398_v29  ;;  %11058 = vmatmul.mubr.msk.f32.vlgmr.msra.gmra.mxu0 %vm2014_vm7, %v14345_v13 }
 0x627   : > { %11041 = vmatpush3.msra.mxu1 %v4059_v39  ;;  %11021 = vmatprep.mubr.msk.f32.mxu1 %vm13277_vm0, %v13276_v0 }
 0x628   : > { %11060 = vmatprep.mubr.msk.f32.mxu0 %vm13277_vm0, %v13276_v0  ;;  %11042 = vmatprep.subr.mxu1 %v13276_v0 }
 0x629   : > { %11043 = vmatpush3.msra.mxu1 %v4058_v57  ;;  %11080 = vmatpush3.msra.mxu0 %v4348_v40 }
 0x62a   : > { %11022 = vmatmul.mubr.msk.f32.gmra.mxu1 %vm2014_vm7, %v14417_v49  ;;  %11061 = vmatmul.mubr.msk.f32.gmra.mxu0 %vm2014_vm7, %v14374_v22 }
 0x62b   : > { %11024 = vmatprep.mubr.msk.f32.mxu1 %vm13277_vm0, %v13276_v0  ;;  %11063 = vmatprep.mubr.msk.f32.mxu0 %vm13277_vm0, %v13276_v0 }
 0x62c   : > { %11081 = vmatprep.subr.mxu0 %v13276_v0  ;;  %11066 = vmatprep.subr.mxu1 %v13276_v0 }
 0x62d   : > { %11082 = vmatpush3.msra.mxu0 %v4347_v41 }
 0x62e   : > { %11025 = vmatmul.mubr.msk.f32.gmra.mxu1 %vm2014_vm7, %v14402_v33  ;;  %11064 = vmatmul.mubr.msk.f32.gmra.mxu0 %vm2014_vm7, %v14364_v16 }
 0x62f   : > { %11044 = vmatprep.mubr.msk.f32.mxu1 %vm13277_vm0, %v13276_v0  ;;  %11083 = vmatprep.mubr.msk.f32.mxu0 %vm13277_vm0, %v13276_v0 }
 0x630   : > { %11105 = vmatprep.subr.mxu0 %v13276_v0 }
 0x632   : > { %11045 = vmatmul.mubr.msk.f32.vlgmr.msra.gmra.mxu1 %vm2014_vm7, %v14342_v12  ;;  %11084 = vmatmul.mubr.msk.f32.vlgmr.msra.gmra.mxu0 %vm2014_vm7, %v3968_v14 }
 0x633   : > { %11067 = vmatpush3.msra.mxu1 %v4231_v42  ;;  %11047 = vmatprep.mubr.msk.f32.mxu1 %vm13277_vm0, %v13276_v0 }
 0x634   : > { %11086 = vmatprep.mubr.msk.f32.mxu0 %vm13277_vm0, %v13276_v0  ;;  %11068 = vmatprep.subr.mxu1 %v13276_v0 }
 0x635   : > { %11069 = vmatpush3.msra.mxu1 %v4230_v3  ;;  %11106 = vmatpush3.msra.mxu0 %v4522_v62 }
 0x636   : > { %11048 = vmatmul.mubr.msk.f32.gmra.mxu1 %vm2014_vm7, %v14370_v23  ;;  %11087 = vmatmul.mubr.msk.f32.gmra.mxu0 %vm2014_vm7, %v3970_v51 }
 0x637   : > { %11050 = vmatprep.mubr.msk.f32.mxu1 %vm13277_vm0, %v13276_v0  ;;  %11089 = vmatprep.mubr.msk.f32.mxu0 %vm13277_vm0, %v13276_v0 }
 0x638   : > { %11107 = vmatprep.subr.mxu0 %v13276_v0  ;;  %11092 = vmatprep.subr.mxu1 %v13276_v0 }
 0x639   : > { %11108 = vmatpush3.msra.mxu0 %v4521_v1 }
 0x63a   : > { %11051 = vmatmul.mubr.msk.f32.gmra.mxu1 %vm2014_vm7, %v14361_v20  ;;  %11090 = vmatmul.mubr.msk.f32.gmra.mxu0 %vm2014_vm7, %v14405_v34 }
 0x63b   : > { %11070 = vmatprep.mubr.msk.f32.mxu1 %vm13277_vm0, %v13276_v0  ;;  %11109 = vmatprep.mubr.msk.f32.mxu0 %vm13277_vm0, %v13276_v0 }
 0x63c   : > { %11131 = vmatprep.subr.mxu0 %v13276_v0 }
 0x63e   : > { %11071 = vmatmul.mubr.msk.f32.vlgmr.msra.gmra.mxu1 %vm2014_vm7, %v14496_v45  ;;  %11110 = vmatmul.mubr.msk.f32.vlgmr.msra.gmra.mxu0 %vm2014_vm7, %v14398_v29 }
 0x63f   : > { %11093 = vmatpush3.msra.mxu1 %v4345_v44  ;;  %11073 = vmatprep.mubr.msk.f32.mxu1 %vm13277_vm0, %v13276_v0 }
 0x640   : > { %11112 = vmatprep.mubr.msk.f32.mxu0 %vm13277_vm0, %v13276_v0  ;;  %11094 = vmatprep.subr.mxu1 %v13276_v0 }
 0x641   : > { %11095 = vmatpush3.msra.mxu1 %v4344_v48  ;;  %11132 = vmatpush3.msra.mxu0 %v4694_v50 }
 0x642   : > { %11074 = vmatmul.mubr.msk.f32.gmra.mxu1 %vm2014_vm7, %v14512_v24  ;;  %11113 = vmatmul.mubr.msk.f32.gmra.mxu0 %vm2014_vm7, %v14417_v49 }
 0x643   : > { %11076 = vmatprep.mubr.msk.f32.mxu1 %vm13277_vm0, %v13276_v0  ;;  %11115 = vmatprep.mubr.msk.f32.mxu0 %vm13277_vm0, %v13276_v0 }
 0x644   : > { %11133 = vmatprep.subr.mxu0 %v13276_v0  ;;  %11118 = vmatprep.subr.mxu1 %v13276_v0 }
 0x645   : > { %11134 = vmatpush3.msra.mxu0 %v4693_v38 }
 0x646   : > { %11077 = vmatmul.mubr.msk.f32.gmra.mxu1 %vm2014_vm7, %v14499_v7  ;;  %11116 = vmatmul.mubr.msk.f32.gmra.mxu0 %vm2014_vm7, %v14402_v33 }
 0x647   : > { %11096 = vmatprep.mubr.msk.f32.mxu1 %vm13277_vm0, %v13276_v0  ;;  %11135 = vmatprep.mubr.msk.f32.mxu0 %vm13277_vm0, %v13276_v0 }
 0x648   : > { %11157 = vmatprep.subr.mxu0 %v13276_v0 }
 0x64a   : > { %11097 = vmatmul.mubr.msk.f32.vlgmr.msra.gmra.mxu1 %vm2014_vm7, %v4431_v10  ;;  %11136 = vmatmul.mubr.msk.f32.vlgmr.msra.gmra.mxu0 %vm2014_vm7, %v14345_v13 }
 0x64b   : > { %11119 = vmatpush3.msra.mxu1 %v4608_v59  ;;  %11099 = vmatprep.mubr.msk.f32.mxu1 %vm13277_vm0, %v13276_v0 }
 0x64c   : > { %11138 = vmatprep.mubr.msk.f32.mxu0 %vm13277_vm0, %v13276_v0  ;;  %11120 = vmatprep.subr.mxu1 %v13276_v0 }
 0x64d   : > { %11121 = vmatpush3.msra.mxu1 %v4607_v5  ;;  %11158 = vmatpush3.msra.mxu0 %v4866_v60 }
 0x64e   : > { %11100 = vmatmul.mubr.msk.f32.gmra.mxu1 %vm2014_vm7, %v4433_v47  ;;  %11139 = vmatmul.mubr.msk.f32.gmra.mxu0 %vm2014_vm7, %v14374_v22  ;;  %v3863_v22 = vld [vmem:[#allocation16] sm:$0x3] }
 0x64f   : > { %11102 = vmatprep.mubr.msk.f32.mxu1 %vm13277_vm0, %v13276_v0  ;;  %11141 = vmatprep.mubr.msk.f32.mxu0 %vm13277_vm0, %v13276_v0  ;;  %v3867_v30 = vrot.slane %v3863_v22, %v13878_v19  ;;  %v3874_v33 = vrot.slane %v3863_v22, %v13881_v21 }
 0x650   : > { %11159 = vmatprep.subr.mxu0 %v13276_v0  ;;  %11144 = vmatprep.subr.mxu1 %v13276_v0 }
 0x651   : > { %11160 = vmatpush3.msra.mxu0 %v4865_v63 }
 0x652   : > { %11103 = vmatmul.mubr.msk.f32.gmra.mxu1 %vm2014_vm7, %v4432_v61  ;;  %11142 = vmatmul.mubr.msk.f32.gmra.mxu0 %vm2014_vm7, %v14364_v16 }
 0x653   : > { %11122 = vmatprep.mubr.msk.f32.mxu1 %vm13277_vm0, %v13276_v0  ;;  %11161 = vmatprep.mubr.msk.f32.mxu0 %vm13277_vm0, %v13276_v0 }
 0x654   : > { %11195 = vmatprep.subr.mxu0 %v13276_v0 }
 0x656   : > { %11123 = vmatmul.mubr.msk.f32.vlgmr.msra.gmra.mxu1 %vm2014_vm7, %v14342_v12  ;;  %11162 = vmatmul.mubr.msk.f32.vlgmr.msra.gmra.mxu0 %vm2014_vm7, %v14325_v54 }
 0x657   : > { %11145 = vmatpush3.msra.mxu1 %v4780_v8  ;;  %11125 = vmatprep.mubr.msk.f32.mxu1 %vm13277_vm0, %v13276_v0 }
 0x658   : > { %11164 = vmatprep.mubr.msk.f32.mxu0 %vm13277_vm0, %v13276_v0  ;;  %11146 = vmatprep.subr.mxu1 %v13276_v0 }
 0x659   : > { %11147 = vmatpush3.msra.mxu1 %v4779_v28 }
 0x65a   : > { %11126 = vmatmul.mubr.msk.f32.gmra.mxu1 %vm2014_vm7, %v14370_v23  ;;  %11165 = vmatmul.mubr.msk.f32.gmra.mxu0 %vm2014_vm7, %v14332_v4 }
 0x65b   : > { %11128 = vmatprep.mubr.msk.f32.mxu1 %vm13277_vm0, %v13276_v0  ;;  %11167 = vmatprep.mubr.msk.f32.mxu0 %vm13277_vm0, %v13276_v0 }
 0x65c   : > { %11170 = vmatprep.subr.mxu1 %v13276_v0 }
 0x65e   : > { %11129 = vmatmul.mubr.msk.f32.gmra.mxu1 %vm2014_vm7, %v14361_v20  ;;  %11168 = vmatmul.mubr.msk.f32.gmra.mxu0 %vm2014_vm7, %v14355_v18 }
 0x65f   : > { %11148 = vmatprep.mubr.msk.f32.mxu1 %vm13277_vm0, %v13276_v0  ;;  %11199 = vmatprep.mubr.msk.f32.mxu0 %vm13277_vm0, %v13276_v0 }
 0x662   : > { %11149 = vmatmul.mubr.msk.f32.vlgmr.msra.gmra.mxu1 %vm2014_vm7, %v14496_v45 }
 0x663   : > { %11151 = vmatprep.mubr.msk.f32.mxu1 %vm13277_vm0, %v13276_v0 }
 0x666   : > { %11152 = vmatmul.mubr.msk.f32.gmra.mxu1 %vm2014_vm7, %v14512_v24 }
 0x667   : > { %11154 = vmatprep.mubr.msk.f32.mxu1 %vm13277_vm0, %v13276_v0 }
 0x66a   : > { %11155 = vmatmul.mubr.msk.f32.gmra.mxu1 %vm2014_vm7, %v14499_v7 }
 0x66b   : > { %11186 = vmatprep.mubr.msk.f32.mxu1 %vm13277_vm0, %v13276_v0 }
 0x6cc   : > { %v3661_v54 = vpop.f32.mrf.mxu1  ;;  %v3846_v4 = vpop.f32.mrf.mxu0 }
 0x6ce   : > { %v10981_v12 = vpop.f32.mrf.mxu1  ;;  %v11007_v13 = vpop.f32.mrf.mxu0 }
 0x6d2   : > { %v3666_v17 = vpop.f32.mrf.mxu1  ;;  %v3851_v58 = vpop.f32.mrf.mxu0 }
 0x6d4   : > { %v10984_v9 = vpop.f32.mrf.mxu1  ;;  %v11010_v18 = vpop.f32.mrf.mxu0 }
 0x6d6   : > { %v3671_v46 = vpop.f32.mrf.mxu1  ;;  %v3856_v20 = vpop.f32.mrf.mxu0 }
 0x6d8   : > { %v10987_v16 = vpop.f32.mrf.mxu1  ;;  %v11013_v23 = vpop.f32.mrf.mxu0 }
 0x6d9   : > { %v4326_v16 = vld [vmem:[#allocation19] sm:$0x3] }
 0x6da   : > { %v3752_v25 = vpop.f32.mrf.mxu1  ;;  %v4043_v27 = vpop.f32.mrf.mxu0 }
 0x6db   : > { %v3753_v31 = vadd.f32 %v3752_v25, %v3661_v54 }
 0x6dc   : > { %v10994_v32 = vpop.f32.mrf.mxu1  ;;  %v11033_v29 = vpop.f32.mrf.mxu0 }
 0x6dd   : > { %v3860_v14 = vadd.f32 %v3846_v4, %v3753_v31  ;;  %v14622_v32 = vrot.slane %v4326_v16, %v13878_v19 }
 0x6de   : > { %v3757_v34 = vpop.f32.mrf.mxu1  ;;  %v4048_v36 = vpop.f32.mrf.mxu0 }
 0x6df   : > { %v3868_v37 = vmul.f32 %v3867_v30, %v3860_v14  ;;  %v3758_v49 = vadd.f32 %v3757_v34, %v3666_v17  ;;  %v5026_v14 = vld [vmem:[%s15779_s23 + $0x38] sm:$0xff] }
 0x6e0   : > { %v10997_v51 = vpop.f32.mrf.mxu1  ;;  %v11036_v55 = vpop.f32.mrf.mxu0  ;;  %11171 = vmatpush3.msra.mxu1 %v5026_v14 }
 0x6e1   : > { %v3861_v39 = vadd.f32 %v3851_v58, %v3758_v49  ;;  %v3875_v57 = vadd.f32 %v3874_v33, %v3868_v37  ;;  %v14629_v37 = vrot.slane %v4326_v16, %v13881_v21  ;;  %11172 = vmatprep.subr.mxu1 %v13276_v0  ;;  %v5024_v51 = vld [vmem:[%s15779_s23 + $0x28] sm:$0xff] }
 0x6e2   : > { %v3762_v40 = vpop.f32.mrf.mxu1  ;;  %v14603_v41 = vpop.f32.mrf.mxu0 }
 0x6e3   : > { %v3869_v42 = vmul.f32 %v3867_v30, %v3861_v39  ;;  %v3763_v3 = vadd.f32 %v3762_v40, %v3671_v46  ;;  %v3878_v62 = vmax.f32 %v3875_v57, 0.0 }
 0x6e4   : > { %v11000_v1 = vpop.f32.mrf.mxu1  ;;  %v11039_v43 = vpop.f32.mrf.mxu0 }
 0x6e5   : > { %v3862_v15 = vadd.f32 %v3856_v20, %v3763_v3  ;;  %4977 = vrot.lane.b32.xlu1 %v3878_v62, %s13278_s26  ;;  %v3876_v44 = vadd.f32 %v3874_v33, %v3869_v42  ;;  %v5023_v42 = vld [vmem:[%s15779_s23 + $0x20] sm:$0xff] }
 0x6e6   : > { %v3952_v45 = vpop.f32.mrf.mxu1  ;;  %v4212_v7 = vpop.f32.mrf.mxu0 }
 0x6e7   : > { %v3870_v48 = vmul.f32 %v3867_v30, %v3862_v15  ;;  %v3879_v50 = vmax.f32 %v3876_v44, 0.0  ;;  %v4044_v17 = vadd.f32 %v4043_v27, %v3952_v45  ;;  %v5022_v15 = vld [vmem:[%s15779_s23 + $0x18] sm:$0xff] }
 0x6e8   : > { %v11020_v24 = vpop.f32.mrf.mxu1  ;;  %v11059_v38 = vpop.f32.mrf.mxu0 }
 0x6e9   : > { %4979 = vrot.lane.b32.xlu0 %v3879_v50, %s13278_s26  ;;  %v14607_v56 = vadd.f32 %v3874_v33, %v3870_v48  ;;  %v5025_v33 = vld [vmem:[%s15779_s23 + $0x30] sm:$0xff] }
 0x6ea   : > { %v3957_v53 = vpop.f32.mrf.mxu1  ;;  %v4217_v59 = vpop.f32.mrf.mxu0  ;;  %11173 = vmatpush3.msra.mxu1 %v5025_v33  ;;  %v5021_v50 = vld [vmem:[%s15779_s23 + $0x10] sm:$0xff] }
 0x6eb   : > { %v4049_v23 = vadd.f32 %v4048_v36, %v3957_v53  ;;  %11174 = vmatprep.subr.mxu1 %v13276_v0 }
 0x6ec   : > { %v11023_v10 = vpop.f32.mrf.mxu1  ;;  %v11062_v61 = vpop.f32.mrf.mxu0  ;;  %11175 = vmatpush3.msra.mxu1 %v5024_v51 }
 0x6ed   : > { %11176 = vmatprep.subr.mxu1 %v13276_v0 }
 0x6ee   : > { %v14609_v5 = vpop.f32.mrf.mxu1  ;;  %v14611_v60 = vpop.f32.mrf.mxu0  ;;  %11177 = vmatpush3.msra.mxu1 %v5023_v42 }
 0x6ef   : > { %11178 = vmatprep.subr.mxu1 %v13276_v0 }
 0x6f0   : > { %v11026_v47 = vpop.f32.mrf.mxu1  ;;  %v11065_v63 = vpop.f32.mrf.mxu0  ;;  %11179 = vmatpush3.msra.mxu1 %v5022_v15 }
 0x6f1   : > { %11180 = vmatprep.subr.mxu1 %v13276_v0 }
 0x6f2   : > { %v4126_v8 = vpop.f32.mrf.mxu1  ;;  %v14613_v28 = vpop.f32.mrf.mxu0  ;;  %11181 = vmatpush3.msra.mxu1 %v5021_v50 }
 0x6f3   : > { %v4140_v18 = vadd.f32 %v4126_v8, %v4044_v17  ;;  %11182 = vmatprep.subr.mxu1 %v13276_v0 }
 0x6f4   : > { %v11046_v54 = vpop.f32.mrf.mxu1  ;;  %v11085_v4 = vpop.f32.mrf.mxu0 }
 0x6f5   : > { %v4226_v30 = vadd.f32 %v4212_v7, %v4140_v18 }
 0x6f6   : > { %v4131_v12 = vpop.f32.mrf.mxu1  ;;  %v14615_v13 = vpop.f32.mrf.mxu0 }
 0x6f7   : > { %v4141_v31 = vadd.f32 %v4131_v12, %v4049_v23 }
 0x6f8   : > { %v11049_v58 = vpop.f32.mrf.mxu1  ;;  %v11088_v9 = vpop.f32.mrf.mxu0 }
 0x6f9   : > { %v4227_v39 = vadd.f32 %v4217_v59, %v4141_v31  ;;  %v5020_v59 = vld [vmem:[%s15779_s23 + $0x8] sm:$0xff] }
 0x6fa   : > { %v14617_v46 = vpop.f32.mrf.mxu1  ;;  %v14619_v20 = vpop.f32.mrf.mxu0  ;;  %11183 = vmatpush3.msra.mxu1 %v5020_v59 }
 0x6fb   : > { %11184 = vmatprep.subr.mxu1 %v13276_v0 }
 0x6fc   : > { %v11052_v22 = vpop.f32.mrf.mxu1  ;;  %v11091_v25 = vpop.f32.mrf.mxu0 }
 0x6fe   : > { %v4309_v29 = vpop.f32.mrf.mxu1  ;;  %v14624_v27 = vpop.f32.mrf.mxu0 }
 0x6ff   : > { %v4323_v34 = vadd.f32 %v4309_v29, %v4226_v30 }
 0x700   : > { %v11072_v36 = vpop.f32.mrf.mxu1  ;;  %v11111_v49 = vpop.f32.mrf.mxu0 }
 0x701   : > { %v4331_v55 = vmul.f32 %v14622_v32, %v4323_v34 }
 0x702   : > { %v4314_v57 = vpop.f32.mrf.mxu1  ;;  %v4594_v40 = vpop.f32.mrf.mxu0 }
 0x703   : > { %v4324_v3 = vadd.f32 %v4314_v57, %v4227_v39  ;;  %v4338_v62 = vadd.f32 %v14629_v37, %v4331_v55  ;;  %v4054_v57 = vadd.f32 %v14603_v41, %v14609_v5 }
 0x704   : > { %v11075_v1 = vpop.f32.mrf.mxu1  ;;  %v11114_v43 = vpop.f32.mrf.mxu0 }
 0x705   : > { %v4332_v44 = vmul.f32 %v14622_v32, %v4324_v3  ;;  %v4341_v45 = vmax.f32 %v4338_v62, 0.0  ;;  %v4956_v1 = vld [vmem:[#allocation22] sm:$0x3]  ;;  %v5019_v43 = vld [vmem:[%s15779_s23] sm:$0xff]  ;;  %v4142_v15 = vadd.f32 %v14617_v46, %v4054_v57 }
 0x706   : > { %v14640_v7 = vpop.f32.mrf.mxu1  ;;  %v4599_v48 = vpop.f32.mrf.mxu0  ;;  %11185 = vmatpush3.msra.mxu1 %v5019_v43  ;;  %v4967_v5 = vrot.slane %v4956_v1, %v13881_v21 }
 0x707   : > { %4989 = vrot.lane.b32.xlu0 %v4341_v45, %s13279_s1  ;;  %v4339_v24 = vadd.f32 %v14629_v37, %v4332_v44  ;;  %11221 = vmatprep.subr.mxu1 %v13276_v0 }
 0x708   : > { %v11078_v38 = vpop.f32.mrf.mxu1  ;;  %v11117_v53 = vpop.f32.mrf.mxu0 }
 0x709   : > { %v4342_v10 = vmax.f32 %v4339_v24, 0.0  ;;  %v4960_v24 = vrot.slane %v4956_v1, %v13878_v19 }
 0x70a   : > { %v4506_v61 = vpop.f32.mrf.mxu1  ;;  %v4761_v47 = vpop.f32.mrf.mxu0 }
 0x70b   : > { %4991 = vrot.lane.b32.xlu1 %v4342_v10, %s13279_s1  ;;  %v4507_v25 = vadd.f32 %v4506_v61, %v14613_v28 }
 0x70c   : > { %v11098_v63 = vpop.f32.mrf.mxu1  ;;  %v11137_v8 = vpop.f32.mrf.mxu0 }
 0x70d   : > { %v4603_v34 = vadd.f32 %v14624_v27, %v4507_v25 }
 0x70e   : > { %v4511_v54 = vpop.f32.mrf.mxu1  ;;  %v4766_v4 = vpop.f32.mrf.mxu0 }
 0x70f   : > { %v4512_v33 = vadd.f32 %v4511_v54, %v14615_v13 }
 0x710   : > { %v11101_v12 = vpop.f32.mrf.mxu1  ;;  %v11140_v17 = vpop.f32.mrf.mxu0 }
 0x711   : > { %v4604_v28 = vadd.f32 %v4594_v40, %v4512_v33 }
 0x712   : > { %v4516_v58 = vpop.f32.mrf.mxu1  ;;  %v4771_v9 = vpop.f32.mrf.mxu0 }
 0x713   : > { %v4517_v42 = vadd.f32 %v4516_v58, %v14619_v20  ;;  %v4228_v20 = vadd.f32 %v14611_v60, %v4142_v15 }
 0x714   : > { %v11104_v18 = vpop.f32.mrf.mxu1  ;;  %v11143_v16 = vpop.f32.mrf.mxu0 }
 0x715   : > { %v4605_v45 = vadd.f32 %v4599_v48, %v4517_v42  ;;  %v4325_v46 = vadd.f32 %v14640_v7, %v4228_v20  ;;  %v3880_v7 = vmax.f32 %v14607_v56, 0.0 }
 0x716   : > { %v4675_v23 = vpop.f32.mrf.mxu1  ;;  %v4939_v22 = vpop.f32.mrf.mxu0 }
 0x717   : > { %v4689_v51 = vadd.f32 %v4675_v23, %v4603_v34  ;;  %v4333_v12 = vmul.f32 %v14622_v32, %v4325_v46 }
 0x718   : > { %v11124_v31 = vpop.f32.mrf.mxu1  ;;  %v11163_v30 = vpop.f32.mrf.mxu0 }
 0x719   : > { %v4775_v44 = vadd.f32 %v4761_v47, %v4689_v51  ;;  %v4340_v25 = vadd.f32 %v14629_v37, %v4333_v12 }
 0x71a   : > { %v4680_v29 = vpop.f32.mrf.mxu1  ;;  %v4944_v14 = vpop.f32.mrf.mxu0 }
 0x71b   : > { %v4690_v13 = vadd.f32 %v4680_v29, %v4604_v28  ;;  %v4343_v32 = vmax.f32 %v4340_v25, 0.0  ;;  %v5150_v28 = vld [vmem:[#allocation28 + $0x18] sm:$0xff] }
 0x71c   : > { %v11127_v36 = vpop.f32.mrf.mxu1  ;;  %v11166_v49 = vpop.f32.mrf.mxu0  ;;  %11196 = vmatpush3.msra.mxu0 %v5150_v28  ;;  %v5800_v28 = vld [vmem:[#allocation31 + $0x48] sm:$0xff] }
 0x71d   : > { %v4776_v53 = vadd.f32 %v4766_v4, %v4690_v13  ;;  %11197 = vmatprep.subr.mxu0 %v13276_v0 }
 0x71e   : > { %v4685_v55 = vpop.f32.mrf.mxu1  ;;  %v4949_v39 = vpop.f32.mrf.mxu0  ;;  %11198 = vmatpush3.msra.mxu0 %v5149_v2  ;;  %v6091_v2 = vld [vmem:[#allocation34 + $0x28] sm:$0xff] }
 0x71f   : > { %v4691_v40 = vadd.f32 %v4685_v55, %v4605_v45  ;;  %11208 = vmatprep.subr.mxu0 %v13276_v0 }
 0x720   : > { %v11130_v3 = vpop.f32.mrf.mxu1  ;;  %v11169_v62 = vpop.f32.mrf.mxu0 }
 0x721   : > { %v4777_v8 = vadd.f32 %v4771_v9, %v4691_v40  ;;  %v5337_v3 = vld [vmem:[#allocation28 + $0x28] sm:$0xff]  ;;  %v5116_v62 = vld [vmem:[#allocation25] sm:$0x3] }
 0x722   : > { %v4847_v27 = vpop.f32.mrf.mxu1  ;;  %v5120_v1 = vrot.slane %v5116_v62, %v13878_v19  ;;  %v5127_v43 = vrot.slane %v5116_v62, %v13881_v21 }
 0x723   : > { %v4861_v50 = vadd.f32 %v4847_v27, %v4775_v44 }
 0x724   : > { %v11150_v41 = vpop.f32.mrf.mxu1 }
 0x725   : > { %v4953_v38 = vadd.f32 %v4939_v22, %v4861_v50 }
 0x726   : > { %v4852_v59 = vpop.f32.mrf.mxu1 }
 0x727   : > { %v4961_v10 = vmul.f32 %v4960_v24, %v4953_v38  ;;  %v4862_v61 = vadd.f32 %v4852_v59, %v4776_v53 }
 0x728   : > { %v11153_v47 = vpop.f32.mrf.mxu1 }
 0x729   : > { %v4954_v63 = vadd.f32 %v4944_v14, %v4862_v61  ;;  %v4968_v48 = vadd.f32 %v4967_v5, %v4961_v10 }
 0x72a   : > { %v4857_v54 = vpop.f32.mrf.mxu1 }
 0x72b   : > { %v4962_v17 = vmul.f32 %v4960_v24, %v4954_v63  ;;  %v4863_v58 = vadd.f32 %v4857_v54, %v4777_v8  ;;  %v4971_v18 = vmax.f32 %v4968_v48, 0.0 }
 0x72c   : > { %v11156_v16 = vpop.f32.mrf.mxu1 }
 0x72d   : > { %v4955_v60 = vadd.f32 %v4949_v39, %v4863_v58  ;;  %5001 = vrot.lane.b32.xlu1 %v4971_v18, %s13280_s11  ;;  %v4969_v4 = vadd.f32 %v4967_v5, %v4962_v17  ;;  %v5147_v17 = vld [vmem:[#allocation28 + $0x8] sm:$0xff] }
 0x72f   : > { %v4963_v23 = vmul.f32 %v4960_v24, %v4955_v60  ;;  %v4972_v22 = vmax.f32 %v4969_v4, 0.0  ;;  %v5146_v60 = vld [vmem:[#allocation28] sm:$0xff] }
 0x730   : > { %v5451_v4 = vld [vmem:[#allocation31 + $0x8] sm:$0xff] }
 0x731   : > { %4981 = vrot.lane.b32.xlu1 %v3880_v7, %s13278_s26  ;;  %5003 = vrot.lane.b32.xlu0 %v4972_v22, %s13280_s11  ;;  %v4970_v9 = vadd.f32 %v4967_v5, %v4963_v23  ;;  %v5450_v22 = vld [vmem:[#allocation31] sm:$0xff] }
 0x733   : > { %v4973_v31 = vmax.f32 %v4970_v9, 0.0 }
 0x735   : > { %4993 = vrot.lane.b32.xlu0 %v4343_v32, %s13279_s1  ;;  %5005 = vrot.lane.b32.xlu1 %v4973_v31, %s13280_s11 }
 0x757   : > { %v4978_v30 = vpop.permute.xlu1 %4977 }
 0x758   : > { %v5010_v56 = vsel %vm2014_vm7, %v3562_v52, %v4978_v30 }
 0x75b   : > { %v4980_v29 = vpop.permute.xlu0 %4979 }
 0x75c   : > { %v5011_v49 = vsel %vm2014_vm7, %v3563_v35, %v4980_v29 }
 0x779   : > { %v4990_v33 = vpop.permute.xlu0 %4989 }
 0x77a   : > { %v5013_v37 = vsel %vm3442_vm11, %v5010_v56, %v4990_v33  ;;  %v5454_v56 = vld [vmem:[#allocation31 + $0x18] sm:$0xff] }
 0x77d   : > { %v4992_v14 = vpop.permute.xlu1 %4991 }
 0x77e   : > { %v5014_v51 = vsel %vm3442_vm11, %v5011_v49, %v4992_v14 }
 0x79f   : > { %v5002_v34 = vpop.permute.xlu1 %5001 }
 0x7a0   : > { %v5016_v36 = vsel %vm3446_vm12, %v5013_v37, %v5002_v34 }
 0x7a1   : > { %11187 = vmatmul.mubr.msk.f32.vlgmr.msra.gmra.mxu1 %vm1880_vm4, %v5016_v36 }
 0x7a2   : > { %11189 = vmatprep.mubr.msk.f32.mxu1 %vm13277_vm0, %v13276_v0  ;;  %11222 = vmatpush3.msra.mxu1 %v5337_v3  ;;  %v5799_v3 = vld [vmem:[#allocation31 + $0x40] sm:$0xff] }
 0x7a3   : > { %v4982_v55 = vpop.permute.xlu1 %4981  ;;  %v5004_v26 = vpop.permute.xlu0 %5003  ;;  %11223 = vmatprep.subr.mxu1 %v13276_v0 }
 0x7a4   : > { %v5017_v52 = vsel %vm3446_vm12, %v5014_v51, %v5004_v26  ;;  %v5012_v11 = vsel %vm2014_vm7, %v3564_v6, %v4982_v55  ;;  %v5336_v6 = vld [vmem:[#allocation28 + $0x20] sm:$0xff]  ;;  %v5714_v55 = vld [vmem:[#allocation31 + $0x38] sm:$0xff] }
 0x7a5   : > { %11190 = vmatmul.mubr.msk.f32.gmra.mxu1 %vm1880_vm4, %v5017_v52  ;;  %v5453_v51 = vld [vmem:[#allocation31 + $0x10] sm:$0xff] }
 0x7a6   : > { %11192 = vmatprep.mubr.msk.f32.mxu1 %vm13277_vm0, %v13276_v0  ;;  %11224 = vmatpush3.msra.mxu1 %v5336_v6  ;;  %v6090_v6 = vld [vmem:[#allocation34 + $0x20] sm:$0xff] }
 0x7a7   : > { %v4994_v39 = vpop.permute.xlu0 %4993  ;;  %v5006_v35 = vpop.permute.xlu1 %5005  ;;  %11247 = vmatprep.subr.mxu1 %v13276_v0 }
 0x7a8   : > { %v5015_v57 = vsel %vm3442_vm11, %v5012_v11, %v4994_v39  ;;  %v5713_v11 = vld [vmem:[#allocation31 + $0x30] sm:$0xff]  ;;  %v5628_v39 = vld [vmem:[#allocation31 + $0x28] sm:$0xff] }
 0x7a9   : > { %v5018_v42 = vsel %vm3446_vm12, %v5015_v57, %v5006_v35  ;;  %v5627_v35 = vld [vmem:[#allocation31 + $0x20] sm:$0xff]  ;;  %v5917_v57 = vld [vmem:[#allocation34 + $0x18] sm:$0xff] }
 0x7aa   : > { %11193 = vmatmul.mubr.msk.f32.gmra.mxu1 %vm1880_vm4, %v5018_v42  ;;  %v5916_v42 = vld [vmem:[#allocation34 + $0x10] sm:$0xff] }
 0x7ab   : > { %11225 = vmatprep.mubr.msk.f32.mxu1 %vm13277_vm0, %v13276_v0 }
 0x861   : > { %v5102_v15 = vpop.f32.mrf.mxu1 }
 0x862   : > { %v5121_v13 = vmul.f32 %v5120_v1, %v5102_v15 }
 0x863   : > { %v11188_v44 = vpop.f32.mrf.mxu1 }
 0x864   : > { %v14702_v27 = vadd.f32 %v5127_v43, %v5121_v13  ;;  %v5913_v44 = vld [vmem:[#allocation34] sm:$0xff] }
 0x865   : > { %v5107_v45 = vpop.f32.mrf.mxu1 }
 0x866   : > { %v5131_v50 = vmax.f32 %v14702_v27, 0.0  ;;  %v5122_v24 = vmul.f32 %v5120_v1, %v5107_v45  ;;  %v6263_v45 = vld [vmem:[#allocation34 + $0x48] sm:$0xff] }
 0x867   : > { %v11191_v41 = vpop.f32.mrf.mxu1 }
 0x868   : > { %v5137_v5 = vrot.slane %v5131_v50, 5  ;;  %v14707_v20 = vadd.f32 %v5127_v43, %v5122_v24  ;;  %v6262_v41 = vld [vmem:[#allocation34 + $0x40] sm:$0xff] }
 0x86a   : > { %v5132_v40 = vmax.f32 %v14707_v20, 0.0  ;;  %v5112_v38 = vpop.f32.mrf.mxu1  ;;  %v14711_v53 = vsel %vm1991_vm5, 0.0, %v5137_v5 }
 0x86b   : > { %v5123_v59 = vmul.f32 %v5120_v1, %v5112_v38  ;;  %v5153_v63 = vrot.slane %v14711_v53, 3  ;;  %v5338_v54 = vrot.slane %v14711_v53, 2  ;;  %v5244_v14 = vrot.slane %v14711_v53, 4 }
 0x86c   : > { %v5138_v46 = vrot.slane %v5132_v40, 5  ;;  %v11194_v10 = vpop.f32.mrf.mxu1  ;;  %v5535_v33 = vrot.slane %v14711_v53, 5  ;;  %v5801_v1 = vrot.slane %v14711_v53, 1  ;;  %v5998_v38 = vrot.slane %v14711_v53, 6 }
 0x86d   : > { %v14715_v61 = vadd.f32 %v5127_v43, %v5123_v59  ;;  %v5914_v43 = vld [vmem:[#allocation34 + $0x8] sm:$0xff]  ;;  %v6177_v59 = vld [vmem:[#allocation34 + $0x38] sm:$0xff] }
 0x86e   : > { %v14718_v47 = vsel %vm1991_vm5, %v5137_v5, %v5138_v46 }
 0x86f   : > { %v5133_v8 = vmax.f32 %v14715_v61, 0.0  ;;  %v5154_v48 = vrot.slane %v14718_v47, 3  ;;  %v5339_v12 = vrot.slane %v14718_v47, 2  ;;  %v5245_v30 = vrot.slane %v14718_v47, 4 }
 0x870   : > { %v5536_v29 = vrot.slane %v14718_v47, 5  ;;  %v5802_v62 = vrot.slane %v14718_v47, 1  ;;  %v5999_v5 = vrot.slane %v14718_v47, 6 }
 0x871   : > { %v5140_v58 = vrot.slane %v5133_v8, 5  ;;  %v14728_v18 = vsel %vm2000_vm6, %v5153_v63, %v5154_v48  ;;  %v14731_v16 = vsel %vm2195_vm8, %v5338_v54, %v5339_v12  ;;  %v14784_v37 = vsel %vm1770_vm1, %v5244_v14, %v5245_v30  ;;  %v6176_v63 = vld [vmem:[#allocation34 + $0x30] sm:$0xff] }
 0x872   : > { %11200 = vmatmul.mubr.msk.f32.vlgmr.msra.gmra.mxu0 %vm2014_vm7, %v14728_v18  ;;  %11226 = vmatmul.mubr.msk.f32.vlgmr.msra.gmra.mxu1 %vm2014_vm7, %v14731_v16  ;;  %v5537_v34 = vsel %vm1991_vm5, %v5535_v33, %v5536_v29  ;;  %v14882_v15 = vsel %vm2659_vm9, %v5801_v1, %v5802_v62 }
 0x873   : > { %v5141_v23 = vsel %vm1991_vm5, %v5138_v46, %v5140_v58  ;;  %11209 = vmatpush3.msra.mxu0 %v5147_v17  ;;  %11202 = vmatprep.mubr.msk.f32.mxu0 %vm13277_vm0, %v13276_v0  ;;  %v6000_v46 = vsel %vm2857_vm10, %v5998_v38, %v5999_v5  ;;  %v6349_v17 = vld [vmem:[#allocation34 + $0x58] sm:$0xff]  ;;  %v6348_v58 = vld [vmem:[#allocation34 + $0x50] sm:$0xff] }
 0x874   : > { %v14741_v7 = vsel %vm2000_vm6, %v5141_v23, 0.0  ;;  %11228 = vmatprep.mubr.msk.f32.mxu1 %vm13277_vm0, %v13276_v0  ;;  %11210 = vmatprep.subr.mxu0 %v13276_v0 }
 0x875   : > { %v14747_v25 = vrot.slane %v14741_v7, 3  ;;  %v14750_v9 = vrot.slane %v14741_v7, 2  ;;  %11211 = vmatpush3.msra.mxu0 %v5146_v60  ;;  %11248 = vmatpush3.msra.mxu1 %v5451_v4  ;;  %v14788_v36 = vrot.slane %v14741_v7, 4  ;;  %v14791_v49 = vrot.slane %v14741_v7, 5 }
 0x876   : > { %11249 = vmatprep.subr.mxu1 %v13276_v0  ;;  %11234 = vmatprep.subr.mxu0 %v13276_v0  ;;  %v14885_v13 = vrot.slane %v14741_v7, 1  ;;  %v6001_v10 = vrot.slane %v14741_v7, 6 }
 0x877   : > { %v14756_v32 = vsel %vm2000_vm6, %v5154_v48, %v14747_v25  ;;  %v14760_v31 = vsel %vm2195_vm8, %v5339_v12, %v14750_v9  ;;  %11250 = vmatpush3.msra.mxu1 %v5450_v22  ;;  %v14803_v26 = vsel %vm1770_vm1, %v5245_v30, %v14788_v36  ;;  %v5539_v52 = vsel %vm1991_vm5, %v5536_v29, %v14791_v49  ;;  %v6435_v48 = vld [vmem:[#allocation34 + $0x68] sm:$0xff]  ;;  %v6434_v12 = vld [vmem:[#allocation34 + $0x60] sm:$0xff] }
 0x878   : > { %11203 = vmatmul.mubr.msk.f32.gmra.mxu0 %vm2014_vm7, %v14756_v32  ;;  %11229 = vmatmul.mubr.msk.f32.gmra.mxu1 %vm2014_vm7, %v14760_v31  ;;  %v14898_v24 = vsel %vm2659_vm9, %v5802_v62, %v14885_v13  ;;  %v6002_v54 = vsel %vm2857_vm10, %v5999_v5, %v6001_v10 }
 0x879   : > { %11205 = vmatprep.mubr.msk.f32.mxu0 %vm13277_vm0, %v13276_v0  ;;  %11231 = vmatprep.mubr.msk.f32.mxu1 %vm13277_vm0, %v13276_v0 }
 0x87a   : > { %11273 = vmatprep.subr.mxu1 %v13276_v0 }
 0x87c   : > { %11206 = vmatmul.mubr.msk.f32.gmra.mxu0 %vm2014_vm7, %v14747_v25  ;;  %11232 = vmatmul.mubr.msk.f32.gmra.mxu1 %vm2014_vm7, %v14750_v9 }
 0x87d   : > { %11212 = vmatprep.mubr.msk.f32.mxu0 %vm13277_vm0, %v13276_v0  ;;  %11251 = vmatprep.mubr.msk.f32.mxu1 %vm13277_vm0, %v13276_v0 }
 0x880   : > { %11213 = vmatmul.mubr.msk.f32.vlgmr.msra.gmra.mxu0 %vm2014_vm7, %v14784_v37  ;;  %11252 = vmatmul.mubr.msk.f32.vlgmr.msra.gmra.mxu1 %vm2014_vm7, %v5537_v34 }
 0x881   : > { %11235 = vmatpush3.msra.mxu0 %v5454_v56  ;;  %11215 = vmatprep.mubr.msk.f32.mxu0 %vm13277_vm0, %v13276_v0 }
 0x882   : > { %11254 = vmatprep.mubr.msk.f32.mxu1 %vm13277_vm0, %v13276_v0  ;;  %11236 = vmatprep.subr.mxu0 %v13276_v0 }
 0x883   : > { %11237 = vmatpush3.msra.mxu0 %v5453_v51  ;;  %11274 = vmatpush3.msra.mxu1 %v5714_v55 }
 0x884   : > { %11216 = vmatmul.mubr.msk.f32.gmra.mxu0 %vm2014_vm7, %v14803_v26  ;;  %11255 = vmatmul.mubr.msk.f32.gmra.mxu1 %vm2014_vm7, %v5539_v52 }
 0x885   : > { %11218 = vmatprep.mubr.msk.f32.mxu0 %vm13277_vm0, %v13276_v0  ;;  %11257 = vmatprep.mubr.msk.f32.mxu1 %vm13277_vm0, %v13276_v0 }
 0x886   : > { %11275 = vmatprep.subr.mxu1 %v13276_v0  ;;  %11260 = vmatprep.subr.mxu0 %v13276_v0 }
 0x887   : > { %11276 = vmatpush3.msra.mxu1 %v5713_v11 }
 0x888   : > { %11219 = vmatmul.mubr.msk.f32.gmra.mxu0 %vm2014_vm7, %v14788_v36  ;;  %11258 = vmatmul.mubr.msk.f32.gmra.mxu1 %vm2014_vm7, %v14791_v49 }
 0x889   : > { %11238 = vmatprep.mubr.msk.f32.mxu0 %vm13277_vm0, %v13276_v0  ;;  %11277 = vmatprep.mubr.msk.f32.mxu1 %vm13277_vm0, %v13276_v0 }
 0x88a   : > { %11299 = vmatprep.subr.mxu1 %v13276_v0 }
 0x88c   : > { %11239 = vmatmul.mubr.msk.f32.vlgmr.msra.gmra.mxu0 %vm2014_vm7, %v14784_v37  ;;  %11278 = vmatmul.mubr.msk.f32.vlgmr.msra.gmra.mxu1 %vm2014_vm7, %v14731_v16 }
 0x88d   : > { %11261 = vmatpush3.msra.mxu0 %v5628_v39  ;;  %11241 = vmatprep.mubr.msk.f32.mxu0 %vm13277_vm0, %v13276_v0 }
 0x88e   : > { %11280 = vmatprep.mubr.msk.f32.mxu1 %vm13277_vm0, %v13276_v0  ;;  %11262 = vmatprep.subr.mxu0 %v13276_v0 }
 0x88f   : > { %11263 = vmatpush3.msra.mxu0 %v5627_v35  ;;  %11300 = vmatpush3.msra.mxu1 %v5917_v57 }
 0x890   : > { %11242 = vmatmul.mubr.msk.f32.gmra.mxu0 %vm2014_vm7, %v14803_v26  ;;  %11281 = vmatmul.mubr.msk.f32.gmra.mxu1 %vm2014_vm7, %v14760_v31 }
 0x891   : > { %11244 = vmatprep.mubr.msk.f32.mxu0 %vm13277_vm0, %v13276_v0  ;;  %11283 = vmatprep.mubr.msk.f32.mxu1 %vm13277_vm0, %v13276_v0 }
 0x892   : > { %11301 = vmatprep.subr.mxu1 %v13276_v0  ;;  %11286 = vmatprep.subr.mxu0 %v13276_v0 }
 0x893   : > { %11302 = vmatpush3.msra.mxu1 %v5916_v42 }
 0x894   : > { %11245 = vmatmul.mubr.msk.f32.gmra.mxu0 %vm2014_vm7, %v14788_v36  ;;  %11284 = vmatmul.mubr.msk.f32.gmra.mxu1 %vm2014_vm7, %v14750_v9 }
 0x895   : > { %11264 = vmatprep.mubr.msk.f32.mxu0 %vm13277_vm0, %v13276_v0  ;;  %11303 = vmatprep.mubr.msk.f32.mxu1 %vm13277_vm0, %v13276_v0 }
 0x896   : > { %11325 = vmatprep.subr.mxu1 %v13276_v0 }
 0x898   : > { %11265 = vmatmul.mubr.msk.f32.vlgmr.msra.gmra.mxu0 %vm2014_vm7, %v14728_v18  ;;  %11304 = vmatmul.mubr.msk.f32.vlgmr.msra.gmra.mxu1 %vm2014_vm7, %v5537_v34 }
 0x899   : > { %11287 = vmatpush3.msra.mxu0 %v5800_v28  ;;  %11267 = vmatprep.mubr.msk.f32.mxu0 %vm13277_vm0, %v13276_v0 }
 0x89a   : > { %11306 = vmatprep.mubr.msk.f32.mxu1 %vm13277_vm0, %v13276_v0  ;;  %11288 = vmatprep.subr.mxu0 %v13276_v0 }
 0x89b   : > { %11289 = vmatpush3.msra.mxu0 %v5799_v3  ;;  %11326 = vmatpush3.msra.mxu1 %v6091_v2 }
 0x89c   : > { %11268 = vmatmul.mubr.msk.f32.gmra.mxu0 %vm2014_vm7, %v14756_v32  ;;  %11307 = vmatmul.mubr.msk.f32.gmra.mxu1 %vm2014_vm7, %v5539_v52 }
 0x89d   : > { %11270 = vmatprep.mubr.msk.f32.mxu0 %vm13277_vm0, %v13276_v0  ;;  %11309 = vmatprep.mubr.msk.f32.mxu1 %vm13277_vm0, %v13276_v0 }
 0x89e   : > { %11327 = vmatprep.subr.mxu1 %v13276_v0  ;;  %11312 = vmatprep.subr.mxu0 %v13276_v0 }
 0x89f   : > { %11328 = vmatpush3.msra.mxu1 %v6090_v6 }
 0x8a0   : > { %11271 = vmatmul.mubr.msk.f32.gmra.mxu0 %vm2014_vm7, %v14747_v25  ;;  %11310 = vmatmul.mubr.msk.f32.gmra.mxu1 %vm2014_vm7, %v14791_v49 }
 0x8a1   : > { %11290 = vmatprep.mubr.msk.f32.mxu0 %vm13277_vm0, %v13276_v0  ;;  %11329 = vmatprep.mubr.msk.f32.mxu1 %vm13277_vm0, %v13276_v0 }
 0x8a2   : > { %11351 = vmatprep.subr.mxu1 %v13276_v0 }
 0x8a4   : > { %11291 = vmatmul.mubr.msk.f32.vlgmr.msra.gmra.mxu0 %vm2014_vm7, %v14882_v15  ;;  %11330 = vmatmul.mubr.msk.f32.vlgmr.msra.gmra.mxu1 %vm2014_vm7, %v14784_v37 }
 0x8a5   : > { %11313 = vmatpush3.msra.mxu0 %v5914_v43  ;;  %11293 = vmatprep.mubr.msk.f32.mxu0 %vm13277_vm0, %v13276_v0 }
 0x8a6   : > { %11332 = vmatprep.mubr.msk.f32.mxu1 %vm13277_vm0, %v13276_v0  ;;  %11314 = vmatprep.subr.mxu0 %v13276_v0 }
 0x8a7   : > { %11315 = vmatpush3.msra.mxu0 %v5913_v44  ;;  %11352 = vmatpush3.msra.mxu1 %v6263_v45 }
 0x8a8   : > { %11294 = vmatmul.mubr.msk.f32.gmra.mxu0 %vm2014_vm7, %v14898_v24  ;;  %11333 = vmatmul.mubr.msk.f32.gmra.mxu1 %vm2014_vm7, %v14803_v26 }
 0x8a9   : > { %11296 = vmatprep.mubr.msk.f32.mxu0 %vm13277_vm0, %v13276_v0  ;;  %11335 = vmatprep.mubr.msk.f32.mxu1 %vm13277_vm0, %v13276_v0 }
 0x8aa   : > { %11353 = vmatprep.subr.mxu1 %v13276_v0  ;;  %11338 = vmatprep.subr.mxu0 %v13276_v0 }
 0x8ab   : > { %11354 = vmatpush3.msra.mxu1 %v6262_v41 }
 0x8ac   : > { %11297 = vmatmul.mubr.msk.f32.gmra.mxu0 %vm2014_vm7, %v14885_v13  ;;  %11336 = vmatmul.mubr.msk.f32.gmra.mxu1 %vm2014_vm7, %v14788_v36 }
 0x8ad   : > { %11316 = vmatprep.mubr.msk.f32.mxu0 %vm13277_vm0, %v13276_v0  ;;  %11355 = vmatprep.mubr.msk.f32.mxu1 %vm13277_vm0, %v13276_v0 }
 0x8ae   : > { %11377 = vmatprep.subr.mxu1 %v13276_v0 }
 0x8b0   : > { %11317 = vmatmul.mubr.msk.f32.vlgmr.msra.gmra.mxu0 %vm2014_vm7, %v6000_v46  ;;  %11356 = vmatmul.mubr.msk.f32.vlgmr.msra.gmra.mxu1 %vm2014_vm7, %v14731_v16 }
 0x8b1   : > { %11339 = vmatpush3.msra.mxu0 %v6177_v59  ;;  %11319 = vmatprep.mubr.msk.f32.mxu0 %vm13277_vm0, %v13276_v0 }
 0x8b2   : > { %11358 = vmatprep.mubr.msk.f32.mxu1 %vm13277_vm0, %v13276_v0  ;;  %11340 = vmatprep.subr.mxu0 %v13276_v0 }
 0x8b3   : > { %11341 = vmatpush3.msra.mxu0 %v6176_v63  ;;  %11378 = vmatpush3.msra.mxu1 %v6435_v48 }
 0x8b4   : > { %11320 = vmatmul.mubr.msk.f32.gmra.mxu0 %vm2014_vm7, %v6002_v54  ;;  %11359 = vmatmul.mubr.msk.f32.gmra.mxu1 %vm2014_vm7, %v14760_v31  ;;  %v5432_v31 = vld [vmem:[#allocation26] sm:$0x3] }
 0x8b5   : > { %11322 = vmatprep.mubr.msk.f32.mxu0 %vm13277_vm0, %v13276_v0  ;;  %11361 = vmatprep.mubr.msk.f32.mxu1 %vm13277_vm0, %v13276_v0  ;;  %v5436_v33 = vrot.slane %v5432_v31, %v13878_v19  ;;  %v5443_v36 = vrot.slane %v5432_v31, %v13881_v21 }
 0x8b6   : > { %11379 = vmatprep.subr.mxu1 %v13276_v0  ;;  %11364 = vmatprep.subr.mxu0 %v13276_v0 }
 0x8b7   : > { %11380 = vmatpush3.msra.mxu1 %v6434_v12 }
 0x8b8   : > { %11323 = vmatmul.mubr.msk.f32.gmra.mxu0 %vm2014_vm7, %v6001_v10  ;;  %11362 = vmatmul.mubr.msk.f32.gmra.mxu1 %vm2014_vm7, %v14750_v9 }
 0x8b9   : > { %11342 = vmatprep.mubr.msk.f32.mxu0 %vm13277_vm0, %v13276_v0  ;;  %11381 = vmatprep.mubr.msk.f32.mxu1 %vm13277_vm0, %v13276_v0 }
 0x8ba   : > { %11409 = vmatprep.subr.mxu1 %v13276_v0 }
 0x8bc   : > { %11343 = vmatmul.mubr.msk.f32.vlgmr.msra.gmra.mxu0 %vm2014_vm7, %v14728_v18  ;;  %11382 = vmatmul.mubr.msk.f32.vlgmr.msra.gmra.mxu1 %vm2014_vm7, %v14711_v53 }
 0x8bd   : > { %11365 = vmatpush3.msra.mxu0 %v6349_v17  ;;  %11345 = vmatprep.mubr.msk.f32.mxu0 %vm13277_vm0, %v13276_v0 }
 0x8be   : > { %11384 = vmatprep.mubr.msk.f32.mxu1 %vm13277_vm0, %v13276_v0  ;;  %11366 = vmatprep.subr.mxu0 %v13276_v0 }
 0x8bf   : > { %11367 = vmatpush3.msra.mxu0 %v6348_v58 }
 0x8c0   : > { %11346 = vmatmul.mubr.msk.f32.gmra.mxu0 %vm2014_vm7, %v14756_v32  ;;  %11385 = vmatmul.mubr.msk.f32.gmra.mxu1 %vm2014_vm7, %v14718_v47 }
 0x8c1   : > { %11348 = vmatprep.mubr.msk.f32.mxu0 %vm13277_vm0, %v13276_v0  ;;  %11387 = vmatprep.mubr.msk.f32.mxu1 %vm13277_vm0, %v13276_v0 }
 0x8c2   : > { %11390 = vmatprep.subr.mxu0 %v13276_v0 }
 0x8c4   : > { %11349 = vmatmul.mubr.msk.f32.gmra.mxu0 %vm2014_vm7, %v14747_v25  ;;  %11388 = vmatmul.mubr.msk.f32.gmra.mxu1 %vm2014_vm7, %v14741_v7 }
 0x8c5   : > { %11368 = vmatprep.mubr.msk.f32.mxu0 %vm13277_vm0, %v13276_v0  ;;  %11417 = vmatprep.mubr.msk.f32.mxu1 %vm13277_vm0, %v13276_v0 }
 0x8c8   : > { %11369 = vmatmul.mubr.msk.f32.vlgmr.msra.gmra.mxu0 %vm2014_vm7, %v14882_v15 }
 0x8c9   : > { %11371 = vmatprep.mubr.msk.f32.mxu0 %vm13277_vm0, %v13276_v0 }
 0x8cc   : > { %11372 = vmatmul.mubr.msk.f32.gmra.mxu0 %vm2014_vm7, %v14898_v24 }
 0x8cd   : > { %11374 = vmatprep.mubr.msk.f32.mxu0 %vm13277_vm0, %v13276_v0 }
 0x8d0   : > { %11375 = vmatmul.mubr.msk.f32.gmra.mxu0 %vm2014_vm7, %v14885_v13 }
 0x8d1   : > { %11406 = vmatprep.mubr.msk.f32.mxu0 %vm13277_vm0, %v13276_v0 }
 0x932   : > { %v5230_v53 = vpop.f32.mrf.mxu0  ;;  %v5415_v47 = vpop.f32.mrf.mxu1 }
 0x934   : > { %v11201_v18 = vpop.f32.mrf.mxu0  ;;  %v11227_v16 = vpop.f32.mrf.mxu1 }
 0x938   : > { %v5235_v60 = vpop.f32.mrf.mxu0  ;;  %v5420_v4 = vpop.f32.mrf.mxu1 }
 0x93a   : > { %v11204_v23 = vpop.f32.mrf.mxu0  ;;  %v11230_v7 = vpop.f32.mrf.mxu1 }
 0x93c   : > { %v5240_v22 = vpop.f32.mrf.mxu0  ;;  %v5425_v25 = vpop.f32.mrf.mxu1 }
 0x93e   : > { %v11207_v9 = vpop.f32.mrf.mxu0  ;;  %v11233_v32 = vpop.f32.mrf.mxu1 }
 0x93f   : > { %v5895_v9 = vld [vmem:[#allocation29] sm:$0x3] }
 0x940   : > { %v5321_v30 = vpop.f32.mrf.mxu0  ;;  %v5612_v29 = vpop.f32.mrf.mxu1 }
 0x941   : > { %v5322_v14 = vadd.f32 %v5321_v30, %v5230_v53 }
 0x942   : > { %v11214_v56 = vpop.f32.mrf.mxu0  ;;  %v11253_v37 = vpop.f32.mrf.mxu1 }
 0x943   : > { %v5429_v34 = vadd.f32 %v5415_v47, %v5322_v14  ;;  %v15002_v56 = vrot.slane %v5895_v9, %v13878_v19 }
 0x944   : > { %v5326_v49 = vpop.f32.mrf.mxu0  ;;  %v5617_v51 = vpop.f32.mrf.mxu1 }
 0x945   : > { %v5437_v55 = vmul.f32 %v5436_v33, %v5429_v34  ;;  %v5327_v26 = vadd.f32 %v5326_v49, %v5235_v60 }
 0x946   : > { %v11217_v52 = vpop.f32.mrf.mxu0  ;;  %v11256_v11 = vpop.f32.mrf.mxu1 }
 0x947   : > { %v5430_v39 = vadd.f32 %v5420_v4, %v5327_v26  ;;  %v5444_v35 = vadd.f32 %v5443_v36, %v5437_v55 }
 0x948   : > { %v5331_v57 = vpop.f32.mrf.mxu0  ;;  %v14989_v42 = vpop.f32.mrf.mxu1 }
 0x949   : > { %v5438_v28 = vmul.f32 %v5436_v33, %v5430_v39  ;;  %v5332_v3 = vadd.f32 %v5331_v57, %v5240_v22  ;;  %v5447_v2 = vmax.f32 %v5444_v35, 0.0 }
 0x94a   : > { %v11220_v6 = vpop.f32.mrf.mxu0  ;;  %v11259_v62 = vpop.f32.mrf.mxu1 }
 0x94b   : > { %v5431_v1 = vadd.f32 %v5425_v25, %v5332_v3  ;;  %6546 = vrot.lane.b32.xlu0 %v5447_v2, %s13278_s26  ;;  %v5445_v43 = vadd.f32 %v5443_v36, %v5438_v28 }
 0x94c   : > { %v5521_v15 = vpop.f32.mrf.mxu0  ;;  %v5781_v13 = vpop.f32.mrf.mxu1 }
 0x94d   : > { %v5439_v44 = vmul.f32 %v5436_v33, %v5431_v1  ;;  %v5448_v45 = vmax.f32 %v5445_v43, 0.0  ;;  %v5613_v60 = vadd.f32 %v5612_v29, %v5521_v15  ;;  %v15005_v29 = vrot.slane %v5895_v9, %v13881_v21 }
 0x94e   : > { %v11240_v24 = vpop.f32.mrf.mxu0  ;;  %v11279_v41 = vpop.f32.mrf.mxu1 }
 0x94f   : > { %6548 = vrot.lane.b32.xlu1 %v5448_v45, %s13278_s26  ;;  %v14993_v5 = vadd.f32 %v5443_v36, %v5439_v44 }
 0x950   : > { %v5526_v38 = vpop.f32.mrf.mxu0  ;;  %v5786_v59 = vpop.f32.mrf.mxu1 }
 0x951   : > { %v5618_v32 = vadd.f32 %v5617_v51, %v5526_v38 }
 0x952   : > { %v11243_v46 = vpop.f32.mrf.mxu0  ;;  %v11282_v10 = vpop.f32.mrf.mxu1 }
 0x954   : > { %v14995_v63 = vpop.f32.mrf.mxu0  ;;  %v14997_v48 = vpop.f32.mrf.mxu1 }
 0x956   : > { %v11246_v54 = vpop.f32.mrf.mxu0  ;;  %v11285_v12 = vpop.f32.mrf.mxu1 }
 0x958   : > { %v5695_v17 = vpop.f32.mrf.mxu0  ;;  %v5984_v58 = vpop.f32.mrf.mxu1 }
 0x959   : > { %v5709_v7 = vadd.f32 %v5695_v17, %v5613_v60 }
 0x95a   : > { %v11266_v53 = vpop.f32.mrf.mxu0  ;;  %v11305_v47 = vpop.f32.mrf.mxu1 }
 0x95b   : > { %v5795_v33 = vadd.f32 %v5781_v13, %v5709_v7 }
 0x95c   : > { %v5700_v18 = vpop.f32.mrf.mxu0  ;;  %v5989_v16 = vpop.f32.mrf.mxu1 }
 0x95d   : > { %v5710_v14 = vadd.f32 %v5700_v18, %v5618_v32 }
 0x95e   : > { %v11269_v4 = vpop.f32.mrf.mxu0  ;;  %v11308_v23 = vpop.f32.mrf.mxu1 }
 0x95f   : > { %v5796_v52 = vadd.f32 %v5786_v59, %v5710_v14 }
 0x960   : > { %v14999_v22 = vpop.f32.mrf.mxu0  ;;  %v5994_v25 = vpop.f32.mrf.mxu1 }
 0x962   : > { %v11272_v31 = vpop.f32.mrf.mxu0  ;;  %v11311_v30 = vpop.f32.mrf.mxu1 }
 0x964   : > { %v5878_v37 = vpop.f32.mrf.mxu0  ;;  %v6158_v34 = vpop.f32.mrf.mxu1 }
 0x965   : > { %v5892_v36 = vadd.f32 %v5878_v37, %v5795_v33 }
 0x966   : > { %v11292_v49 = vpop.f32.mrf.mxu0  ;;  %v11331_v55 = vpop.f32.mrf.mxu1 }
 0x967   : > { %v5900_v26 = vmul.f32 %v15002_v56, %v5892_v36  ;;  %v5623_v49 = vadd.f32 %v14989_v42, %v14995_v63  ;;  %v6638_v63 = vld [vmem:[%s15780_s29 + $0x30] sm:$0xff] }
 0x968   : > { %v5883_v11 = vpop.f32.mrf.mxu0  ;;  %v6163_v51 = vpop.f32.mrf.mxu1 }
 0x969   : > { %v5893_v39 = vadd.f32 %v5883_v11, %v5796_v52  ;;  %v5907_v35 = vadd.f32 %v15005_v29, %v5900_v26  ;;  %v6525_v11 = vld [vmem:[#allocation32] sm:$0x3] }
 0x96a   : > { %v11295_v57 = vpop.f32.mrf.mxu0  ;;  %v11334_v28 = vpop.f32.mrf.mxu1  ;;  %v6536_v42 = vrot.slane %v6525_v11, %v13881_v21 }
 0x96b   : > { %v5901_v3 = vmul.f32 %v15002_v56, %v5893_v39  ;;  %v5910_v2 = vmax.f32 %v5907_v35, 0.0  ;;  %v5711_v39 = vadd.f32 %v14999_v22, %v5623_v49  ;;  %v6639_v57 = vld [vmem:[%s15780_s29 + $0x38] sm:$0xff] }
 0x96c   : > { %v5888_v6 = vpop.f32.mrf.mxu0  ;;  %v6168_v62 = vpop.f32.mrf.mxu1  ;;  %11391 = vmatpush3.msra.mxu0 %v6639_v57 }
 0x96d   : > { %6558 = vrot.lane.b32.xlu1 %v5910_v2, %s13279_s1  ;;  %v5908_v1 = vadd.f32 %v15005_v29, %v5901_v3  ;;  %v6529_v2 = vrot.slane %v6525_v11, %v13878_v19  ;;  %11392 = vmatprep.subr.mxu0 %v13276_v0 }
 0x96e   : > { %v11298_v43 = vpop.f32.mrf.mxu0  ;;  %v11337_v15 = vpop.f32.mrf.mxu1  ;;  %11393 = vmatpush3.msra.mxu0 %v6638_v63 }
 0x96f   : > { %v5911_v13 = vmax.f32 %v5908_v1, 0.0  ;;  %11394 = vmatprep.subr.mxu0 %v13276_v0 }
 0x970   : > { %v6075_v44 = vpop.f32.mrf.mxu0  ;;  %v6330_v45 = vpop.f32.mrf.mxu1 }
 0x971   : > { %6560 = vrot.lane.b32.xlu0 %v5911_v13, %s13279_s1  ;;  %v6076_v60 = vadd.f32 %v6075_v44, %v5984_v58 }
 0x972   : > { %v11318_v24 = vpop.f32.mrf.mxu0  ;;  %v11357_v41 = vpop.f32.mrf.mxu1 }
 0x973   : > { %v6172_v31 = vadd.f32 %v6158_v34, %v6076_v60  ;;  %v6636_v41 = vld [vmem:[%s15780_s29 + $0x20] sm:$0xff] }
 0x974   : > { %v6080_v38 = vpop.f32.mrf.mxu0  ;;  %v6335_v59 = vpop.f32.mrf.mxu1 }
 0x975   : > { %v6081_v32 = vadd.f32 %v6080_v38, %v5989_v16 }
 0x976   : > { %v11321_v46 = vpop.f32.mrf.mxu0  ;;  %v11360_v10 = vpop.f32.mrf.mxu1 }
 0x977   : > { %v6173_v26 = vadd.f32 %v6163_v51, %v6081_v32  ;;  %v6635_v10 = vld [vmem:[%s15780_s29 + $0x18] sm:$0xff]  ;;  %v6632_v32 = vld [vmem:[%s15780_s29] sm:$0xff] }
 0x978   : > { %v6085_v54 = vpop.f32.mrf.mxu0  ;;  %v6340_v12 = vpop.f32.mrf.mxu1 }
 0x979   : > { %v6086_v55 = vadd.f32 %v6085_v54, %v5994_v25  ;;  %v5797_v25 = vadd.f32 %v14997_v48, %v5711_v39 }
 0x97a   : > { %v11324_v17 = vpop.f32.mrf.mxu0  ;;  %v11363_v53 = vpop.f32.mrf.mxu1 }
 0x97b   : > { %v6174_v28 = vadd.f32 %v6168_v62, %v6086_v55  ;;  %v6637_v62 = vld [vmem:[%s15780_s29 + $0x28] sm:$0xff]  ;;  %v5894_v13 = vadd.f32 %v5888_v6, %v5797_v25 }
 0x97c   : > { %v6244_v47 = vpop.f32.mrf.mxu0  ;;  %v6508_v18 = vpop.f32.mrf.mxu1  ;;  %11395 = vmatpush3.msra.mxu0 %v6637_v62 }
 0x97d   : > { %v6258_v33 = vadd.f32 %v6244_v47, %v6172_v31  ;;  %11396 = vmatprep.subr.mxu0 %v13276_v0  ;;  %v5902_v54 = vmul.f32 %v15002_v56, %v5894_v13  ;;  %v5449_v56 = vmax.f32 %v14993_v5, 0.0 }
 0x97e   : > { %v11344_v4 = vpop.f32.mrf.mxu0  ;;  %v11383_v23 = vpop.f32.mrf.mxu1  ;;  %11397 = vmatpush3.msra.mxu0 %v6636_v41 }
 0x97f   : > { %v6344_v16 = vadd.f32 %v6330_v45, %v6258_v33  ;;  %11398 = vmatprep.subr.mxu0 %v13276_v0  ;;  %v6633_v4 = vld [vmem:[%s15780_s29 + $0x8] sm:$0xff] }
 0x980   : > { %v6249_v7 = vpop.f32.mrf.mxu0  ;;  %v6513_v9 = vpop.f32.mrf.mxu1  ;;  %11399 = vmatpush3.msra.mxu0 %v6635_v10 }
 0x981   : > { %v6259_v35 = vadd.f32 %v6249_v7, %v6173_v26  ;;  %11400 = vmatprep.subr.mxu0 %v13276_v0 }
 0x982   : > { %v11347_v30 = vpop.f32.mrf.mxu0  ;;  %v11386_v14 = vpop.f32.mrf.mxu1 }
 0x983   : > { %v6345_v43 = vadd.f32 %v6335_v59, %v6259_v35 }
 0x984   : > { %v6254_v37 = vpop.f32.mrf.mxu0  ;;  %v6518_v36 = vpop.f32.mrf.mxu1 }
 0x985   : > { %v6260_v22 = vadd.f32 %v6254_v37, %v6174_v28 }
 0x986   : > { %v11350_v52 = vpop.f32.mrf.mxu0  ;;  %v11389_v58 = vpop.f32.mrf.mxu1 }
 0x987   : > { %v6346_v48 = vadd.f32 %v6340_v12, %v6260_v22 }
 0x988   : > { %v6416_v34 = vpop.f32.mrf.mxu0 }
 0x989   : > { %v6430_v3 = vadd.f32 %v6416_v34, %v6344_v16 }
 0x98a   : > { %v11370_v1 = vpop.f32.mrf.mxu0 }
 0x98b   : > { %v6522_v51 = vadd.f32 %v6508_v18, %v6430_v3  ;;  %v6634_v18 = vld [vmem:[%s15780_s29 + $0x10] sm:$0xff] }
 0x98c   : > { %v6421_v15 = vpop.f32.mrf.mxu0  ;;  %11401 = vmatpush3.msra.mxu0 %v6634_v18  ;;  %v6893_v18 = vld [vmem:[#allocation38 + $0x48] sm:$0xff] }
 0x98d   : > { %v6530_v44 = vmul.f32 %v6529_v2, %v6522_v51  ;;  %v6431_v45 = vadd.f32 %v6421_v15, %v6345_v43  ;;  %11402 = vmatprep.subr.mxu0 %v13276_v0 }
 0x98e   : > { %v11373_v24 = vpop.f32.mrf.mxu0  ;;  %11403 = vmatpush3.msra.mxu0 %v6633_v4  ;;  %v6713_v4 = vld [vmem:[#allocation35] sm:$0x3] }
 0x98f   : > { %v6523_v38 = vadd.f32 %v6513_v9, %v6431_v45  ;;  %v6537_v46 = vadd.f32 %v6536_v42, %v6530_v44  ;;  %v5909_v9 = vadd.f32 %v15005_v29, %v5902_v54  ;;  %11404 = vmatprep.subr.mxu0 %v13276_v0  ;;  %v6738_v54 = vld [vmem:[#allocation38 + $0x38] sm:$0xff] }
 0x990   : > { %v6426_v59 = vpop.f32.mrf.mxu0  ;;  %11405 = vmatpush3.msra.mxu0 %v6632_v32  ;;  %11410 = vmatpush3.msra.mxu1 %v6738_v54  ;;  %v7291_v54 = vld [vmem:[#allocation41 + $0x80] sm:$0xff] }
 0x991   : > { %v6531_v6 = vmul.f32 %v6529_v2, %v6523_v38  ;;  %v6432_v17 = vadd.f32 %v6426_v59, %v6346_v48  ;;  %v6540_v53 = vmax.f32 %v6537_v46, 0.0  ;;  %v5912_v30 = vmax.f32 %v5909_v9, 0.0  ;;  %11431 = vmatprep.subr.mxu0 %v13276_v0  ;;  %11411 = vmatprep.subr.mxu1 %v13276_v0 }
 0x992   : > { %v11376_v47 = vpop.f32.mrf.mxu0 }
 0x993   : > { %v6524_v60 = vadd.f32 %v6518_v36, %v6432_v17  ;;  %6570 = vrot.lane.b32.xlu0 %v6540_v53, %s13280_s11  ;;  %v6538_v12 = vadd.f32 %v6536_v42, %v6531_v6  ;;  %v6895_v6 = vld [vmem:[#allocation38 + $0x58] sm:$0xff]  ;;  %v6737_v17 = vld [vmem:[#allocation38 + $0x30] sm:$0xff]  ;;  %v6736_v47 = vld [vmem:[#allocation38 + $0x28] sm:$0xff] }
 0x994   : > { %v6894_v53 = vld [vmem:[#allocation38 + $0x50] sm:$0xff]  ;;  %11412 = vmatpush3.msra.mxu1 %v6737_v17 }
 0x995   : > { %v6532_v23 = vmul.f32 %v6529_v2, %v6524_v60  ;;  %v6541_v7 = vmax.f32 %v6538_v12, 0.0  ;;  %11413 = vmatprep.subr.mxu1 %v13276_v0  ;;  %v6735_v60 = vld [vmem:[#allocation38 + $0x20] sm:$0xff] }
 0x996   : > { %11414 = vmatpush3.msra.mxu1 %v6736_v47  ;;  %v6892_v12 = vld [vmem:[#allocation38 + $0x40] sm:$0xff] }
 0x997   : > { %6550 = vrot.lane.b32.xlu0 %v5449_v56, %s13278_s26  ;;  %6572 = vrot.lane.b32.xlu1 %v6541_v7, %s13280_s11  ;;  %v6539_v31 = vadd.f32 %v6536_v42, %v6532_v23  ;;  %v6717_v23 = vrot.slane %v6713_v4, %v13878_v19  ;;  %v6722_v56 = vrot.slane %v6713_v4, %v13881_v21  ;;  %v7692_v4 = vld [vmem:[#allocation44 + $0x90] sm:$0xff]  ;;  %s15784_s26 = sld [smem:[#allocation98_spill]] }
 0x998   : > { %11415 = vmatprep.subr.mxu1 %v13276_v0 }
 0x999   : > { %v6542_v14 = vmax.f32 %v6539_v31, 0.0  ;;  %11416 = vmatpush3.msra.mxu1 %v6735_v60  ;;  %v7693_v60 = vld [vmem:[#allocation44 + $0x98] sm:$0xff] }
 0x99a   : > { %11420 = vmatprep.subr.mxu1 %v13276_v0 }
 0x99b   : > { %6562 = vrot.lane.b32.xlu1 %v5912_v30, %s13279_s1  ;;  %6574 = vrot.lane.b32.xlu0 %v6542_v14, %s13280_s11  ;;  %s15786_s11 = sld [smem:[#allocation95_spill]] }
 0x9bd   : > { %v6547_v5 = vpop.permute.xlu0 %6546 }
 0x9be   : > { %v6579_v36 = vsel %vm2014_vm7, %v5131_v50, %v6547_v5 }
 0x9c1   : > { %v6549_v29 = vpop.permute.xlu1 %6548 }
 0x9c2   : > { %v6580_v58 = vsel %vm2014_vm7, %v5132_v40, %v6549_v29 }
 0x9df   : > { %v6559_v37 = vpop.permute.xlu1 %6558 }
 0x9e0   : > { %v6582_v49 = vsel %vm3442_vm11, %v6579_v36, %v6559_v37 }
 0x9e3   : > { %v6561_v33 = vpop.permute.xlu0 %6560 }
 0x9e4   : > { %v6583_v11 = vsel %vm3442_vm11, %v6580_v58, %v6561_v33 }
 0xa05   : > { %v6571_v55 = vpop.permute.xlu0 %6570 }
 0xa06   : > { %v6585_v26 = vsel %vm3446_vm12, %v6582_v49, %v6571_v55  ;;  %v6733_v55 = vld [vmem:[#allocation38 + $0x18] sm:$0xff] }
 0xa07   : > { %v6589_v52 = vrot.slane %v6585_v26, 1  ;;  %v6592_v35 = vrot.slane %v6585_v26, 2 }
 0xa09   : > { %v6591_v39 = vmax.f32 %v6585_v26, %v6589_v52  ;;  %v6551_v16 = vpop.permute.xlu0 %6550  ;;  %v6573_v34 = vpop.permute.xlu1 %6572  ;;  %v6987_v26 = vld [vmem:[#allocation41 + $0x18] sm:$0xff] }
 0xa0a   : > { %v6586_v27 = vsel %vm3446_vm12, %v6583_v11, %v6573_v34  ;;  %v6581_v3 = vsel %vm2014_vm7, %v5133_v8, %v6551_v16  ;;  %v6732_v11 = vld [vmem:[#allocation38 + $0x10] sm:$0xff]  ;;  %v6730_v34 = vld [vmem:[#allocation38] sm:$0xff] }
 0xa0b   : > { %v6594_v57 = vmax.f32 %v6591_v39, %v6592_v35  ;;  %v6596_v50 = vrot.slane %v6586_v27, 2  ;;  %v6599_v28 = vrot.slane %v6586_v27, 1  ;;  %v6731_v35 = vld [vmem:[#allocation38 + $0x8] sm:$0xff] }
 0xa0c   : > { %v6985_v16 = vld [vmem:[#allocation41 + $0x8] sm:$0xff] }
 0xa0d   : > { %v6611_v2 = vrot.slane %v6594_v57, 1  ;;  %v6613_v1 = vrot.slane %v6594_v57, 2  ;;  %v6598_v20 = vmax.f32 %v6591_v39, %v6596_v50  ;;  %v6601_v42 = vmax.f32 %v6586_v27, %v6599_v28  ;;  %v6563_v40 = vpop.permute.xlu1 %6562  ;;  %v6575_v63 = vpop.permute.xlu0 %6574  ;;  %v6986_v39 = vld [vmem:[#allocation41 + $0x10] sm:$0xff] }
 0xa0e   : > { %v6584_v25 = vsel %vm3442_vm11, %v6581_v3, %v6563_v40  ;;  %v6991_v40 = vld [vmem:[#allocation41 + $0x30] sm:$0xff] }
 0xa0f   : > { %v6625_v22 = vsel %vm1752_vm2, %v6594_v57, %v6611_v2  ;;  %v6602_v51 = vmax.f32 %v6601_v42, %v6596_v50  ;;  %v6616_v43 = vrot.slane %v6598_v20, 3  ;;  %v6587_v15 = vsel %vm3446_vm12, %v6584_v25, %v6575_v63  ;;  %v6984_v50 = vld [vmem:[#allocation41] sm:$0xff]  ;;  %v7218_v20 = vld [vmem:[#allocation41 + $0x78] sm:$0xff]  ;;  %v7217_v63 = vld [vmem:[#allocation41 + $0x70] sm:$0xff] }
 0xa10   : > { %v6626_v62 = vsel %vm2857_vm10, %v6625_v22, %v6613_v1  ;;  %v6604_v13 = vrot.slane %v6587_v15, 1  ;;  %v6607_v24 = vrot.slane %v6587_v15, 2  ;;  %v6992_v1 = vld [vmem:[#allocation41 + $0x38] sm:$0xff]  ;;  %v6990_v25 = vld [vmem:[#allocation41 + $0x28] sm:$0xff] }
 0xa11   : > { %v6619_v61 = vrot.slane %v6602_v51, 5  ;;  %v6621_v44 = vrot.slane %v6602_v51, 6  ;;  %v6627_v8 = vsel %vm1991_vm5, %v6626_v62, %v6616_v43  ;;  %v6623_v41 = vrot.slane %v6602_v51, 7  ;;  %v7216_v22 = vld [vmem:[#allocation41 + $0x68] sm:$0xff]  ;;  %v6989_v51 = vld [vmem:[#allocation41 + $0x20] sm:$0xff]  ;;  %v7142_v15 = vld [vmem:[#allocation41 + $0x58] sm:$0xff] }
 0xa12   : > { %v6606_v45 = vmax.f32 %v6586_v27, %v6604_v13  ;;  %v7215_v43 = vld [vmem:[#allocation41 + $0x60] sm:$0xff]  ;;  %v7141_v13 = vld [vmem:[#allocation41 + $0x50] sm:$0xff] }
 0xa13   : > { %v6628_v38 = vsel %vm1770_vm1, %v6627_v8, %v6619_v61  ;;  %v7391_v62 = vld [vmem:[#allocation44 + $0x38] sm:$0xff]  ;;  %v7390_v61 = vld [vmem:[#allocation44 + $0x30] sm:$0xff]  ;;  %v7389_v8 = vld [vmem:[#allocation44 + $0x28] sm:$0xff] }
 0xa14   : > { %v6629_v48 = vsel %vm2000_vm6, %v6628_v38, %v6621_v44  ;;  %v6609_v46 = vmax.f32 %v6606_v45, %v6607_v24  ;;  %v7140_v44 = vld [vmem:[#allocation41 + $0x48] sm:$0xff]  ;;  %v7139_v45 = vld [vmem:[#allocation41 + $0x40] sm:$0xff] }
 0xa15   : > { %v6630_v59 = vsel %vm2195_vm8, %v6629_v48, %v6623_v41  ;;  %v7388_v24 = vld [vmem:[#allocation44 + $0x20] sm:$0xff]  ;;  %v7294_v41 = vld [vmem:[#allocation41 + $0x98] sm:$0xff]  ;;  %v7293_v48 = vld [vmem:[#allocation41 + $0x90] sm:$0xff] }
 0xa16   : > { %v6631_v10 = vsel %vm2659_vm9, %v6630_v59, %v6609_v46  ;;  %v7541_v38 = vld [vmem:[#allocation44 + $0x58] sm:$0xff]  ;;  %v7540_v46 = vld [vmem:[#allocation44 + $0x50] sm:$0xff]  ;;  %v7292_v59 = vld [vmem:[#allocation41 + $0x88] sm:$0xff] }
 0xa17   : > { %11407 = vmatmul.mubr.msk.f32.vlgmr.msra.gmra.mxu0 %vm1880_vm4, %v6631_v10  ;;  %v7539_v10 = vld [vmem:[#allocation44 + $0x48] sm:$0xff] }
 0xa18   : > { %11439 = vmatprep.mubr.msk.f32.mxu0 %vm13277_vm0, %v13276_v0  ;;  %11432 = vmatpush3.msra.mxu0 %v6895_v6 }
 0xa19   : > { %11433 = vmatprep.subr.mxu0 %v13276_v0 }
 0xa1a   : > { %11434 = vmatpush3.msra.mxu0 %v6894_v53  ;;  %v7538_v53 = vld [vmem:[#allocation44 + $0x40] sm:$0xff] }
 0xa1b   : > { %11435 = vmatprep.subr.mxu0 %v13276_v0 }
 0xa1c   : > { %11436 = vmatpush3.msra.mxu0 %v6893_v18  ;;  %v7386_v18 = vld [vmem:[#allocation44 + $0x18] sm:$0xff] }
 0xa1d   : > { %11437 = vmatprep.subr.mxu0 %v13276_v0 }
 0xa1e   : > { %11438 = vmatpush3.msra.mxu0 %v6892_v12  ;;  %v7385_v12 = vld [vmem:[#allocation44 + $0x10] sm:$0xff] }
 0xa1f   : > { %11453 = vmatprep.subr.mxu0 %v13276_v0 }
 0xad7   : > { %v6709_v7 = vpop.f32.mrf.mxu0 }
 0xad8   : > { %v6718_v9 = vmul.f32 %v6717_v23, %v6709_v7  ;;  %v7384_v23 = vld [vmem:[#allocation44 + $0x8] sm:$0xff]  ;;  %v7383_v7 = vld [vmem:[#allocation44] sm:$0xff] }
 0xad9   : > { %v11408_v32 = vpop.f32.mrf.mxu0 }
 0xada   : > { %v15078_v31 = vadd.f32 %v6722_v56, %v6718_v9  ;;  %v7691_v56 = vld [vmem:[#allocation44 + $0x88] sm:$0xff] }
 0xadc   : > { %v6724_v30 = vmax.f32 %v15078_v31, 0.0  ;;  %v8235_v31 = vld [vmem:[#allocation46 + $0xb0] sm:$0xff] }
 0xade   : > { %v6726_v14 = vrot.slane %v6724_v30, 5 }
 0xae0   : > { %v15084_v5 = vsel %vm1991_vm5, 0.0, %v6726_v14  ;;  %v15087_v29 = vsel %vm1991_vm5, %v6726_v14, 0.0  ;;  %v7690_v14 = vld [vmem:[#allocation44 + $0x80] sm:$0xff] }
 0xae1   : > { %v6742_v33 = vrot.slane %v15087_v29, 3  ;;  %v6741_v37 = vrot.slane %v15084_v5, 3  ;;  %v6896_v36 = vrot.slane %v15084_v5, 2  ;;  %v6897_v49 = vrot.slane %v15087_v29, 2 }
 0xae2   : > { %v6816_v27 = vrot.slane %v15084_v5, 4  ;;  %v6817_v57 = vrot.slane %v15087_v29, 4  ;;  %v7063_v28 = vrot.slane %v15084_v5, 5  ;;  %v7064_v3 = vrot.slane %v15087_v29, 5 }
 0xae3   : > { %v15094_v52 = vsel %vm2000_vm6, %v6741_v37, %v6742_v33  ;;  %v15097_v58 = vsel %vm2195_vm8, %v6896_v36, %v6897_v49  ;;  %v7295_v6 = vrot.slane %v15084_v5, 1  ;;  %v7296_v17 = vrot.slane %v15087_v29, 1  ;;  %v7617_v37 = vld [vmem:[#allocation44 + $0x78] sm:$0xff]  ;;  %v7844_v49 = vld [vmem:[#allocation44 + $0xd0] sm:$0xff] }
 0xae4   : > { %11418 = vmatmul.mubr.msk.f32.vlgmr.msra.gmra.mxu1 %vm3442_vm11, %v15094_v52  ;;  %11440 = vmatmul.mubr.msk.f32.vlgmr.msra.gmra.mxu0 %vm3442_vm11, %v15097_v58  ;;  %v15118_v2 = vsel %vm1770_vm1, %v6816_v27, %v6817_v57  ;;  %v7065_v42 = vsel %vm1991_vm5, %v7063_v28, %v7064_v3  ;;  %v7462_v9 = vrot.slane %v15084_v5, 6  ;;  %v7463_v32 = vrot.slane %v15087_v29, 6  ;;  %v7845_v36 = vld [vmem:[#allocation44 + $0xd8] sm:$0xff]  ;;  %v7616_v29 = vld [vmem:[#allocation44 + $0x70] sm:$0xff] }
 0xae5   : > { %11421 = vmatpush3.msra.mxu1 %v6733_v55  ;;  %11454 = vmatpush3.msra.mxu0 %v6987_v26  ;;  %v15170_v47 = vsel %vm2659_vm9, %v7295_v6, %v7296_v17  ;;  %v7615_v55 = vld [vmem:[#allocation44 + $0x68] sm:$0xff]  ;;  %v7973_v17 = vld [vmem:[%s15782_s18 + $0x60] sm:$0xff] }
 0xae6   : > { %11422 = vmatprep.subr.mxu1 %v13276_v0  ;;  %11455 = vmatprep.subr.mxu0 %v13276_v0  ;;  %v7464_v33 = vsel %vm2857_vm10, %v7462_v9, %v7463_v32  ;;  %v7843_v26 = vld [vmem:[#allocation44 + $0xc8] sm:$0xff] }
 0xae7   : > { %11423 = vmatpush3.msra.mxu1 %v6732_v11  ;;  %11456 = vmatpush3.msra.mxu0 %v6986_v39  ;;  %v7614_v11 = vld [vmem:[#allocation44 + $0x60] sm:$0xff]  ;;  %v7769_v39 = vld [vmem:[#allocation44 + $0xb8] sm:$0xff] }
 0xae8   : > { %11424 = vmatprep.subr.mxu1 %v13276_v0  ;;  %11457 = vmatprep.subr.mxu0 %v13276_v0  ;;  %v7970_v9 = vld [vmem:[%s15782_s18 + $0x48] sm:$0xff] }
 0xae9   : > { %11425 = vmatpush3.msra.mxu1 %v6731_v35  ;;  %11458 = vmatpush3.msra.mxu0 %v6985_v16  ;;  %v7768_v35 = vld [vmem:[#allocation44 + $0xb0] sm:$0xff]  ;;  %v7767_v16 = vld [vmem:[#allocation44 + $0xa8] sm:$0xff] }
 0xaea   : > { %11426 = vmatprep.subr.mxu1 %v13276_v0  ;;  %11459 = vmatprep.subr.mxu0 %v13276_v0 }
 0xaeb   : > { %11427 = vmatpush3.msra.mxu1 %v6730_v34  ;;  %11428 = vmatprep.mubr.msk.f32.mxu1 %vm13277_vm0, %v13276_v0  ;;  %v7766_v34 = vld [vmem:[#allocation44 + $0xa0] sm:$0xff] }
 0xaec   : > { %11460 = vmatpush3.msra.mxu0 %v6984_v50  ;;  %11461 = vmatprep.mubr.msk.f32.mxu0 %vm13277_vm0, %v13276_v0  ;;  %v6972_v50 = vld [vmem:[#allocation37] sm:$0x3] }
 0xaed   : > { %11429 = vmatmul.mubr.msk.f32.vlgmr.msra.gmra.mxu1 %vm3442_vm11, %v15118_v2  ;;  %11442 = vmatprep.subr.mxu1 %v13276_v0 }
 0xaee   : > { %11462 = vmatmul.mubr.msk.f32.vlgmr.msra.gmra.mxu0 %vm3442_vm11, %v7065_v42  ;;  %11475 = vmatprep.subr.mxu0 %v13276_v0 }
 0xaef   : > { %11443 = vmatpush3.msra.mxu1 %v6992_v1  ;;  %11476 = vmatpush3.msra.mxu0 %v7218_v20 }
 0xaf0   : > { %11444 = vmatprep.subr.mxu1 %v13276_v0  ;;  %11477 = vmatprep.subr.mxu0 %v13276_v0 }
 0xaf1   : > { %11445 = vmatpush3.msra.mxu1 %v6991_v40  ;;  %11478 = vmatpush3.msra.mxu0 %v7217_v63  ;;  %v6981_v63 = vrot.slane %v6972_v50, %v13881_v21 }
 0xaf2   : > { %11446 = vmatprep.subr.mxu1 %v13276_v0  ;;  %11479 = vmatprep.subr.mxu0 %v13276_v0 }
 0xaf3   : > { %11447 = vmatpush3.msra.mxu1 %v6990_v25  ;;  %11480 = vmatpush3.msra.mxu0 %v7216_v22 }
 0xaf4   : > { %11448 = vmatprep.subr.mxu1 %v13276_v0  ;;  %11481 = vmatprep.subr.mxu0 %v13276_v0 }
 0xaf5   : > { %11449 = vmatpush3.msra.mxu1 %v6989_v51  ;;  %11450 = vmatprep.mubr.msk.f32.mxu1 %vm13277_vm0, %v13276_v0 }
 0xaf6   : > { %11482 = vmatpush3.msra.mxu0 %v7215_v43  ;;  %11483 = vmatprep.mubr.msk.f32.mxu0 %vm13277_vm0, %v13276_v0 }
 0xaf7   : > { %11451 = vmatmul.mubr.msk.f32.vlgmr.msra.gmra.mxu1 %vm3442_vm11, %v15118_v2  ;;  %11464 = vmatprep.subr.mxu1 %v13276_v0 }
 0xaf8   : > { %11484 = vmatmul.mubr.msk.f32.vlgmr.msra.gmra.mxu0 %vm3442_vm11, %v15097_v58  ;;  %11497 = vmatprep.subr.mxu0 %v13276_v0 }
 0xaf9   : > { %11465 = vmatpush3.msra.mxu1 %v7142_v15  ;;  %11498 = vmatpush3.msra.mxu0 %v7391_v62 }
 0xafa   : > { %11466 = vmatprep.subr.mxu1 %v13276_v0  ;;  %11499 = vmatprep.subr.mxu0 %v13276_v0 }
 0xafb   : > { %11467 = vmatpush3.msra.mxu1 %v7141_v13  ;;  %11500 = vmatpush3.msra.mxu0 %v7390_v61 }
 0xafc   : > { %11468 = vmatprep.subr.mxu1 %v13276_v0  ;;  %11501 = vmatprep.subr.mxu0 %v13276_v0 }
 0xafd   : > { %11469 = vmatpush3.msra.mxu1 %v7140_v44  ;;  %11502 = vmatpush3.msra.mxu0 %v7389_v8 }
 0xafe   : > { %11470 = vmatprep.subr.mxu1 %v13276_v0  ;;  %11503 = vmatprep.subr.mxu0 %v13276_v0 }
 0xaff   : > { %11471 = vmatpush3.msra.mxu1 %v7139_v45  ;;  %11472 = vmatprep.mubr.msk.f32.mxu1 %vm13277_vm0, %v13276_v0 }
 0xb00   : > { %11504 = vmatpush3.msra.mxu0 %v7388_v24  ;;  %11505 = vmatprep.mubr.msk.f32.mxu0 %vm13277_vm0, %v13276_v0 }
 0xb01   : > { %11473 = vmatmul.mubr.msk.f32.vlgmr.msra.gmra.mxu1 %vm3442_vm11, %v15094_v52  ;;  %11486 = vmatprep.subr.mxu1 %v13276_v0 }
 0xb02   : > { %11506 = vmatmul.mubr.msk.f32.vlgmr.msra.gmra.mxu0 %vm3442_vm11, %v7065_v42  ;;  %11519 = vmatprep.subr.mxu0 %v13276_v0 }
 0xb03   : > { %11487 = vmatpush3.msra.mxu1 %v7294_v41  ;;  %11520 = vmatpush3.msra.mxu0 %v7541_v38  ;;  %v7371_v38 = vld [vmem:[#allocation40] sm:$0x3] }
 0xb04   : > { %11488 = vmatprep.subr.mxu1 %v13276_v0  ;;  %11521 = vmatprep.subr.mxu0 %v13276_v0 }
 0xb05   : > { %11489 = vmatpush3.msra.mxu1 %v7293_v48  ;;  %11522 = vmatpush3.msra.mxu0 %v7540_v46  ;;  %v7976_v48 = vld [vmem:[%s15781_s0 + $0x78] sm:$0xff]  ;;  %v7975_v46 = vld [vmem:[%s15782_s18 + $0x70] sm:$0xff]  ;;  %s15787_s0 = sld [smem:[#allocation97_spill]] }
 0xb06   : > { %11490 = vmatprep.subr.mxu1 %v13276_v0  ;;  %11523 = vmatprep.subr.mxu0 %v13276_v0 }
 0xb07   : > { %11491 = vmatpush3.msra.mxu1 %v7292_v59  ;;  %11524 = vmatpush3.msra.mxu0 %v7539_v10  ;;  %v7974_v59 = vld [vmem:[%s15782_s18 + $0x68] sm:$0xff] }
 0xb08   : > { %11492 = vmatprep.subr.mxu1 %v13276_v0  ;;  %11525 = vmatprep.subr.mxu0 %v13276_v0 }
 0xb09   : > { %11493 = vmatpush3.msra.mxu1 %v7291_v54  ;;  %11494 = vmatprep.mubr.msk.f32.mxu1 %vm13277_vm0, %v13276_v0  ;;  %v7375_v54 = vrot.slane %v7371_v38, %v13878_v19 }
 0xb0a   : > { %11526 = vmatpush3.msra.mxu0 %v7538_v53  ;;  %11527 = vmatprep.mubr.msk.f32.mxu0 %vm13277_vm0, %v13276_v0 }
 0xb0b   : > { %11495 = vmatmul.mubr.msk.f32.vlgmr.msra.gmra.mxu1 %vm3442_vm11, %v15170_v47  ;;  %11508 = vmatprep.subr.mxu1 %v13276_v0 }
 0xb0c   : > { %11528 = vmatmul.mubr.msk.f32.vlgmr.msra.gmra.mxu0 %vm3442_vm11, %v15118_v2  ;;  %11541 = vmatprep.subr.mxu0 %v13276_v0  ;;  %v6976_v2 = vrot.slane %v6972_v50, %v13878_v19 }
 0xb0d   : > { %11509 = vmatpush3.msra.mxu1 %v7386_v18  ;;  %11542 = vmatpush3.msra.mxu0 %v7693_v60  ;;  %v7380_v18 = vrot.slane %v7371_v38, %v13881_v21 }
 0xb0e   : > { %11510 = vmatprep.subr.mxu1 %v13276_v0  ;;  %11543 = vmatprep.subr.mxu0 %v13276_v0 }
 0xb0f   : > { %11511 = vmatpush3.msra.mxu1 %v7385_v12  ;;  %11544 = vmatpush3.msra.mxu0 %v7692_v4  ;;  %v7972_v12 = vld [vmem:[%s15782_s18 + $0x58] sm:$0xff] }
 0xb10   : > { %11512 = vmatprep.subr.mxu1 %v13276_v0  ;;  %11545 = vmatprep.subr.mxu0 %v13276_v0 }
 0xb11   : > { %11513 = vmatpush3.msra.mxu1 %v7384_v23  ;;  %11546 = vmatpush3.msra.mxu0 %v7691_v56  ;;  %v7971_v56 = vld [vmem:[%s15782_s18 + $0x50] sm:$0xff] }
 0xb12   : > { %11514 = vmatprep.subr.mxu1 %v13276_v0  ;;  %11547 = vmatprep.subr.mxu0 %v13276_v0 }
 0xb13   : > { %11515 = vmatpush3.msra.mxu1 %v7383_v7  ;;  %11516 = vmatprep.mubr.msk.f32.mxu1 %vm13277_vm0, %v13276_v0 }
 0xb14   : > { %11548 = vmatpush3.msra.mxu0 %v7690_v14  ;;  %11549 = vmatprep.mubr.msk.f32.mxu0 %vm13277_vm0, %v13276_v0  ;;  %v7969_v14 = vld [vmem:[%s15782_s18 + $0x40] sm:$0xff] }
 0xb15   : > { %11517 = vmatmul.mubr.msk.f32.vlgmr.msra.gmra.mxu1 %vm3442_vm11, %v7464_v33  ;;  %11530 = vmatprep.subr.mxu1 %v13276_v0 }
 0xb16   : > { %11550 = vmatmul.mubr.msk.f32.vlgmr.msra.gmra.mxu0 %vm3442_vm11, %v15097_v58  ;;  %11563 = vmatprep.subr.mxu0 %v13276_v0  ;;  %v7842_v58 = vld [vmem:[#allocation44 + $0xc0] sm:$0xff] }
 0xb17   : > { %11531 = vmatpush3.msra.mxu1 %v7617_v37  ;;  %11564 = vmatpush3.msra.mxu0 %v7845_v36  ;;  %v7968_v37 = vld [vmem:[%s15782_s18 + $0x38] sm:$0xff] }
 0xb18   : > { %11532 = vmatprep.subr.mxu1 %v13276_v0  ;;  %11565 = vmatprep.subr.mxu0 %v13276_v0 }
 0xb19   : > { %11533 = vmatpush3.msra.mxu1 %v7616_v29  ;;  %11566 = vmatpush3.msra.mxu0 %v7844_v49  ;;  %v7967_v49 = vld [vmem:[%s15782_s18 + $0x30] sm:$0xff] }
 0xb1a   : > { %11534 = vmatprep.subr.mxu1 %v13276_v0  ;;  %11567 = vmatprep.subr.mxu0 %v13276_v0 }
 0xb1b   : > { %11535 = vmatpush3.msra.mxu1 %v7615_v55  ;;  %11568 = vmatpush3.msra.mxu0 %v7843_v26  ;;  %v7966_v26 = vld [vmem:[%s15782_s18 + $0x28] sm:$0xff] }
 0xb1c   : > { %11536 = vmatprep.subr.mxu1 %v13276_v0  ;;  %11569 = vmatprep.subr.mxu0 %v13276_v0 }
 0xb1d   : > { %11537 = vmatpush3.msra.mxu1 %v7614_v11  ;;  %11538 = vmatprep.mubr.msk.f32.mxu1 %vm13277_vm0, %v13276_v0 }
 0xb1e   : > { %11570 = vmatpush3.msra.mxu0 %v7842_v58  ;;  %11571 = vmatprep.mubr.msk.f32.mxu0 %vm13277_vm0, %v13276_v0 }
 0xb1f   : > { %11539 = vmatmul.mubr.msk.f32.vlgmr.msra.gmra.mxu1 %vm3442_vm11, %v15094_v52  ;;  %11552 = vmatprep.subr.mxu1 %v13276_v0 }
 0xb20   : > { %11572 = vmatmul.mubr.msk.f32.vlgmr.msra.gmra.mxu0 %vm3442_vm11, %v15084_v5  ;;  %11553 = vmatpush3.msra.mxu1 %v7769_v39 }
 0xb21   : > { %11554 = vmatprep.subr.mxu1 %v13276_v0  ;;  %11560 = vmatprep.mubr.msk.f32.mxu1 %vm13277_vm0, %v13276_v0 }
 0xb22   : > { %11555 = vmatpush3.msra.mxu1 %v7768_v35  ;;  %11609 = vmatprep.subr.mxu0 %v13276_v0 }
 0xb23   : > { %11556 = vmatprep.subr.mxu1 %v13276_v0  ;;  %11625 = vmatprep.mubr.msk.f32.mxu0 %vm13277_vm0, %v13276_v0 }
 0xb24   : > { %11557 = vmatpush3.msra.mxu1 %v7767_v16 }
 0xb25   : > { %11558 = vmatprep.subr.mxu1 %v13276_v0 }
 0xb26   : > { %11559 = vmatpush3.msra.mxu1 %v7766_v34 }
 0xb27   : > { %11561 = vmatmul.mubr.msk.f32.vlgmr.msra.gmra.mxu1 %vm3442_vm11, %v15170_v47  ;;  %11574 = vmatprep.subr.mxu1 %v13276_v0 }
 0xb28   : > { %11606 = vmatprep.mubr.msk.f32.mxu1 %vm13277_vm0, %v13276_v0  ;;  %11575 = vmatpush3.msra.mxu1 %v7976_v48 }
 0xb29   : > { %11576 = vmatprep.subr.mxu1 %v13276_v0 }
 0xb2a   : > { %11577 = vmatpush3.msra.mxu1 %v7975_v46 }
 0xb2b   : > { %11578 = vmatprep.subr.mxu1 %v13276_v0 }
 0xb2c   : > { %11579 = vmatpush3.msra.mxu1 %v7974_v59 }
 0xb2d   : > { %11580 = vmatprep.subr.mxu1 %v13276_v0 }
 0xb2e   : > { %11581 = vmatpush3.msra.mxu1 %v7973_v17 }
 0xb2f   : > { %11582 = vmatprep.subr.mxu1 %v13276_v0 }
 0xb30   : > { %11583 = vmatpush3.msra.mxu1 %v7972_v12  ;;  %v8232_v12 = vld [vmem:[#allocation46 + $0x98] sm:$0xff] }
 0xb31   : > { %11584 = vmatprep.subr.mxu1 %v13276_v0 }
 0xb32   : > { %11585 = vmatpush3.msra.mxu1 %v7971_v56  ;;  %v8074_v56 = vld [vmem:[#allocation46 + $0x48] sm:$0xff] }
 0xb33   : > { %11586 = vmatprep.subr.mxu1 %v13276_v0 }
 0xb34   : > { %11587 = vmatpush3.msra.mxu1 %v7970_v9  ;;  %v8073_v9 = vld [vmem:[#allocation46 + $0x40] sm:$0xff] }
 0xb35   : > { %11588 = vmatprep.subr.mxu1 %v13276_v0 }
 0xb36   : > { %11589 = vmatpush3.msra.mxu1 %v7969_v14  ;;  %v8047_v14 = vld [vmem:[%s15783_s16] sm:$0x3] }
 0xb37   : > { %11590 = vmatprep.subr.mxu1 %v13276_v0 }
 0xb38   : > { %11591 = vmatpush3.msra.mxu1 %v7968_v37  ;;  %v8056_v37 = vrot.slane %v8047_v14, %v13881_v21 }
 0xb39   : > { %11592 = vmatprep.subr.mxu1 %v13276_v0 }
 0xb3a   : > { %11593 = vmatpush3.msra.mxu1 %v7967_v49 }
 0xb3b   : > { %11594 = vmatprep.subr.mxu1 %v13276_v0 }
 0xb3c   : > { %11595 = vmatpush3.msra.mxu1 %v7966_v26 }
 0xb3d   : > { %11596 = vmatprep.subr.mxu1 %v13276_v0 }
 0xba4   : > { %v6812_v5 = vpop.f32.mrf.mxu1  ;;  %v6967_v52 = vpop.f32.mrf.mxu0 }
 0xba6   : > { %v11419_v27 = vpop.f32.mrf.mxu1  ;;  %v11441_v57 = vpop.f32.mrf.mxu0 }
 0xba7   : > { %v7965_v57 = vld [vmem:[%s15782_s18 + $0x20] sm:$0xff] }
 0xba8   : > { %11597 = vmatpush3.msra.mxu1 %v7965_v57  ;;  %v8069_v57 = vld [vmem:[#allocation46 + $0x28] sm:$0xff] }
 0xba9   : > { %11598 = vmatprep.subr.mxu1 %v13276_v0 }
 0xbad   : > { %v6887_v28 = vpop.f32.mrf.mxu1 }
 0xbae   : > { %v6888_v3 = vadd.f32 %v6887_v28, %v6812_v5  ;;  %v7134_v1 = vpop.f32.mrf.mxu0 }
 0xbaf   : > { %v11430_v20 = vpop.f32.mrf.mxu1 }
 0xbb0   : > { %v6971_v42 = vadd.f32 %v6967_v52, %v6888_v3  ;;  %v11463_v40 = vpop.f32.mrf.mxu0  ;;  %v7919_v52 = vld [vmem:[#allocation43] sm:$0x3] }
 0xbb1   : > { %v7923_v3 = vrot.slane %v7919_v52, %v13878_v19  ;;  %v7963_v40 = vld [vmem:[%s15782_s18 + $0x10] sm:$0xff] }
 0xbb2   : > { %v6977_v25 = vmul.f32 %v6976_v2, %v6971_v42  ;;  %v7964_v2 = vld [vmem:[%s15782_s18 + $0x18] sm:$0xff]  ;;  %v7928_v42 = vrot.slane %v7919_v52, %v13881_v21 }
 0xbb3   : > { %11599 = vmatpush3.msra.mxu1 %v7964_v2  ;;  %v8070_v52 = vld [vmem:[#allocation46 + $0x30] sm:$0xff]  ;;  %v8067_v2 = vld [vmem:[#allocation46 + $0x18] sm:$0xff] }
 0xbb4   : > { %v6982_v22 = vadd.f32 %v6981_v63, %v6977_v25  ;;  %11600 = vmatprep.subr.mxu1 %v13276_v0  ;;  %v7962_v63 = vld [vmem:[%s15782_s18 + $0x8] sm:$0xff] }
 0xbb5   : > { %11601 = vmatpush3.msra.mxu1 %v7963_v40  ;;  %v8065_v40 = vld [vmem:[#allocation46 + $0x8] sm:$0xff] }
 0xbb6   : > { %v6983_v51 = vmax.f32 %v6982_v22, 0.0  ;;  %11602 = vmatprep.subr.mxu1 %v13276_v0  ;;  %v7961_v22 = vld [vmem:[%s15782_s18] sm:$0xff] }
 0xbb7   : > { %v7059_v43 = vpop.f32.mrf.mxu1  ;;  %11603 = vmatpush3.msra.mxu1 %v7962_v63  ;;  %v8324_v63 = vld [vmem:[%s15784_s26 + $0x8] sm:$0xff] }
 0xbb8   : > { %v7285_v15 = vpop.f32.mrf.mxu0  ;;  %7932 = vrot.lane.b32.xlu1 %v6983_v51, %s13279_s1  ;;  %v7135_v45 = vadd.f32 %v7134_v1, %v7059_v43  ;;  %11604 = vmatprep.subr.mxu1 %v13276_v0  ;;  %v8080_v43 = vld [vmem:[#allocation46 + $0x78] sm:$0xff]  ;;  %s15785_s1 = sld [smem:[#allocation69_spill]] }
 0xbb9   : > { %v11452_v62 = vpop.f32.mrf.mxu1  ;;  %11605 = vmatpush3.msra.mxu1 %v7961_v22  ;;  %11610 = vmatpush3.msra.mxu0 %v8080_v43  ;;  %v8323_v22 = vld [vmem:[%s15784_s26] sm:$0xff]  ;;  %v8412_v43 = vrot.slane %v13276_v0, 5 }
 0xbba   : > { %v11485_v13 = vpop.f32.mrf.mxu0  ;;  %11647 = vmatprep.subr.mxu1 %v13276_v0  ;;  %11611 = vmatprep.subr.mxu0 %v13276_v0  ;;  %v8079_v62 = vld [vmem:[#allocation46 + $0x70] sm:$0xff] }
 0xbbb   : > { %11612 = vmatpush3.msra.mxu0 %v8079_v62  ;;  %v10097_v62 = vld [vmem:[%s15784_s26 + $0x78] sm:$0xff] }
 0xbbc   : > { %11613 = vmatprep.subr.mxu0 %v13276_v0 }
 0xbc1   : > { %v7209_v61 = vpop.f32.mrf.mxu1 }
 0xbc2   : > { %v7458_v44 = vpop.f32.mrf.mxu0  ;;  %v7213_v41 = vadd.f32 %v7209_v61, %v7135_v45 }
 0xbc3   : > { %v11474_v8 = vpop.f32.mrf.mxu1 }
 0xbc4   : > { %v11507_v24 = vpop.f32.mrf.mxu0  ;;  %v7289_v10 = vadd.f32 %v7285_v15, %v7213_v41 }
 0xbcb   : > { %v7366_v6 = vpop.f32.mrf.mxu1 }
 0xbcc   : > { %v7370_v53 = vadd.f32 %v7366_v6, %v7289_v10  ;;  %v7608_v47 = vpop.f32.mrf.mxu0  ;;  %v8236_v6 = vld [vmem:[#allocation46 + $0xb8] sm:$0xff] }
 0xbcd   : > { %v11496_v60 = vpop.f32.mrf.mxu1 }
 0xbce   : > { %v7376_v4 = vmul.f32 %v7375_v54, %v7370_v53  ;;  %v11529_v23 = vpop.f32.mrf.mxu0  ;;  %v8234_v53 = vld [vmem:[#allocation46 + $0xa8] sm:$0xff]  ;;  %v8076_v60 = vld [vmem:[#allocation46 + $0x58] sm:$0xff] }
 0xbcf   : > { %v8231_v23 = vld [vmem:[#allocation46 + $0x90] sm:$0xff] }
 0xbd0   : > { %v7381_v7 = vadd.f32 %v7380_v18, %v7376_v4  ;;  %v8233_v18 = vld [vmem:[#allocation46 + $0xa0] sm:$0xff]  ;;  %v8075_v4 = vld [vmem:[#allocation46 + $0x50] sm:$0xff] }
 0xbd2   : > { %v7382_v32 = vmax.f32 %v7381_v7, 0.0  ;;  %v8230_v7 = vld [vmem:[#allocation46 + $0x88] sm:$0xff] }
 0xbd4   : > { %7936 = vrot.lane.b32.xlu0 %v7382_v32, %s13281_s10  ;;  %v8229_v32 = vld [vmem:[#allocation46 + $0x80] sm:$0xff] }
 0xbd5   : > { %v7533_v33 = vpop.f32.mrf.mxu1 }
 0xbd6   : > { %v7760_v36 = vpop.f32.mrf.mxu0  ;;  %v7534_v11 = vadd.f32 %v7533_v33, %v7458_v44  ;;  %v8051_v33 = vrot.slane %v8047_v14, %v13878_v19  ;;  %v10101_v14 = vld [vmem:[%s15784_s26 + $0x88] sm:$0xff] }
 0xbd7   : > { %v11518_v29 = vpop.f32.mrf.mxu1 }
 0xbd8   : > { %v11551_v55 = vpop.f32.mrf.mxu0  ;;  %v7612_v39 = vadd.f32 %v7608_v47, %v7534_v11  ;;  %v8077_v47 = vld [vmem:[#allocation46 + $0x60] sm:$0xff] }
 0xbdf   : > { %v7684_v58 = vpop.f32.mrf.mxu1 }
 0xbe0   : > { %v7914_v35 = vpop.f32.mrf.mxu0  ;;  %v7688_v34 = vadd.f32 %v7684_v58, %v7612_v39 }
 0xbe1   : > { %v11540_v16 = vpop.f32.mrf.mxu1 }
 0xbe2   : > { %v11573_v5 = vpop.f32.mrf.mxu0  ;;  %v7764_v27 = vadd.f32 %v7760_v36, %v7688_v34  ;;  %v8071_v16 = vld [vmem:[#allocation46 + $0x38] sm:$0xff] }
 0xbe3   : > { %v8330_v5 = vld [vmem:[%s15784_s26 + $0x38] sm:$0xff] }
 0xbe7   : > { %v7836_v50 = vpop.f32.mrf.mxu1 }
 0xbe8   : > { %v7840_v28 = vadd.f32 %v7836_v50, %v7764_v27  ;;  %v8329_v27 = vld [vmem:[%s15784_s26 + $0x30] sm:$0xff]  ;;  %v8328_v50 = vld [vmem:[%s15784_s26 + $0x28] sm:$0xff] }
 0xbe9   : > { %v11562_v1 = vpop.f32.mrf.mxu1 }
 0xbea   : > { %v7918_v20 = vadd.f32 %v7914_v35, %v7840_v28  ;;  %v8068_v28 = vld [vmem:[#allocation46 + $0x20] sm:$0xff]  ;;  %v8326_v1 = vld [vmem:[%s15784_s26 + $0x18] sm:$0xff] }
 0xbec   : > { %v7924_v25 = vmul.f32 %v7923_v3, %v7918_v20  ;;  %v8327_v3 = vld [vmem:[%s15784_s26 + $0x20] sm:$0xff]  ;;  %v8066_v20 = vld [vmem:[#allocation46 + $0x10] sm:$0xff] }
 0xbee   : > { %v7929_v51 = vadd.f32 %v7928_v42, %v7924_v25  ;;  %v8325_v42 = vld [vmem:[%s15784_s26 + $0x10] sm:$0xff]  ;;  %v8064_v25 = vld [vmem:[#allocation46] sm:$0xff] }
 0xbf0   : > { %v7930_v15 = vmax.f32 %v7929_v51, 0.0 }
 0xbf2   : > { %7940 = vrot.lane.b32.xlu1 %v7930_v15, %s13282_s22  ;;  %s10182_s22 = sshll.u32 %s13540_s15, 4 }
 0xc2a   : > { %v7933_v13 = vpop.permute.xlu1 %7932 }
 0xc2b   : > { %v7943_v44 = vsel %vm3442_vm11, %v6724_v30, %v7933_v13  ;;  %v8078_v30 = vld [vmem:[#allocation46 + $0x68] sm:$0xff]  ;;  %v10116_v13 = vld [vmem:[%s15784_s26 + $0xf8] sm:$0xff] }
 0xc2c   : > { %11614 = vmatpush3.msra.mxu0 %v8078_v30  ;;  %v10107_v30 = vld [vmem:[%s15784_s26 + $0xb8] sm:$0xff] }
 0xc2d   : > { %11615 = vmatprep.subr.mxu0 %v13276_v0 }
 0xc2e   : > { %11616 = vmatpush3.msra.mxu0 %v8077_v47  ;;  %v10106_v47 = vld [vmem:[%s15784_s26 + $0xb0] sm:$0xff] }
 0xc2f   : > { %11617 = vmatprep.subr.mxu0 %v13276_v0 }
 0xc30   : > { %11618 = vmatpush3.msra.mxu0 %v8076_v60  ;;  %v10105_v60 = vld [vmem:[%s15784_s26 + $0xa8] sm:$0xff] }
 0xc31   : > { %11619 = vmatprep.subr.mxu0 %v13276_v0 }
 0xc32   : > { %11620 = vmatpush3.msra.mxu0 %v8075_v4  ;;  %v10104_v4 = vld [vmem:[%s15784_s26 + $0xa0] sm:$0xff] }
 0xc33   : > { %11621 = vmatprep.subr.mxu0 %v13276_v0 }
 0xc34   : > { %11622 = vmatpush3.msra.mxu0 %v8074_v56  ;;  %v10103_v56 = vld [vmem:[%s15784_s26 + $0x98] sm:$0xff] }
 0xc35   : > { %11623 = vmatprep.subr.mxu0 %v13276_v0 }
 0xc36   : > { %11624 = vmatpush3.msra.mxu0 %v8073_v9  ;;  %v10102_v9 = vld [vmem:[%s15784_s26 + $0x90] sm:$0xff] }
 0xc37   : > { %11628 = vmatprep.subr.mxu0 %v13276_v0 }
 0xc46   : > { %v7937_v61 = vpop.permute.xlu0 %7936 }
 0xc47   : > { %v7944_v8 = vsel %vm1880_vm4, %v7943_v44, %v7937_v61  ;;  %v10096_v44 = vld [vmem:[%s15784_s26 + $0x70] sm:$0xff] }
 0xc64   : > { %v7941_v45 = vpop.permute.xlu1 %7940 }
 0xc65   : > { %v7946_v24 = vsel %vm7945_vm13, %v7944_v8, %v7941_v45  ;;  %v10115_v8 = vld [vmem:[%s15784_s26 + $0xf0] sm:$0xff]  ;;  %v10095_v45 = vld [vmem:[%s15784_s26 + $0x68] sm:$0xff] }
 0xc66   : > { %v7948_v41 = vrot.slane %v7946_v24, 1 }
 0xc68   : > { %v7950_v38 = vmax.f32 %v7946_v24, %v7948_v41  ;;  %v10114_v24 = vld [vmem:[%s15784_s26 + $0xe8] sm:$0xff]  ;;  %v10094_v41 = vld [vmem:[%s15784_s26 + $0x60] sm:$0xff] }
 0xc6a   : > { %v7952_v48 = vrot.slane %v7950_v38, 1  ;;  %v7954_v46 = vrot.slane %v7950_v38, 2  ;;  %v7956_v59 = vrot.slane %v7950_v38, 3 }
 0xc6c   : > { %v7958_v10 = vsel %vm1752_vm2, %v7950_v38, %v7952_v48  ;;  %v10113_v38 = vld [vmem:[%s15784_s26 + $0xe0] sm:$0xff]  ;;  %v10093_v48 = vld [vmem:[%s15784_s26 + $0x58] sm:$0xff] }
 0xc6d   : > { %v7959_v54 = vsel %vm2857_vm10, %v7958_v10, %v7954_v46  ;;  %v10112_v46 = vld [vmem:[%s15784_s26 + $0xd8] sm:$0xff]  ;;  %v10111_v10 = vld [vmem:[%s15784_s26 + $0xd0] sm:$0xff] }
 0xc6e   : > { %v7960_v17 = vsel %vm1991_vm5, %v7959_v54, %v7956_v59  ;;  %v10092_v59 = vld [vmem:[%s15784_s26 + $0x50] sm:$0xff]  ;;  %v10091_v54 = vld [vmem:[%s15784_s26 + $0x48] sm:$0xff] }
 0xc6f   : > { %11607 = vmatmul.mubr.f32.vlgmr.msra.gmra.mxu1 %v7960_v17  ;;  %v10090_v17 = vld [vmem:[%s15784_s26 + $0x40] sm:$0xff] }
 0xc70   : > { %11648 = vmatpush3.msra.mxu1 %v8236_v6  ;;  %11663 = vmatprep.mubr.msk.f32.mxu1 %vm13277_vm0, %v13276_v0  ;;  %v10110_v6 = vld [vmem:[%s15784_s26 + $0xc8] sm:$0xff] }
 0xc71   : > { %11649 = vmatprep.subr.mxu1 %v13276_v0 }
 0xc72   : > { %11650 = vmatpush3.msra.mxu1 %v8235_v31  ;;  %v10109_v31 = vld [vmem:[%s15784_s26 + $0xc0] sm:$0xff] }
 0xc73   : > { %11651 = vmatprep.subr.mxu1 %v13276_v0 }
 0xc74   : > { %11652 = vmatpush3.msra.mxu1 %v8234_v53  ;;  %v10134_v53 = vld [vmem:[%s13502_s9 + $0x78] sm:$0xff] }
 0xc75   : > { %11653 = vmatprep.subr.mxu1 %v13276_v0 }
 0xc76   : > { %11654 = vmatpush3.msra.mxu1 %v8233_v18  ;;  %v10133_v18 = vld [vmem:[%s13502_s9 + $0x70] sm:$0xff] }
 0xc77   : > { %11655 = vmatprep.subr.mxu1 %v13276_v0 }
 0xc78   : > { %11656 = vmatpush3.msra.mxu1 %v8232_v12  ;;  %v10132_v12 = vld [vmem:[%s13502_s9 + $0x68] sm:$0xff] }
 0xc79   : > { %11657 = vmatprep.subr.mxu1 %v13276_v0 }
 0xc7a   : > { %11658 = vmatpush3.msra.mxu1 %v8231_v23  ;;  %v10131_v23 = vld [vmem:[%s13502_s9 + $0x60] sm:$0xff] }
 0xc7b   : > { %11659 = vmatprep.subr.mxu1 %v13276_v0 }
 0xc7c   : > { %11660 = vmatpush3.msra.mxu1 %v8230_v7  ;;  %v10130_v7 = vld [vmem:[%s13502_s9 + $0x58] sm:$0xff] }
 0xc7d   : > { %11661 = vmatprep.subr.mxu1 %v13276_v0 }
 0xc7e   : > { %11662 = vmatpush3.msra.mxu1 %v8229_v32  ;;  %v10129_v32 = vld [vmem:[%s13502_s9 + $0x50] sm:$0xff] }
 0xc7f   : > { %11685 = vmatprep.subr.mxu1 %v13276_v0 }
 0xd2f   : > { %v8043_v36 = vpop.f32.mrf.mxu1 }
 0xd30   : > { %v8052_v29 = vmul.f32 %v8051_v33, %v8043_v36  ;;  %v10128_v33 = vld [vmem:[%s13502_s9 + $0x48] sm:$0xff]  ;;  %v10127_v36 = vld [vmem:[%s13502_s9 + $0x40] sm:$0xff] }
 0xd31   : > { %v11608_v49 = vpop.f32.mrf.mxu1 }
 0xd32   : > { %v15292_v55 = vadd.f32 %v8056_v37, %v8052_v29  ;;  %v10100_v37 = vld [vmem:[%s15784_s26 + $0x80] sm:$0xff]  ;;  %v10125_v29 = vld [vmem:[%s15784_s26 + $0x138] sm:$0xff] }
 0xd33   : > { %v10144_v49 = vld [vmem:[%s13502_s9 + $0xb8] sm:$0xff] }
 0xd34   : > { %v8058_v26 = vmax.f32 %v15292_v55, 0.0  ;;  %v9440_v55 = vld [vmem:[#allocation2] sm:$0x1] }
 0xd36   : > { %v8060_v11 = vrot.slane %v8058_v26, 5 }
 0xd38   : > { %v8062_v58 = vsel %vm1991_vm5, 0.0, %v8060_v11  ;;  %v10124_v11 = vld [vmem:[%s15784_s26 + $0x130] sm:$0xff] }
 0xd39   : > { %v15299_v39 = vsel %vm2659_vm9, %v8062_v58, 0.0  ;;  %v10143_v58 = vld [vmem:[%s13502_s9 + $0xb0] sm:$0xff] }
 0xd3a   : > { %v15302_v35 = vrot.slane %v15299_v39, 3  ;;  %v15305_v34 = vrot.slane %v15299_v39, 2  ;;  %v8411_v51 = vrot.slane %v15299_v39, 5  ;;  %v15338_v15 = vrot.slane %v15299_v39, 4 }
 0xd3c   : > { %11626 = vmatmul.mubr.msk.f32.vlgmr.msra.gmra.mxu0 %vm1880_vm4, %v15302_v35  ;;  %11664 = vmatmul.mubr.msk.f32.vlgmr.msra.gmra.mxu1 %vm1880_vm4, %v15305_v34  ;;  %v15348_v61 = vsel %vm1991_vm5, %v8411_v51, %v8412_v43  ;;  %v10161_v51 = vld [vmem:[%s13502_s9 + $0x130] sm:$0xff]  ;;  %v8746_v43 = vld [vmem:[%s13502_s9 + $0x28] sm:$0xff] }
 0xd3d   : > { %11629 = vmatpush3.msra.mxu0 %v8071_v16  ;;  %11686 = vmatpush3.msra.mxu1 %v8330_v5  ;;  %v10123_v16 = vld [vmem:[%s15784_s26 + $0x128] sm:$0xff] }
 0xd3e   : > { %11630 = vmatprep.subr.mxu0 %v13276_v0  ;;  %11687 = vmatprep.subr.mxu1 %v13276_v0  ;;  %v10142_v5 = vld [vmem:[%s13502_s9 + $0xa8] sm:$0xff] }
 0xd3f   : > { %11631 = vmatpush3.msra.mxu0 %v8070_v52  ;;  %11688 = vmatpush3.msra.mxu1 %v8329_v27  ;;  %v10122_v52 = vld [vmem:[%s15784_s26 + $0x120] sm:$0xff] }
 0xd40   : > { %11632 = vmatprep.subr.mxu0 %v13276_v0  ;;  %11689 = vmatprep.subr.mxu1 %v13276_v0  ;;  %v10141_v27 = vld [vmem:[%s13502_s9 + $0xa0] sm:$0xff] }
 0xd41   : > { %11633 = vmatpush3.msra.mxu0 %v8069_v57  ;;  %11690 = vmatpush3.msra.mxu1 %v8328_v50  ;;  %v10121_v57 = vld [vmem:[%s15784_s26 + $0x118] sm:$0xff] }
 0xd42   : > { %11634 = vmatprep.subr.mxu0 %v13276_v0  ;;  %11691 = vmatprep.subr.mxu1 %v13276_v0  ;;  %v10140_v50 = vld [vmem:[%s13502_s9 + $0x98] sm:$0xff] }
 0xd43   : > { %11635 = vmatpush3.msra.mxu0 %v8068_v28  ;;  %11692 = vmatpush3.msra.mxu1 %v8327_v3  ;;  %v10120_v28 = vld [vmem:[%s15784_s26 + $0x110] sm:$0xff] }
 0xd44   : > { %11636 = vmatprep.subr.mxu0 %v13276_v0  ;;  %11693 = vmatprep.subr.mxu1 %v13276_v0  ;;  %v10139_v3 = vld [vmem:[%s13502_s9 + $0x90] sm:$0xff] }
 0xd45   : > { %11637 = vmatpush3.msra.mxu0 %v8067_v2  ;;  %11694 = vmatpush3.msra.mxu1 %v8326_v1  ;;  %v10119_v2 = vld [vmem:[%s15784_s26 + $0x108] sm:$0xff] }
 0xd46   : > { %11638 = vmatprep.subr.mxu0 %v13276_v0  ;;  %11695 = vmatprep.subr.mxu1 %v13276_v0  ;;  %v10138_v1 = vld [vmem:[%s13502_s9 + $0x88] sm:$0xff] }
 0xd47   : > { %11639 = vmatpush3.msra.mxu0 %v8066_v20  ;;  %11696 = vmatpush3.msra.mxu1 %v8325_v42  ;;  %v10118_v20 = vld [vmem:[%s15784_s26 + $0x100] sm:$0xff] }
 0xd48   : > { %11640 = vmatprep.subr.mxu0 %v13276_v0  ;;  %11697 = vmatprep.subr.mxu1 %v13276_v0  ;;  %v10137_v42 = vld [vmem:[%s13502_s9 + $0x80] sm:$0xff] }
 0xd49   : > { %11641 = vmatpush3.msra.mxu0 %v8065_v40  ;;  %11698 = vmatpush3.msra.mxu1 %v8324_v63  ;;  %v8655_v40 = vrot.slane %v15299_v39, 1  ;;  %v8748_v63 = vld [vmem:[%s13502_s9 + $0x38] sm:$0xff] }
 0xd4a   : > { %11642 = vmatprep.subr.mxu0 %v13276_v0  ;;  %11699 = vmatprep.subr.mxu1 %v13276_v0 }
 0xd4b   : > { %11643 = vmatpush3.msra.mxu0 %v8064_v25  ;;  %11644 = vmatprep.mubr.msk.f32.mxu0 %vm13277_vm0, %v13276_v0  ;;  %v10162_v25 = vld [vmem:[%s13502_s9 + $0x138] sm:$0xff] }
 0xd4c   : > { %11700 = vmatpush3.msra.mxu1 %v8323_v22  ;;  %11701 = vmatprep.mubr.msk.f32.mxu1 %vm13277_vm0, %v13276_v0  ;;  %v8747_v22 = vld [vmem:[%s13502_s9 + $0x30] sm:$0xff] }
 0xd4d   : > { %11645 = vmatmul.mubr.msk.f32.vlgmr.msra.gmra.mxu0 %vm1880_vm4, %v15338_v15  ;;  %11666 = vmatprep.subr.mxu0 %v13276_v0 }
 0xd4e   : > { %11702 = vmatmul.mubr.msk.f32.vlgmr.msra.gmra.mxu1 %vm1880_vm4, %v15348_v61  ;;  %11723 = vmatprep.subr.mxu1 %v13276_v0 }
 0xd4f   : > { %11667 = vmatpush3.msra.mxu0 %v10097_v62  ;;  %11724 = vmatpush3.msra.mxu1 %v10116_v13  ;;  %v10160_v62 = vld [vmem:[%s13502_s9 + $0x128] sm:$0xff]  ;;  %v10159_v13 = vld [vmem:[%s13502_s9 + $0x120] sm:$0xff] }
 0xd50   : > { %11668 = vmatprep.subr.mxu0 %v13276_v0  ;;  %11725 = vmatprep.subr.mxu1 %v13276_v0 }
 0xd51   : > { %11669 = vmatpush3.msra.mxu0 %v10096_v44  ;;  %11726 = vmatpush3.msra.mxu1 %v10115_v8  ;;  %v10158_v44 = vld [vmem:[%s13502_s9 + $0x118] sm:$0xff]  ;;  %v8743_v8 = vld [vmem:[%s13502_s9 + $0x10] sm:$0xff] }
 0xd52   : > { %11670 = vmatprep.subr.mxu0 %v13276_v0  ;;  %11727 = vmatprep.subr.mxu1 %v13276_v0 }
 0xd53   : > { %11671 = vmatpush3.msra.mxu0 %v10095_v45  ;;  %11728 = vmatpush3.msra.mxu1 %v10114_v24  ;;  %v10157_v45 = vld [vmem:[%s13502_s9 + $0x110] sm:$0xff]  ;;  %v8742_v24 = vld [vmem:[%s13502_s9 + $0x8] sm:$0xff] }
 0xd54   : > { %11672 = vmatprep.subr.mxu0 %v13276_v0  ;;  %11729 = vmatprep.subr.mxu1 %v13276_v0 }
 0xd55   : > { %11673 = vmatpush3.msra.mxu0 %v10094_v41  ;;  %11730 = vmatpush3.msra.mxu1 %v10113_v38  ;;  %v10156_v41 = vld [vmem:[%s13502_s9 + $0x108] sm:$0xff]  ;;  %v8741_v38 = vld [vmem:[%s13502_s9] sm:$0xff] }
 0xd56   : > { %11674 = vmatprep.subr.mxu0 %v13276_v0  ;;  %11731 = vmatprep.subr.mxu1 %v13276_v0 }
 0xd57   : > { %11675 = vmatpush3.msra.mxu0 %v10093_v48  ;;  %11732 = vmatpush3.msra.mxu1 %v10112_v46  ;;  %v8828_v48 = vrot.slane %v15299_v39, 6  ;;  %v8829_v46 = vrot.slane %v13276_v0, 6 }
 0xd58   : > { %11676 = vmatprep.subr.mxu0 %v13276_v0  ;;  %11733 = vmatprep.subr.mxu1 %v13276_v0 }
 0xd59   : > { %11677 = vmatpush3.msra.mxu0 %v10092_v59  ;;  %11734 = vmatpush3.msra.mxu1 %v10111_v10  ;;  %v10155_v59 = vld [vmem:[%s13502_s9 + $0x100] sm:$0xff]  ;;  %v8830_v10 = vsel %vm2857_vm10, %v8828_v48, %v8829_v46 }
 0xd5a   : > { %11678 = vmatprep.subr.mxu0 %v13276_v0  ;;  %11735 = vmatprep.subr.mxu1 %v13276_v0  ;;  %v9347_v48 = vld [vmem:[%s15785_s1 + $0xa0] sm:$0xff] }
 0xd5b   : > { %11679 = vmatpush3.msra.mxu0 %v10091_v54  ;;  %11736 = vmatpush3.msra.mxu1 %v10110_v6  ;;  %v10153_v54 = vld [vmem:[%s13502_s9 + $0xf8] sm:$0xff]  ;;  %v9331_v46 = vld [vmem:[%s15785_s1 + $0x20] sm:$0xff] }
 0xd5c   : > { %11680 = vmatprep.subr.mxu0 %v13276_v0  ;;  %11737 = vmatprep.subr.mxu1 %v13276_v0  ;;  %v10180_v6 = vld [vmem:[%s13502_s9 + $0x1b8] sm:$0xff] }
 0xd5d   : > { %11681 = vmatpush3.msra.mxu0 %v10090_v17  ;;  %11682 = vmatprep.mubr.msk.f32.mxu0 %vm13277_vm0, %v13276_v0  ;;  %v10152_v17 = vld [vmem:[%s13502_s9 + $0xf0] sm:$0xff] }
 0xd5e   : > { %11738 = vmatpush3.msra.mxu1 %v10109_v31  ;;  %11739 = vmatprep.mubr.msk.f32.mxu1 %vm13277_vm0, %v13276_v0  ;;  %v10179_v31 = vld [vmem:[%s13502_s9 + $0x1b0] sm:$0xff] }
 0xd5f   : > { %11683 = vmatmul.mubr.msk.f32.vlgmr.msra.gmra.mxu0 %vm1880_vm4, %v15338_v15  ;;  %11704 = vmatprep.subr.mxu0 %v13276_v0 }
 0xd60   : > { %11740 = vmatmul.mubr.msk.f32.vlgmr.msra.gmra.mxu1 %vm1880_vm4, %v15305_v34  ;;  %11761 = vmatprep.subr.mxu1 %v13276_v0 }
 0xd61   : > { %11705 = vmatpush3.msra.mxu0 %v10107_v30  ;;  %11762 = vmatpush3.msra.mxu1 %v10134_v53  ;;  %v10151_v30 = vld [vmem:[%s13502_s9 + $0xe8] sm:$0xff] }
 0xd62   : > { %11706 = vmatprep.subr.mxu0 %v13276_v0  ;;  %11763 = vmatprep.subr.mxu1 %v13276_v0  ;;  %v10178_v53 = vld [vmem:[%s13502_s9 + $0x1a8] sm:$0xff] }
 0xd63   : > { %11707 = vmatpush3.msra.mxu0 %v10106_v47  ;;  %11764 = vmatpush3.msra.mxu1 %v10133_v18  ;;  %v10177_v47 = vld [vmem:[%s13502_s9 + $0x1a0] sm:$0xff]  ;;  %v10149_v18 = vld [vmem:[%s13502_s9 + $0xd8] sm:$0xff] }
 0xd64   : > { %11708 = vmatprep.subr.mxu0 %v13276_v0  ;;  %11765 = vmatprep.subr.mxu1 %v13276_v0 }
 0xd65   : > { %11709 = vmatpush3.msra.mxu0 %v10105_v60  ;;  %11766 = vmatpush3.msra.mxu1 %v10132_v12  ;;  %v10176_v60 = vld [vmem:[%s13502_s9 + $0x198] sm:$0xff]  ;;  %v10148_v12 = vld [vmem:[%s13502_s9 + $0xd0] sm:$0xff] }
 0xd66   : > { %11710 = vmatprep.subr.mxu0 %v13276_v0  ;;  %11767 = vmatprep.subr.mxu1 %v13276_v0 }
 0xd67   : > { %11711 = vmatpush3.msra.mxu0 %v10104_v4  ;;  %11768 = vmatpush3.msra.mxu1 %v10131_v23  ;;  %v10175_v4 = vld [vmem:[%s13502_s9 + $0x190] sm:$0xff]  ;;  %v10147_v23 = vld [vmem:[%s13502_s9 + $0xc8] sm:$0xff] }
 0xd68   : > { %11712 = vmatprep.subr.mxu0 %v13276_v0  ;;  %11769 = vmatprep.subr.mxu1 %v13276_v0 }
 0xd69   : > { %11713 = vmatpush3.msra.mxu0 %v10103_v56  ;;  %11770 = vmatpush3.msra.mxu1 %v10130_v7  ;;  %v10174_v56 = vld [vmem:[%s13502_s9 + $0x188] sm:$0xff]  ;;  %v10146_v7 = vld [vmem:[%s13502_s9 + $0xc0] sm:$0xff] }
 0xd6a   : > { %11714 = vmatprep.subr.mxu0 %v13276_v0  ;;  %11771 = vmatprep.subr.mxu1 %v13276_v0 }
 0xd6b   : > { %11715 = vmatpush3.msra.mxu0 %v10102_v9  ;;  %11772 = vmatpush3.msra.mxu1 %v10129_v32  ;;  %v10173_v9 = vld [vmem:[%s13502_s9 + $0x180] sm:$0xff]  ;;  %v10171_v32 = vld [vmem:[%s13502_s9 + $0x178] sm:$0xff] }
 0xd6c   : > { %11716 = vmatprep.subr.mxu0 %v13276_v0  ;;  %11773 = vmatprep.subr.mxu1 %v13276_v0 }
 0xd6d   : > { %11717 = vmatpush3.msra.mxu0 %v10101_v14  ;;  %11774 = vmatpush3.msra.mxu1 %v10128_v33  ;;  %v10170_v14 = vld [vmem:[%s13502_s9 + $0x170] sm:$0xff]  ;;  %v10169_v33 = vld [vmem:[%s13502_s9 + $0x168] sm:$0xff] }
 0xd6e   : > { %11718 = vmatprep.subr.mxu0 %v13276_v0  ;;  %11775 = vmatprep.subr.mxu1 %v13276_v0 }
 0xd6f   : > { %11719 = vmatpush3.msra.mxu0 %v10100_v37  ;;  %11720 = vmatprep.mubr.msk.f32.mxu0 %vm13277_vm0, %v13276_v0  ;;  %v10167_v37 = vld [vmem:[%s13502_s9 + $0x158] sm:$0xff] }
 0xd70   : > { %11776 = vmatpush3.msra.mxu1 %v10127_v36  ;;  %11777 = vmatprep.mubr.msk.f32.mxu1 %vm13277_vm0, %v13276_v0  ;;  %v10166_v36 = vld [vmem:[%s13502_s9 + $0x150] sm:$0xff] }
 0xd71   : > { %11721 = vmatmul.mubr.msk.f32.vlgmr.msra.gmra.mxu0 %vm1880_vm4, %v15302_v35  ;;  %11742 = vmatprep.subr.mxu0 %v13276_v0 }
 0xd72   : > { %11778 = vmatmul.mubr.msk.f32.vlgmr.msra.gmra.mxu1 %vm1880_vm4, %v15348_v61  ;;  %11799 = vmatprep.subr.mxu1 %v13276_v0  ;;  %v8744_v61 = vld [vmem:[%s13502_s9 + $0x18] sm:$0xff] }
 0xd73   : > { %11743 = vmatpush3.msra.mxu0 %v10125_v29  ;;  %11800 = vmatpush3.msra.mxu1 %v10144_v49  ;;  %v10165_v29 = vld [vmem:[%s13502_s9 + $0x148] sm:$0xff]  ;;  %v10164_v49 = vld [vmem:[%s13502_s9 + $0x140] sm:$0xff] }
 0xd74   : > { %11744 = vmatprep.subr.mxu0 %v13276_v0  ;;  %11801 = vmatprep.subr.mxu1 %v13276_v0 }
 0xd75   : > { %11745 = vmatpush3.msra.mxu0 %v10124_v11  ;;  %11802 = vmatpush3.msra.mxu1 %v10143_v58 }
 0xd76   : > { %11746 = vmatprep.subr.mxu0 %v13276_v0  ;;  %11803 = vmatprep.subr.mxu1 %v13276_v0 }
 0xd77   : > { %11747 = vmatpush3.msra.mxu0 %v10123_v16  ;;  %11804 = vmatpush3.msra.mxu1 %v10142_v5 }
 0xd78   : > { %11748 = vmatprep.subr.mxu0 %v13276_v0  ;;  %11805 = vmatprep.subr.mxu1 %v13276_v0 }
 0xd79   : > { %11749 = vmatpush3.msra.mxu0 %v10122_v52  ;;  %11806 = vmatpush3.msra.mxu1 %v10141_v27  ;;  %v9358_v52 = vld [vmem:[%s15785_s1 + $0xf8] sm:$0xff] }
 0xd7a   : > { %11750 = vmatprep.subr.mxu0 %v13276_v0  ;;  %11807 = vmatprep.subr.mxu1 %v13276_v0  ;;  %v9342_v27 = vld [vmem:[%s15785_s1 + $0x78] sm:$0xff] }
 0xd7b   : > { %11751 = vmatpush3.msra.mxu0 %v10121_v57  ;;  %11808 = vmatpush3.msra.mxu1 %v10140_v50  ;;  %v9357_v57 = vld [vmem:[%s15785_s1 + $0xf0] sm:$0xff] }
 0xd7c   : > { %11752 = vmatprep.subr.mxu0 %v13276_v0  ;;  %11809 = vmatprep.subr.mxu1 %v13276_v0  ;;  %v9341_v50 = vld [vmem:[%s15785_s1 + $0x70] sm:$0xff] }
 0xd7d   : > { %11753 = vmatpush3.msra.mxu0 %v10120_v28  ;;  %11810 = vmatpush3.msra.mxu1 %v10139_v3  ;;  %v9355_v28 = vld [vmem:[%s15785_s1 + $0xe0] sm:$0xff] }
 0xd7e   : > { %11754 = vmatprep.subr.mxu0 %v13276_v0  ;;  %11811 = vmatprep.subr.mxu1 %v13276_v0  ;;  %v9339_v3 = vld [vmem:[%s15785_s1 + $0x60] sm:$0xff] }
 0xd7f   : > { %11755 = vmatpush3.msra.mxu0 %v10119_v2  ;;  %11812 = vmatpush3.msra.mxu1 %v10138_v1  ;;  %v9354_v2 = vld [vmem:[%s15785_s1 + $0xd8] sm:$0xff] }
 0xd80   : > { %11756 = vmatprep.subr.mxu0 %v13276_v0  ;;  %11813 = vmatprep.subr.mxu1 %v13276_v0  ;;  %v9338_v1 = vld [vmem:[%s15785_s1 + $0x58] sm:$0xff] }
 0xd81   : > { %11757 = vmatpush3.msra.mxu0 %v10118_v20  ;;  %11758 = vmatprep.mubr.msk.f32.mxu0 %vm13277_vm0, %v13276_v0  ;;  %v9353_v20 = vld [vmem:[%s15785_s1 + $0xd0] sm:$0xff] }
 0xd82   : > { %11814 = vmatpush3.msra.mxu1 %v10137_v42  ;;  %11815 = vmatprep.mubr.msk.f32.mxu1 %vm13277_vm0, %v13276_v0 }
 0xd83   : > { %11759 = vmatmul.mubr.msk.f32.vlgmr.msra.gmra.mxu0 %vm1880_vm4, %v8655_v40  ;;  %11780 = vmatprep.subr.mxu0 %v13276_v0 }
 0xd84   : > { %11816 = vmatmul.mubr.msk.f32.vlgmr.msra.gmra.mxu1 %vm1880_vm4, %v15338_v15  ;;  %11837 = vmatprep.subr.mxu1 %v13276_v0  ;;  %v8745_v15 = vld [vmem:[%s13502_s9 + $0x20] sm:$0xff] }
 0xd85   : > { %11781 = vmatpush3.msra.mxu0 %v8748_v63  ;;  %11838 = vmatpush3.msra.mxu1 %v10162_v25 }
 0xd86   : > { %11782 = vmatprep.subr.mxu0 %v13276_v0  ;;  %11839 = vmatprep.subr.mxu1 %v13276_v0 }
 0xd87   : > { %11783 = vmatpush3.msra.mxu0 %v8747_v22  ;;  %11840 = vmatpush3.msra.mxu1 %v10161_v51  ;;  %v9352_v22 = vld [vmem:[%s15785_s1 + $0xc8] sm:$0xff] }
 0xd88   : > { %11784 = vmatprep.subr.mxu0 %v13276_v0  ;;  %11841 = vmatprep.subr.mxu1 %v13276_v0 }
 0xd89   : > { %11785 = vmatpush3.msra.mxu0 %v8746_v43  ;;  %11842 = vmatpush3.msra.mxu1 %v10160_v62  ;;  %v9336_v43 = vld [vmem:[%s15785_s1 + $0x48] sm:$0xff] }
 0xd8a   : > { %11786 = vmatprep.subr.mxu0 %v13276_v0  ;;  %11843 = vmatprep.subr.mxu1 %v13276_v0 }
 0xd8b   : > { %11787 = vmatpush3.msra.mxu0 %v8745_v15  ;;  %11844 = vmatpush3.msra.mxu1 %v10159_v13  ;;  %v9351_v13 = vld [vmem:[%s15785_s1 + $0xc0] sm:$0xff] }
 0xd8c   : > { %11788 = vmatprep.subr.mxu0 %v13276_v0  ;;  %11845 = vmatprep.subr.mxu1 %v13276_v0 }
 0xd8d   : > { %11789 = vmatpush3.msra.mxu0 %v8744_v61  ;;  %11846 = vmatpush3.msra.mxu1 %v10158_v44  ;;  %v9335_v61 = vld [vmem:[%s15785_s1 + $0x40] sm:$0xff]  ;;  %v9350_v44 = vld [vmem:[%s15785_s1 + $0xb8] sm:$0xff] }
 0xd8e   : > { %11790 = vmatprep.subr.mxu0 %v13276_v0  ;;  %11847 = vmatprep.subr.mxu1 %v13276_v0 }
 0xd8f   : > { %11791 = vmatpush3.msra.mxu0 %v8743_v8  ;;  %11848 = vmatpush3.msra.mxu1 %v10157_v45  ;;  %v9334_v8 = vld [vmem:[%s15785_s1 + $0x38] sm:$0xff]  ;;  %v9349_v45 = vld [vmem:[%s15785_s1 + $0xb0] sm:$0xff] }
 0xd90   : > { %11792 = vmatprep.subr.mxu0 %v13276_v0  ;;  %11849 = vmatprep.subr.mxu1 %v13276_v0 }
 0xd91   : > { %11793 = vmatpush3.msra.mxu0 %v8742_v24  ;;  %11850 = vmatpush3.msra.mxu1 %v10156_v41  ;;  %v9333_v24 = vld [vmem:[%s15785_s1 + $0x30] sm:$0xff]  ;;  %v9348_v41 = vld [vmem:[%s15785_s1 + $0xa8] sm:$0xff] }
 0xd92   : > { %11794 = vmatprep.subr.mxu0 %v13276_v0  ;;  %11851 = vmatprep.subr.mxu1 %v13276_v0 }
 0xd93   : > { %11795 = vmatpush3.msra.mxu0 %v8741_v38  ;;  %11796 = vmatprep.mubr.msk.f32.mxu0 %vm13277_vm0, %v13276_v0  ;;  %v9332_v38 = vld [vmem:[%s15785_s1 + $0x28] sm:$0xff] }
 0xd94   : > { %11852 = vmatpush3.msra.mxu1 %v10155_v59  ;;  %11853 = vmatprep.mubr.msk.f32.mxu1 %vm13277_vm0, %v13276_v0  ;;  %v9346_v59 = vld [vmem:[%s15785_s1 + $0x98] sm:$0xff] }
 0xd95   : > { %11797 = vmatmul.mubr.msk.f32.vlgmr.msra.gmra.mxu0 %vm1880_vm4, %v8830_v10  ;;  %11818 = vmatprep.subr.mxu0 %v13276_v0  ;;  %v9330_v10 = vld [vmem:[%s15785_s1 + $0x18] sm:$0xff] }
 0xd96   : > { %11854 = vmatmul.mubr.msk.f32.vlgmr.msra.gmra.mxu1 %vm1880_vm4, %v15305_v34  ;;  %11875 = vmatprep.subr.mxu1 %v13276_v0  ;;  %v10150_v34 = vld [vmem:[%s13502_s9 + $0xe0] sm:$0xff] }
 0xd97   : > { %11819 = vmatpush3.msra.mxu0 %v10153_v54  ;;  %11876 = vmatpush3.msra.mxu1 %v10180_v6  ;;  %v9345_v54 = vld [vmem:[%s15785_s1 + $0x90] sm:$0xff] }
 0xd98   : > { %11820 = vmatprep.subr.mxu0 %v13276_v0  ;;  %11877 = vmatprep.subr.mxu1 %v13276_v0  ;;  %v9329_v6 = vld [vmem:[%s15785_s1 + $0x10] sm:$0xff] }
 0xd99   : > { %11821 = vmatpush3.msra.mxu0 %v10152_v17  ;;  %11878 = vmatpush3.msra.mxu1 %v10179_v31 }
 0xd9a   : > { %11822 = vmatprep.subr.mxu0 %v13276_v0  ;;  %11879 = vmatprep.subr.mxu1 %v13276_v0 }
 0xd9b   : > { %11823 = vmatpush3.msra.mxu0 %v10151_v30  ;;  %11880 = vmatpush3.msra.mxu1 %v10178_v53 }
 0xd9c   : > { %11824 = vmatprep.subr.mxu0 %v13276_v0  ;;  %11881 = vmatprep.subr.mxu1 %v13276_v0 }
 0xd9d   : > { %11825 = vmatpush3.msra.mxu0 %v10150_v34  ;;  %11882 = vmatpush3.msra.mxu1 %v10177_v47 }
 0xd9e   : > { %11826 = vmatprep.subr.mxu0 %v13276_v0  ;;  %11883 = vmatprep.subr.mxu1 %v13276_v0 }
 0xd9f   : > { %11827 = vmatpush3.msra.mxu0 %v10149_v18  ;;  %11884 = vmatpush3.msra.mxu1 %v10176_v60 }
 0xda0   : > { %11828 = vmatprep.subr.mxu0 %v13276_v0  ;;  %11885 = vmatprep.subr.mxu1 %v13276_v0 }
 0xda1   : > { %11829 = vmatpush3.msra.mxu0 %v10148_v12  ;;  %11886 = vmatpush3.msra.mxu1 %v10175_v4 }
 0xda2   : > { %11830 = vmatprep.subr.mxu0 %v13276_v0  ;;  %11887 = vmatprep.subr.mxu1 %v13276_v0 }
 0xda3   : > { %11831 = vmatpush3.msra.mxu0 %v10147_v23  ;;  %11888 = vmatpush3.msra.mxu1 %v10174_v56 }
 0xda4   : > { %11832 = vmatprep.subr.mxu0 %v13276_v0  ;;  %11889 = vmatprep.subr.mxu1 %v13276_v0 }
 0xda5   : > { %11833 = vmatpush3.msra.mxu0 %v10146_v7  ;;  %11834 = vmatprep.mubr.msk.f32.mxu0 %vm13277_vm0, %v13276_v0 }
 0xda6   : > { %11890 = vmatpush3.msra.mxu1 %v10173_v9  ;;  %11891 = vmatprep.mubr.msk.f32.mxu1 %vm13277_vm0, %v13276_v0 }
 0xda7   : > { %11835 = vmatmul.mubr.msk.f32.vlgmr.msra.gmra.mxu0 %vm1880_vm4, %v15302_v35  ;;  %11856 = vmatprep.subr.mxu0 %v13276_v0  ;;  %v10168_v35 = vld [vmem:[%s13502_s9 + $0x160] sm:$0xff] }
 0xda8   : > { %11892 = vmatmul.mubr.msk.f32.vlgmr.msra.gmra.mxu1 %vm1880_vm4, %v15299_v39  ;;  %11857 = vmatpush3.msra.mxu0 %v10171_v32  ;;  %v9340_v39 = vld [vmem:[%s15785_s1 + $0x68] sm:$0xff] }
 0xda9   : > { %11858 = vmatprep.subr.mxu0 %v13276_v0  ;;  %11872 = vmatprep.mubr.msk.f32.mxu0 %vm13277_vm0, %v13276_v0 }
 0xdaa   : > { %11859 = vmatpush3.msra.mxu0 %v10170_v14 }
 0xdab   : > { %11860 = vmatprep.subr.mxu0 %v13276_v0 }
 0xdac   : > { %11861 = vmatpush3.msra.mxu0 %v10169_v33 }
 0xdad   : > { %11862 = vmatprep.subr.mxu0 %v13276_v0 }
 0xdae   : > { %11863 = vmatpush3.msra.mxu0 %v10168_v35 }
 0xdaf   : > { %11864 = vmatprep.subr.mxu0 %v13276_v0 }
 0xdb0   : > { %11865 = vmatpush3.msra.mxu0 %v10167_v37 }
 0xdb1   : > { %11866 = vmatprep.subr.mxu0 %v13276_v0 }
 0xdb2   : > { %11867 = vmatpush3.msra.mxu0 %v10166_v36 }
 0xdb3   : > { %11868 = vmatprep.subr.mxu0 %v13276_v0 }
 0xdb4   : > { %11869 = vmatpush3.msra.mxu0 %v10165_v29 }
 0xdb5   : > { %11870 = vmatprep.subr.mxu0 %v13276_v0  ;;  %v9356_v0 = vld [vmem:[%s15785_s1 + $0xe8] sm:$0xff] }
 0xdb6   : > { %11871 = vmatpush3.msra.mxu0 %v10164_v49 }
 0xdb7   : > { %11873 = vmatmul.mubr.msk.f32.vlgmr.msra.gmra.mxu0 %vm1880_vm4, %v8655_v40  ;;  %10684 = vmatprep.subr.mxu0 %v9358_v52  ;;  %v9337_v40 = vld [vmem:[%s15785_s1 + $0x50] sm:$0xff]  ;;  %v8311_v52 = vld [vmem:[%s15786_s11] sm:$0x3] }
 0xdb8   : > { %10685 = vmatpush3.msra.mxu0 %v9342_v27 }
 0xdb9   : > { %10686 = vmatprep.subr.mxu0 %v9357_v57  ;;  %v8315_v57 = vrot.slane %v8311_v52, %v13878_v19 }
 0xdba   : > { %10687 = vmatpush3.msra.mxu0 %v9341_v50  ;;  %v9305_v50 = vld [vmem:[#allocation47] sm:$0x3] }
 0xdbb   : > { %10688 = vmatprep.subr.mxu0 %v9356_v0 }
 0xdbc   : > { %10689 = vmatpush3.msra.mxu0 %v9340_v39 }
 0xdbd   : > { %10690 = vmatprep.subr.mxu0 %v9355_v28  ;;  %v9344_v28 = vld [vmem:[%s15785_s1 + $0x88] sm:$0xff] }
 0xdbe   : > { %10691 = vmatpush3.msra.mxu0 %v9339_v3 }
 0xdbf   : > { %10692 = vmatprep.subr.mxu0 %v9354_v2 }
 0xdc0   : > { %10693 = vmatpush3.msra.mxu0 %v9338_v1  ;;  %v9309_v1 = vrot.slane %v9305_v50, %v13878_v19 }
 0xdc1   : > { %10694 = vmatprep.subr.mxu0 %v9353_v20  ;;  %v8320_v20 = vrot.slane %v8311_v52, %v13881_v21 }
 0xdc2   : > { %10695 = vmatpush3.msra.mxu0 %v9337_v40 }
 0xdc3   : > { %10696 = vmatprep.subr.mxu0 %v9352_v22 }
 0xdc4   : > { %10697 = vmatpush3.msra.mxu0 %v9336_v43 }
 0xdc5   : > { %10698 = vmatprep.subr.mxu0 %v9351_v13 }
 0xdc6   : > { %10699 = vmatpush3.msra.mxu0 %v9335_v61 }
 0xdc7   : > { %10700 = vmatprep.subr.mxu0 %v9350_v44 }
 0xdc8   : > { %10701 = vmatpush3.msra.mxu0 %v9334_v8  ;;  %v8729_v8 = vld [vmem:[%s15787_s0] sm:$0x3]  ;;  %s9455_s0 = scalar_lea.hbm %s13517_s6, %s10182_s22 }
 0xdc9   : > { %10702 = vmatprep.subr.mxu0 %v9349_v45  ;;  %v8733_v45 = vrot.slane %v8729_v8, %v13878_v19 }
 0xdca   : > { %10703 = vmatpush3.msra.mxu0 %v9333_v24 }
 0xdcb   : > { %10704 = vmatprep.subr.mxu0 %v9348_v41  ;;  %v8738_v41 = vrot.slane %v8729_v8, %v13881_v21 }
 0xdcc   : > { %10705 = vmatpush3.msra.mxu0 %v9332_v38 }
 0xdcd   : > { %10706 = vmatprep.subr.mxu0 %v9347_v48 }
 0xdce   : > { %10707 = vmatpush3.msra.mxu0 %v9331_v46 }
 0xdcf   : > { %10708 = vmatprep.subr.mxu0 %v9346_v59 }
 0xdd0   : > { %10709 = vmatpush3.msra.mxu0 %v9330_v10 }
 0xdd1   : > { %10710 = vmatprep.subr.mxu0 %v9345_v54 }
 0xdd2   : > { %10711 = vmatpush3.msra.mxu0 %v9329_v6 }
 0xdd3   : > { %10712 = vmatprep.subr.mxu0 %v9344_v28 }
 0xdfc   : > { %v8151_v11 = vpop.f32.mrf.mxu0  ;;  %v8306_v58 = vpop.f32.mrf.mxu1 }
 0xdfe   : > { %v11627_v16 = vpop.f32.mrf.mxu0  ;;  %v11665_v5 = vpop.f32.mrf.mxu1 }
 0xe0d   : > { %v8224_v42 = vpop.f32.mrf.mxu0 }
 0xe0e   : > { %v8225_v63 = vadd.f32 %v8224_v42, %v8151_v11  ;;  %v8482_v25 = vpop.f32.mrf.mxu1  ;;  %v9328_v42 = vld [vmem:[%s15785_s1 + $0x8] sm:$0xff] }
 0xe0f   : > { %v11646_v51 = vpop.f32.mrf.mxu0  ;;  %10713 = vmatpush3.msra.mxu0 %v9328_v42 }
 0xe10   : > { %v15588_v62 = vadd.f32 %v8306_v58, %v8225_v63  ;;  %v11703_v15 = vpop.f32.mrf.mxu1  ;;  %v9343_v63 = vld [vmem:[%s15785_s1 + $0x80] sm:$0xff]  ;;  %v9314_v51 = vrot.slane %v9305_v50, %v13881_v21 }
 0xe11   : > { %10714 = vmatprep.subr.mxu0 %v9343_v63 }
 0xe12   : > { %v8316_v3 = vmul.f32 %v8315_v57, %v15588_v62 }
 0xe14   : > { %v8321_v15 = vadd.f32 %v8320_v20, %v8316_v3 }
 0xe16   : > { %v8322_v13 = vmax.f32 %v8321_v15, 0.0 }
 0xe1f   : > { %v8406_v17 = vpop.f32.mrf.mxu0 }
 0xe20   : > { %v8483_v31 = vadd.f32 %v8482_v25, %v8406_v17  ;;  %v8641_v30 = vpop.f32.mrf.mxu1  ;;  %v9327_v25 = vld [vmem:[%s15785_s1] sm:$0xff] }
 0xe21   : > { %v11684_v53 = vpop.f32.mrf.mxu0  ;;  %10715 = vmatpush3.msra.mxu0 %v9327_v25 }
 0xe22   : > { %v11741_v34 = vpop.f32.mrf.mxu1 }
 0xe31   : > { %v8561_v47 = vpop.f32.mrf.mxu0 }
 0xe32   : > { %v8565_v18 = vadd.f32 %v8561_v47, %v8483_v31  ;;  %v8824_v60 = vpop.f32.mrf.mxu1 }
 0xe33   : > { %v11722_v12 = vpop.f32.mrf.mxu0 }
 0xe34   : > { %v11779_v4 = vpop.f32.mrf.mxu1  ;;  %v8645_v23 = vadd.f32 %v8641_v30, %v8565_v18 }
 0xe43   : > { %v8724_v56 = vpop.f32.mrf.mxu0 }
 0xe44   : > { %v8728_v7 = vadd.f32 %v8724_v56, %v8645_v23  ;;  %v8978_v9 = vpop.f32.mrf.mxu1 }
 0xe45   : > { %v11760_v32 = vpop.f32.mrf.mxu0 }
 0xe46   : > { %v11817_v14 = vpop.f32.mrf.mxu1  ;;  %v8734_v24 = vmul.f32 %v8733_v45, %v8728_v7 }
 0xe48   : > { %v8739_v38 = vadd.f32 %v8738_v41, %v8734_v24 }
 0xe4a   : > { %v8740_v46 = vmax.f32 %v8739_v38, 0.0 }
 0xe55   : > { %v8899_v33 = vpop.f32.mrf.mxu0 }
 0xe56   : > { %v9138_v35 = vpop.f32.mrf.mxu1  ;;  %v8900_v16 = vadd.f32 %v8899_v33, %v8824_v60 }
 0xe57   : > { %v11798_v37 = vpop.f32.mrf.mxu0 }
 0xe58   : > { %v11855_v36 = vpop.f32.mrf.mxu1  ;;  %v8982_v5 = vadd.f32 %v8978_v9, %v8900_v16 }
 0xe67   : > { %v9058_v29 = vpop.f32.mrf.mxu0 }
 0xe68   : > { %v9300_v49 = vpop.f32.mrf.mxu1  ;;  %v9062_v27 = vadd.f32 %v9058_v29, %v8982_v5 }
 0xe69   : > { %v11836_v11 = vpop.f32.mrf.mxu0 }
 0xe6a   : > { %v11893_v58 = vpop.f32.mrf.mxu1  ;;  %v9142_v0 = vadd.f32 %v9138_v35, %v9062_v27 }
 0xe77   : > { %v9218_v39 = vpop.f32.mrf.mxu0 }
 0xe78   : > { %v9222_v2 = vadd.f32 %v9218_v39, %v9142_v0 }
 0xe79   : > { %v11874_v40 = vpop.f32.mrf.mxu0 }
 0xe7a   : > { %v9304_v22 = vadd.f32 %v9300_v49, %v9222_v2 }
 0xe7c   : > { %v9310_v43 = vmul.f32 %v9309_v1, %v9304_v22 }
 0xe7e   : > { %v9315_v62 = vadd.f32 %v9314_v51, %v9310_v43 }
 0xe80   : > { %v9316_v61 = vmax.f32 %v9315_v62, 0.0 }
 0xe82   : > { %v12288_v44 = vpack.i.bf16 %v8322_v13, %v9316_v61 }
 0xe84   : > { %12289 = vrot.lane.b32.xlu0 %v12288_v44, %s13281_s10  ;;  %s1741_s10 = sand.u32 1, %s13189_s7  }
 0xe85   : > { %s1742_s16 = scalar_lea.vmem [#allocation49], %s1741_s10  ;;  %s9445_s1 = scalar_lea.sflag [#allocation4], %s1741_s10 }
 0xe86   : > { %s9457_s11 = sshll.u32 %s1742_s16, 4  ;;  %s9458_s11 = int_to_ptr.vmem [resolvable:$true] %s9457_s11 }
 0xe87   : > { %s13073_s2 = scalar_lea.vmem %s9458_s11, 16  ;;  %p13080_p2 = scmp.lt.s32.totalorder %s9458_s11, %s13078_s4 }
 0xe88   : > { %p13074_p12 = scmp.ne.s32.totalorder %s9458_s11, %s13073_s2  ;;  %p13081_p9 = scmp.lt.s32.totalorder %s13079_s5, %s13073_s2 }
 0xe8a   : > { %p13075_p0 = pnand %p13074_p12, %p15788_p11  ;;  %p13082_p3 = por %p13081_p9, %p13080_p2 }
 0xe8c   : > { %p13076_p1 = pneg %p13075_p0 }
 0xe8e   : > { %p13083_p4 = pnand %p13082_p3, %p13076_p1 }
 0xef6   : > { %v12290_v48 = vpop.permute.xlu0 %12289 }
 0xef7   : > { %v12292_v59 = vunpack.i.h.bf16 %v12290_v48  ;;  %v12291_v10 = vunpack.i.l.bf16 %v12290_v48 }
 0xef9   : > { %v9325_v54 = vsel %vm1880_vm4, %v8058_v26, %v12292_v59  ;;  %v9326_v6 = vsel %vm1880_vm4, %v8740_v46, %v12291_v10 }
 0xefa   : > { %9423 = vmatprep.mubr.f32.mxu0 %v9326_v6 }
 0xefb   : > { %9424 = vmatmul.mubr.f32.vlgmr.msra.gmra.mxu0 %v9325_v54 }
 0xfbb   : > { %v10716_v17 = vpop.f32.mrf.mxu0 }
 0xfbd   : > { %v10717_v19 = vpop.f32.mrf.mxu0 }
 0xfbe   : > { %v10718_v31 = vadd.f32 %v10717_v19, %v10716_v17 }
 0xfc0   : > { %v9430_v30 = vrot.slane %v10718_v31, 1  ;;  %v9433_v53 = vrot.slane %v10718_v31, 2  ;;  %v9436_v47 = vrot.slane %v10718_v31, 3 }
 0xfc2   : > { %v9432_v21 = vadd.f32 %v10718_v31, %v9430_v30 }
 0xfc4   : > { %v9435_v34 = vadd.f32 %v9433_v53, %v9432_v21 }
 0xfc6   : > { %v9438_v18 = vadd.f32 %v9436_v47, %v9435_v34 }
 0xfc8   : > { %v9439_v26 = vmul.f32 0.25, %v9438_v18 }
 0xfca   : > { %v9441_v60 = vadd.f32 %v9440_v55, %v9439_v26 }
 0xfcc   : > { %9443 = vst.msk [vmem:[%s1742_s16] sm:$0x1] %vm9442_vm14, %v9441_v60 }
 0xfcd   : > { %13086 = shalt.err (!%p13083_p4)
}
 0xfce   : > { %s13087_s15 = scalar_lea.hbm %s9455_s0, 16  ;;  %s13091_s10 = scalar_lea.hbm %s13517_s6, 32 }
 0xfcf   : > { %p13088_p5 = scmp.ne.s32.totalorder %s9455_s0, %s13087_s15  ;;  %p13092_p13 = scmp.lt.s32.totalorder %s9455_s0, %s13517_s6 }
 0xfd0   : > { %p13093_p7 = scmp.lt.s32.totalorder %s13091_s10, %s13087_s15 }
 0xfd1   : > { %p13089_p6 = pnand %p13088_p5, %p15788_p11 }
 0xfd2   : > { %p13094_p8 = por %p13093_p7, %p13092_p13 }
 0xfd3   : > { %p13090_p10 = pneg %p13089_p6 }
 0xfd5   : > { %p13095_p12 = pnand %p13094_p8, %p13090_p10 }
 0xfd7   : > { %13098 = shalt.err (!%p13095_p12)
}
 0xfd8   : > { %12014 = dma.vmem_to_hbm [thread:$0]  (%p15788_p11), %s9458_s11, 16, %s9455_s0, %s9445_s1  }
 0xfd9 PF: > { %s15789_s5 = sld [smem:[#allocation102_spill]] }
 0xfda   : > { %s15790_s4 = sld [smem:[#allocation100_spill]] }
 0xfdb   : > { %s15791_s2 = sld [smem:[#allocation105_spill]] }
 0xfdf   : > { %p12171_p0 = scmp.ge.s32.totalorder %s15789_s5, 2 }
 0xfe0   : > { %s9469_s3 = sand.u32 1, %s15790_s4  }
 0xfe1   : > { %p15792_p1 = scmp.ne.s32.totalorder %s15791_s2, 0  ;;  %s9470_s22 = scalar_lea.sflag [#allocation4], %s9469_s3 }
 0xfe3   : > { %p12108_p2 = pnand %p12171_p0, %p15792_p1 }
 0xfe5   : > { %p12109_p9 = pneg %p12108_p2 }
 0xfe7   : > { %13180 = dma.done.wait (%p12109_p9), %s9470_s22, 16  }
 0xfe8   : > { %13182 = vsyncadd (%p12109_p9), %s9470_s22, 4294967280  ;;  %s15793_s11 = sld [smem:[#allocation103_spill]]  ;;  %s15796_s0 = smov %s13189_s7 }
 0xfe9   : > { %s15794_s16 = sld [smem:[#allocation101_spill]] }
 0xfea   : > { %s15795_s10 = sld [smem:[#allocation104_spill]] }
 0xfee   : > { %p117_p3 = scmp.ge.s32.totalorder %s15793_s11, 4  }
 0xfef   : > { %s15797_s7 = smov %s15794_s16 }
 0xff0   :  { %119 = sbr.rel (!%p117_p3) target bundleno = 102 (0x66), region = 461 }
 0xff5   :  { %9474 = vsyncpa [#allocation3], 1 }
 0xff6   :  { %9476 = vsyncpa [#allocation3 + $0x1], 1 }
 0xff7   :  { %9477 = vsyncpa [#allocation6], 1 }
 0xff8   :  { %9478 = vsyncpa [#allocation9], 1 }
 0xff9   :  { %9479 = vsyncpa [#allocation12], 1 }
 0xffa   :  { %9480 = vsyncpa [#allocation15], 1 }
 0xffb   :  { %9481 = vsyncpa [#allocation18], 1 }
 0xffc   :  { %9482 = vsyncpa [#allocation21], 1 }
 0xffd   :  { %9483 = vsyncpa [#allocation24], 1 }
 0xffe   :  { %9484 = vsyncpa [#allocation27], 1 }
 0xfff   :  { %9485 = vsyncpa [#allocation30], 1 }
0x1000   :  { %9486 = vsyncpa [#allocation33], 1 }
0x1001   :  { %9487 = vsyncpa [#allocation36], 1 }
0x1002   :  { %9488 = vsyncpa [#allocation39], 1 }
0x1003   :  { %9489 = vsyncpa [#allocation42], 1 }
0x1004   :  { %9490 = vsyncpa [#allocation45], 1 }
0x1005   :  { %9491 = vsyncpa [#allocation48], 1 }
0x1006   :  { %9492 = vsyncpa [#allocation4], 1 }
0x1007   :  { %9494 = vsyncpa [#allocation4 + $0x1], 1 }

</bundles_post_ra>
